<compile_context>
chip_gen: v7x
topology: tpu7x:2x2x1
jax: 0.10.0
libtpu: 0.0.40
codegen_flags: <defaults>
</compile_context>

<pallas_src>
"""FiLMConvEncoderProjection forward pass as ONE fused JAX Pallas TPU kernel.

Changes vs. the previous version (per performance review):
  * FiLM gamma/beta generator is hoisted to the XLA glue as a single
    (B,E)@(E,2*L*C) dense; the kernel no longer runs degenerate M=1 matmuls
    and no longer DMAs the generator weights.
  * Batch blocking: grid=(B/Bblk,) and each grid step processes Bblk images
    flattened to M = Bblk*H*W rows, so the 1x1 input conv is one
    (M,AE)@(AE,C) matmul and per-step pipeline overhead is amortized.
  * The 9 tap matmuls per 3x3 block are folded into ONE (M,9C)@(9C,C) MXU
    matmul: the 9 shifted/masked windows are assembled into a VMEM im2col
    scratch in-kernel (still no HBM traffic for activations).
  * The activation stays resident in a per-image halo'd VMEM scratch across
    layers; only the (never-written) halo bands are zeroed each grid step
    instead of the whole buffer, and the interior is written exactly once per
    layer (the FiLM/ReLU/residual update writes straight back into it).
  * Masks shrunk to (P,1) lane-broadcast form; projection bias moved to SMEM;
    vmem_limit_bytes and dimension_semantics=("parallel",) set explicitly.

# TODO(synk): FiLMConvEncoder internals reconstructed from its call signature
# (attribute-embedding image encoder, mission word-embedding -> FiLM gamma/beta
# generator, 1x1 input conv, residual 3x3 FiLM conv blocks); BatchNorm from the
# canonical FiLM block is omitted since the exact reference source was not given.
"""

import jax
import jax.numpy as jnp
from jax.experimental import pallas as pl
from jax.experimental.pallas import tpu as pltpu


# ----------------------------------------------------------------------------
# Fused Pallas kernel: Bblk images per grid step, activations VMEM-resident.
# ----------------------------------------------------------------------------

def _make_fused_kernel(H, W, n_layers, block_b, m_top):
    P = H * W                      # cells per image
    S = P + 2 * m_top              # rows per image in the halo'd scratch

    def kernel(x_ref, film_ref, w_in_ref, b_in_ref, w_conv_ref, b_conv_ref,
               w_proj_ref, b_proj_ref, out_ref, hpad_ref, col_ref):
        C = w_in_ref.shape[1]

        # ---- 1x1 input conv over all Bblk*P cells in ONE (M,AE)@(AE,C) matmul
        h0 = jnp.dot(x_ref[...], w_in_ref[...],
                     preferred_element_type=jnp.float32)
        h0 = jnp.maximum(h0 + b_in_ref[...], 0.0)              # (M, C)

        # Scatter h0 into each image's halo'd slot; zero ONLY the halo bands.
        # (Done every grid step rather than under program_id==0: on v7x each
        #  TensorCore owns its own scratch and only sees part of the parallel
        #  grid, so a program_id==0 gate would leave one core's halo garbage.)
        zero_band = jnp.zeros((m_top, C), jnp.float32)
        for b in range(block_b):
            base = b * S
            hpad_ref[base:base + m_top, :] = zero_band
            hpad_ref[base + m_top:base + m_top + P, :] = h0[b * P:(b + 1) * P, :]
            hpad_ref[base + m_top + P:base + S, :] = zero_band

        # (P,1) column-validity masks for the +-1 horizontal taps (lane bcast);
        # they cancel the row-wraparound of the flattened shifted windows.
        col_x = jax.lax.broadcasted_iota(jnp.int32, (P, 1), 0) % W
        mask_l = (col_x > 0).astype(jnp.float32)               # taps reading x-1
        mask_r = (col_x < (W - 1)).astype(jnp.float32)         # taps reading x+1

        # ---- residual FiLM 3x3 conv blocks; h stays resident in hpad_ref ----
        for l in range(n_layers):
            # In-kernel im2col: 9 shifted/masked windows -> (M, 9C) scratch.
            # TODO(synk): +-1 tap starts are not 8-aligned (one sublane shuffle
            # per window); a pltpu.roll / row-padded variant could move that
            # shift work onto the XLU slot at larger sizes.
            for t in range(9):
                oy, ox = t // 3 - 1, t % 3 - 1
                d = oy * W + ox
                for b in range(block_b):
                    start = b * S + m_top + d
                    win = hpad_ref[start:start + P, :]         # (P, C)
                    if ox == -1:
                        win = win * mask_l
                    elif ox == 1:
                        win = win * mask_r
                    col_ref[b * P:(b + 1) * P, t * C:(t + 1) * C] = win

            # ONE well-shaped (M, 9C)@(9C, C) MXU matmul replaces 9 K=C ones.
            y = jnp.dot(col_ref[...], w_conv_ref[l],
                        preferred_element_type=jnp.float32) + b_conv_ref[l]

            # FiLM + ReLU + residual, written straight back into the interior.
            for b in range(block_b):
                gamma = film_ref[b, l, 0:1, :]                 # (1, C)
                beta = film_ref[b, l, 1:2, :]                  # (1, C)
                yb = y[b * P:(b + 1) * P, :] * (1.0 + gamma) + beta
                lo = b * S + m_top
                hpad_ref[lo:lo + P, :] = (jnp.maximum(yb, 0.0)
                                          + hpad_ref[lo:lo + P, :])

        # ---- fused per-cell projection epilogue ------------------------------
        b_proj = b_proj_ref[0, 0]                              # scalar from SMEM
        for b in range(block_b):
            lo = b * S + m_top
            hb = hpad_ref[lo:lo + P, :]
            s = jnp.sum(hb * w_proj_ref[...], axis=-1)         # (P,)
            out_ref[0, b:b + 1, :] = s[None, :] + b_proj

    return kernel


def _pick_block_batch(B, P, target_rows=512):
    """Largest divisor of B keeping <= target rows per step and >=2 grid steps."""
    bblk = 1
    for cand in range(1, B + 1):
        if B % cand == 0 and cand * P <= target_rows:
            bblk = cand
    while bblk > 1 and B // bblk < 2:      # leave work for both v7x cores
        bblk = max(d for d in range(1, bblk) if B % d == 0)
    return bblk


def fused_film_encoder_projection(x, film, w_in, b_in, w_conv, b_conv,
                                  w_proj, b_proj, *, H, W):
    """x: (B, H*W, A*E) cell embeddings, film: (B, L, 2, C) -> (B, H*W)."""
    B, P, AE = x.shape
    L = w_conv.shape[0]
    C = w_in.shape[1]
    assert P == H * W and P % 8 == 0  # TODO(synk): generalize to unaligned H*W
    block_b = _pick_block_batch(B, P)
    M = block_b * P
    m_top = ((W + 1 + 7) // 8) * 8            # >= W+1 halo rows, 8-aligned
    S = P + 2 * m_top

    kernel = _make_fused_kernel(H, W, L, block_b, m_top)
    x2 = x.reshape(B * P, AE)                 # row-major; blocks of M rows

    out = pl.pallas_call(
        kernel,
        out_shape=jax.ShapeDtypeStruct((B // block_b, block_b, P), jnp.float32),
        grid=(B // block_b,),
        in_specs=[
            pl.BlockSpec((M, AE), lambda i: (i, 0)),                 # cell embeddings
            pl.BlockSpec((block_b, L, 2, C), lambda i: (i, 0, 0, 0)),  # FiLM gamma/beta
            pl.BlockSpec((AE, C), lambda i: (0, 0)),                 # 1x1 conv W
            pl.BlockSpec((1, C), lambda i: (0, 0)),                  # 1x1 conv b
            pl.BlockSpec((L, 9 * C, C), lambda i: (0, 0, 0)),        # 3x3 conv W (tap-major K)
            pl.BlockSpec((L, 1, C), lambda i: (0, 0, 0)),            # 3x3 conv b
            pl.BlockSpec((1, C), lambda i: (0, 0)),                  # projection W
            pl.BlockSpec(memory_space=pltpu.MemorySpace.SMEM),       # projection bias scalar
        ],
        out_specs=pl.BlockSpec((1, block_b, P), lambda i: (i, 0, 0)),
        scratch_shapes=[
            pltpu.VMEM((block_b * S, C), jnp.float32),               # halo'd resident h
            pltpu.VMEM((M, 9 * C), jnp.float32),                     # im2col staging
        ],
        compiler_params=pltpu.CompilerParams(
            dimension_semantics=("parallel",),
            vmem_limit_bytes=32 * 1024 * 1024),
        # TODO(synk): at production sizes (bigger H*W, imm_dim=128, more layers)
        # add a spatial-tile grid axis with halo exchange, single-buffer the
        # constant-index weight specs (pl.Buffered(1)) and consider bf16 MXU
        # operands for v6e/v7x; not needed at these toy shapes.
    )(x2, film, w_in, b_in, w_conv, b_conv, w_proj, b_proj)
    return out.reshape(B, P)


# ----------------------------------------------------------------------------
# JAX glue (embedding gathers, mission pooling, FiLM generator) + parameters
# ----------------------------------------------------------------------------

def init_params(key, attrib_offsets, emb_dim, n_words, imm_dim, n_layers,
                n_attribs):
    total_attrib = attrib_offsets[-1]
    ks = jax.random.split(key, 10)
    in_dim = n_attribs * emb_dim
    p = {}
    p["attrib_emb"] = 0.1 * jax.random.normal(ks[0], (total_attrib, emb_dim), jnp.float32)
    p["word_emb"] = 0.1 * jax.random.normal(ks[1], (n_words, emb_dim), jnp.float32)
    p["w_film_gen"] = jax.random.normal(
        ks[2], (emb_dim, n_layers * 2 * imm_dim), jnp.float32) / (emb_dim ** 0.5)
    p["b_film_gen"] = 0.1 * jax.random.normal(ks[3], (n_layers * 2 * imm_dim,), jnp.float32)
    p["w_in"] = jax.random.normal(ks[4], (in_dim, imm_dim), jnp.float32) / (in_dim ** 0.5)
    p["b_in"] = 0.1 * jax.random.normal(ks[5], (1, imm_dim), jnp.float32)
    p["w_conv"] = jax.random.normal(
        ks[6], (n_layers, 9 * imm_dim, imm_dim), jnp.float32) / ((9 * imm_dim) ** 0.5)
    p["b_conv"] = 0.1 * jax.random.normal(ks[7], (n_layers, 1, imm_dim), jnp.float32)
    p["w_proj"] = jax.random.normal(ks[8], (1, imm_dim), jnp.float32) / (imm_dim ** 0.5)
    p["b_proj"] = 0.1 * jax.random.normal(ks[9], (1, 1), jnp.float32)
    return p


def film_conv_encoder_projection(params, images, missions, *, attrib_offsets,
                                 emb_dim, imm_dim, n_layers):
    """Returns (projected_image_components [B,H*W], image_components [B,H*W,A*E])."""
    B, H, W, A = images.shape
    P = H * W

    # Embedding gathers + mission pooling stay in XLA glue (no clean Pallas
    # gather equivalent); the FiLM generator is hoisted here as ONE well-shaped
    # (B,E)@(E,2*L*C) dense (perf review: no M=1 matmuls inside the kernel).
    offsets = jnp.asarray(attrib_offsets[:-1], jnp.int32)              # (A,)
    flat_idx = images + offsets[None, None, None, :]                   # (B,H,W,A)
    cell_emb = jnp.take(params["attrib_emb"], flat_idx, axis=0)        # (B,H,W,A,E)
    image_components = cell_emb.reshape(B, P, A * emb_dim)             # (B,P,A*E)

    word_emb = jnp.take(params["word_emb"], missions, axis=0)          # (B,Lw,E)
    mission_emb = jnp.mean(word_emb, axis=1)                           # (B,E)
    film = mission_emb @ params["w_film_gen"] + params["b_film_gen"]   # (B,2*L*C)
    film = film.reshape(B, n_layers, 2, imm_dim)                       # (B,L,2,C)

    projected = fused_film_encoder_projection(
        image_components, film, params["w_in"], params["b_in"],
        params["w_conv"], params["b_conv"], params["w_proj"],
        params["b_proj"], H=H, W=W)                                    # (B,P)
    return projected, image_components


# ----------------------------------------------------------------------------
# Pure-JAX reference of the same forward (for a numerics check in __main__)
# ----------------------------------------------------------------------------

def reference_forward(params, images, missions, *, attrib_offsets, emb_dim,
                      imm_dim, n_layers):
    B, H, W, A = images.shape
    hi = jax.lax.Precision.HIGHEST
    offsets = jnp.asarray(attrib_offsets[:-1], jnp.int32)
    flat_idx = images + offsets[None, None, None, :]
    cell = jnp.take(params["attrib_emb"], flat_idx, axis=0).reshape(B, H, W, A * emb_dim)
    mission = jnp.mean(jnp.take(params["word_emb"], missions, axis=0), axis=1)
    film = (jnp.dot(mission, params["w_film_gen"], precision=hi)
            + params["b_film_gen"]).reshape(B, n_layers, 2, imm_dim)
    h = jnp.maximum(
        jnp.einsum("bhwa,ac->bhwc", cell, params["w_in"], precision=hi)
        + params["b_in"][0], 0.0)
    w_conv = params["w_conv"].reshape(n_layers, 3, 3, imm_dim, imm_dim)
    for l in range(n_layers):
        hp = jnp.pad(h, ((0, 0), (1, 1), (1, 1), (0, 0)))
        y = jnp.zeros_like(h)
        for oy in range(3):
            for ox in range(3):
                y = y + jnp.einsum("bhwc,cd->bhwd",
                                   hp[:, oy:oy + H, ox:ox + W, :],
                                   w_conv[l, oy, ox], precision=hi)
        y = y + params["b_conv"][l, 0]
        gamma = film[:, l, 0][:, None, None, :]
        beta = film[:, l, 1][:, None, None, :]
        h = jnp.maximum(y * (1.0 + gamma) + beta, 0.0) + h
    proj = (jnp.einsum("bhwc,c->bhw", h, params["w_proj"][0], precision=hi)
            + params["b_proj"][0, 0])
    return proj.reshape(B, H * W), cell.reshape(B, H * W, A * emb_dim)


# ----------------------------------------------------------------------------
# Main
# ----------------------------------------------------------------------------

if __name__ == "__main__":
    B, H, W = 8, 8, 8
    n_attribs = 2
    attrib_offsets = [0, 8, 16]      # each attribute has 8 categorical values
    emb_dim = 16
    n_words = 16
    seq_len = 6
    imm_dim = 32
    n_layers = 2                     # layer_mults=None -> 2 FiLM blocks @ imm_dim

    key = jax.random.PRNGKey(0)
    k_img, k_mis, k_par = jax.random.split(key, 3)
    images = jax.random.randint(k_img, (B, H, W, n_attribs), 0, 8, dtype=jnp.int32)
    missions = jax.random.randint(k_mis, (B, seq_len), 0, n_words, dtype=jnp.int32)

    params = init_params(k_par, attrib_offsets, emb_dim, n_words, imm_dim,
                         n_layers, n_attribs)

    fwd = jax.jit(lambda p, im, mi: film_conv_encoder_projection(
        p, im, mi, attrib_offsets=attrib_offsets, emb_dim=emb_dim,
        imm_dim=imm_dim, n_layers=n_layers))

    projected, image_components = fwd(params, images, missions)
    jax.block_until_ready((projected, image_components))

    assert projected.shape == (B, H * W)
    assert image_components.shape == (B, H * W, n_attribs * emb_dim)

    # Numerics check against the pure-JAX reference of the same forward pass.
    ref_proj, ref_comp = reference_forward(
        params, images, missions, attrib_offsets=attrib_offsets,
        emb_dim=emb_dim, imm_dim=imm_dim, n_layers=n_layers)
    assert jnp.allclose(image_components, ref_comp, rtol=1e-5, atol=1e-5)
    err = float(jnp.max(jnp.abs(projected - ref_proj)))
    assert jnp.allclose(projected, ref_proj, rtol=2e-3, atol=2e-3), err

    print("KERNEL_OK")
</pallas_src>

<mosaic_0001>
module attributes {stable_mosaic.version = 11 : i64} {
  func.func @kernel(%arg0: i32, %arg1: memref<256x32xf32, #tpu.memory_space<vmem>>, %arg2: memref<4x2x2x32xf32, #tpu.memory_space<vmem>>, %arg3: memref<32x32xf32, #tpu.memory_space<vmem>>, %arg4: memref<1x32xf32, #tpu.memory_space<vmem>>, %arg5: memref<2x288x32xf32, #tpu.memory_space<vmem>>, %arg6: memref<2x1x32xf32, #tpu.memory_space<vmem>>, %arg7: memref<1x32xf32, #tpu.memory_space<vmem>>, %arg8: memref<1x1xf32, #tpu.memory_space<smem>>, %arg9: memref<1x4x64xf32, #tpu.memory_space<vmem>>, %arg10: memref<384x32xf32, #tpu.memory_space<vmem>>, %arg11: memref<256x288xf32, #tpu.memory_space<vmem>>) attributes {dimension_semantics = [#tpu.dimension_semantics<parallel>], iteration_bounds = array<i64: 2>, scalar_prefetch = 0 : i64, scratch_operands = 2 : i64, tpu.core_type = #tpu.core_type<tc>, window_params = [{transform_indices = @transform_0, window_bounds = array<i64: 256, 32>}, {transform_indices = @transform_1, window_bounds = array<i64: 4, 2, 2, 32>}, {pipeline_mode = #tpu.pipeline_mode<synchronous>, transform_indices = @transform_2, window_bounds = array<i64: 32, 32>}, {pipeline_mode = #tpu.pipeline_mode<synchronous>, transform_indices = @transform_3, window_bounds = array<i64: 1, 32>}, {pipeline_mode = #tpu.pipeline_mode<synchronous>, transform_indices = @transform_4, window_bounds = array<i64: 2, 288, 32>}, {pipeline_mode = #tpu.pipeline_mode<synchronous>, transform_indices = @transform_5, window_bounds = array<i64: 2, 1, 32>}, {pipeline_mode = #tpu.pipeline_mode<synchronous>, transform_indices = @transform_6, window_bounds = array<i64: 1, 32>}, {transform_indices = @transform_7, window_bounds = array<i64: 1, 1>}, {transform_indices = @transform_8, window_bounds = array<i64: 1, 4, 64>}]} {
    %c0 = arith.constant 0 : index
    %c0_0 = arith.constant 0 : index
    %0 = vector.load %arg1[%c0, %c0_0] : memref<256x32xf32, #tpu.memory_space<vmem>>, vector<256x32xf32>
    %c0_1 = arith.constant 0 : index
    %c0_2 = arith.constant 0 : index
    %1 = vector.load %arg3[%c0_1, %c0_2] : memref<32x32xf32, #tpu.memory_space<vmem>>, vector<32x32xf32>
    %cst = arith.constant dense<0.000000e+00> : vector<256x32xf32>
    %2 = tpu.matmul %0, %1, %cst {dimension_numbers = #tpu.dot_dimension_numbers<[1], [0], [0], [1], [0, 0, 1, 1], [], []>} : vector<256x32xf32>, vector<32x32xf32>, vector<256x32xf32> -> vector<256x32xf32>
    %c0_3 = arith.constant 0 : index
    %c0_4 = arith.constant 0 : index
    %3 = vector.load %arg4[%c0_3, %c0_4] : memref<1x32xf32, #tpu.memory_space<vmem>>, vector<1x32xf32>
    %4 = vector.broadcast %3 : vector<1x32xf32> to vector<256x32xf32>
    %5 = arith.addf %2, %4 : vector<256x32xf32>
    %cst_5 = arith.constant 0.000000e+00 : f32
    %6 = vector.broadcast %cst_5 : f32 to vector<256x32xf32>
    %7 = arith.maximumf %5, %6 : vector<256x32xf32>
    %cst_6 = arith.constant 0.000000e+00 : f32
    %8 = vector.broadcast %cst_6 : f32 to vector<16x32xf32>
    %c0_7 = arith.constant 0 : index
    %c0_8 = arith.constant 0 : index
    %9 = vector.load %arg10[%c0_7, %c0_8] : memref<384x32xf32, #tpu.memory_space<vmem>>, vector<16x32xf32>
    tpu.vector_store %arg10[%c0_7, %c0_8], %8 {strides = array<i32>} : memref<384x32xf32, #tpu.memory_space<vmem>>, vector<16x32xf32>,
    %10 = vector.extract_strided_slice %7 {offsets = [0, 0], sizes = [64, 32], strides = [1, 1]} : vector<256x32xf32> to vector<64x32xf32>
    %c16 = arith.constant 16 : index
    %c0_9 = arith.constant 0 : index
    %11 = vector.load %arg10[%c16, %c0_9] : memref<384x32xf32, #tpu.memory_space<vmem>>, vector<64x32xf32>
    tpu.vector_store %arg10[%c16, %c0_9], %10 {strides = array<i32>} : memref<384x32xf32, #tpu.memory_space<vmem>>, vector<64x32xf32>,
    %c80 = arith.constant 80 : index
    %c0_10 = arith.constant 0 : index
    %12 = vector.load %arg10[%c80, %c0_10] : memref<384x32xf32, #tpu.memory_space<vmem>>, vector<16x32xf32>
    tpu.vector_store %arg10[%c80, %c0_10], %8 {strides = array<i32>} : memref<384x32xf32, #tpu.memory_space<vmem>>, vector<16x32xf32>,
    %c96 = arith.constant 96 : index
    %c0_11 = arith.constant 0 : index
    %13 = vector.load %arg10[%c96, %c0_11] : memref<384x32xf32, #tpu.memory_space<vmem>>, vector<16x32xf32>
    tpu.vector_store %arg10[%c96, %c0_11], %8 {strides = array<i32>} : memref<384x32xf32, #tpu.memory_space<vmem>>, vector<16x32xf32>,
    %14 = vector.extract_strided_slice %7 {offsets = [64, 0], sizes = [64, 32], strides = [1, 1]} : vector<256x32xf32> to vector<64x32xf32>
    %c112 = arith.constant 112 : index
    %c0_12 = arith.constant 0 : index
    %15 = vector.load %arg10[%c112, %c0_12] : memref<384x32xf32, #tpu.memory_space<vmem>>, vector<64x32xf32>
    tpu.vector_store %arg10[%c112, %c0_12], %14 {strides = array<i32>} : memref<384x32xf32, #tpu.memory_space<vmem>>, vector<64x32xf32>,
    %c176 = arith.constant 176 : index
    %c0_13 = arith.constant 0 : index
    %16 = vector.load %arg10[%c176, %c0_13] : memref<384x32xf32, #tpu.memory_space<vmem>>, vector<16x32xf32>
    tpu.vector_store %arg10[%c176, %c0_13], %8 {strides = array<i32>} : memref<384x32xf32, #tpu.memory_space<vmem>>, vector<16x32xf32>,
    %c192 = arith.constant 192 : index
    %c0_14 = arith.constant 0 : index
    %17 = vector.load %arg10[%c192, %c0_14] : memref<384x32xf32, #tpu.memory_space<vmem>>, vector<16x32xf32>
    tpu.vector_store %arg10[%c192, %c0_14], %8 {strides = array<i32>} : memref<384x32xf32, #tpu.memory_space<vmem>>, vector<16x32xf32>,
    %18 = vector.extract_strided_slice %7 {offsets = [128, 0], sizes = [64, 32], strides = [1, 1]} : vector<256x32xf32> to vector<64x32xf32>
    %c208 = arith.constant 208 : index
    %c0_15 = arith.constant 0 : index
    %19 = vector.load %arg10[%c208, %c0_15] : memref<384x32xf32, #tpu.memory_space<vmem>>, vector<64x32xf32>
    tpu.vector_store %arg10[%c208, %c0_15], %18 {strides = array<i32>} : memref<384x32xf32, #tpu.memory_space<vmem>>, vector<64x32xf32>,
    %c272 = arith.constant 272 : index
    %c0_16 = arith.constant 0 : index
    %20 = vector.load %arg10[%c272, %c0_16] : memref<384x32xf32, #tpu.memory_space<vmem>>, vector<16x32xf32>
    tpu.vector_store %arg10[%c272, %c0_16], %8 {strides = array<i32>} : memref<384x32xf32, #tpu.memory_space<vmem>>, vector<16x32xf32>,
    %c288 = arith.constant 288 : index
    %c0_17 = arith.constant 0 : index
    %21 = vector.load %arg10[%c288, %c0_17] : memref<384x32xf32, #tpu.memory_space<vmem>>, vector<16x32xf32>
    tpu.vector_store %arg10[%c288, %c0_17], %8 {strides = array<i32>} : memref<384x32xf32, #tpu.memory_space<vmem>>, vector<16x32xf32>,
    %22 = vector.extract_strided_slice %7 {offsets = [192, 0], sizes = [64, 32], strides = [1, 1]} : vector<256x32xf32> to vector<64x32xf32>
    %c304 = arith.constant 304 : index
    %c0_18 = arith.constant 0 : index
    %23 = vector.load %arg10[%c304, %c0_18] : memref<384x32xf32, #tpu.memory_space<vmem>>, vector<64x32xf32>
    tpu.vector_store %arg10[%c304, %c0_18], %22 {strides = array<i32>} : memref<384x32xf32, #tpu.memory_space<vmem>>, vector<64x32xf32>,
    %c368 = arith.constant 368 : index
    %c0_19 = arith.constant 0 : index
    %24 = vector.load %arg10[%c368, %c0_19] : memref<384x32xf32, #tpu.memory_space<vmem>>, vector<16x32xf32>
    tpu.vector_store %arg10[%c368, %c0_19], %8 {strides = array<i32>} : memref<384x32xf32, #tpu.memory_space<vmem>>, vector<16x32xf32>,
    %25 = tpu.iota {dimensions = array<i32: 0>} : vector<64x1xi32>
    %c8_i32 = arith.constant 8 : i32
    %c0_i32 = arith.constant 0 : i32
    %26 = arith.cmpi eq, %c8_i32, %c0_i32 : i32
    %c1_i32 = arith.constant 1 : i32
    %27 = arith.select %26, %c1_i32, %c8_i32 : i32
    %28 = vector.broadcast %27 : i32 to vector<64x1xi32>
    %29 = arith.remsi %25, %28 : vector<64x1xi32>
    %c0_i32_20 = arith.constant 0 : i32
    %30 = vector.broadcast %c0_i32_20 : i32 to vector<64x1xi32>
    %31 = arith.cmpi ne, %29, %30 : vector<64x1xi32>
    %c0_i32_21 = arith.constant 0 : i32
    %32 = vector.broadcast %c0_i32_21 : i32 to vector<64x1xi32>
    %33 = arith.cmpi slt, %29, %32 : vector<64x1xi32>
    %c0_i32_22 = arith.constant 0 : i32
    %34 = arith.cmpi slt, %27, %c0_i32_22 : i32
    %35 = vector.broadcast %34 : i1 to vector<64x1xi1>
    %36 = vector.broadcast %35 : vector<64x1xi1> to vector<64x1xi1>
    %37 = arith.xori %33, %36 : vector<64x1xi1>
    %38 = arith.andi %37, %31 : vector<64x1xi1>
    %39 = vector.broadcast %27 : i32 to vector<64x1xi32>
    %40 = arith.addi %29, %39 : vector<64x1xi32>
    %41 = arith.select %38, %40, %29 : vector<64x1xi1>, vector<64x1xi32>
    %c0_i32_23 = arith.constant 0 : i32
    %42 = vector.broadcast %c0_i32_23 : i32 to vector<64x1xi32>
    %43 = arith.cmpi sgt, %41, %42 : vector<64x1xi32>
    %44 = arith.extui %43 : vector<64x1xi1> to vector<64x1xi32>
    %45 = arith.sitofp %44 : vector<64x1xi32> to vector<64x1xf32>
    %c7_i32 = arith.constant 7 : i32
    %46 = vector.broadcast %c7_i32 : i32 to vector<64x1xi32>
    %47 = arith.cmpi slt, %41, %46 : vector<64x1xi32>
    %48 = arith.extui %47 : vector<64x1xi1> to vector<64x1xi32>
    %49 = arith.sitofp %48 : vector<64x1xi32> to vector<64x1xf32>
    %c7 = arith.constant 7 : index
    %c0_24 = arith.constant 0 : index
    %50 = vector.load %arg10[%c7, %c0_24] : memref<384x32xf32, #tpu.memory_space<vmem>>, vector<64x32xf32>
    %51 = vector.broadcast %45 : vector<64x1xf32> to vector<64x32xf32>
    %52 = arith.mulf %50, %51 : vector<64x32xf32>
    %c0_25 = arith.constant 0 : index
    %c0_26 = arith.constant 0 : index
    %53 = vector.load %arg11[%c0_25, %c0_26] : memref<256x288xf32, #tpu.memory_space<vmem>>, vector<64x32xf32>
    tpu.vector_store %arg11[%c0_25, %c0_26], %52 {strides = array<i32>} : memref<256x288xf32, #tpu.memory_space<vmem>>, vector<64x32xf32>,
    %c103 = arith.constant 103 : index
    %c0_27 = arith.constant 0 : index
    %54 = vector.load %arg10[%c103, %c0_27] : memref<384x32xf32, #tpu.memory_space<vmem>>, vector<64x32xf32>
    %55 = vector.broadcast %45 : vector<64x1xf32> to vector<64x32xf32>
    %56 = arith.mulf %54, %55 : vector<64x32xf32>
    %c64 = arith.constant 64 : index
    %c0_28 = arith.constant 0 : index
    %57 = vector.load %arg11[%c64, %c0_28] : memref<256x288xf32, #tpu.memory_space<vmem>>, vector<64x32xf32>
    tpu.vector_store %arg11[%c64, %c0_28], %56 {strides = array<i32>} : memref<256x288xf32, #tpu.memory_space<vmem>>, vector<64x32xf32>,
    %c199 = arith.constant 199 : index
    %c0_29 = arith.constant 0 : index
    %58 = vector.load %arg10[%c199, %c0_29] : memref<384x32xf32, #tpu.memory_space<vmem>>, vector<64x32xf32>
    %59 = vector.broadcast %45 : vector<64x1xf32> to vector<64x32xf32>
    %60 = arith.mulf %58, %59 : vector<64x32xf32>
    %c128 = arith.constant 128 : index
    %c0_30 = arith.constant 0 : index
    %61 = vector.load %arg11[%c128, %c0_30] : memref<256x288xf32, #tpu.memory_space<vmem>>, vector<64x32xf32>
    tpu.vector_store %arg11[%c128, %c0_30], %60 {strides = array<i32>} : memref<256x288xf32, #tpu.memory_space<vmem>>, vector<64x32xf32>,
    %c295 = arith.constant 295 : index
    %c0_31 = arith.constant 0 : index
    %62 = vector.load %arg10[%c295, %c0_31] : memref<384x32xf32, #tpu.memory_space<vmem>>, vector<64x32xf32>
    %63 = vector.broadcast %45 : vector<64x1xf32> to vector<64x32xf32>
    %64 = arith.mulf %62, %63 : vector<64x32xf32>
    %c192_32 = arith.constant 192 : index
    %c0_33 = arith.constant 0 : index
    %65 = vector.load %arg11[%c192_32, %c0_33] : memref<256x288xf32, #tpu.memory_space<vmem>>, vector<64x32xf32>
    tpu.vector_store %arg11[%c192_32, %c0_33], %64 {strides = array<i32>} : memref<256x288xf32, #tpu.memory_space<vmem>>, vector<64x32xf32>,
    %c8 = arith.constant 8 : index
    %c0_34 = arith.constant 0 : index
    %66 = vector.load %arg10[%c8, %c0_34] : memref<384x32xf32, #tpu.memory_space<vmem>>, vector<64x32xf32>
    %c0_35 = arith.constant 0 : index
    %c32 = arith.constant 32 : index
    %67 = vector.load %arg11[%c0_35, %c32] : memref<256x288xf32, #tpu.memory_space<vmem>>, vector<64x32xf32>
    tpu.vector_store %arg11[%c0_35, %c32], %66 {strides = array<i32>} : memref<256x288xf32, #tpu.memory_space<vmem>>, vector<64x32xf32>,
    %c104 = arith.constant 104 : index
    %c0_36 = arith.constant 0 : index
    %68 = vector.load %arg10[%c104, %c0_36] : memref<384x32xf32, #tpu.memory_space<vmem>>, vector<64x32xf32>
    %c64_37 = arith.constant 64 : index
    %c32_38 = arith.constant 32 : index
    %69 = vector.load %arg11[%c64_37, %c32_38] : memref<256x288xf32, #tpu.memory_space<vmem>>, vector<64x32xf32>
    tpu.vector_store %arg11[%c64_37, %c32_38], %68 {strides = array<i32>} : memref<256x288xf32, #tpu.memory_space<vmem>>, vector<64x32xf32>,
    %c200 = arith.constant 200 : index
    %c0_39 = arith.constant 0 : index
    %70 = vector.load %arg10[%c200, %c0_39] : memref<384x32xf32, #tpu.memory_space<vmem>>, vector<64x32xf32>
    %c128_40 = arith.constant 128 : index
    %c32_41 = arith.constant 32 : index
    %71 = vector.load %arg11[%c128_40, %c32_41] : memref<256x288xf32, #tpu.memory_space<vmem>>, vector<64x32xf32>
    tpu.vector_store %arg11[%c128_40, %c32_41], %70 {strides = array<i32>} : memref<256x288xf32, #tpu.memory_space<vmem>>, vector<64x32xf32>,
    %c296 = arith.constant 296 : index
    %c0_42 = arith.constant 0 : index
    %72 = vector.load %arg10[%c296, %c0_42] : memref<384x32xf32, #tpu.memory_space<vmem>>, vector<64x32xf32>
    %c192_43 = arith.constant 192 : index
    %c32_44 = arith.constant 32 : index
    %73 = vector.load %arg11[%c192_43, %c32_44] : memref<256x288xf32, #tpu.memory_space<vmem>>, vector<64x32xf32>
    tpu.vector_store %arg11[%c192_43, %c32_44], %72 {strides = array<i32>} : memref<256x288xf32, #tpu.memory_space<vmem>>, vector<64x32xf32>,
    %c9 = arith.constant 9 : index
    %c0_45 = arith.constant 0 : index
    %74 = vector.load %arg10[%c9, %c0_45] : memref<384x32xf32, #tpu.memory_space<vmem>>, vector<64x32xf32>
    %75 = vector.broadcast %49 : vector<64x1xf32> to vector<64x32xf32>
    %76 = arith.mulf %74, %75 : vector<64x32xf32>
    %c0_46 = arith.constant 0 : index
    %c64_47 = arith.constant 64 : index
    %77 = vector.load %arg11[%c0_46, %c64_47] : memref<256x288xf32, #tpu.memory_space<vmem>>, vector<64x32xf32>
    tpu.vector_store %arg11[%c0_46, %c64_47], %76 {strides = array<i32>} : memref<256x288xf32, #tpu.memory_space<vmem>>, vector<64x32xf32>,
    %c105 = arith.constant 105 : index
    %c0_48 = arith.constant 0 : index
    %78 = vector.load %arg10[%c105, %c0_48] : memref<384x32xf32, #tpu.memory_space<vmem>>, vector<64x32xf32>
    %79 = vector.broadcast %49 : vector<64x1xf32> to vector<64x32xf32>
    %80 = arith.mulf %78, %79 : vector<64x32xf32>
    %c64_49 = arith.constant 64 : index
    %c64_50 = arith.constant 64 : index
    %81 = vector.load %arg11[%c64_49, %c64_50] : memref<256x288xf32, #tpu.memory_space<vmem>>, vector<64x32xf32>
    tpu.vector_store %arg11[%c64_49, %c64_50], %80 {strides = array<i32>} : memref<256x288xf32, #tpu.memory_space<vmem>>, vector<64x32xf32>,
    %c201 = arith.constant 201 : index
    %c0_51 = arith.constant 0 : index
    %82 = vector.load %arg10[%c201, %c0_51] : memref<384x32xf32, #tpu.memory_space<vmem>>, vector<64x32xf32>
    %83 = vector.broadcast %49 : vector<64x1xf32> to vector<64x32xf32>
    %84 = arith.mulf %82, %83 : vector<64x32xf32>
    %c128_52 = arith.constant 128 : index
    %c64_53 = arith.constant 64 : index
    %85 = vector.load %arg11[%c128_52, %c64_53] : memref<256x288xf32, #tpu.memory_space<vmem>>, vector<64x32xf32>
    tpu.vector_store %arg11[%c128_52, %c64_53], %84 {strides = array<i32>} : memref<256x288xf32, #tpu.memory_space<vmem>>, vector<64x32xf32>,
    %c297 = arith.constant 297 : index
    %c0_54 = arith.constant 0 : index
    %86 = vector.load %arg10[%c297, %c0_54] : memref<384x32xf32, #tpu.memory_space<vmem>>, vector<64x32xf32>
    %87 = vector.broadcast %49 : vector<64x1xf32> to vector<64x32xf32>
    %88 = arith.mulf %86, %87 : vector<64x32xf32>
    %c192_55 = arith.constant 192 : index
    %c64_56 = arith.constant 64 : index
    %89 = vector.load %arg11[%c192_55, %c64_56] : memref<256x288xf32, #tpu.memory_space<vmem>>, vector<64x32xf32>
    tpu.vector_store %arg11[%c192_55, %c64_56], %88 {strides = array<i32>} : memref<256x288xf32, #tpu.memory_space<vmem>>, vector<64x32xf32>,
    %c15 = arith.constant 15 : index
    %c0_57 = arith.constant 0 : index
    %90 = vector.load %arg10[%c15, %c0_57] : memref<384x32xf32, #tpu.memory_space<vmem>>, vector<64x32xf32>
    %91 = vector.broadcast %45 : vector<64x1xf32> to vector<64x32xf32>
    %92 = arith.mulf %90, %91 : vector<64x32xf32>
    %c0_58 = arith.constant 0 : index
    %c96_59 = arith.constant 96 : index
    %93 = vector.load %arg11[%c0_58, %c96_59] : memref<256x288xf32, #tpu.memory_space<vmem>>, vector<64x32xf32>
    tpu.vector_store %arg11[%c0_58, %c96_59], %92 {strides = array<i32>} : memref<256x288xf32, #tpu.memory_space<vmem>>, vector<64x32xf32>,
    %c111 = arith.constant 111 : index
    %c0_60 = arith.constant 0 : index
    %94 = vector.load %arg10[%c111, %c0_60] : memref<384x32xf32, #tpu.memory_space<vmem>>, vector<64x32xf32>
    %95 = vector.broadcast %45 : vector<64x1xf32> to vector<64x32xf32>
    %96 = arith.mulf %94, %95 : vector<64x32xf32>
    %c64_61 = arith.constant 64 : index
    %c96_62 = arith.constant 96 : index
    %97 = vector.load %arg11[%c64_61, %c96_62] : memref<256x288xf32, #tpu.memory_space<vmem>>, vector<64x32xf32>
    tpu.vector_store %arg11[%c64_61, %c96_62], %96 {strides = array<i32>} : memref<256x288xf32, #tpu.memory_space<vmem>>, vector<64x32xf32>,
    %c207 = arith.constant 207 : index
    %c0_63 = arith.constant 0 : index
    %98 = vector.load %arg10[%c207, %c0_63] : memref<384x32xf32, #tpu.memory_space<vmem>>, vector<64x32xf32>
    %99 = vector.broadcast %45 : vector<64x1xf32> to vector<64x32xf32>
    %100 = arith.mulf %98, %99 : vector<64x32xf32>
    %c128_64 = arith.constant 128 : index
    %c96_65 = arith.constant 96 : index
    %101 = vector.load %arg11[%c128_64, %c96_65] : memref<256x288xf32, #tpu.memory_space<vmem>>, vector<64x32xf32>
    tpu.vector_store %arg11[%c128_64, %c96_65], %100 {strides = array<i32>} : memref<256x288xf32, #tpu.memory_space<vmem>>, vector<64x32xf32>,
    %c303 = arith.constant 303 : index
    %c0_66 = arith.constant 0 : index
    %102 = vector.load %arg10[%c303, %c0_66] : memref<384x32xf32, #tpu.memory_space<vmem>>, vector<64x32xf32>
    %103 = vector.broadcast %45 : vector<64x1xf32> to vector<64x32xf32>
    %104 = arith.mulf %102, %103 : vector<64x32xf32>
    %c192_67 = arith.constant 192 : index
    %c96_68 = arith.constant 96 : index
    %105 = vector.load %arg11[%c192_67, %c96_68] : memref<256x288xf32, #tpu.memory_space<vmem>>, vector<64x32xf32>
    tpu.vector_store %arg11[%c192_67, %c96_68], %104 {strides = array<i32>} : memref<256x288xf32, #tpu.memory_space<vmem>>, vector<64x32xf32>,
    %c16_69 = arith.constant 16 : index
    %c0_70 = arith.constant 0 : index
    %106 = vector.load %arg10[%c16_69, %c0_70] : memref<384x32xf32, #tpu.memory_space<vmem>>, vector<64x32xf32>
    %c0_71 = arith.constant 0 : index
    %c128_72 = arith.constant 128 : index
    %107 = vector.load %arg11[%c0_71, %c128_72] : memref<256x288xf32, #tpu.memory_space<vmem>>, vector<64x32xf32>
    tpu.vector_store %arg11[%c0_71, %c128_72], %106 {strides = array<i32>} : memref<256x288xf32, #tpu.memory_space<vmem>>, vector<64x32xf32>,
    %c112_73 = arith.constant 112 : index
    %c0_74 = arith.constant 0 : index
    %108 = vector.load %arg10[%c112_73, %c0_74] : memref<384x32xf32, #tpu.memory_space<vmem>>, vector<64x32xf32>
    %c64_75 = arith.constant 64 : index
    %c128_76 = arith.constant 128 : index
    %109 = vector.load %arg11[%c64_75, %c128_76] : memref<256x288xf32, #tpu.memory_space<vmem>>, vector<64x32xf32>
    tpu.vector_store %arg11[%c64_75, %c128_76], %108 {strides = array<i32>} : memref<256x288xf32, #tpu.memory_space<vmem>>, vector<64x32xf32>,
    %c208_77 = arith.constant 208 : index
    %c0_78 = arith.constant 0 : index
    %110 = vector.load %arg10[%c208_77, %c0_78] : memref<384x32xf32, #tpu.memory_space<vmem>>, vector<64x32xf32>
    %c128_79 = arith.constant 128 : index
    %c128_80 = arith.constant 128 : index
    %111 = vector.load %arg11[%c128_79, %c128_80] : memref<256x288xf32, #tpu.memory_space<vmem>>, vector<64x32xf32>
    tpu.vector_store %arg11[%c128_79, %c128_80], %110 {strides = array<i32>} : memref<256x288xf32, #tpu.memory_space<vmem>>, vector<64x32xf32>,
    %c304_81 = arith.constant 304 : index
    %c0_82 = arith.constant 0 : index
    %112 = vector.load %arg10[%c304_81, %c0_82] : memref<384x32xf32, #tpu.memory_space<vmem>>, vector<64x32xf32>
    %c192_83 = arith.constant 192 : index
    %c128_84 = arith.constant 128 : index
    %113 = vector.load %arg11[%c192_83, %c128_84] : memref<256x288xf32, #tpu.memory_space<vmem>>, vector<64x32xf32>
    tpu.vector_store %arg11[%c192_83, %c128_84], %112 {strides = array<i32>} : memref<256x288xf32, #tpu.memory_space<vmem>>, vector<64x32xf32>,
    %c17 = arith.constant 17 : index
    %c0_85 = arith.constant 0 : index
    %114 = vector.load %arg10[%c17, %c0_85] : memref<384x32xf32, #tpu.memory_space<vmem>>, vector<64x32xf32>
    %115 = vector.broadcast %49 : vector<64x1xf32> to vector<64x32xf32>
    %116 = arith.mulf %114, %115 : vector<64x32xf32>
    %c0_86 = arith.constant 0 : index
    %c160 = arith.constant 160 : index
    %117 = vector.load %arg11[%c0_86, %c160] : memref<256x288xf32, #tpu.memory_space<vmem>>, vector<64x32xf32>
    tpu.vector_store %arg11[%c0_86, %c160], %116 {strides = array<i32>} : memref<256x288xf32, #tpu.memory_space<vmem>>, vector<64x32xf32>,
    %c113 = arith.constant 113 : index
    %c0_87 = arith.constant 0 : index
    %118 = vector.load %arg10[%c113, %c0_87] : memref<384x32xf32, #tpu.memory_space<vmem>>, vector<64x32xf32>
    %119 = vector.broadcast %49 : vector<64x1xf32> to vector<64x32xf32>
    %120 = arith.mulf %118, %119 : vector<64x32xf32>
    %c64_88 = arith.constant 64 : index
    %c160_89 = arith.constant 160 : index
    %121 = vector.load %arg11[%c64_88, %c160_89] : memref<256x288xf32, #tpu.memory_space<vmem>>, vector<64x32xf32>
    tpu.vector_store %arg11[%c64_88, %c160_89], %120 {strides = array<i32>} : memref<256x288xf32, #tpu.memory_space<vmem>>, vector<64x32xf32>,
    %c209 = arith.constant 209 : index
    %c0_90 = arith.constant 0 : index
    %122 = vector.load %arg10[%c209, %c0_90] : memref<384x32xf32, #tpu.memory_space<vmem>>, vector<64x32xf32>
    %123 = vector.broadcast %49 : vector<64x1xf32> to vector<64x32xf32>
    %124 = arith.mulf %122, %123 : vector<64x32xf32>
    %c128_91 = arith.constant 128 : index
    %c160_92 = arith.constant 160 : index
    %125 = vector.load %arg11[%c128_91, %c160_92] : memref<256x288xf32, #tpu.memory_space<vmem>>, vector<64x32xf32>
    tpu.vector_store %arg11[%c128_91, %c160_92], %124 {strides = array<i32>} : memref<256x288xf32, #tpu.memory_space<vmem>>, vector<64x32xf32>,
    %c305 = arith.constant 305 : index
    %c0_93 = arith.constant 0 : index
    %126 = vector.load %arg10[%c305, %c0_93] : memref<384x32xf32, #tpu.memory_space<vmem>>, vector<64x32xf32>
    %127 = vector.broadcast %49 : vector<64x1xf32> to vector<64x32xf32>
    %128 = arith.mulf %126, %127 : vector<64x32xf32>
    %c192_94 = arith.constant 192 : index
    %c160_95 = arith.constant 160 : index
    %129 = vector.load %arg11[%c192_94, %c160_95] : memref<256x288xf32, #tpu.memory_space<vmem>>, vector<64x32xf32>
    tpu.vector_store %arg11[%c192_94, %c160_95], %128 {strides = array<i32>} : memref<256x288xf32, #tpu.memory_space<vmem>>, vector<64x32xf32>,
    %c23 = arith.constant 23 : index
    %c0_96 = arith.constant 0 : index
    %130 = vector.load %arg10[%c23, %c0_96] : memref<384x32xf32, #tpu.memory_space<vmem>>, vector<64x32xf32>
    %131 = vector.broadcast %45 : vector<64x1xf32> to vector<64x32xf32>
    %132 = arith.mulf %130, %131 : vector<64x32xf32>
    %c0_97 = arith.constant 0 : index
    %c192_98 = arith.constant 192 : index
    %133 = vector.load %arg11[%c0_97, %c192_98] : memref<256x288xf32, #tpu.memory_space<vmem>>, vector<64x32xf32>
    tpu.vector_store %arg11[%c0_97, %c192_98], %132 {strides = array<i32>} : memref<256x288xf32, #tpu.memory_space<vmem>>, vector<64x32xf32>,
    %c119 = arith.constant 119 : index
    %c0_99 = arith.constant 0 : index
    %134 = vector.load %arg10[%c119, %c0_99] : memref<384x32xf32, #tpu.memory_space<vmem>>, vector<64x32xf32>
    %135 = vector.broadcast %45 : vector<64x1xf32> to vector<64x32xf32>
    %136 = arith.mulf %134, %135 : vector<64x32xf32>
    %c64_100 = arith.constant 64 : index
    %c192_101 = arith.constant 192 : index
    %137 = vector.load %arg11[%c64_100, %c192_101] : memref<256x288xf32, #tpu.memory_space<vmem>>, vector<64x32xf32>
    tpu.vector_store %arg11[%c64_100, %c192_101], %136 {strides = array<i32>} : memref<256x288xf32, #tpu.memory_space<vmem>>, vector<64x32xf32>,
    %c215 = arith.constant 215 : index
    %c0_102 = arith.constant 0 : index
    %138 = vector.load %arg10[%c215, %c0_102] : memref<384x32xf32, #tpu.memory_space<vmem>>, vector<64x32xf32>
    %139 = vector.broadcast %45 : vector<64x1xf32> to vector<64x32xf32>
    %140 = arith.mulf %138, %139 : vector<64x32xf32>
    %c128_103 = arith.constant 128 : index
    %c192_104 = arith.constant 192 : index
    %141 = vector.load %arg11[%c128_103, %c192_104] : memref<256x288xf32, #tpu.memory_space<vmem>>, vector<64x32xf32>
    tpu.vector_store %arg11[%c128_103, %c192_104], %140 {strides = array<i32>} : memref<256x288xf32, #tpu.memory_space<vmem>>, vector<64x32xf32>,
    %c311 = arith.constant 311 : index
    %c0_105 = arith.constant 0 : index
    %142 = vector.load %arg10[%c311, %c0_105] : memref<384x32xf32, #tpu.memory_space<vmem>>, vector<64x32xf32>
    %143 = vector.broadcast %45 : vector<64x1xf32> to vector<64x32xf32>
    %144 = arith.mulf %142, %143 : vector<64x32xf32>
    %c192_106 = arith.constant 192 : index
    %c192_107 = arith.constant 192 : index
    %145 = vector.load %arg11[%c192_106, %c192_107] : memref<256x288xf32, #tpu.memory_space<vmem>>, vector<64x32xf32>
    tpu.vector_store %arg11[%c192_106, %c192_107], %144 {strides = array<i32>} : memref<256x288xf32, #tpu.memory_space<vmem>>, vector<64x32xf32>,
    %c24 = arith.constant 24 : index
    %c0_108 = arith.constant 0 : index
    %146 = vector.load %arg10[%c24, %c0_108] : memref<384x32xf32, #tpu.memory_space<vmem>>, vector<64x32xf32>
    %c0_109 = arith.constant 0 : index
    %c224 = arith.constant 224 : index
    %147 = vector.load %arg11[%c0_109, %c224] : memref<256x288xf32, #tpu.memory_space<vmem>>, vector<64x32xf32>
    tpu.vector_store %arg11[%c0_109, %c224], %146 {strides = array<i32>} : memref<256x288xf32, #tpu.memory_space<vmem>>, vector<64x32xf32>,
    %c120 = arith.constant 120 : index
    %c0_110 = arith.constant 0 : index
    %148 = vector.load %arg10[%c120, %c0_110] : memref<384x32xf32, #tpu.memory_space<vmem>>, vector<64x32xf32>
    %c64_111 = arith.constant 64 : index
    %c224_112 = arith.constant 224 : index
    %149 = vector.load %arg11[%c64_111, %c224_112] : memref<256x288xf32, #tpu.memory_space<vmem>>, vector<64x32xf32>
    tpu.vector_store %arg11[%c64_111, %c224_112], %148 {strides = array<i32>} : memref<256x288xf32, #tpu.memory_space<vmem>>, vector<64x32xf32>,
    %c216 = arith.constant 216 : index
    %c0_113 = arith.constant 0 : index
    %150 = vector.load %arg10[%c216, %c0_113] : memref<384x32xf32, #tpu.memory_space<vmem>>, vector<64x32xf32>
    %c128_114 = arith.constant 128 : index
    %c224_115 = arith.constant 224 : index
    %151 = vector.load %arg11[%c128_114, %c224_115] : memref<256x288xf32, #tpu.memory_space<vmem>>, vector<64x32xf32>
    tpu.vector_store %arg11[%c128_114, %c224_115], %150 {strides = array<i32>} : memref<256x288xf32, #tpu.memory_space<vmem>>, vector<64x32xf32>,
    %c312 = arith.constant 312 : index
    %c0_116 = arith.constant 0 : index
    %152 = vector.load %arg10[%c312, %c0_116] : memref<384x32xf32, #tpu.memory_space<vmem>>, vector<64x32xf32>
    %c192_117 = arith.constant 192 : index
    %c224_118 = arith.constant 224 : index
    %153 = vector.load %arg11[%c192_117, %c224_118] : memref<256x288xf32, #tpu.memory_space<vmem>>, vector<64x32xf32>
    tpu.vector_store %arg11[%c192_117, %c224_118], %152 {strides = array<i32>} : memref<256x288xf32, #tpu.memory_space<vmem>>, vector<64x32xf32>,
    %c25 = arith.constant 25 : index
    %c0_119 = arith.constant 0 : index
    %154 = vector.load %arg10[%c25, %c0_119] : memref<384x32xf32, #tpu.memory_space<vmem>>, vector<64x32xf32>
    %155 = vector.broadcast %49 : vector<64x1xf32> to vector<64x32xf32>
    %156 = arith.mulf %154, %155 : vector<64x32xf32>
    %c0_120 = arith.constant 0 : index
    %c256 = arith.constant 256 : index
    %157 = vector.load %arg11[%c0_120, %c256] : memref<256x288xf32, #tpu.memory_space<vmem>>, vector<64x32xf32>
    tpu.vector_store %arg11[%c0_120, %c256], %156 {strides = array<i32>} : memref<256x288xf32, #tpu.memory_space<vmem>>, vector<64x32xf32>,
    %c121 = arith.constant 121 : index
    %c0_121 = arith.constant 0 : index
    %158 = vector.load %arg10[%c121, %c0_121] : memref<384x32xf32, #tpu.memory_space<vmem>>, vector<64x32xf32>
    %159 = vector.broadcast %49 : vector<64x1xf32> to vector<64x32xf32>
    %160 = arith.mulf %158, %159 : vector<64x32xf32>
    %c64_122 = arith.constant 64 : index
    %c256_123 = arith.constant 256 : index
    %161 = vector.load %arg11[%c64_122, %c256_123] : memref<256x288xf32, #tpu.memory_space<vmem>>, vector<64x32xf32>
    tpu.vector_store %arg11[%c64_122, %c256_123], %160 {strides = array<i32>} : memref<256x288xf32, #tpu.memory_space<vmem>>, vector<64x32xf32>,
    %c217 = arith.constant 217 : index
    %c0_124 = arith.constant 0 : index
    %162 = vector.load %arg10[%c217, %c0_124] : memref<384x32xf32, #tpu.memory_space<vmem>>, vector<64x32xf32>
    %163 = vector.broadcast %49 : vector<64x1xf32> to vector<64x32xf32>
    %164 = arith.mulf %162, %163 : vector<64x32xf32>
    %c128_125 = arith.constant 128 : index
    %c256_126 = arith.constant 256 : index
    %165 = vector.load %arg11[%c128_125, %c256_126] : memref<256x288xf32, #tpu.memory_space<vmem>>, vector<64x32xf32>
    tpu.vector_store %arg11[%c128_125, %c256_126], %164 {strides = array<i32>} : memref<256x288xf32, #tpu.memory_space<vmem>>, vector<64x32xf32>,
    %c313 = arith.constant 313 : index
    %c0_127 = arith.constant 0 : index
    %166 = vector.load %arg10[%c313, %c0_127] : memref<384x32xf32, #tpu.memory_space<vmem>>, vector<64x32xf32>
    %167 = vector.broadcast %49 : vector<64x1xf32> to vector<64x32xf32>
    %168 = arith.mulf %166, %167 : vector<64x32xf32>
    %c192_128 = arith.constant 192 : index
    %c256_129 = arith.constant 256 : index
    %169 = vector.load %arg11[%c192_128, %c256_129] : memref<256x288xf32, #tpu.memory_space<vmem>>, vector<64x32xf32>
    tpu.vector_store %arg11[%c192_128, %c256_129], %168 {strides = array<i32>} : memref<256x288xf32, #tpu.memory_space<vmem>>, vector<64x32xf32>,
    %c0_130 = arith.constant 0 : index
    %c0_131 = arith.constant 0 : index
    %170 = vector.load %arg11[%c0_130, %c0_131] : memref<256x288xf32, #tpu.memory_space<vmem>>, vector<256x288xf32>
    %c0_132 = arith.constant 0 : index
    %c0_133 = arith.constant 0 : index
    %c0_134 = arith.constant 0 : index
    %171 = vector.load %arg5[%c0_132, %c0_133, %c0_134] : memref<2x288x32xf32, #tpu.memory_space<vmem>>, vector<1x288x32xf32>
    %172 = vector.shape_cast %171 : vector<1x288x32xf32> to vector<288x32xf32>
    %cst_135 = arith.constant dense<0.000000e+00> : vector<256x32xf32>
    %173 = tpu.matmul %170, %172, %cst_135 {dimension_numbers = #tpu.dot_dimension_numbers<[1], [0], [0], [1], [0, 0, 1, 1], [], []>} : vector<256x288xf32>, vector<288x32xf32>, vector<256x32xf32> -> vector<256x32xf32>
    %c0_136 = arith.constant 0 : index
    %c0_137 = arith.constant 0 : index
    %c0_138 = arith.constant 0 : index
    %174 = vector.load %arg6[%c0_136, %c0_137, %c0_138] : memref<2x1x32xf32, #tpu.memory_space<vmem>>, vector<1x1x32xf32>
    %175 = vector.shape_cast %174 : vector<1x1x32xf32> to vector<1x32xf32>
    %176 = vector.broadcast %175 : vector<1x32xf32> to vector<256x32xf32>
    %177 = arith.addf %173, %176 : vector<256x32xf32>
    %c0_139 = arith.constant 0 : index
    %c0_140 = arith.constant 0 : index
    %c0_141 = arith.constant 0 : index
    %c0_142 = arith.constant 0 : index
    %178 = vector.load %arg2[%c0_139, %c0_140, %c0_141, %c0_142] : memref<4x2x2x32xf32, #tpu.memory_space<vmem>>, vector<1x1x1x32xf32>
    %179 = vector.shape_cast %178 : vector<1x1x1x32xf32> to vector<1x32xf32>
    %c0_143 = arith.constant 0 : index
    %c0_144 = arith.constant 0 : index
    %c1 = arith.constant 1 : index
    %c0_145 = arith.constant 0 : index
    %180 = vector.load %arg2[%c0_143, %c0_144, %c1, %c0_145] : memref<4x2x2x32xf32, #tpu.memory_space<vmem>>, vector<1x1x1x32xf32>
    %181 = vector.shape_cast %180 : vector<1x1x1x32xf32> to vector<1x32xf32>
    %182 = vector.extract_strided_slice %177 {offsets = [0, 0], sizes = [64, 32], strides = [1, 1]} : vector<256x32xf32> to vector<64x32xf32>
    %cst_146 = arith.constant 1.000000e+00 : f32
    %183 = vector.broadcast %cst_146 : f32 to vector<1x32xf32>
    %184 = arith.addf %183, %179 : vector<1x32xf32>
    %185 = vector.broadcast %184 : vector<1x32xf32> to vector<64x32xf32>
    %186 = arith.mulf %182, %185 : vector<64x32xf32>
    %187 = vector.broadcast %181 : vector<1x32xf32> to vector<64x32xf32>
    %188 = arith.addf %186, %187 : vector<64x32xf32>
    %cst_147 = arith.constant 0.000000e+00 : f32
    %189 = vector.broadcast %cst_147 : f32 to vector<64x32xf32>
    %190 = arith.maximumf %188, %189 : vector<64x32xf32>
    %c16_148 = arith.constant 16 : index
    %c0_149 = arith.constant 0 : index
    %191 = vector.load %arg10[%c16_148, %c0_149] : memref<384x32xf32, #tpu.memory_space<vmem>>, vector<64x32xf32>
    %192 = arith.addf %190, %191 : vector<64x32xf32>
    %c16_150 = arith.constant 16 : index
    %c0_151 = arith.constant 0 : index
    %193 = vector.load %arg10[%c16_150, %c0_151] : memref<384x32xf32, #tpu.memory_space<vmem>>, vector<64x32xf32>
    tpu.vector_store %arg10[%c16_150, %c0_151], %192 {strides = array<i32>} : memref<384x32xf32, #tpu.memory_space<vmem>>, vector<64x32xf32>,
    %c1_152 = arith.constant 1 : index
    %c0_153 = arith.constant 0 : index
    %c0_154 = arith.constant 0 : index
    %c0_155 = arith.constant 0 : index
    %194 = vector.load %arg2[%c1_152, %c0_153, %c0_154, %c0_155] : memref<4x2x2x32xf32, #tpu.memory_space<vmem>>, vector<1x1x1x32xf32>
    %195 = vector.shape_cast %194 : vector<1x1x1x32xf32> to vector<1x32xf32>
    %c1_156 = arith.constant 1 : index
    %c0_157 = arith.constant 0 : index
    %c1_158 = arith.constant 1 : index
    %c0_159 = arith.constant 0 : index
    %196 = vector.load %arg2[%c1_156, %c0_157, %c1_158, %c0_159] : memref<4x2x2x32xf32, #tpu.memory_space<vmem>>, vector<1x1x1x32xf32>
    %197 = vector.shape_cast %196 : vector<1x1x1x32xf32> to vector<1x32xf32>
    %198 = vector.extract_strided_slice %177 {offsets = [64, 0], sizes = [64, 32], strides = [1, 1]} : vector<256x32xf32> to vector<64x32xf32>
    %cst_160 = arith.constant 1.000000e+00 : f32
    %199 = vector.broadcast %cst_160 : f32 to vector<1x32xf32>
    %200 = arith.addf %199, %195 : vector<1x32xf32>
    %201 = vector.broadcast %200 : vector<1x32xf32> to vector<64x32xf32>
    %202 = arith.mulf %198, %201 : vector<64x32xf32>
    %203 = vector.broadcast %197 : vector<1x32xf32> to vector<64x32xf32>
    %204 = arith.addf %202, %203 : vector<64x32xf32>
    %cst_161 = arith.constant 0.000000e+00 : f32
    %205 = vector.broadcast %cst_161 : f32 to vector<64x32xf32>
    %206 = arith.maximumf %204, %205 : vector<64x32xf32>
    %c112_162 = arith.constant 112 : index
    %c0_163 = arith.constant 0 : index
    %207 = vector.load %arg10[%c112_162, %c0_163] : memref<384x32xf32, #tpu.memory_space<vmem>>, vector<64x32xf32>
    %208 = arith.addf %206, %207 : vector<64x32xf32>
    %c112_164 = arith.constant 112 : index
    %c0_165 = arith.constant 0 : index
    %209 = vector.load %arg10[%c112_164, %c0_165] : memref<384x32xf32, #tpu.memory_space<vmem>>, vector<64x32xf32>
    tpu.vector_store %arg10[%c112_164, %c0_165], %208 {strides = array<i32>} : memref<384x32xf32, #tpu.memory_space<vmem>>, vector<64x32xf32>,
    %c2 = arith.constant 2 : index
    %c0_166 = arith.constant 0 : index
    %c0_167 = arith.constant 0 : index
    %c0_168 = arith.constant 0 : index
    %210 = vector.load %arg2[%c2, %c0_166, %c0_167, %c0_168] : memref<4x2x2x32xf32, #tpu.memory_space<vmem>>, vector<1x1x1x32xf32>
    %211 = vector.shape_cast %210 : vector<1x1x1x32xf32> to vector<1x32xf32>
    %c2_169 = arith.constant 2 : index
    %c0_170 = arith.constant 0 : index
    %c1_171 = arith.constant 1 : index
    %c0_172 = arith.constant 0 : index
    %212 = vector.load %arg2[%c2_169, %c0_170, %c1_171, %c0_172] : memref<4x2x2x32xf32, #tpu.memory_space<vmem>>, vector<1x1x1x32xf32>
    %213 = vector.shape_cast %212 : vector<1x1x1x32xf32> to vector<1x32xf32>
    %214 = vector.extract_strided_slice %177 {offsets = [128, 0], sizes = [64, 32], strides = [1, 1]} : vector<256x32xf32> to vector<64x32xf32>
    %cst_173 = arith.constant 1.000000e+00 : f32
    %215 = vector.broadcast %cst_173 : f32 to vector<1x32xf32>
    %216 = arith.addf %215, %211 : vector<1x32xf32>
    %217 = vector.broadcast %216 : vector<1x32xf32> to vector<64x32xf32>
    %218 = arith.mulf %214, %217 : vector<64x32xf32>
    %219 = vector.broadcast %213 : vector<1x32xf32> to vector<64x32xf32>
    %220 = arith.addf %218, %219 : vector<64x32xf32>
    %cst_174 = arith.constant 0.000000e+00 : f32
    %221 = vector.broadcast %cst_174 : f32 to vector<64x32xf32>
    %222 = arith.maximumf %220, %221 : vector<64x32xf32>
    %c208_175 = arith.constant 208 : index
    %c0_176 = arith.constant 0 : index
    %223 = vector.load %arg10[%c208_175, %c0_176] : memref<384x32xf32, #tpu.memory_space<vmem>>, vector<64x32xf32>
    %224 = arith.addf %222, %223 : vector<64x32xf32>
    %c208_177 = arith.constant 208 : index
    %c0_178 = arith.constant 0 : index
    %225 = vector.load %arg10[%c208_177, %c0_178] : memref<384x32xf32, #tpu.memory_space<vmem>>, vector<64x32xf32>
    tpu.vector_store %arg10[%c208_177, %c0_178], %224 {strides = array<i32>} : memref<384x32xf32, #tpu.memory_space<vmem>>, vector<64x32xf32>,
    %c3 = arith.constant 3 : index
    %c0_179 = arith.constant 0 : index
    %c0_180 = arith.constant 0 : index
    %c0_181 = arith.constant 0 : index
    %226 = vector.load %arg2[%c3, %c0_179, %c0_180, %c0_181] : memref<4x2x2x32xf32, #tpu.memory_space<vmem>>, vector<1x1x1x32xf32>
    %227 = vector.shape_cast %226 : vector<1x1x1x32xf32> to vector<1x32xf32>
    %c3_182 = arith.constant 3 : index
    %c0_183 = arith.constant 0 : index
    %c1_184 = arith.constant 1 : index
    %c0_185 = arith.constant 0 : index
    %228 = vector.load %arg2[%c3_182, %c0_183, %c1_184, %c0_185] : memref<4x2x2x32xf32, #tpu.memory_space<vmem>>, vector<1x1x1x32xf32>
    %229 = vector.shape_cast %228 : vector<1x1x1x32xf32> to vector<1x32xf32>
    %230 = vector.extract_strided_slice %177 {offsets = [192, 0], sizes = [64, 32], strides = [1, 1]} : vector<256x32xf32> to vector<64x32xf32>
    %cst_186 = arith.constant 1.000000e+00 : f32
    %231 = vector.broadcast %cst_186 : f32 to vector<1x32xf32>
    %232 = arith.addf %231, %227 : vector<1x32xf32>
    %233 = vector.broadcast %232 : vector<1x32xf32> to vector<64x32xf32>
    %234 = arith.mulf %230, %233 : vector<64x32xf32>
    %235 = vector.broadcast %229 : vector<1x32xf32> to vector<64x32xf32>
    %236 = arith.addf %234, %235 : vector<64x32xf32>
    %cst_187 = arith.constant 0.000000e+00 : f32
    %237 = vector.broadcast %cst_187 : f32 to vector<64x32xf32>
    %238 = arith.maximumf %236, %237 : vector<64x32xf32>
    %c304_188 = arith.constant 304 : index
    %c0_189 = arith.constant 0 : index
    %239 = vector.load %arg10[%c304_188, %c0_189] : memref<384x32xf32, #tpu.memory_space<vmem>>, vector<64x32xf32>
    %240 = arith.addf %238, %239 : vector<64x32xf32>
    %c304_190 = arith.constant 304 : index
    %c0_191 = arith.constant 0 : index
    %241 = vector.load %arg10[%c304_190, %c0_191] : memref<384x32xf32, #tpu.memory_space<vmem>>, vector<64x32xf32>
    tpu.vector_store %arg10[%c304_190, %c0_191], %240 {strides = array<i32>} : memref<384x32xf32, #tpu.memory_space<vmem>>, vector<64x32xf32>,
    %c7_192 = arith.constant 7 : index
    %c0_193 = arith.constant 0 : index
    %242 = vector.load %arg10[%c7_192, %c0_193] : memref<384x32xf32, #tpu.memory_space<vmem>>, vector<64x32xf32>
    %243 = vector.broadcast %45 : vector<64x1xf32> to vector<64x32xf32>
    %244 = arith.mulf %242, %243 : vector<64x32xf32>
    %c0_194 = arith.constant 0 : index
    %c0_195 = arith.constant 0 : index
    %245 = vector.load %arg11[%c0_194, %c0_195] : memref<256x288xf32, #tpu.memory_space<vmem>>, vector<64x32xf32>
    tpu.vector_store %arg11[%c0_194, %c0_195], %244 {strides = array<i32>} : memref<256x288xf32, #tpu.memory_space<vmem>>, vector<64x32xf32>,
    %c103_196 = arith.constant 103 : index
    %c0_197 = arith.constant 0 : index
    %246 = vector.load %arg10[%c103_196, %c0_197] : memref<384x32xf32, #tpu.memory_space<vmem>>, vector<64x32xf32>
    %247 = vector.broadcast %45 : vector<64x1xf32> to vector<64x32xf32>
    %248 = arith.mulf %246, %247 : vector<64x32xf32>
    %c64_198 = arith.constant 64 : index
    %c0_199 = arith.constant 0 : index
    %249 = vector.load %arg11[%c64_198, %c0_199] : memref<256x288xf32, #tpu.memory_space<vmem>>, vector<64x32xf32>
    tpu.vector_store %arg11[%c64_198, %c0_199], %248 {strides = array<i32>} : memref<256x288xf32, #tpu.memory_space<vmem>>, vector<64x32xf32>,
    %c199_200 = arith.constant 199 : index
    %c0_201 = arith.constant 0 : index
    %250 = vector.load %arg10[%c199_200, %c0_201] : memref<384x32xf32, #tpu.memory_space<vmem>>, vector<64x32xf32>
    %251 = vector.broadcast %45 : vector<64x1xf32> to vector<64x32xf32>
    %252 = arith.mulf %250, %251 : vector<64x32xf32>
    %c128_202 = arith.constant 128 : index
    %c0_203 = arith.constant 0 : index
    %253 = vector.load %arg11[%c128_202, %c0_203] : memref<256x288xf32, #tpu.memory_space<vmem>>, vector<64x32xf32>
    tpu.vector_store %arg11[%c128_202, %c0_203], %252 {strides = array<i32>} : memref<256x288xf32, #tpu.memory_space<vmem>>, vector<64x32xf32>,
    %c295_204 = arith.constant 295 : index
    %c0_205 = arith.constant 0 : index
    %254 = vector.load %arg10[%c295_204, %c0_205] : memref<384x32xf32, #tpu.memory_space<vmem>>, vector<64x32xf32>
    %255 = vector.broadcast %45 : vector<64x1xf32> to vector<64x32xf32>
    %256 = arith.mulf %254, %255 : vector<64x32xf32>
    %c192_206 = arith.constant 192 : index
    %c0_207 = arith.constant 0 : index
    %257 = vector.load %arg11[%c192_206, %c0_207] : memref<256x288xf32, #tpu.memory_space<vmem>>, vector<64x32xf32>
    tpu.vector_store %arg11[%c192_206, %c0_207], %256 {strides = array<i32>} : memref<256x288xf32, #tpu.memory_space<vmem>>, vector<64x32xf32>,
    %c8_208 = arith.constant 8 : index
    %c0_209 = arith.constant 0 : index
    %258 = vector.load %arg10[%c8_208, %c0_209] : memref<384x32xf32, #tpu.memory_space<vmem>>, vector<64x32xf32>
    %c0_210 = arith.constant 0 : index
    %c32_211 = arith.constant 32 : index
    %259 = vector.load %arg11[%c0_210, %c32_211] : memref<256x288xf32, #tpu.memory_space<vmem>>, vector<64x32xf32>
    tpu.vector_store %arg11[%c0_210, %c32_211], %258 {strides = array<i32>} : memref<256x288xf32, #tpu.memory_space<vmem>>, vector<64x32xf32>,
    %c104_212 = arith.constant 104 : index
    %c0_213 = arith.constant 0 : index
    %260 = vector.load %arg10[%c104_212, %c0_213] : memref<384x32xf32, #tpu.memory_space<vmem>>, vector<64x32xf32>
    %c64_214 = arith.constant 64 : index
    %c32_215 = arith.constant 32 : index
    %261 = vector.load %arg11[%c64_214, %c32_215] : memref<256x288xf32, #tpu.memory_space<vmem>>, vector<64x32xf32>
    tpu.vector_store %arg11[%c64_214, %c32_215], %260 {strides = array<i32>} : memref<256x288xf32, #tpu.memory_space<vmem>>, vector<64x32xf32>,
    %c200_216 = arith.constant 200 : index
    %c0_217 = arith.constant 0 : index
    %262 = vector.load %arg10[%c200_216, %c0_217] : memref<384x32xf32, #tpu.memory_space<vmem>>, vector<64x32xf32>
    %c128_218 = arith.constant 128 : index
    %c32_219 = arith.constant 32 : index
    %263 = vector.load %arg11[%c128_218, %c32_219] : memref<256x288xf32, #tpu.memory_space<vmem>>, vector<64x32xf32>
    tpu.vector_store %arg11[%c128_218, %c32_219], %262 {strides = array<i32>} : memref<256x288xf32, #tpu.memory_space<vmem>>, vector<64x32xf32>,
    %c296_220 = arith.constant 296 : index
    %c0_221 = arith.constant 0 : index
    %264 = vector.load %arg10[%c296_220, %c0_221] : memref<384x32xf32, #tpu.memory_space<vmem>>, vector<64x32xf32>
    %c192_222 = arith.constant 192 : index
    %c32_223 = arith.constant 32 : index
    %265 = vector.load %arg11[%c192_222, %c32_223] : memref<256x288xf32, #tpu.memory_space<vmem>>, vector<64x32xf32>
    tpu.vector_store %arg11[%c192_222, %c32_223], %264 {strides = array<i32>} : memref<256x288xf32, #tpu.memory_space<vmem>>, vector<64x32xf32>,
    %c9_224 = arith.constant 9 : index
    %c0_225 = arith.constant 0 : index
    %266 = vector.load %arg10[%c9_224, %c0_225] : memref<384x32xf32, #tpu.memory_space<vmem>>, vector<64x32xf32>
    %267 = vector.broadcast %49 : vector<64x1xf32> to vector<64x32xf32>
    %268 = arith.mulf %266, %267 : vector<64x32xf32>
    %c0_226 = arith.constant 0 : index
    %c64_227 = arith.constant 64 : index
    %269 = vector.load %arg11[%c0_226, %c64_227] : memref<256x288xf32, #tpu.memory_space<vmem>>, vector<64x32xf32>
    tpu.vector_store %arg11[%c0_226, %c64_227], %268 {strides = array<i32>} : memref<256x288xf32, #tpu.memory_space<vmem>>, vector<64x32xf32>,
    %c105_228 = arith.constant 105 : index
    %c0_229 = arith.constant 0 : index
    %270 = vector.load %arg10[%c105_228, %c0_229] : memref<384x32xf32, #tpu.memory_space<vmem>>, vector<64x32xf32>
    %271 = vector.broadcast %49 : vector<64x1xf32> to vector<64x32xf32>
    %272 = arith.mulf %270, %271 : vector<64x32xf32>
    %c64_230 = arith.constant 64 : index
    %c64_231 = arith.constant 64 : index
    %273 = vector.load %arg11[%c64_230, %c64_231] : memref<256x288xf32, #tpu.memory_space<vmem>>, vector<64x32xf32>
    tpu.vector_store %arg11[%c64_230, %c64_231], %272 {strides = array<i32>} : memref<256x288xf32, #tpu.memory_space<vmem>>, vector<64x32xf32>,
    %c201_232 = arith.constant 201 : index
    %c0_233 = arith.constant 0 : index
    %274 = vector.load %arg10[%c201_232, %c0_233] : memref<384x32xf32, #tpu.memory_space<vmem>>, vector<64x32xf32>
    %275 = vector.broadcast %49 : vector<64x1xf32> to vector<64x32xf32>
    %276 = arith.mulf %274, %275 : vector<64x32xf32>
    %c128_234 = arith.constant 128 : index
    %c64_235 = arith.constant 64 : index
    %277 = vector.load %arg11[%c128_234, %c64_235] : memref<256x288xf32, #tpu.memory_space<vmem>>, vector<64x32xf32>
    tpu.vector_store %arg11[%c128_234, %c64_235], %276 {strides = array<i32>} : memref<256x288xf32, #tpu.memory_space<vmem>>, vector<64x32xf32>,
    %c297_236 = arith.constant 297 : index
    %c0_237 = arith.constant 0 : index
    %278 = vector.load %arg10[%c297_236, %c0_237] : memref<384x32xf32, #tpu.memory_space<vmem>>, vector<64x32xf32>
    %279 = vector.broadcast %49 : vector<64x1xf32> to vector<64x32xf32>
    %280 = arith.mulf %278, %279 : vector<64x32xf32>
    %c192_238 = arith.constant 192 : index
    %c64_239 = arith.constant 64 : index
    %281 = vector.load %arg11[%c192_238, %c64_239] : memref<256x288xf32, #tpu.memory_space<vmem>>, vector<64x32xf32>
    tpu.vector_store %arg11[%c192_238, %c64_239], %280 {strides = array<i32>} : memref<256x288xf32, #tpu.memory_space<vmem>>, vector<64x32xf32>,
    %c15_240 = arith.constant 15 : index
    %c0_241 = arith.constant 0 : index
    %282 = vector.load %arg10[%c15_240, %c0_241] : memref<384x32xf32, #tpu.memory_space<vmem>>, vector<64x32xf32>
    %283 = vector.broadcast %45 : vector<64x1xf32> to vector<64x32xf32>
    %284 = arith.mulf %282, %283 : vector<64x32xf32>
    %c0_242 = arith.constant 0 : index
    %c96_243 = arith.constant 96 : index
    %285 = vector.load %arg11[%c0_242, %c96_243] : memref<256x288xf32, #tpu.memory_space<vmem>>, vector<64x32xf32>
    tpu.vector_store %arg11[%c0_242, %c96_243], %284 {strides = array<i32>} : memref<256x288xf32, #tpu.memory_space<vmem>>, vector<64x32xf32>,
    %c111_244 = arith.constant 111 : index
    %c0_245 = arith.constant 0 : index
    %286 = vector.load %arg10[%c111_244, %c0_245] : memref<384x32xf32, #tpu.memory_space<vmem>>, vector<64x32xf32>
    %287 = vector.broadcast %45 : vector<64x1xf32> to vector<64x32xf32>
    %288 = arith.mulf %286, %287 : vector<64x32xf32>
    %c64_246 = arith.constant 64 : index
    %c96_247 = arith.constant 96 : index
    %289 = vector.load %arg11[%c64_246, %c96_247] : memref<256x288xf32, #tpu.memory_space<vmem>>, vector<64x32xf32>
    tpu.vector_store %arg11[%c64_246, %c96_247], %288 {strides = array<i32>} : memref<256x288xf32, #tpu.memory_space<vmem>>, vector<64x32xf32>,
    %c207_248 = arith.constant 207 : index
    %c0_249 = arith.constant 0 : index
    %290 = vector.load %arg10[%c207_248, %c0_249] : memref<384x32xf32, #tpu.memory_space<vmem>>, vector<64x32xf32>
    %291 = vector.broadcast %45 : vector<64x1xf32> to vector<64x32xf32>
    %292 = arith.mulf %290, %291 : vector<64x32xf32>
    %c128_250 = arith.constant 128 : index
    %c96_251 = arith.constant 96 : index
    %293 = vector.load %arg11[%c128_250, %c96_251] : memref<256x288xf32, #tpu.memory_space<vmem>>, vector<64x32xf32>
    tpu.vector_store %arg11[%c128_250, %c96_251], %292 {strides = array<i32>} : memref<256x288xf32, #tpu.memory_space<vmem>>, vector<64x32xf32>,
    %c303_252 = arith.constant 303 : index
    %c0_253 = arith.constant 0 : index
    %294 = vector.load %arg10[%c303_252, %c0_253] : memref<384x32xf32, #tpu.memory_space<vmem>>, vector<64x32xf32>
    %295 = vector.broadcast %45 : vector<64x1xf32> to vector<64x32xf32>
    %296 = arith.mulf %294, %295 : vector<64x32xf32>
    %c192_254 = arith.constant 192 : index
    %c96_255 = arith.constant 96 : index
    %297 = vector.load %arg11[%c192_254, %c96_255] : memref<256x288xf32, #tpu.memory_space<vmem>>, vector<64x32xf32>
    tpu.vector_store %arg11[%c192_254, %c96_255], %296 {strides = array<i32>} : memref<256x288xf32, #tpu.memory_space<vmem>>, vector<64x32xf32>,
    %c16_256 = arith.constant 16 : index
    %c0_257 = arith.constant 0 : index
    %298 = vector.load %arg10[%c16_256, %c0_257] : memref<384x32xf32, #tpu.memory_space<vmem>>, vector<64x32xf32>
    %c0_258 = arith.constant 0 : index
    %c128_259 = arith.constant 128 : index
    %299 = vector.load %arg11[%c0_258, %c128_259] : memref<256x288xf32, #tpu.memory_space<vmem>>, vector<64x32xf32>
    tpu.vector_store %arg11[%c0_258, %c128_259], %298 {strides = array<i32>} : memref<256x288xf32, #tpu.memory_space<vmem>>, vector<64x32xf32>,
    %c112_260 = arith.constant 112 : index
    %c0_261 = arith.constant 0 : index
    %300 = vector.load %arg10[%c112_260, %c0_261] : memref<384x32xf32, #tpu.memory_space<vmem>>, vector<64x32xf32>
    %c64_262 = arith.constant 64 : index
    %c128_263 = arith.constant 128 : index
    %301 = vector.load %arg11[%c64_262, %c128_263] : memref<256x288xf32, #tpu.memory_space<vmem>>, vector<64x32xf32>
    tpu.vector_store %arg11[%c64_262, %c128_263], %300 {strides = array<i32>} : memref<256x288xf32, #tpu.memory_space<vmem>>, vector<64x32xf32>,
    %c208_264 = arith.constant 208 : index
    %c0_265 = arith.constant 0 : index
    %302 = vector.load %arg10[%c208_264, %c0_265] : memref<384x32xf32, #tpu.memory_space<vmem>>, vector<64x32xf32>
    %c128_266 = arith.constant 128 : index
    %c128_267 = arith.constant 128 : index
    %303 = vector.load %arg11[%c128_266, %c128_267] : memref<256x288xf32, #tpu.memory_space<vmem>>, vector<64x32xf32>
    tpu.vector_store %arg11[%c128_266, %c128_267], %302 {strides = array<i32>} : memref<256x288xf32, #tpu.memory_space<vmem>>, vector<64x32xf32>,
    %c304_268 = arith.constant 304 : index
    %c0_269 = arith.constant 0 : index
    %304 = vector.load %arg10[%c304_268, %c0_269] : memref<384x32xf32, #tpu.memory_space<vmem>>, vector<64x32xf32>
    %c192_270 = arith.constant 192 : index
    %c128_271 = arith.constant 128 : index
    %305 = vector.load %arg11[%c192_270, %c128_271] : memref<256x288xf32, #tpu.memory_space<vmem>>, vector<64x32xf32>
    tpu.vector_store %arg11[%c192_270, %c128_271], %304 {strides = array<i32>} : memref<256x288xf32, #tpu.memory_space<vmem>>, vector<64x32xf32>,
    %c17_272 = arith.constant 17 : index
    %c0_273 = arith.constant 0 : index
    %306 = vector.load %arg10[%c17_272, %c0_273] : memref<384x32xf32, #tpu.memory_space<vmem>>, vector<64x32xf32>
    %307 = vector.broadcast %49 : vector<64x1xf32> to vector<64x32xf32>
    %308 = arith.mulf %306, %307 : vector<64x32xf32>
    %c0_274 = arith.constant 0 : index
    %c160_275 = arith.constant 160 : index
    %309 = vector.load %arg11[%c0_274, %c160_275] : memref<256x288xf32, #tpu.memory_space<vmem>>, vector<64x32xf32>
    tpu.vector_store %arg11[%c0_274, %c160_275], %308 {strides = array<i32>} : memref<256x288xf32, #tpu.memory_space<vmem>>, vector<64x32xf32>,
    %c113_276 = arith.constant 113 : index
    %c0_277 = arith.constant 0 : index
    %310 = vector.load %arg10[%c113_276, %c0_277] : memref<384x32xf32, #tpu.memory_space<vmem>>, vector<64x32xf32>
    %311 = vector.broadcast %49 : vector<64x1xf32> to vector<64x32xf32>
    %312 = arith.mulf %310, %311 : vector<64x32xf32>
    %c64_278 = arith.constant 64 : index
    %c160_279 = arith.constant 160 : index
    %313 = vector.load %arg11[%c64_278, %c160_279] : memref<256x288xf32, #tpu.memory_space<vmem>>, vector<64x32xf32>
    tpu.vector_store %arg11[%c64_278, %c160_279], %312 {strides = array<i32>} : memref<256x288xf32, #tpu.memory_space<vmem>>, vector<64x32xf32>,
    %c209_280 = arith.constant 209 : index
    %c0_281 = arith.constant 0 : index
    %314 = vector.load %arg10[%c209_280, %c0_281] : memref<384x32xf32, #tpu.memory_space<vmem>>, vector<64x32xf32>
    %315 = vector.broadcast %49 : vector<64x1xf32> to vector<64x32xf32>
    %316 = arith.mulf %314, %315 : vector<64x32xf32>
    %c128_282 = arith.constant 128 : index
    %c160_283 = arith.constant 160 : index
    %317 = vector.load %arg11[%c128_282, %c160_283] : memref<256x288xf32, #tpu.memory_space<vmem>>, vector<64x32xf32>
    tpu.vector_store %arg11[%c128_282, %c160_283], %316 {strides = array<i32>} : memref<256x288xf32, #tpu.memory_space<vmem>>, vector<64x32xf32>,
    %c305_284 = arith.constant 305 : index
    %c0_285 = arith.constant 0 : index
    %318 = vector.load %arg10[%c305_284, %c0_285] : memref<384x32xf32, #tpu.memory_space<vmem>>, vector<64x32xf32>
    %319 = vector.broadcast %49 : vector<64x1xf32> to vector<64x32xf32>
    %320 = arith.mulf %318, %319 : vector<64x32xf32>
    %c192_286 = arith.constant 192 : index
    %c160_287 = arith.constant 160 : index
    %321 = vector.load %arg11[%c192_286, %c160_287] : memref<256x288xf32, #tpu.memory_space<vmem>>, vector<64x32xf32>
    tpu.vector_store %arg11[%c192_286, %c160_287], %320 {strides = array<i32>} : memref<256x288xf32, #tpu.memory_space<vmem>>, vector<64x32xf32>,
    %c23_288 = arith.constant 23 : index
    %c0_289 = arith.constant 0 : index
    %322 = vector.load %arg10[%c23_288, %c0_289] : memref<384x32xf32, #tpu.memory_space<vmem>>, vector<64x32xf32>
    %323 = vector.broadcast %45 : vector<64x1xf32> to vector<64x32xf32>
    %324 = arith.mulf %322, %323 : vector<64x32xf32>
    %c0_290 = arith.constant 0 : index
    %c192_291 = arith.constant 192 : index
    %325 = vector.load %arg11[%c0_290, %c192_291] : memref<256x288xf32, #tpu.memory_space<vmem>>, vector<64x32xf32>
    tpu.vector_store %arg11[%c0_290, %c192_291], %324 {strides = array<i32>} : memref<256x288xf32, #tpu.memory_space<vmem>>, vector<64x32xf32>,
    %c119_292 = arith.constant 119 : index
    %c0_293 = arith.constant 0 : index
    %326 = vector.load %arg10[%c119_292, %c0_293] : memref<384x32xf32, #tpu.memory_space<vmem>>, vector<64x32xf32>
    %327 = vector.broadcast %45 : vector<64x1xf32> to vector<64x32xf32>
    %328 = arith.mulf %326, %327 : vector<64x32xf32>
    %c64_294 = arith.constant 64 : index
    %c192_295 = arith.constant 192 : index
    %329 = vector.load %arg11[%c64_294, %c192_295] : memref<256x288xf32, #tpu.memory_space<vmem>>, vector<64x32xf32>
    tpu.vector_store %arg11[%c64_294, %c192_295], %328 {strides = array<i32>} : memref<256x288xf32, #tpu.memory_space<vmem>>, vector<64x32xf32>,
    %c215_296 = arith.constant 215 : index
    %c0_297 = arith.constant 0 : index
    %330 = vector.load %arg10[%c215_296, %c0_297] : memref<384x32xf32, #tpu.memory_space<vmem>>, vector<64x32xf32>
    %331 = vector.broadcast %45 : vector<64x1xf32> to vector<64x32xf32>
    %332 = arith.mulf %330, %331 : vector<64x32xf32>
    %c128_298 = arith.constant 128 : index
    %c192_299 = arith.constant 192 : index
    %333 = vector.load %arg11[%c128_298, %c192_299] : memref<256x288xf32, #tpu.memory_space<vmem>>, vector<64x32xf32>
    tpu.vector_store %arg11[%c128_298, %c192_299], %332 {strides = array<i32>} : memref<256x288xf32, #tpu.memory_space<vmem>>, vector<64x32xf32>,
    %c311_300 = arith.constant 311 : index
    %c0_301 = arith.constant 0 : index
    %334 = vector.load %arg10[%c311_300, %c0_301] : memref<384x32xf32, #tpu.memory_space<vmem>>, vector<64x32xf32>
    %335 = vector.broadcast %45 : vector<64x1xf32> to vector<64x32xf32>
    %336 = arith.mulf %334, %335 : vector<64x32xf32>
    %c192_302 = arith.constant 192 : index
    %c192_303 = arith.constant 192 : index
    %337 = vector.load %arg11[%c192_302, %c192_303] : memref<256x288xf32, #tpu.memory_space<vmem>>, vector<64x32xf32>
    tpu.vector_store %arg11[%c192_302, %c192_303], %336 {strides = array<i32>} : memref<256x288xf32, #tpu.memory_space<vmem>>, vector<64x32xf32>,
    %c24_304 = arith.constant 24 : index
    %c0_305 = arith.constant 0 : index
    %338 = vector.load %arg10[%c24_304, %c0_305] : memref<384x32xf32, #tpu.memory_space<vmem>>, vector<64x32xf32>
    %c0_306 = arith.constant 0 : index
    %c224_307 = arith.constant 224 : index
    %339 = vector.load %arg11[%c0_306, %c224_307] : memref<256x288xf32, #tpu.memory_space<vmem>>, vector<64x32xf32>
    tpu.vector_store %arg11[%c0_306, %c224_307], %338 {strides = array<i32>} : memref<256x288xf32, #tpu.memory_space<vmem>>, vector<64x32xf32>,
    %c120_308 = arith.constant 120 : index
    %c0_309 = arith.constant 0 : index
    %340 = vector.load %arg10[%c120_308, %c0_309] : memref<384x32xf32, #tpu.memory_space<vmem>>, vector<64x32xf32>
    %c64_310 = arith.constant 64 : index
    %c224_311 = arith.constant 224 : index
    %341 = vector.load %arg11[%c64_310, %c224_311] : memref<256x288xf32, #tpu.memory_space<vmem>>, vector<64x32xf32>
    tpu.vector_store %arg11[%c64_310, %c224_311], %340 {strides = array<i32>} : memref<256x288xf32, #tpu.memory_space<vmem>>, vector<64x32xf32>,
    %c216_312 = arith.constant 216 : index
    %c0_313 = arith.constant 0 : index
    %342 = vector.load %arg10[%c216_312, %c0_313] : memref<384x32xf32, #tpu.memory_space<vmem>>, vector<64x32xf32>
    %c128_314 = arith.constant 128 : index
    %c224_315 = arith.constant 224 : index
    %343 = vector.load %arg11[%c128_314, %c224_315] : memref<256x288xf32, #tpu.memory_space<vmem>>, vector<64x32xf32>
    tpu.vector_store %arg11[%c128_314, %c224_315], %342 {strides = array<i32>} : memref<256x288xf32, #tpu.memory_space<vmem>>, vector<64x32xf32>,
    %c312_316 = arith.constant 312 : index
    %c0_317 = arith.constant 0 : index
    %344 = vector.load %arg10[%c312_316, %c0_317] : memref<384x32xf32, #tpu.memory_space<vmem>>, vector<64x32xf32>
    %c192_318 = arith.constant 192 : index
    %c224_319 = arith.constant 224 : index
    %345 = vector.load %arg11[%c192_318, %c224_319] : memref<256x288xf32, #tpu.memory_space<vmem>>, vector<64x32xf32>
    tpu.vector_store %arg11[%c192_318, %c224_319], %344 {strides = array<i32>} : memref<256x288xf32, #tpu.memory_space<vmem>>, vector<64x32xf32>,
    %c25_320 = arith.constant 25 : index
    %c0_321 = arith.constant 0 : index
    %346 = vector.load %arg10[%c25_320, %c0_321] : memref<384x32xf32, #tpu.memory_space<vmem>>, vector<64x32xf32>
    %347 = vector.broadcast %49 : vector<64x1xf32> to vector<64x32xf32>
    %348 = arith.mulf %346, %347 : vector<64x32xf32>
    %c0_322 = arith.constant 0 : index
    %c256_323 = arith.constant 256 : index
    %349 = vector.load %arg11[%c0_322, %c256_323] : memref<256x288xf32, #tpu.memory_space<vmem>>, vector<64x32xf32>
    tpu.vector_store %arg11[%c0_322, %c256_323], %348 {strides = array<i32>} : memref<256x288xf32, #tpu.memory_space<vmem>>, vector<64x32xf32>,
    %c121_324 = arith.constant 121 : index
    %c0_325 = arith.constant 0 : index
    %350 = vector.load %arg10[%c121_324, %c0_325] : memref<384x32xf32, #tpu.memory_space<vmem>>, vector<64x32xf32>
    %351 = vector.broadcast %49 : vector<64x1xf32> to vector<64x32xf32>
    %352 = arith.mulf %350, %351 : vector<64x32xf32>
    %c64_326 = arith.constant 64 : index
    %c256_327 = arith.constant 256 : index
    %353 = vector.load %arg11[%c64_326, %c256_327] : memref<256x288xf32, #tpu.memory_space<vmem>>, vector<64x32xf32>
    tpu.vector_store %arg11[%c64_326, %c256_327], %352 {strides = array<i32>} : memref<256x288xf32, #tpu.memory_space<vmem>>, vector<64x32xf32>,
    %c217_328 = arith.constant 217 : index
    %c0_329 = arith.constant 0 : index
    %354 = vector.load %arg10[%c217_328, %c0_329] : memref<384x32xf32, #tpu.memory_space<vmem>>, vector<64x32xf32>
    %355 = vector.broadcast %49 : vector<64x1xf32> to vector<64x32xf32>
    %356 = arith.mulf %354, %355 : vector<64x32xf32>
    %c128_330 = arith.constant 128 : index
    %c256_331 = arith.constant 256 : index
    %357 = vector.load %arg11[%c128_330, %c256_331] : memref<256x288xf32, #tpu.memory_space<vmem>>, vector<64x32xf32>
    tpu.vector_store %arg11[%c128_330, %c256_331], %356 {strides = array<i32>} : memref<256x288xf32, #tpu.memory_space<vmem>>, vector<64x32xf32>,
    %c313_332 = arith.constant 313 : index
    %c0_333 = arith.constant 0 : index
    %358 = vector.load %arg10[%c313_332, %c0_333] : memref<384x32xf32, #tpu.memory_space<vmem>>, vector<64x32xf32>
    %359 = vector.broadcast %49 : vector<64x1xf32> to vector<64x32xf32>
    %360 = arith.mulf %358, %359 : vector<64x32xf32>
    %c192_334 = arith.constant 192 : index
    %c256_335 = arith.constant 256 : index
    %361 = vector.load %arg11[%c192_334, %c256_335] : memref<256x288xf32, #tpu.memory_space<vmem>>, vector<64x32xf32>
    tpu.vector_store %arg11[%c192_334, %c256_335], %360 {strides = array<i32>} : memref<256x288xf32, #tpu.memory_space<vmem>>, vector<64x32xf32>,
    %c0_336 = arith.constant 0 : index
    %c0_337 = arith.constant 0 : index
    %362 = vector.load %arg11[%c0_336, %c0_337] : memref<256x288xf32, #tpu.memory_space<vmem>>, vector<256x288xf32>
    %c1_338 = arith.constant 1 : index
    %c0_339 = arith.constant 0 : index
    %c0_340 = arith.constant 0 : index
    %363 = vector.load %arg5[%c1_338, %c0_339, %c0_340] : memref<2x288x32xf32, #tpu.memory_space<vmem>>, vector<1x288x32xf32>
    %364 = vector.shape_cast %363 : vector<1x288x32xf32> to vector<288x32xf32>
    %cst_341 = arith.constant dense<0.000000e+00> : vector<256x32xf32>
    %365 = tpu.matmul %362, %364, %cst_341 {dimension_numbers = #tpu.dot_dimension_numbers<[1], [0], [0], [1], [0, 0, 1, 1], [], []>} : vector<256x288xf32>, vector<288x32xf32>, vector<256x32xf32> -> vector<256x32xf32>
    %c1_342 = arith.constant 1 : index
    %c0_343 = arith.constant 0 : index
    %c0_344 = arith.constant 0 : index
    %366 = vector.load %arg6[%c1_342, %c0_343, %c0_344] : memref<2x1x32xf32, #tpu.memory_space<vmem>>, vector<1x1x32xf32>
    %367 = vector.shape_cast %366 : vector<1x1x32xf32> to vector<1x32xf32>
    %368 = vector.broadcast %367 : vector<1x32xf32> to vector<256x32xf32>
    %369 = arith.addf %365, %368 : vector<256x32xf32>
    %c0_345 = arith.constant 0 : index
    %c1_346 = arith.constant 1 : index
    %c0_347 = arith.constant 0 : index
    %c0_348 = arith.constant 0 : index
    %370 = vector.load %arg2[%c0_345, %c1_346, %c0_347, %c0_348] : memref<4x2x2x32xf32, #tpu.memory_space<vmem>>, vector<1x1x1x32xf32>
    %371 = vector.shape_cast %370 : vector<1x1x1x32xf32> to vector<1x32xf32>
    %c0_349 = arith.constant 0 : index
    %c1_350 = arith.constant 1 : index
    %c1_351 = arith.constant 1 : index
    %c0_352 = arith.constant 0 : index
    %372 = vector.load %arg2[%c0_349, %c1_350, %c1_351, %c0_352] : memref<4x2x2x32xf32, #tpu.memory_space<vmem>>, vector<1x1x1x32xf32>
    %373 = vector.shape_cast %372 : vector<1x1x1x32xf32> to vector<1x32xf32>
    %374 = vector.extract_strided_slice %369 {offsets = [0, 0], sizes = [64, 32], strides = [1, 1]} : vector<256x32xf32> to vector<64x32xf32>
    %cst_353 = arith.constant 1.000000e+00 : f32
    %375 = vector.broadcast %cst_353 : f32 to vector<1x32xf32>
    %376 = arith.addf %375, %371 : vector<1x32xf32>
    %377 = vector.broadcast %376 : vector<1x32xf32> to vector<64x32xf32>
    %378 = arith.mulf %374, %377 : vector<64x32xf32>
    %379 = vector.broadcast %373 : vector<1x32xf32> to vector<64x32xf32>
    %380 = arith.addf %378, %379 : vector<64x32xf32>
    %cst_354 = arith.constant 0.000000e+00 : f32
    %381 = vector.broadcast %cst_354 : f32 to vector<64x32xf32>
    %382 = arith.maximumf %380, %381 : vector<64x32xf32>
    %c16_355 = arith.constant 16 : index
    %c0_356 = arith.constant 0 : index
    %383 = vector.load %arg10[%c16_355, %c0_356] : memref<384x32xf32, #tpu.memory_space<vmem>>, vector<64x32xf32>
    %384 = arith.addf %382, %383 : vector<64x32xf32>
    %c16_357 = arith.constant 16 : index
    %c0_358 = arith.constant 0 : index
    %385 = vector.load %arg10[%c16_357, %c0_358] : memref<384x32xf32, #tpu.memory_space<vmem>>, vector<64x32xf32>
    tpu.vector_store %arg10[%c16_357, %c0_358], %384 {strides = array<i32>} : memref<384x32xf32, #tpu.memory_space<vmem>>, vector<64x32xf32>,
    %c1_359 = arith.constant 1 : index
    %c1_360 = arith.constant 1 : index
    %c0_361 = arith.constant 0 : index
    %c0_362 = arith.constant 0 : index
    %386 = vector.load %arg2[%c1_359, %c1_360, %c0_361, %c0_362] : memref<4x2x2x32xf32, #tpu.memory_space<vmem>>, vector<1x1x1x32xf32>
    %387 = vector.shape_cast %386 : vector<1x1x1x32xf32> to vector<1x32xf32>
    %c1_363 = arith.constant 1 : index
    %c1_364 = arith.constant 1 : index
    %c1_365 = arith.constant 1 : index
    %c0_366 = arith.constant 0 : index
    %388 = vector.load %arg2[%c1_363, %c1_364, %c1_365, %c0_366] : memref<4x2x2x32xf32, #tpu.memory_space<vmem>>, vector<1x1x1x32xf32>
    %389 = vector.shape_cast %388 : vector<1x1x1x32xf32> to vector<1x32xf32>
    %390 = vector.extract_strided_slice %369 {offsets = [64, 0], sizes = [64, 32], strides = [1, 1]} : vector<256x32xf32> to vector<64x32xf32>
    %cst_367 = arith.constant 1.000000e+00 : f32
    %391 = vector.broadcast %cst_367 : f32 to vector<1x32xf32>
    %392 = arith.addf %391, %387 : vector<1x32xf32>
    %393 = vector.broadcast %392 : vector<1x32xf32> to vector<64x32xf32>
    %394 = arith.mulf %390, %393 : vector<64x32xf32>
    %395 = vector.broadcast %389 : vector<1x32xf32> to vector<64x32xf32>
    %396 = arith.addf %394, %395 : vector<64x32xf32>
    %cst_368 = arith.constant 0.000000e+00 : f32
    %397 = vector.broadcast %cst_368 : f32 to vector<64x32xf32>
    %398 = arith.maximumf %396, %397 : vector<64x32xf32>
    %c112_369 = arith.constant 112 : index
    %c0_370 = arith.constant 0 : index
    %399 = vector.load %arg10[%c112_369, %c0_370] : memref<384x32xf32, #tpu.memory_space<vmem>>, vector<64x32xf32>
    %400 = arith.addf %398, %399 : vector<64x32xf32>
    %c112_371 = arith.constant 112 : index
    %c0_372 = arith.constant 0 : index
    %401 = vector.load %arg10[%c112_371, %c0_372] : memref<384x32xf32, #tpu.memory_space<vmem>>, vector<64x32xf32>
    tpu.vector_store %arg10[%c112_371, %c0_372], %400 {strides = array<i32>} : memref<384x32xf32, #tpu.memory_space<vmem>>, vector<64x32xf32>,
    %c2_373 = arith.constant 2 : index
    %c1_374 = arith.constant 1 : index
    %c0_375 = arith.constant 0 : index
    %c0_376 = arith.constant 0 : index
    %402 = vector.load %arg2[%c2_373, %c1_374, %c0_375, %c0_376] : memref<4x2x2x32xf32, #tpu.memory_space<vmem>>, vector<1x1x1x32xf32>
    %403 = vector.shape_cast %402 : vector<1x1x1x32xf32> to vector<1x32xf32>
    %c2_377 = arith.constant 2 : index
    %c1_378 = arith.constant 1 : index
    %c1_379 = arith.constant 1 : index
    %c0_380 = arith.constant 0 : index
    %404 = vector.load %arg2[%c2_377, %c1_378, %c1_379, %c0_380] : memref<4x2x2x32xf32, #tpu.memory_space<vmem>>, vector<1x1x1x32xf32>
    %405 = vector.shape_cast %404 : vector<1x1x1x32xf32> to vector<1x32xf32>
    %406 = vector.extract_strided_slice %369 {offsets = [128, 0], sizes = [64, 32], strides = [1, 1]} : vector<256x32xf32> to vector<64x32xf32>
    %cst_381 = arith.constant 1.000000e+00 : f32
    %407 = vector.broadcast %cst_381 : f32 to vector<1x32xf32>
    %408 = arith.addf %407, %403 : vector<1x32xf32>
    %409 = vector.broadcast %408 : vector<1x32xf32> to vector<64x32xf32>
    %410 = arith.mulf %406, %409 : vector<64x32xf32>
    %411 = vector.broadcast %405 : vector<1x32xf32> to vector<64x32xf32>
    %412 = arith.addf %410, %411 : vector<64x32xf32>
    %cst_382 = arith.constant 0.000000e+00 : f32
    %413 = vector.broadcast %cst_382 : f32 to vector<64x32xf32>
    %414 = arith.maximumf %412, %413 : vector<64x32xf32>
    %c208_383 = arith.constant 208 : index
    %c0_384 = arith.constant 0 : index
    %415 = vector.load %arg10[%c208_383, %c0_384] : memref<384x32xf32, #tpu.memory_space<vmem>>, vector<64x32xf32>
    %416 = arith.addf %414, %415 : vector<64x32xf32>
    %c208_385 = arith.constant 208 : index
    %c0_386 = arith.constant 0 : index
    %417 = vector.load %arg10[%c208_385, %c0_386] : memref<384x32xf32, #tpu.memory_space<vmem>>, vector<64x32xf32>
    tpu.vector_store %arg10[%c208_385, %c0_386], %416 {strides = array<i32>} : memref<384x32xf32, #tpu.memory_space<vmem>>, vector<64x32xf32>,
    %c3_387 = arith.constant 3 : index
    %c1_388 = arith.constant 1 : index
    %c0_389 = arith.constant 0 : index
    %c0_390 = arith.constant 0 : index
    %418 = vector.load %arg2[%c3_387, %c1_388, %c0_389, %c0_390] : memref<4x2x2x32xf32, #tpu.memory_space<vmem>>, vector<1x1x1x32xf32>
    %419 = vector.shape_cast %418 : vector<1x1x1x32xf32> to vector<1x32xf32>
    %c3_391 = arith.constant 3 : index
    %c1_392 = arith.constant 1 : index
    %c1_393 = arith.constant 1 : index
    %c0_394 = arith.constant 0 : index
    %420 = vector.load %arg2[%c3_391, %c1_392, %c1_393, %c0_394] : memref<4x2x2x32xf32, #tpu.memory_space<vmem>>, vector<1x1x1x32xf32>
    %421 = vector.shape_cast %420 : vector<1x1x1x32xf32> to vector<1x32xf32>
    %422 = vector.extract_strided_slice %369 {offsets = [192, 0], sizes = [64, 32], strides = [1, 1]} : vector<256x32xf32> to vector<64x32xf32>
    %cst_395 = arith.constant 1.000000e+00 : f32
    %423 = vector.broadcast %cst_395 : f32 to vector<1x32xf32>
    %424 = arith.addf %423, %419 : vector<1x32xf32>
    %425 = vector.broadcast %424 : vector<1x32xf32> to vector<64x32xf32>
    %426 = arith.mulf %422, %425 : vector<64x32xf32>
    %427 = vector.broadcast %421 : vector<1x32xf32> to vector<64x32xf32>
    %428 = arith.addf %426, %427 : vector<64x32xf32>
    %cst_396 = arith.constant 0.000000e+00 : f32
    %429 = vector.broadcast %cst_396 : f32 to vector<64x32xf32>
    %430 = arith.maximumf %428, %429 : vector<64x32xf32>
    %c304_397 = arith.constant 304 : index
    %c0_398 = arith.constant 0 : index
    %431 = vector.load %arg10[%c304_397, %c0_398] : memref<384x32xf32, #tpu.memory_space<vmem>>, vector<64x32xf32>
    %432 = arith.addf %430, %431 : vector<64x32xf32>
    %c304_399 = arith.constant 304 : index
    %c0_400 = arith.constant 0 : index
    %433 = vector.load %arg10[%c304_399, %c0_400] : memref<384x32xf32, #tpu.memory_space<vmem>>, vector<64x32xf32>
    tpu.vector_store %arg10[%c304_399, %c0_400], %432 {strides = array<i32>} : memref<384x32xf32, #tpu.memory_space<vmem>>, vector<64x32xf32>,
    %c0_401 = arith.constant 0 : index
    %c0_402 = arith.constant 0 : index
    %434 = memref.load %arg8[%c0_401, %c0_402] : memref<1x1xf32, #tpu.memory_space<smem>>
    %c16_403 = arith.constant 16 : index
    %c0_404 = arith.constant 0 : index
    %435 = vector.load %arg10[%c16_403, %c0_404] : memref<384x32xf32, #tpu.memory_space<vmem>>, vector<64x32xf32>
    %c0_405 = arith.constant 0 : index
    %c0_406 = arith.constant 0 : index
    %436 = vector.load %arg7[%c0_405, %c0_406] : memref<1x32xf32, #tpu.memory_space<vmem>>, vector<1x32xf32>
    %437 = vector.broadcast %436 : vector<1x32xf32> to vector<64x32xf32>
    %438 = arith.mulf %435, %437 : vector<64x32xf32>
    %cst_407 = arith.constant dense<0.000000e+00> : vector<64xf32>
    %439 = vector.multi_reduction <add>, %438, %cst_407 [1] : vector<64x32xf32> to vector<64xf32>
    %440 = vector.shape_cast %439 : vector<64xf32> to vector<1x64xf32>
    %441 = vector.broadcast %434 : f32 to vector<1x64xf32>
    %442 = arith.addf %440, %441 : vector<1x64xf32>
    %c0_408 = arith.constant 0 : index
    %c0_409 = arith.constant 0 : index
    %c0_410 = arith.constant 0 : index
    %443 = vector.load %arg9[%c0_408, %c0_409, %c0_410] : memref<1x4x64xf32, #tpu.memory_space<vmem>>, vector<1x1x64xf32>
    %444 = vector.shape_cast %443 : vector<1x1x64xf32> to vector<1x64xf32>
    %445 = vector.shape_cast %442 : vector<1x64xf32> to vector<1x1x64xf32>
    tpu.vector_store %arg9[%c0_408, %c0_409, %c0_410], %445 {strides = array<i32>} : memref<1x4x64xf32, #tpu.memory_space<vmem>>, vector<1x1x64xf32>,
    %c112_411 = arith.constant 112 : index
    %c0_412 = arith.constant 0 : index
    %446 = vector.load %arg10[%c112_411, %c0_412] : memref<384x32xf32, #tpu.memory_space<vmem>>, vector<64x32xf32>
    %c0_413 = arith.constant 0 : index
    %c0_414 = arith.constant 0 : index
    %447 = vector.load %arg7[%c0_413, %c0_414] : memref<1x32xf32, #tpu.memory_space<vmem>>, vector<1x32xf32>
    %448 = vector.broadcast %447 : vector<1x32xf32> to vector<64x32xf32>
    %449 = arith.mulf %446, %448 : vector<64x32xf32>
    %cst_415 = arith.constant dense<0.000000e+00> : vector<64xf32>
    %450 = vector.multi_reduction <add>, %449, %cst_415 [1] : vector<64x32xf32> to vector<64xf32>
    %451 = vector.shape_cast %450 : vector<64xf32> to vector<1x64xf32>
    %452 = vector.broadcast %434 : f32 to vector<1x64xf32>
    %453 = arith.addf %451, %452 : vector<1x64xf32>
    %c0_416 = arith.constant 0 : index
    %c1_417 = arith.constant 1 : index
    %c0_418 = arith.constant 0 : index
    %454 = vector.load %arg9[%c0_416, %c1_417, %c0_418] : memref<1x4x64xf32, #tpu.memory_space<vmem>>, vector<1x1x64xf32>
    %455 = vector.shape_cast %454 : vector<1x1x64xf32> to vector<1x64xf32>
    %456 = vector.shape_cast %453 : vector<1x64xf32> to vector<1x1x64xf32>
    tpu.vector_store %arg9[%c0_416, %c1_417, %c0_418], %456 {strides = array<i32>} : memref<1x4x64xf32, #tpu.memory_space<vmem>>, vector<1x1x64xf32>,
    %c208_419 = arith.constant 208 : index
    %c0_420 = arith.constant 0 : index
    %457 = vector.load %arg10[%c208_419, %c0_420] : memref<384x32xf32, #tpu.memory_space<vmem>>, vector<64x32xf32>
    %c0_421 = arith.constant 0 : index
    %c0_422 = arith.constant 0 : index
    %458 = vector.load %arg7[%c0_421, %c0_422] : memref<1x32xf32, #tpu.memory_space<vmem>>, vector<1x32xf32>
    %459 = vector.broadcast %458 : vector<1x32xf32> to vector<64x32xf32>
    %460 = arith.mulf %457, %459 : vector<64x32xf32>
    %cst_423 = arith.constant dense<0.000000e+00> : vector<64xf32>
    %461 = vector.multi_reduction <add>, %460, %cst_423 [1] : vector<64x32xf32> to vector<64xf32>
    %462 = vector.shape_cast %461 : vector<64xf32> to vector<1x64xf32>
    %463 = vector.broadcast %434 : f32 to vector<1x64xf32>
    %464 = arith.addf %462, %463 : vector<1x64xf32>
    %c0_424 = arith.constant 0 : index
    %c2_425 = arith.constant 2 : index
    %c0_426 = arith.constant 0 : index
    %465 = vector.load %arg9[%c0_424, %c2_425, %c0_426] : memref<1x4x64xf32, #tpu.memory_space<vmem>>, vector<1x1x64xf32>
    %466 = vector.shape_cast %465 : vector<1x1x64xf32> to vector<1x64xf32>
    %467 = vector.shape_cast %464 : vector<1x64xf32> to vector<1x1x64xf32>
    tpu.vector_store %arg9[%c0_424, %c2_425, %c0_426], %467 {strides = array<i32>} : memref<1x4x64xf32, #tpu.memory_space<vmem>>, vector<1x1x64xf32>,
    %c304_427 = arith.constant 304 : index
    %c0_428 = arith.constant 0 : index
    %468 = vector.load %arg10[%c304_427, %c0_428] : memref<384x32xf32, #tpu.memory_space<vmem>>, vector<64x32xf32>
    %c0_429 = arith.constant 0 : index
    %c0_430 = arith.constant 0 : index
    %469 = vector.load %arg7[%c0_429, %c0_430] : memref<1x32xf32, #tpu.memory_space<vmem>>, vector<1x32xf32>
    %470 = vector.broadcast %469 : vector<1x32xf32> to vector<64x32xf32>
    %471 = arith.mulf %468, %470 : vector<64x32xf32>
    %cst_431 = arith.constant dense<0.000000e+00> : vector<64xf32>
    %472 = vector.multi_reduction <add>, %471, %cst_431 [1] : vector<64x32xf32> to vector<64xf32>
    %473 = vector.shape_cast %472 : vector<64xf32> to vector<1x64xf32>
    %474 = vector.broadcast %434 : f32 to vector<1x64xf32>
    %475 = arith.addf %473, %474 : vector<1x64xf32>
    %c0_432 = arith.constant 0 : index
    %c3_433 = arith.constant 3 : index
    %c0_434 = arith.constant 0 : index
    %476 = vector.load %arg9[%c0_432, %c3_433, %c0_434] : memref<1x4x64xf32, #tpu.memory_space<vmem>>, vector<1x1x64xf32>
    %477 = vector.shape_cast %476 : vector<1x1x64xf32> to vector<1x64xf32>
    %478 = vector.shape_cast %475 : vector<1x64xf32> to vector<1x1x64xf32>
    tpu.vector_store %arg9[%c0_432, %c3_433, %c0_434], %478 {strides = array<i32>} : memref<1x4x64xf32, #tpu.memory_space<vmem>>, vector<1x1x64xf32>,
    return
  }
  func.func @transform_0(%arg0: i32) -> (i32, i32) {
    %c0_i32 = arith.constant 0 : i32
    %c0_i32_0 = arith.constant 0 : i32
    return %arg0, %c0_i32 : i32, i32
  }
  func.func @transform_1(%arg0: i32) -> (i32, i32, i32, i32) {
    %c0_i32 = arith.constant 0 : i32
    %c0_i32_0 = arith.constant 0 : i32
    %c0_i32_1 = arith.constant 0 : i32
    %c0_i32_2 = arith.constant 0 : i32
    return %arg0, %c0_i32, %c0_i32_0, %c0_i32_1 : i32, i32, i32, i32
  }
  func.func @transform_2(%arg0: i32) -> (i32, i32) {
    %c0_i32 = arith.constant 0 : i32
    %c0_i32_0 = arith.constant 0 : i32
    %c0_i32_1 = arith.constant 0 : i32
    return %c0_i32, %c0_i32_0 : i32, i32
  }
  func.func @transform_3(%arg0: i32) -> (i32, i32) {
    %c0_i32 = arith.constant 0 : i32
    %c0_i32_0 = arith.constant 0 : i32
    %c0_i32_1 = arith.constant 0 : i32
    return %c0_i32, %c0_i32_0 : i32, i32
  }
  func.func @transform_4(%arg0: i32) -> (i32, i32, i32) {
    %c0_i32 = arith.constant 0 : i32
    %c0_i32_0 = arith.constant 0 : i32
    %c0_i32_1 = arith.constant 0 : i32
    %c0_i32_2 = arith.constant 0 : i32
    return %c0_i32, %c0_i32_0, %c0_i32_1 : i32, i32, i32
  }
  func.func @transform_5(%arg0: i32) -> (i32, i32, i32) {
    %c0_i32 = arith.constant 0 : i32
    %c0_i32_0 = arith.constant 0 : i32
    %c0_i32_1 = arith.constant 0 : i32
    %c0_i32_2 = arith.constant 0 : i32
    return %c0_i32, %c0_i32_0, %c0_i32_1 : i32, i32, i32
  }
  func.func @transform_6(%arg0: i32) -> (i32, i32) {
    %c0_i32 = arith.constant 0 : i32
    %c0_i32_0 = arith.constant 0 : i32
    %c0_i32_1 = arith.constant 0 : i32
    return %c0_i32, %c0_i32_0 : i32, i32
  }
  func.func @transform_7(%arg0: i32) -> (i32, i32) {
    %c0_i32 = arith.constant 0 : i32
    %c0_i32_0 = arith.constant 0 : i32
    %c0_i32_1 = arith.constant 0 : i32
    return %c0_i32, %c0_i32_0 : i32, i32
  }
  func.func @transform_8(%arg0: i32) -> (i32, i32, i32) {
    %c0_i32 = arith.constant 0 : i32
    %c0_i32_0 = arith.constant 0 : i32
    %c0_i32_1 = arith.constant 0 : i32
    return %arg0, %c0_i32, %c0_i32_0 : i32, i32, i32
  }
}

</mosaic_0001>

<bundles_post_ra>
// kernel: _lambda_.1
= control target key start
LH: loop header
LB: loop body
LE: loop exit
PB: predicated region body
PF: predicated region fallthrough
CT: control target
= control target key end

     0   :  { %s10738_s0 = inlined_call_operand.vmem [shape: f32[512,32], index: 0, kind: input, shape index: {}]   ;;  %s10739_s1 = inlined_call_operand.vmem [shape: f32[8,2,2,32], index: 1, kind: input, shape index: {}]   ;;  %s10740_s2 = inlined_call_operand.vmem [shape: f32[32,32], index: 2, kind: input, shape index: {}]   ;;  %s10741_s3 = inlined_call_operand.vmem [shape: f32[1,32], index: 3, kind: input, shape index: {}]   ;;  %s10742_s4 = inlined_call_operand.vmem [shape: f32[2,288,32], index: 4, kind: input, shape index: {}]   ;;  %s10743_s5 = inlined_call_operand.vmem [shape: f32[2,1,32], index: 5, kind: input, shape index: {}]   ;;  %s10744_s6 = inlined_call_operand.vmem [shape: f32[1,32], index: 6, kind: input, shape index: {}]   ;;  %s10745_s7 = inlined_call_operand.<no memory space> [shape: f32[1,1], index: 7, kind: input, shape index: {}]   ;;  %s10746_s8 = inlined_call_operand.hbm [shape: f32[2,4,64], index: 8, kind: output, shape index: {}]  }
   0x1   :  { %13 = sst [smem:[#allocation4]] %s10745_s7 }
   0x2   :  { %14 = vsyncpa [#allocation6], 0 }
   0x3   :  { %16 = vsyncpa [#allocation6 + $0x1], 0  ;;  %s7135_s29 = smov 0   ;;  %s7137_s30 = smov 0  }
   0x4   :  { %s7139_s9 = smov 0   ;;  %s7141_s10 = smov 0  }
   0x5 LB: > { %s7156_s7 = sadd.s32 4294967295, %s7079_s10   ;;  %s6376_s11 = sadd.s32 4294967294, %s7079_s10   ;;  %s7079_s10 = sphi %s7141_s10, %s10787_s10   ;;  %s7075_s9 = sphi %s7139_s9, %s10786_s9   ;;  %s7071_s30 = sphi %s7137_s30, %s10785_s30   ;;  %s7067_s29 = sphi %s7135_s29, %s10784_s29  }
   0x6   : > { %s7160_s12 = sadd.s32 1, %s7079_s10   ;;  %s207_s13 = sadd.s32 1, %s7075_s9 }
   0x7   : > { %s204_s14 = ssub.s32 %s7079_s10, %s7160_s12  ;;  %p217_p0 = scmp.ne.s32.totalorder %s7075_s9, %s7071_s30 }
   0x8   : > { %p205_p1 = scmp.eq.s32.totalorder %s204_s14, 0  ;;  %p218_p2 = scmp.eq.s32.totalorder %s7156_s7, 1 }
   0x9   : > { %p223_p3 = scmp.ne.s32.totalorder %s7071_s30, %s7067_s29  ;;  %p224_p4 = scmp.eq.s32.totalorder %s6376_s11, 1 }
   0xa   : > { %s7171_s15 = scalar_select %p205_p1, %s7075_s9, %s207_s13  }
   0xb   : > { %p7173_p5 = por %p218_p2, %p217_p0  ;;  %p7177_p6 = por %p224_p4, %p223_p3 }
   0xc   : > { %p6379_p7 = scmp.ge.s32.totalorder %s7079_s10, 1  ;;  %p279_p8 = scmp.lt.s32.totalorder %s7079_s10, 3 }
   0xe   : > { %p280_p9 = pnand %p6379_p7, %p279_p8 }
  0x10   : > { %283 = sbr.rel (%p280_p9) target bundleno = 1534 (0x5fe), region = 52 }
  0x17   : > { %v364_v0 = vld [vmem:[%s10740_s2] sm:$0xff]  ;;  %v365_v1 = vld [vmem:[%s10740_s2 + $0x8] sm:$0xff]  ;;  %v366_v2 = vld [vmem:[%s10740_s2 + $0x10] sm:$0xff]  ;;  %s6381_s24 = sshll.u32 %s7156_s7, 5  ;;  %vm375_vm0 = vcmask 261120   ;;  %v7081_v28 = vmov 0.0   ;;  %v10747_v57 = vlaneseq }
  0x18   : > { %v6845_v3 = vpack.c.bf16 %v365_v1, %v364_v0  ;;  %v367_v4 = vld [vmem:[%s10740_s2 + $0x18] sm:$0xff]  ;;  %p320_p10 = scmp.lt.s32.totalorder %s6381_s24, 63  ;;  %730 = vst.msk [vmem:[#allocation2 + $0x8] sm:$0xff] %vm375_vm0, %v7081_v28  ;;  %729 = vst.msk [vmem:[#allocation2] sm:$0xff] %vm375_vm0, %v7081_v28  ;;  %s7082_s14 = smov 32   ;;  %v2597_v44 = vld [vmem:[%s10742_s4 + $0x100] sm:$0xff] }
  0x19   : > { %v6849_v5 = vpack.c.bf16 %v367_v4, %v366_v2  ;;  %739 = vst.msk [vmem:[#allocation2 + $0x50] sm:$0xff] %vm375_vm0, %v7081_v28  ;;  %740 = vst.msk [vmem:[#allocation2 + $0x58] sm:$0xff] %vm375_vm0, %v7081_v28  ;;  %s7083_s18 = smov 96   ;;  %v2598_v45 = vld [vmem:[%s10742_s4 + $0x108] sm:$0xff]  ;;  %v2599_v47 = vld [vmem:[%s10742_s4 + $0x110] sm:$0xff]  ;;  %v10748_v52 = vmov 0.0|0.0  }
  0x1a   : > { %6846 = vmatprep.subr.bf16.mxu0 %v6845_v3  ;;  %s10789_s24 = smov (!%p320_p10, %s6381_s24), 63  ;;  %741 = vst.msk [vmem:[#allocation2 + $0x60] sm:$0xff] %vm375_vm0, %v7081_v28  ;;  %742 = vst.msk [vmem:[#allocation2 + $0x68] sm:$0xff] %vm375_vm0, %v7081_v28  ;;  %v6901_v46 = vpack.c.bf16 %v2598_v45, %v2597_v44  ;;  %v2600_v48 = vld [vmem:[%s10742_s4 + $0x118] sm:$0xff]  ;;  %v2565_v50 = vld [vmem:[%s10742_s4] sm:$0xff]  ;;  %6853 = vmatprep.subr.bf16.mxu1 %v10748_v52  ;;  %v7337_v61 = vshrl.u32 %v10747_v57, 7 }
  0x1b   : > { %6848 = vmatpush3.bf16.msra.mxu0 %v6845_v3  ;;  %s6382_s27 = sshll.u32 %s10789_s24, 3  ;;  %751 = vst.msk [vmem:[#allocation2 + $0xb0] sm:$0xff] %vm375_vm0, %v7081_v28  ;;  %752 = vst.msk [vmem:[#allocation2 + $0xb8] sm:$0xff] %vm375_vm0, %v7081_v28  ;;  %v6905_v49 = vpack.c.bf16 %v2600_v48, %v2599_v47  ;;  %v2566_v51 = vld [vmem:[%s10742_s4 + $0x8] sm:$0xff]  ;;  %v2567_v54 = vld [vmem:[%s10742_s4 + $0x10] sm:$0xff]  ;;  %vm1066_vm3 = vcmask 523520  }
  0x1c   : > { %6850 = vmatprep.subr.bf16.mxu0 %v6849_v5  ;;  %s7199_s13 = scalar_lea.vmem %s10738_s0, %s6382_s27  ;;  %753 = vst.msk [vmem:[#allocation2 + $0xc0] sm:$0xff] %vm375_vm0, %v7081_v28  ;;  %754 = vst.msk [vmem:[#allocation2 + $0xc8] sm:$0xff] %vm375_vm0, %v7081_v28  ;;  %v6854_v53 = vpack.c.bf16 %v2566_v51, %v2565_v50  ;;  %v2568_v55 = vld [vmem:[%s10742_s4 + $0x18] sm:$0xff]  ;;  %v2569_v58 = vld [vmem:[%s10742_s4 + $0x20] sm:$0xff]  ;;  %v7347_v0 = vadd.s32 56, %v7337_v61  ;;  %s7085_s21 = smov 64  }
  0x1d   : > { %v332_v6 = vld [vmem:[%s7199_s13] sm:$0xff]  ;;  %v333_v7 = vld [vmem:[%s7199_s13 + $0x8] sm:$0xff]  ;;  %v334_v8 = vld [vmem:[%s7199_s13 + $0x10] sm:$0xff]  ;;  %763 = vst.msk [vmem:[#allocation2 + $0x110] sm:$0xff] %vm375_vm0, %v7081_v28  ;;  %v6857_v56 = vpack.c.bf16 %v2568_v55, %v2567_v54  ;;  %s6383_s22 = sshll.u32 %s7156_s7, 2  ;;  %s5856_s28 = sld [smem:[#allocation4]] }
  0x1e   : > { %6685 = vmatprep.mubr.msk.f32.mxu0 %vm375_vm0, %v332_v6  ;;  %v335_v9 = vld [vmem:[%s7199_s13 + $0x18] sm:$0xff]  ;;  %v336_v10 = vld [vmem:[%s7199_s13 + $0x20] sm:$0xff]  ;;  %v337_v11 = vld [vmem:[%s7199_s13 + $0x28] sm:$0xff]  ;;  %764 = vst.msk [vmem:[#allocation2 + $0x118] sm:$0xff] %vm375_vm0, %v7081_v28  ;;  %6855 = vmatpush1.bf16.msra.mxu1 %v6854_v53  ;;  %v839_v4 = vand.u32 7, %v7347_v0  ;;  %p326_p11 = scmp.lt.s32.totalorder %s6383_s22, 7 }
  0x1f   : > { %6852 = vmatpush3.bf16.msra.mxu0 %v6849_v5  ;;  %v338_v12 = vld [vmem:[%s7199_s13 + $0x30] sm:$0xff]  ;;  %v339_v13 = vld [vmem:[%s7199_s13 + $0x38] sm:$0xff]  ;;  %v340_v14 = vld [vmem:[%s7199_s13 + $0x40] sm:$0xff]  ;;  %765 = vst.msk [vmem:[#allocation2 + $0x120] sm:$0xff] %vm375_vm0, %v7081_v28  ;;  %6856 = vmatprep.subr.bf16.mxu1 %v10748_v52  ;;  %s316_s11 = sand.u32 1, %s7071_s30  }
  0x20   : > { %v341_v15 = vld [vmem:[%s7199_s13 + $0x48] sm:$0xff]  ;;  %v342_v16 = vld [vmem:[%s7199_s13 + $0x50] sm:$0xff]  ;;  %v343_v17 = vld [vmem:[%s7199_s13 + $0x58] sm:$0xff]  ;;  %766 = vst.msk [vmem:[#allocation2 + $0x128] sm:$0xff] %vm375_vm0, %v7081_v28  ;;  %6902 = vmatprep.subr.bf16.mxu0 %v6901_v46  ;;  %vm913_vm1 = vcmp.lt.s32.totalorder %v839_v4, 7  ;;  %s10791_s22 = smov (!%p326_p11, %s6383_s22), 7 }
  0x21   : > { %v344_v18 = vld [vmem:[%s7199_s13 + $0x60] sm:$0xff]  ;;  %v345_v19 = vld [vmem:[%s7199_s13 + $0x68] sm:$0xff]  ;;  %v346_v20 = vld [vmem:[%s7199_s13 + $0x70] sm:$0xff]  ;;  %775 = vst.msk [vmem:[#allocation2 + $0x170] sm:$0xff] %vm375_vm0, %v7081_v28  ;;  %s6568_s27 = sshll.u32 %s10791_s22, 2  ;;  %s6380_s19 = sshll.u32 %s316_s11, 2 }
  0x22   : > { %6686 = vmatmul.mubr.msk.f32.vlgmr.msra.gmra.mrb[0].mxu0 %vm375_vm0, %v333_v7  ;;  %v347_v21 = vld [vmem:[%s7199_s13 + $0x78] sm:$0xff]  ;;  %v348_v22 = vld [vmem:[%s7199_s13 + $0x80] sm:$0xff]  ;;  %v349_v23 = vld [vmem:[%s7199_s13 + $0x88] sm:$0xff]  ;;  %776 = vst.msk [vmem:[#allocation2 + $0x178] sm:$0xff] %vm375_vm0, %v7081_v28  ;;  %6858 = vmatpush1.bf16.msra.mxu1 %v6857_v56  ;;  %s10606_s20 = scalar_lea.vmem [#allocation5], %s6380_s19  ;;  %s6565_s22 = sshll.u32 %s7156_s7, 6 }
  0x23   : > { %6688 = vmatprep.mubr.msk.f32.mxu0 %vm375_vm0, %v334_v8  ;;  %v350_v24 = vld [vmem:[%s7199_s13 + $0x90] sm:$0xff]  ;;  %v351_v25 = vld [vmem:[%s7199_s13 + $0x98] sm:$0xff]  ;;  %v352_v26 = vld [vmem:[%s7199_s13 + $0xa0] sm:$0xff]  ;;  %6904 = vmatpush3.bf16.msra.mxu0 %v6901_v46  ;;  %10754 = vst [vmem:[#allocation8_spill] sm:$0xff] %v7337_v61  ;;  %s6305_s23 = sshll.u32 %s10606_s20, 4  ;;  %s6292_s7 = scalar_lea.sflag [#allocation6], %s316_s11  ;;  %s10693_s23 = int_to_ptr.vmem [resolvable:$true] %s6305_s23 }
  0x24   : > { %v353_v27 = vld [vmem:[%s7199_s13 + $0xa8] sm:$0xff]  ;;  %v2188_v30 = vld [vmem:[#allocation2 + $0x50] sm:$0xff]  ;;  %v355_v33 = vld [vmem:[%s7199_s13 + $0xb8] sm:$0xff]  ;;  %6906 = vmatprep.subr.bf16.mxu0 %v6905_v49  ;;  %6859 = vmatprep.subr.bf16.mxu1 %v10748_v52 }
  0x25   : > { %v1026_v29 = vld [vmem:[#allocation2 + $0x8] sm:$0xff]  ;;  %v354_v32 = vld [vmem:[%s7199_s13 + $0xb0] sm:$0xff]  ;;  %2211 = vrot.lane.b32.xlu1 %v2188_v30, %s7083_s18  ;;  %v356_v36 = vld [vmem:[%s7199_s13 + $0xc0] sm:$0xff] }
  0x26   : > { %6689 = vmatmul.mubr.msk.f32.gmra.mrb[2].mxu0 %vm375_vm0, %v335_v9  ;;  %1042 = vrot.lane.b32.xlu0 %v1026_v29, %s7082_s14  ;;  %v1075_v31 = vld [vmem:[#allocation2 + $0x68] sm:$0xff]  ;;  %v2236_v34 = vld [vmem:[#allocation2 + $0xb0] sm:$0xff]  ;;  %v359_v39 = vld [vmem:[%s7199_s13 + $0xd8] sm:$0xff]  ;;  %v7367_v9 = vsel %vm913_vm1, 1.0, %v7081_v28  ;;  %vm7661_vm1 = vcmp.gt.s32.totalorder %v839_v4, 0 }
  0x27   : > { %6691 = vmatprep.mubr.msk.f32.mxu0 %vm375_vm0, %v336_v10  ;;  %v1123_v35 = vld [vmem:[#allocation2 + $0xc8] sm:$0xff]  ;;  %v358_v38 = vld [vmem:[%s7199_s13 + $0xd0] sm:$0xff]  ;;  %v360_v40 = vld [vmem:[%s7199_s13 + $0xe0] sm:$0xff]  ;;  %6908 = vmatpush3.bf16.msra.mxu0 %v6905_v49  ;;  %v7440_v49 = vadd.s32 16, %v7337_v61 }
  0x28   : > { %v357_v37 = vld [vmem:[%s7199_s13 + $0xc8] sm:$0xff]  ;;  %v362_v42 = vld [vmem:[%s7199_s13 + $0xf0] sm:$0xff]  ;;  %v363_v43 = vld [vmem:[%s7199_s13 + $0xf8] sm:$0xff]  ;;  %6909 = vmatprep.subr.bf16.mxu0 %v10748_v52 }
  0x29   : > { %2259 = vrot.lane.b32.xlu1 %v2236_v34, %s7083_s18  ;;  %v361_v41 = vld [vmem:[%s7199_s13 + $0xe8] sm:$0xff]  ;;  %v2571_v62 = vld [vmem:[%s10742_s4 + $0x30] sm:$0xff]  ;;  %v2572_v63 = vld [vmem:[%s10742_s4 + $0x38] sm:$0xff]  ;;  %s8643_s13 = scalar_lea.vmem %s10739_s1, %s6568_s27 }
  0x2a   : > { %6692 = vmatmul.mubr.msk.f32.gmra.mrb[4].mxu0 %vm375_vm0, %v337_v11  ;;  %1091 = vrot.lane.b32.xlu0 %v1075_v31, %s7082_s14  ;;  %v2570_v59 = vld [vmem:[%s10742_s4 + $0x28] sm:$0xff]  ;;  %v6863_v1 = vpack.c.bf16 %v2572_v63, %v2571_v62  ;;  %v2573_v2 = vld [vmem:[%s10742_s4 + $0x40] sm:$0xff]  ;;  %v2575_v6 = vld [vmem:[%s10742_s4 + $0x50] sm:$0xff]  ;;  %v804_v63 = vand.u32 7, %v7440_v49 }
  0x2b   : > { %6694 = vmatprep.mubr.msk.f32.mxu0 %vm375_vm0, %v338_v12  ;;  %v6860_v60 = vpack.c.bf16 %v2570_v59, %v2569_v58  ;;  %v2574_v3 = vld [vmem:[%s10742_s4 + $0x48] sm:$0xff]  ;;  %v2576_v7 = vld [vmem:[%s10742_s4 + $0x58] sm:$0xff]  ;;  %v2577_v12 = vld [vmem:[%s10742_s4 + $0x60] sm:$0xff] }
  0x2c   : > { %v6866_v5 = vpack.c.bf16 %v2574_v3, %v2573_v2  ;;  %v6869_v8 = vpack.c.bf16 %v2576_v7, %v2575_v6  ;;  %v2380_v10 = vld [vmem:[#allocation2 + $0x51] sm:$0xff]  ;;  %v978_v34 = vld [vmem:[#allocation2 + $0xc7] sm:$0xff]  ;;  %v7458_v3 = vadd.s32 32, %v7337_v61  ;;  %vm7477_vm7 = vcmp.gt.s32.totalorder %v804_v63, 0 }
  0x2d   : > { %6861 = vmatpush1.bf16.msra.mxu1 %v6860_v60  ;;  %v2388_v11 = vmul.f32 %v7367_v9, %v2380_v10  ;;  %v2583_v29 = vld [vmem:[%s10742_s4 + $0x90] sm:$0xff]  ;;  %v2584_v30 = vld [vmem:[%s10742_s4 + $0x98] sm:$0xff]  ;;  %v2589_v55 = vld [vmem:[%s10742_s4 + $0xc0] sm:$0xff]  ;;  %vm7531_vm9 = vcmp.lt.s32.totalorder %v804_v63, 7 }
  0x2e   : > { %6695 = vmatmul.mubr.msk.f32.gmra.mrb[6].mxu0 %vm375_vm0, %v339_v13  ;;  %1139 = vrot.lane.b32.xlu0 %v1123_v35, %s7082_s14  ;;  %v2578_v13 = vld [vmem:[%s10742_s4 + $0x68] sm:$0xff]  ;;  %v2585_v35 = vld [vmem:[%s10742_s4 + $0xa0] sm:$0xff]  ;;  %v2588_v44 = vld [vmem:[%s10742_s4 + $0xb8] sm:$0xff] }
  0x2f   : > { %6697 = vmatprep.mubr.msk.f32.mxu0 %vm375_vm0, %v340_v14  ;;  %6862 = vmatprep.subr.bf16.mxu1 %v10748_v52  ;;  %v790_v14 = vand.u32 7, %v7337_v61  ;;  %2396 = vst.msk [vmem:[#allocation3 + $0xb8] sm:$0xff] %vm375_vm0, %v2388_v11  ;;  %v2590_v56 = vld [vmem:[%s10742_s4 + $0xc8] sm:$0xff]  ;;  %v2591_v7 = vld [vmem:[%s10742_s4 + $0xd0] sm:$0xff] }
  0x30   : > { %v6890_v60 = vpack.c.bf16 %v2590_v56, %v2589_v55  ;;  %v2595_v55 = vld [vmem:[%s10742_s4 + $0xf0] sm:$0xff]  ;;  %v2596_v56 = vld [vmem:[%s10742_s4 + $0xf8] sm:$0xff] }
  0x31   : > { %6864 = vmatpush1.bf16.msra.mxu1 %v6863_v1  ;;  %vm882_vm2 = vcmp.gt.s32.totalorder %v790_v14, 0  ;;  %v7455_v1 = vadd.s32 24, %v7337_v61  ;;  %vm906_vm4 = vcmp.lt.s32.totalorder %v790_v14, 7 }
  0x32   : > { %6698 = vmatmul.mubr.msk.f32.gmra.mrb[8].mxu0 %vm375_vm0, %v341_v15  ;;  %6865 = vmatprep.subr.bf16.mxu1 %v10748_v52  ;;  %v6872_v15 = vpack.c.bf16 %v2578_v13, %v2577_v12 }
  0x33   : > { %6700 = vmatprep.mubr.msk.f32.mxu0 %vm375_vm0, %v342_v16  ;;  %v2579_v16 = vld [vmem:[%s10742_s4 + $0x70] sm:$0xff] }
  0x35   : > { %6867 = vmatpush1.bf16.msra.mxu1 %v6866_v5 }
  0x36   : > { %6701 = vmatmul.mubr.msk.f32.gmra.mrb[10].mxu0 %vm375_vm0, %v343_v17  ;;  %6868 = vmatprep.subr.bf16.mxu1 %v10748_v52  ;;  %v2580_v17 = vld [vmem:[%s10742_s4 + $0x78] sm:$0xff] }
  0x37   : > { %6703 = vmatprep.mubr.msk.f32.mxu0 %vm375_vm0, %v344_v18  ;;  %v6875_v18 = vpack.c.bf16 %v2580_v17, %v2579_v16  ;;  %v811_v16 = vand.u32 7, %v7455_v1 }
  0x39   : > { %6870 = vmatpush1.bf16.msra.mxu1 %v6869_v8  ;;  %v2592_v8 = vld [vmem:[%s10742_s4 + $0xd8] sm:$0xff]  ;;  %vm7521_vm8 = vcmp.gt.s32.totalorder %v811_v16, 0  ;;  %vm7579_vm11 = vcmp.lt.s32.totalorder %v811_v16, 7  ;;  %v7598_v16 = vsel %vm7531_vm9, 1.0, %v7081_v28  ;;  %vm5960_vm9 = vcmask 392512  }
  0x3a   : > { %6704 = vmatmul.mubr.msk.f32.gmra.mrb[12].mxu0 %vm375_vm0, %v345_v19  ;;  %6871 = vmatprep.subr.bf16.mxu1 %v10748_v52  ;;  %v7389_v19 = vsel %vm882_vm2, 1.0, %v7081_v28  ;;  %v6893_v12 = vpack.c.bf16 %v2592_v8, %v2591_v7 }
  0x3b   : > { %6706 = vmatprep.mubr.msk.f32.mxu0 %vm375_vm0, %v346_v20  ;;  %v7391_v20 = vld [vmem:[#allocation3 + $0xb8] sm:$0xff] }
  0x3c   : > { %4856 = vst.msk [vmem:[#allocation3 + $0xb8] sm:$0xff] %vm375_vm0, %v2388_v11 }
  0x3d   : > { %6873 = vmatpush1.bf16.msra.mxu1 %v6872_v15 }
  0x3e   : > { %6707 = vmatmul.mubr.msk.f32.gmra.mrb[14].mxu0 %vm375_vm0, %v347_v21  ;;  %6874 = vmatprep.subr.bf16.mxu1 %v10748_v52  ;;  %v930_v21 = vld [vmem:[#allocation2 + $0x7] sm:$0xff] }
  0x3f   : > { %6709 = vmatprep.mubr.msk.f32.mxu0 %vm375_vm0, %v348_v22  ;;  %v2581_v22 = vld [vmem:[%s10742_s4 + $0x80] sm:$0xff] }
  0x41   : > { %6876 = vmatpush1.bf16.msra.mxu1 %v6875_v18  ;;  %v7483_v18 = vsel %vm906_vm4, 1.0, %v7081_v28  ;;  %vm1267_vm4 = vcmask 785920  }
  0x42   : > { %6710 = vmatmul.mubr.msk.f32.gmra.mrb[16].mxu0 %vm375_vm0, %v349_v23  ;;  %6877 = vmatprep.subr.bf16.mxu1 %v10748_v52  ;;  %v938_v23 = vmul.f32 %v7389_v19, %v930_v21 }
  0x43   : > { %6712 = vmatprep.mubr.msk.f32.mxu0 %vm375_vm0, %v350_v24  ;;  %v2582_v24 = vld [vmem:[%s10742_s4 + $0x88] sm:$0xff] }
  0x44   : > { %946 = vst.msk [vmem:[#allocation3] sm:$0xff] %vm375_vm0, %v938_v23 }
  0x46   : > { %6713 = vmatmul.mubr.msk.f32.gmra.mrb[18].mxu0 %vm375_vm0, %v351_v25 }
  0x47   : > { %6715 = vmatprep.mubr.msk.f32.mxu0 %vm375_vm0, %v352_v26  ;;  %v6878_v26 = vpack.c.bf16 %v2582_v24, %v2581_v22  ;;  %v818_v22 = vand.u32 7, %v7458_v3  ;;  %v7625_v3 = vsel %vm7579_vm11, 1.0, %v7081_v28  ;;  %vm5967_vm11 = vcmask 458112  }
  0x49   : > { %6879 = vmatpush1.bf16.msra.mxu1 %v6878_v26  ;;  %v7490_v26 = vadd.s32 48, %v7337_v61  ;;  %vm7537_vm10 = vcmp.gt.s32.totalorder %v818_v22, 0  ;;  %vm7611_vm13 = vcmp.lt.s32.totalorder %v818_v22, 7 }
  0x4a   : > { %6716 = vmatmul.mubr.msk.f32.gmra.mrb[20].mxu0 %vm375_vm0, %v353_v27  ;;  %v954_v27 = vld [vmem:[#allocation2 + $0x67] sm:$0xff]  ;;  %6880 = vmatprep.subr.bf16.mxu1 %v10748_v52 }
  0x4b   : > { %6718 = vmatprep.mubr.msk.f32.mxu0 %vm375_vm0, %v354_v32  ;;  %v962_v31 = vmul.f32 %v7389_v19, %v954_v27  ;;  %v6881_v32 = vpack.c.bf16 %v2584_v30, %v2583_v29  ;;  %v2593_v27 = vld [vmem:[%s10742_s4 + $0xe0] sm:$0xff]  ;;  %v2594_v29 = vld [vmem:[%s10742_s4 + $0xe8] sm:$0xff]  ;;  %v832_v49 = vand.u32 7, %v7490_v26  ;;  %v7690_v26 = vsel %vm7611_vm13, 1.0, %v7081_v28 }
  0x4d   : > { %970 = vst.msk [vmem:[#allocation3 + $0xc0] sm:$0xff] %vm375_vm0, %v962_v31  ;;  %6882 = vmatpush1.bf16.msra.mxu1 %v6881_v32  ;;  %vm7605_vm12 = vcmp.lt.s32.totalorder %v832_v49, 7  ;;  %vm7675_vm2 = vcmp.gt.s32.totalorder %v832_v49, 0 }
  0x4e   : > { %6719 = vmatmul.mubr.msk.f32.gmra.mrb[22].mxu0 %vm375_vm0, %v355_v33  ;;  %6883 = vmatprep.subr.bf16.mxu1 %v10748_v52 }
  0x4f   : > { %6721 = vmatprep.mubr.msk.f32.mxu0 %vm375_vm0, %v356_v36  ;;  %v2586_v36 = vld [vmem:[%s10742_s4 + $0xa8] sm:$0xff] }
  0x52   : > { %6722 = vmatmul.mubr.msk.f32.gmra.mrb[24].mxu0 %vm375_vm0, %v357_v37  ;;  %v986_v37 = vmul.f32 %v7389_v19, %v978_v34  ;;  %v7508_v34 = vsel %vm7477_vm7, 1.0, %v7081_v28  ;;  %vm5946_vm7 = vcmask 261312  }
  0x53   : > { %6724 = vmatprep.mubr.msk.f32.mxu0 %vm375_vm0, %v358_v38  ;;  %v6884_v38 = vpack.c.bf16 %v2586_v36, %v2585_v35  ;;  %v7511_v35 = vadd.s32 40, %v7337_v61  ;;  %v6896_v36 = vpack.c.bf16 %v2594_v29, %v2593_v27 }
  0x54   : > { %994 = vst.msk [vmem:[#allocation3 + $0x180] sm:$0xff] %vm375_vm0, %v986_v37 }
  0x55   : > { %6885 = vmatpush1.bf16.msra.mxu1 %v6884_v38  ;;  %v825_v63 = vand.u32 7, %v7511_v35 }
  0x56   : > { %6725 = vmatmul.mubr.msk.f32.gmra.mrb[26].mxu0 %vm375_vm0, %v359_v39  ;;  %6886 = vmatprep.subr.bf16.mxu1 %v10748_v52 }
  0x57   : > { %6727 = vmatprep.mubr.msk.f32.mxu0 %vm375_vm0, %v360_v40  ;;  %v7427_v40 = vld [vmem:[%s10741_s3] ss:$0 sm:$0xff]  ;;  %vm7639_vm14 = vcmp.lt.s32.totalorder %v825_v63, 7  ;;  %vm7643_vm15 = vcmp.gt.s32.totalorder %v825_v63, 0 }
  0x58   : > { %v7695_v49 = vsel %vm7639_vm14, 1.0, %v7081_v28 }
  0x5a   : > { %6728 = vmatmul.mubr.msk.f32.gmra.mrb[28].mxu0 %vm375_vm0, %v361_v41 }
  0x5b   : > { %6730 = vmatprep.mubr.msk.f32.mxu0 %vm375_vm0, %v362_v42  ;;  %v779_v42 = vadd.s32 8, %v7337_v61 }
  0x5d   : > { %v797_v54 = vand.u32 7, %v779_v42 }
  0x5e   : > { %6731 = vmatmul.mubr.msk.f32.gmra.mrb[30].mxu0 %vm375_vm0, %v363_v43  ;;  %v2587_v43 = vld [vmem:[%s10742_s4 + $0xb0] sm:$0xff] }
  0x5f   : > { %v6887_v47 = vpack.c.bf16 %v2588_v44, %v2587_v43  ;;  %vm883_vm5 = vcmp.gt.s32.totalorder %v797_v54, 0  ;;  %vm7472_vm6 = vcmp.lt.s32.totalorder %v797_v54, 7 }
  0x60   : > { %v7486_v21 = vsel %vm883_vm5, 1.0, %v7081_v28  ;;  %v7529_v44 = vsel %vm7472_vm6, 1.0, %v7081_v28  ;;  %vm1492_vm5 = vcmask 1048320   ;;  %vm5939_vm6 = vcmask 195712  }
  0x61   : > { %6888 = vmatpush1.bf16.msra.mxu1 %v6887_v47 }
  0x62   : > { %6889 = vmatprep.subr.bf16.mxu1 %v10748_v52 }
  0x65   : > { %6891 = vmatpush1.bf16.msra.mxu1 %v6890_v60 }
  0x66   : > { %6892 = vmatprep.subr.bf16.mxu1 %v10748_v52 }
  0x69   : > { %6894 = vmatpush1.bf16.msra.mxu1 %v6893_v12  ;;  %v7586_v12 = vsel %vm7537_vm10, 1.0, %v7081_v28  ;;  %vm5974_vm10 = vcmask 523712  }
  0x6a   : > { %6895 = vmatprep.subr.bf16.mxu1 %v10748_v52 }
  0x6d   : > { %6897 = vmatpush1.bf16.msra.mxu1 %v6896_v36 }
  0x6e   : > { %6898 = vmatprep.subr.bf16.mxu1 %v10748_v52 }
  0x98   : > { %v1043_v25 = vpop.permute.xlu0 %1042 }
  0x99   : > { %1067 = vst.msk [vmem:[#allocation3] sm:$0xff] %vm1066_vm3, %v1043_v25 }
  0x9c   : > { %v1092_v33 = vpop.permute.xlu0 %1091 }
  0x9d   : > { %1115 = vst.msk [vmem:[#allocation3 + $0xc0] sm:$0xff] %vm1066_vm3, %v1092_v33 }
  0xa0   : > { %v1140_v39 = vpop.permute.xlu0 %1139 }
  0xa1   : > { %1163 = vst.msk [vmem:[#allocation3 + $0x180] sm:$0xff] %vm1066_vm3, %v1140_v39 }
  0xf5   : > { %v6687_v41 = vpop.f32.mrb[0].mxu0 }
  0xf6   : > { %v544_v45 = vadd.f32 %v6687_v41, %v7427_v40  ;;  %v538_v46 = vpop.f32.mrb[1].mxu0 }
  0xf7   : > { %v539_v48 = vadd.f32 %v7427_v40, %v538_v46 }
  0xf8   : > { %v698_v50 = vmax.f32 %v544_v45, 0.0 }
  0xf9   : > { %v697_v51 = vmax.f32 %v539_v48, 0.0  ;;  %v6690_v53 = vpop.f32.mrb[2].mxu0 }
  0xfa   : > { %732 = vst.msk [vmem:[#allocation2 + $0x18] sm:$0xff] %vm375_vm0, %v698_v50  ;;  %v554_v58 = vadd.f32 %v6690_v53, %v7427_v40  ;;  %v548_v59 = vpop.f32.mrb[3].mxu0 }
  0xfb   : > { %731 = vst.msk [vmem:[#allocation2 + $0x10] sm:$0xff] %vm375_vm0, %v697_v51  ;;  %v549_v62 = vadd.f32 %v7427_v40, %v548_v59 }
  0xfc   : > { %v700_v2 = vmax.f32 %v554_v58, 0.0 }
  0xfd   : > { %v699_v5 = vmax.f32 %v549_v62, 0.0  ;;  %v6693_v6 = vpop.f32.mrb[4].mxu0  ;;  %v7566_v62 = vsel %vm7521_vm8, 1.0, %v7081_v28  ;;  %vm5953_vm8 = vcmask 326912  }
  0xfe   : > { %734 = vst.msk [vmem:[#allocation2 + $0x28] sm:$0xff] %vm375_vm0, %v700_v2  ;;  %v564_v10 = vadd.f32 %v6693_v6, %v7427_v40  ;;  %v558_v11 = vpop.f32.mrb[5].mxu0 }
  0xff   : > { %733 = vst.msk [vmem:[#allocation2 + $0x20] sm:$0xff] %vm375_vm0, %v699_v5  ;;  %v559_v14 = vadd.f32 %v7427_v40, %v558_v11  ;;  %v6899_v5 = vpack.c.bf16 %v2596_v56, %v2595_v55 }
 0x100   : > { %v702_v17 = vmax.f32 %v564_v10, 0.0 }
 0x101   : > { %v2181_v23 = vld [vmem:[#allocation2 + $0x18] sm:$0xff]  ;;  %v701_v24 = vmax.f32 %v559_v14, 0.0  ;;  %v6696_v25 = vpop.f32.mrb[6].mxu0  ;;  %6900 = vmatpush1.bf16.msra.mxu1 %v6899_v5 }
 0x102   : > { %2197 = vrot.lane.b32.xlu0 %v2181_v23, %s7083_s18  ;;  %1046 = vrot.lane.b32.xlu1 %v2181_v23, %s7082_s14  ;;  %736 = vst.msk [vmem:[#allocation2 + $0x38] sm:$0xff] %vm375_vm0, %v702_v17  ;;  %v7502_v30 = vld [vmem:[#allocation2 + $0x11] sm:$0xff]  ;;  %v574_v32 = vadd.f32 %v6696_v25, %v7427_v40  ;;  %v568_v33 = vpop.f32.mrb[7].mxu0  ;;  %v1219_v48 = vld [vmem:[#allocation2 + $0x9] sm:$0xff]  ;;  %v7716_v17 = vsel %vm7643_vm15, 1.0, %v7081_v28  ;;  %v7721_v23 = vsel %vm7661_vm1, 1.0, %v7081_v28 }
 0x103   : > { %v1027_v31 = vld [vmem:[#allocation2 + $0x10] sm:$0xff]  ;;  %735 = vst.msk [vmem:[#allocation2 + $0x30] sm:$0xff] %vm375_vm0, %v701_v24  ;;  %v1741_v37 = vmul.f32 %v7483_v18, %v7502_v30  ;;  %v569_v41 = vadd.f32 %v7427_v40, %v568_v33  ;;  %v1670_v43 = vld [vmem:[#allocation2 + $0x18] sm:$0xff]  ;;  %v1227_v14 = vmul.f32 %v7483_v18, %v1219_v48  ;;  %v1228_v47 = vmul.f32 %v7529_v44, %v7502_v30 }
 0x104   : > { %v7516_v38 = vld [vmem:[#allocation2 + $0x17] sm:$0xff]  ;;  %v7518_v39 = vld [vmem:[#allocation2 + $0xf] sm:$0xff]  ;;  %1677 = vst.msk [vmem:[#allocation3 + $0x8] sm:$0xff] %vm375_vm0, %v1027_v31  ;;  %v704_v45 = vmax.f32 %v574_v32, 0.0  ;;  %1678 = vst.msk [vmem:[#allocation3 + $0x20] sm:$0xff] %vm375_vm0, %v1670_v43  ;;  %v7657_v48 = vsel %vm7605_vm12, 1.0, %v7081_v28 }
 0x105   : > { %v703_v50 = vmax.f32 %v569_v41, 0.0  ;;  %v6699_v51 = vpop.f32.mrb[8].mxu0  ;;  %v940_v53 = vmul.f32 %v7508_v34, %v7516_v38  ;;  %v939_v54 = vmul.f32 %v7486_v21, %v7518_v39  ;;  %v1672_v13 = vld [vmem:[#allocation2 + $0x28] sm:$0xff]  ;;  %v1965_v15 = vmul.f32 %v7389_v19, %v7516_v38 }
 0x106   : > { %v7554_v58 = vld [vmem:[#allocation2 + $0x19] sm:$0xff]  ;;  %v7556_v59 = vld [vmem:[#allocation2 + $0x21] sm:$0xff]  ;;  %1757 = vrot.lane.b32.xlu1 %v1741_v37, %s7082_s14  ;;  %1044 = vrot.lane.b32.xlu0 %v1027_v31, %s7082_s14  ;;  %738 = vst.msk [vmem:[#allocation2 + $0x48] sm:$0xff] %vm375_vm0, %v704_v45  ;;  %v584_v1 = vadd.f32 %v6699_v51, %v7427_v40  ;;  %v578_v2 = vpop.f32.mrb[9].mxu0  ;;  %1680 = vst.msk [vmem:[#allocation3 + $0x50] sm:$0xff] %vm375_vm0, %v1672_v13  ;;  %v1452_v46 = vmul.f32 %v7389_v19, %v7518_v39  ;;  %vm5977_vm12 = vcmask 516096  }
 0x107   : > { %v7560_v60 = vld [vmem:[#allocation2 + $0x20] sm:$0xff]  ;;  %v2382_v6 = vmul.f32 %v7529_v44, %v7556_v59  ;;  %v2381_v7 = vmul.f32 %v7483_v18, %v7554_v58  ;;  %737 = vst.msk [vmem:[#allocation2 + $0x40] sm:$0xff] %vm375_vm0, %v703_v50  ;;  %948 = vst.msk [vmem:[#allocation3 + $0x30] sm:$0xff] %vm375_vm0, %v940_v53  ;;  %v579_v25 = vadd.f32 %v7427_v40, %v578_v2 }
 0x108   : > { %v7574_v8 = vld [vmem:[#allocation2 + $0x1f] sm:$0xff]  ;;  %v7577_v10 = vld [vmem:[#allocation2 + $0x27] sm:$0xff]  ;;  %947 = vst.msk [vmem:[#allocation3 + $0x18] sm:$0xff] %vm375_vm0, %v939_v54  ;;  %1679 = vst.msk [vmem:[#allocation3 + $0x38] sm:$0xff] %vm375_vm0, %v7560_v60  ;;  %v706_v24 = vmax.f32 %v584_v1, 0.0 }
 0x109   : > { %2390 = vst.msk [vmem:[#allocation3 + $0x28] sm:$0xff] %vm375_vm0, %v2382_v6  ;;  %2389 = vst.msk [vmem:[#allocation3 + $0x10] sm:$0xff] %vm375_vm0, %v2381_v7  ;;  %v6702_v27 = vpop.f32.mrb[10].mxu0  ;;  %v1674_v29 = vld [vmem:[#allocation2 + $0x38] sm:$0xff]  ;;  %v941_v36 = vmul.f32 %v7566_v62, %v7574_v8  ;;  %v942_v37 = vmul.f32 %v7586_v12, %v7577_v10  ;;  %v705_v39 = vmax.f32 %v579_v25, 0.0  ;;  %v7728_v25 = vsel %vm7675_vm2, 1.0, %v7081_v28 }
 0x10a   : > { %v7616_v31 = vld [vmem:[#allocation2 + $0x29] sm:$0xff]  ;;  %v7618_v32 = vld [vmem:[#allocation2 + $0x31] sm:$0xff]  ;;  %1243 = vrot.lane.b32.xlu1 %v1227_v14, %s7085_s21  ;;  %1981 = vrot.lane.b32.xlu0 %v1965_v15, %s7085_s21  ;;  %v594_v33 = vadd.f32 %v6702_v27, %v7427_v40  ;;  %v588_v35 = vpop.f32.mrb[11].mxu0  ;;  %1682 = vst.msk [vmem:[#allocation3 + $0x80] sm:$0xff] %vm375_vm0, %v1674_v29  ;;  %744 = vst.msk [vmem:[#allocation2 + $0x78] sm:$0xff] %vm375_vm0, %v706_v24  ;;  %v1453_v14 = vmul.f32 %v7486_v21, %v7516_v38 }
 0x10b   : > { %v7627_v22 = vld [vmem:[#allocation2 + $0x30] sm:$0xff]  ;;  %v2383_v41 = vmul.f32 %v7598_v16, %v7616_v31  ;;  %v2384_v42 = vmul.f32 %v7625_v3, %v7618_v32  ;;  %949 = vst.msk [vmem:[#allocation3 + $0x48] sm:$0xff] %vm375_vm0, %v941_v36  ;;  %950 = vst.msk [vmem:[#allocation3 + $0x60] sm:$0xff] %vm375_vm0, %v942_v37  ;;  %v589_v7 = vadd.f32 %v7427_v40, %v588_v35 }
 0x10c   : > { %1681 = vst.msk [vmem:[#allocation3 + $0x68] sm:$0xff] %vm375_vm0, %v7627_v22  ;;  %v708_v53 = vmax.f32 %v594_v33, 0.0  ;;  %v7699_v1 = vld [vmem:[#allocation2 + $0x2f] sm:$0xff]  ;;  %v7703_v5 = vld [vmem:[#allocation2 + $0x37] sm:$0xff]  ;;  %743 = vst.msk [vmem:[#allocation2 + $0x70] sm:$0xff] %vm375_vm0, %v705_v39 }
 0x10d   : > { %v7667_v51 = vld [vmem:[#allocation2 + $0x49] sm:$0xff]  ;;  %2391 = vst.msk [vmem:[#allocation3 + $0x40] sm:$0xff] %vm375_vm0, %v2383_v41  ;;  %2392 = vst.msk [vmem:[#allocation3 + $0x58] sm:$0xff] %vm375_vm0, %v2384_v42  ;;  %v6705_v4 = vpop.f32.mrb[12].mxu0  ;;  %v707_v38 = vmax.f32 %v589_v7, 0.0  ;;  %v943_v41 = vmul.f32 %v7716_v17, %v7699_v1  ;;  %v944_v42 = vmul.f32 %v7728_v25, %v7703_v5 }
 0x10e   : > { %v7671_v30 = vld [vmem:[#allocation2 + $0x48] sm:$0xff]  ;;  %1468 = vrot.lane.b32.xlu1 %v1452_v46, %s7083_s18  ;;  %1245 = vrot.lane.b32.xlu0 %v1228_v47, %s7085_s21  ;;  %v2387_v54 = vmul.f32 %v7657_v48, %v7667_v51  ;;  %v7683_v55 = vld [vmem:[#allocation2 + $0x39] sm:$0xff]  ;;  %v598_v63 = vpop.f32.mrb[13].mxu0  ;;  %746 = vst.msk [vmem:[#allocation2 + $0x88] sm:$0xff] %vm375_vm0, %v708_v53  ;;  %v604_v29 = vadd.f32 %v6705_v4, %v7427_v40 }
 0x10f   : > { %v7685_v56 = vld [vmem:[#allocation2 + $0x41] sm:$0xff]  ;;  %1684 = vst.msk [vmem:[#allocation3 + $0xb0] sm:$0xff] %vm375_vm0, %v7671_v30  ;;  %v2385_v2 = vmul.f32 %v7690_v26, %v7683_v55  ;;  %v599_v28 = vadd.f32 %v7427_v40, %v598_v63  ;;  %745 = vst.msk [vmem:[#allocation2 + $0x80] sm:$0xff] %vm375_vm0, %v707_v38  ;;  %v1966_v63 = vmul.f32 %v7486_v21, %v7574_v8 }
 0x110   : > { %v2386_v6 = vmul.f32 %v7695_v49, %v7685_v56  ;;  %v1675_v11 = vld [vmem:[#allocation2 + $0x40] sm:$0xff]  ;;  %v2471_v13 = vld [vmem:[#allocation3 + $0x10] sm:$0xff]  ;;  %v2474_v15 = vld [vmem:[#allocation3 + $0x28] sm:$0xff]  ;;  %2395 = vst.msk [vmem:[#allocation3 + $0xa0] sm:$0xff] %vm375_vm0, %v2387_v54  ;;  %v710_v47 = vmax.f32 %v604_v29, 0.0 }
 0x111   : > { %v7723_v24 = vld [vmem:[#allocation2 + $0x3f] sm:$0xff]  ;;  %1683 = vst.msk [vmem:[#allocation3 + $0x98] sm:$0xff] %vm375_vm0, %v1675_v11  ;;  %6741 = vmatprep.mubr.msk.f32.mxu0 %vm375_vm0, %v2471_v13  ;;  %2393 = vst.msk [vmem:[#allocation3 + $0x70] sm:$0xff] %vm375_vm0, %v2385_v2  ;;  %v6708_v27 = vpop.f32.mrb[14].mxu0  ;;  %v709_v50 = vmax.f32 %v599_v28, 0.0  ;;  %v1030_v53 = vld [vmem:[#allocation2 + $0x28] sm:$0xff] }
 0x112   : > { %2394 = vst.msk [vmem:[#allocation3 + $0x88] sm:$0xff] %vm375_vm0, %v2386_v6  ;;  %1048 = vrot.lane.b32.xlu1 %v7560_v60, %s7082_s14  ;;  %1470 = vrot.lane.b32.xlu0 %v1453_v14, %s7083_s18  ;;  %v614_v33 = vadd.f32 %v6708_v27, %v7427_v40  ;;  %v608_v35 = vpop.f32.mrb[15].mxu0  ;;  %v1686_v36 = vld [vmem:[#allocation2 + $0x78] sm:$0xff]  ;;  %v945_v43 = vmul.f32 %v7721_v23, %v7723_v24  ;;  %951 = vst.msk [vmem:[#allocation3 + $0x78] sm:$0xff] %vm375_vm0, %v943_v41 }
 0x113   : > { %6742 = vmatmul.mubr.msk.f32.vlgmr.msra.gmra.mrb[32].mxu0 %vm375_vm0, %v2474_v15  ;;  %v609_v37 = vadd.f32 %v7427_v40, %v608_v35  ;;  %1694 = vst.msk [vmem:[#allocation3 + $0xe0] sm:$0xff] %vm375_vm0, %v1686_v36  ;;  %952 = vst.msk [vmem:[#allocation3 + $0x90] sm:$0xff] %vm375_vm0, %v944_v42  ;;  %v7761_v4 = vld [vmem:[#allocation2 + $0x77] sm:$0xff]  ;;  %v7763_v54 = vld [vmem:[#allocation2 + $0x6f] sm:$0xff]  ;;  %v1743_v36 = vmul.f32 %v7598_v16, %v7556_v59 }
 0x114   : > { %v2477_v45 = vld [vmem:[#allocation3 + $0x40] sm:$0xff]  ;;  %v2480_v46 = vld [vmem:[#allocation3 + $0x58] sm:$0xff]  ;;  %v712_v39 = vmax.f32 %v614_v33, 0.0  ;;  %953 = vst.msk [vmem:[#allocation3 + $0xa8] sm:$0xff] %vm375_vm0, %v945_v43  ;;  %748 = vst.msk [vmem:[#allocation2 + $0x98] sm:$0xff] %vm375_vm0, %v710_v47  ;;  %v963_v6 = vmul.f32 %v7486_v21, %v7763_v54  ;;  %v964_v11 = vmul.f32 %v7508_v34, %v7761_v4 }
 0x115   : > { %6744 = vmatprep.mubr.msk.f32.mxu0 %vm375_vm0, %v2477_v45  ;;  %v711_v0 = vmax.f32 %v609_v37, 0.0  ;;  %747 = vst.msk [vmem:[#allocation2 + $0x90] sm:$0xff] %vm375_vm0, %v709_v50  ;;  %v1685_v13 = vld [vmem:[#allocation2 + $0x70] sm:$0xff]  ;;  %v1688_v14 = vld [vmem:[#allocation2 + $0x88] sm:$0xff]  ;;  %v1742_v37 = vmul.f32 %v7529_v44, %v7554_v58 }
 0x116   : > { %2199 = vrot.lane.b32.xlu1 %v7560_v60, %s7083_s18  ;;  %1050 = vrot.lane.b32.xlu0 %v1030_v53, %s7082_s14  ;;  %750 = vst.msk [vmem:[#allocation2 + $0xa8] sm:$0xff] %vm375_vm0, %v712_v39  ;;  %v7775_v15 = vld [vmem:[#allocation2 + $0x79] sm:$0xff]  ;;  %v7777_v38 = vld [vmem:[#allocation2 + $0x81] sm:$0xff]  ;;  %971 = vst.msk [vmem:[#allocation3 + $0xd8] sm:$0xff] %vm375_vm0, %v963_v6 }
 0x117   : > { %6745 = vmatmul.mubr.msk.f32.gmra.mrb[34].mxu0 %vm375_vm0, %v2480_v46  ;;  %749 = vst.msk [vmem:[#allocation2 + $0xa0] sm:$0xff] %vm375_vm0, %v711_v0  ;;  %v2489_v7 = vld [vmem:[#allocation3 + $0xa0] sm:$0xff]  ;;  %1693 = vst.msk [vmem:[#allocation3 + $0xc8] sm:$0xff] %vm375_vm0, %v1685_v13  ;;  %v2405_v27 = vmul.f32 %v7483_v18, %v7775_v15  ;;  %v2406_v29 = vmul.f32 %v7529_v44, %v7777_v38 }
 0x118   : > { %v2483_v60 = vld [vmem:[#allocation3 + $0x70] sm:$0xff]  ;;  %1696 = vst.msk [vmem:[#allocation3 + $0x110] sm:$0xff] %vm375_vm0, %v1688_v14  ;;  %v7787_v28 = vld [vmem:[#allocation2 + $0x7f] sm:$0xff]  ;;  %v7789_v33 = vld [vmem:[#allocation2 + $0x87] sm:$0xff] }
 0x119   : > { %v2486_v2 = vld [vmem:[#allocation3 + $0x88] sm:$0xff]  ;;  %6747 = vmatprep.mubr.msk.f32.mxu0 %vm375_vm0, %v2483_v60  ;;  %972 = vst.msk [vmem:[#allocation3 + $0xf0] sm:$0xff] %vm375_vm0, %v964_v11  ;;  %v1687_v35 = vld [vmem:[#allocation2 + $0x80] sm:$0xff]  ;;  %2413 = vst.msk [vmem:[#allocation3 + $0xd0] sm:$0xff] %vm375_vm0, %v2405_v27  ;;  %v965_v45 = vmul.f32 %v7566_v62, %v7787_v28  ;;  %v966_v46 = vmul.f32 %v7586_v12, %v7789_v33  ;;  %v1229_v60 = vmul.f32 %v7598_v16, %v7554_v58 }
 0x11a   : > { %1983 = vrot.lane.b32.xlu1 %v1966_v63, %s7085_s21  ;;  %2201 = vrot.lane.b32.xlu0 %v1030_v53, %s7083_s18  ;;  %1695 = vst.msk [vmem:[#allocation3 + $0xf8] sm:$0xff] %vm375_vm0, %v1687_v35  ;;  %2414 = vst.msk [vmem:[#allocation3 + $0xe8] sm:$0xff] %vm375_vm0, %v2406_v29  ;;  %v1454_v29 = vmul.f32 %v7508_v34, %v7574_v8  ;;  %v1230_v35 = vmul.f32 %v7625_v3, %v7556_v59 }
 0x11b   : > { %6748 = vmatmul.mubr.msk.f32.gmra.mrb[36].mxu0 %vm375_vm0, %v2486_v2  ;;  %973 = vst.msk [vmem:[#allocation3 + $0x108] sm:$0xff] %vm375_vm0, %v965_v45  ;;  %974 = vst.msk [vmem:[#allocation3 + $0x120] sm:$0xff] %vm375_vm0, %v966_v46  ;;  %v1967_v2 = vmul.f32 %v7508_v34, %v7577_v10  ;;  %v1690_v14 = vld [vmem:[#allocation2 + $0x98] sm:$0xff] }
 0x11c   : > { %6750 = vmatprep.mubr.msk.f32.mxu0 %vm375_vm0, %v2489_v7  ;;  %v7798_v41 = vld [vmem:[#allocation2 + $0x89] sm:$0xff]  ;;  %v7800_v42 = vld [vmem:[#allocation2 + $0x91] sm:$0xff]  ;;  %1698 = vst.msk [vmem:[#allocation3 + $0x140] sm:$0xff] %vm375_vm0, %v1690_v14 }
 0x11d   : > { %v7804_v43 = vld [vmem:[#allocation2 + $0xa9] sm:$0xff]  ;;  %v2407_v50 = vmul.f32 %v7598_v16, %v7798_v41  ;;  %v2408_v0 = vmul.f32 %v7625_v3, %v7800_v42  ;;  %v7840_v7 = vld [vmem:[#allocation2 + $0x97] sm:$0xff] }
 0x11e   : > { %1761 = vrot.lane.b32.xlu1 %v1743_v36, %s7082_s14  ;;  %1759 = vrot.lane.b32.xlu0 %v1742_v37, %s7082_s14  ;;  %v2411_v47 = vmul.f32 %v7657_v48, %v7804_v43  ;;  %v7816_v39 = vld [vmem:[#allocation2 + $0x99] sm:$0xff]  ;;  %v7818_v53 = vld [vmem:[#allocation2 + $0xa1] sm:$0xff]  ;;  %v1689_v13 = vld [vmem:[#allocation2 + $0x90] sm:$0xff]  ;;  %v968_v46 = vmul.f32 %v7728_v25, %v7840_v7 }
 0x11f   : > { %6751 = vmatmul.mubr.msk.f32.gmra.mrb[38].mxu0 %vm375_vm0, %v7391_v20  ;;  %v2409_v63 = vmul.f32 %v7690_v26, %v7816_v39  ;;  %2415 = vst.msk [vmem:[#allocation3 + $0x100] sm:$0xff] %vm375_vm0, %v2407_v50  ;;  %2416 = vst.msk [vmem:[#allocation3 + $0x118] sm:$0xff] %vm375_vm0, %v2408_v0  ;;  %v7835_v20 = vld [vmem:[#allocation2 + $0x8f] sm:$0xff]  ;;  %v2410_v58 = vmul.f32 %v7695_v49, %v7818_v53  ;;  %v7844_v11 = vld [vmem:[#allocation2 + $0x9f] sm:$0xff] }
 0x120   : > { %2419 = vst.msk [vmem:[#allocation3 + $0x160] sm:$0xff] %vm375_vm0, %v2411_v47  ;;  %v7837_v6 = vld [vmem:[#allocation2 + $0xa8] sm:$0xff]  ;;  %1697 = vst.msk [vmem:[#allocation3 + $0x128] sm:$0xff] %vm375_vm0, %v1689_v13  ;;  %v1691_v27 = vld [vmem:[#allocation2 + $0xa0] sm:$0xff]  ;;  %v967_v45 = vmul.f32 %v7716_v17, %v7835_v20  ;;  %v969_v8 = vmul.f32 %v7721_v23, %v7844_v11  ;;  %v1455_v47 = vmul.f32 %v7566_v62, %v7577_v10 }
 0x121   : > { %2417 = vst.msk [vmem:[#allocation3 + $0x130] sm:$0xff] %vm375_vm0, %v2409_v63  ;;  %1700 = vst.msk [vmem:[#allocation3 + $0x170] sm:$0xff] %vm375_vm0, %v7837_v6  ;;  %v2495_v36 = vld [vmem:[#allocation3 + $0xd0] sm:$0xff]  ;;  %v2498_v37 = vld [vmem:[#allocation3 + $0xe8] sm:$0xff]  ;;  %v6711_v63 = vpop.f32.mrb[16].mxu0 }
 0x122   : > { %1247 = vrot.lane.b32.xlu1 %v1229_v60, %s7085_s21  ;;  %1985 = vrot.lane.b32.xlu0 %v1967_v2, %s7085_s21  ;;  %2418 = vst.msk [vmem:[#allocation3 + $0x148] sm:$0xff] %vm375_vm0, %v2410_v58  ;;  %1699 = vst.msk [vmem:[#allocation3 + $0x158] sm:$0xff] %vm375_vm0, %v1691_v27  ;;  %v624_v2 = vadd.f32 %v6711_v63, %v7427_v40  ;;  %v618_v58 = vpop.f32.mrb[17].mxu0  ;;  %v1032_v13 = vld [vmem:[#allocation2 + $0x38] sm:$0xff] }
 0x123   : > { %6753 = vmatprep.mubr.msk.f32.mxu0 %vm375_vm0, %v2495_v36  ;;  %975 = vst.msk [vmem:[#allocation3 + $0x138] sm:$0xff] %vm375_vm0, %v967_v45  ;;  %976 = vst.msk [vmem:[#allocation3 + $0x150] sm:$0xff] %vm375_vm0, %v968_v46  ;;  %v619_v14 = vadd.f32 %v7427_v40, %v618_v58  ;;  %v6714_v27 = vpop.f32.mrb[18].mxu0  ;;  %v1968_v46 = vmul.f32 %v7566_v62, %v7699_v1 }
 0x124   : > { %977 = vst.msk [vmem:[#allocation3 + $0x168] sm:$0xff] %vm375_vm0, %v969_v8  ;;  %6754 = vmatmul.mubr.msk.f32.gmra.mrb[40].mxu0 %vm375_vm0, %v2498_v37  ;;  %v628_v36 = vpop.f32.mrb[19].mxu0 }
 0x125   : > { %v713_v37 = vmax.f32 %v619_v14, 0.0  ;;  %v629_v45 = vadd.f32 %v7427_v40, %v628_v36 }
 0x126   : > { %1472 = vrot.lane.b32.xlu1 %v1454_v29, %s7083_s18  ;;  %1249 = vrot.lane.b32.xlu0 %v1230_v35, %s7085_s21  ;;  %v2501_v59 = vld [vmem:[#allocation3 + $0x100] sm:$0xff]  ;;  %v2504_v50 = vld [vmem:[#allocation3 + $0x118] sm:$0xff]  ;;  %v714_v29 = vmax.f32 %v624_v2, 0.0  ;;  %v634_v35 = vadd.f32 %v6714_v27, %v7427_v40  ;;  %v1969_v2 = vmul.f32 %v7586_v12, %v7703_v5 }
 0x127   : > { %6756 = vmatprep.mubr.msk.f32.mxu0 %vm375_vm0, %v2501_v59  ;;  %v2513_v10 = vld [vmem:[#allocation3 + $0x160] sm:$0xff]  ;;  %755 = vst.msk [vmem:[#allocation2 + $0xd0] sm:$0xff] %vm375_vm0, %v713_v37  ;;  %v1745_v59 = vmul.f32 %v7690_v26, %v7618_v32  ;;  %v2404_v27 = vld [vmem:[#allocation2 + $0xb1] sm:$0xff] }
 0x128   : > { %v2507_v0 = vld [vmem:[#allocation3 + $0x130] sm:$0xff]  ;;  %6757 = vmatmul.mubr.msk.f32.gmra.mrb[42].mxu0 %vm375_vm0, %v2504_v50  ;;  %756 = vst.msk [vmem:[#allocation2 + $0xd8] sm:$0xff] %vm375_vm0, %v714_v29  ;;  %v716_v8 = vmax.f32 %v634_v35, 0.0  ;;  %v6717_v50 = vpop.f32.mrb[20].mxu0  ;;  %v1456_v29 = vmul.f32 %v7586_v12, %v7699_v1  ;;  %v2412_v36 = vmul.f32 %v7367_v9, %v2404_v27  ;;  %v1033_v1 = vld [vmem:[#allocation2 + $0x40] sm:$0xff] }
 0x129   : > { %6759 = vmatprep.mubr.msk.f32.mxu0 %vm375_vm0, %v2507_v0  ;;  %v2510_v60 = vld [vmem:[#allocation3 + $0x148] sm:$0xff]  ;;  %v644_v0 = vadd.f32 %v6717_v50, %v7427_v40  ;;  %v638_v63 = vpop.f32.mrb[21].mxu0 }
 0x12a   : > { %1052 = vrot.lane.b32.xlu1 %v7627_v22, %s7082_s14  ;;  %1474 = vrot.lane.b32.xlu0 %v1455_v47, %s7083_s18  ;;  %758 = vst.msk [vmem:[#allocation2 + $0xe8] sm:$0xff] %vm375_vm0, %v716_v8  ;;  %v1744_v47 = vmul.f32 %v7625_v3, %v7616_v31  ;;  %2420 = vst.msk [vmem:[#allocation3 + $0x178] sm:$0xff] %vm375_vm0, %v2412_v36 }
 0x12b   : > { %v718_v58 = vmax.f32 %v644_v0, 0.0 }
 0x12c   : > { %6760 = vmatmul.mubr.msk.f32.gmra.mrb[44].mxu0 %vm375_vm0, %v2510_v60  ;;  %v1231_v60 = vmul.f32 %v7690_v26, %v7616_v31  ;;  %v1232_v31 = vmul.f32 %v7695_v49, %v7618_v32 }
 0x12d   : > { %6762 = vmatprep.mubr.msk.f32.mxu0 %vm375_vm0, %v2513_v10  ;;  %760 = vst.msk [vmem:[#allocation2 + $0xf8] sm:$0xff] %vm375_vm0, %v718_v58 }
 0x12e   : > { %2203 = vrot.lane.b32.xlu1 %v7627_v22, %s7083_s18  ;;  %1054 = vrot.lane.b32.xlu0 %v1032_v13, %s7082_s14  ;;  %v715_v22 = vmax.f32 %v629_v45, 0.0  ;;  %v7918_v35 = vld [vmem:[#allocation2 + $0xd0] sm:$0xff] }
 0x12f   : > { %v7921_v37 = vld [vmem:[#allocation2 + $0xd7] sm:$0xff]  ;;  %1709 = vst.msk [vmem:[#allocation3 + $0x188] sm:$0xff] %vm375_vm0, %v7918_v35 }
 0x130   : > { %757 = vst.msk [vmem:[#allocation2 + $0xe0] sm:$0xff] %vm375_vm0, %v715_v22  ;;  %v1702_v32 = vld [vmem:[#allocation2 + $0xd8] sm:$0xff]  ;;  %v1457_v22 = vmul.f32 %v7716_v17, %v7703_v5 }
 0x131   : > { %1710 = vst.msk [vmem:[#allocation3 + $0x1a0] sm:$0xff] %vm375_vm0, %v1702_v32 }
 0x132   : > { %1987 = vrot.lane.b32.xlu1 %v1968_v46, %s7085_s21  ;;  %2205 = vrot.lane.b32.xlu0 %v1032_v13, %s7083_s18  ;;  %v639_v13 = vadd.f32 %v7427_v40, %v638_v63  ;;  %v7925_v46 = vld [vmem:[#allocation2 + $0xcf] sm:$0xff] }
 0x133   : > { %v1964_v63 = vld [vmem:[#allocation2 + $0x4f] sm:$0xff] }
 0x134   : > { %v717_v14 = vmax.f32 %v639_v13, 0.0 }
 0x136   : > { %1765 = vrot.lane.b32.xlu1 %v1745_v59, %s7082_s14  ;;  %1763 = vrot.lane.b32.xlu0 %v1744_v47, %s7082_s14  ;;  %759 = vst.msk [vmem:[#allocation2 + $0xf0] sm:$0xff] %vm375_vm0, %v717_v14  ;;  %v988_v59 = vmul.f32 %v7508_v34, %v7921_v37  ;;  %v987_v47 = vmul.f32 %v7486_v21, %v7925_v46 }
 0x137   : > { %v7910_v10 = vld [vmem:[#allocation2 + $0xd9] sm:$0xff]  ;;  %v7949_v5 = vld [vmem:[#allocation2 + $0xe1] sm:$0xff] }
 0x138   : > { %v2429_v45 = vmul.f32 %v7483_v18, %v7910_v10  ;;  %v7927_v8 = vld [vmem:[#allocation2 + $0xdf] sm:$0xff]  ;;  %996 = vst.msk [vmem:[#allocation3 + $0x1b0] sm:$0xff] %vm375_vm0, %v988_v59  ;;  %995 = vst.msk [vmem:[#allocation3 + $0x198] sm:$0xff] %vm375_vm0, %v987_v47  ;;  %v2430_v13 = vmul.f32 %v7529_v44, %v7949_v5  ;;  %v7961_v14 = vld [vmem:[#allocation2 + $0xe7] sm:$0xff]  ;;  %v6720_v47 = vpop.f32.mrb[22].mxu0 }
 0x139   : > { %v989_v50 = vmul.f32 %v7566_v62, %v7927_v8  ;;  %v7957_v58 = vld [vmem:[#allocation2 + $0xe0] sm:$0xff] }
 0x13a   : > { %1251 = vrot.lane.b32.xlu1 %v1231_v60, %s7085_s21  ;;  %1989 = vrot.lane.b32.xlu0 %v1969_v2, %s7085_s21  ;;  %2437 = vst.msk [vmem:[#allocation3 + $0x190] sm:$0xff] %vm375_vm0, %v2429_v45  ;;  %v2516_v60 = vld [vmem:[#allocation3 + $0x178] sm:$0xff]  ;;  %1711 = vst.msk [vmem:[#allocation3 + $0x1b8] sm:$0xff] %vm375_vm0, %v7957_v58  ;;  %v990_v45 = vmul.f32 %v7586_v12, %v7961_v14 }
 0x13b   : > { %997 = vst.msk [vmem:[#allocation3 + $0x1c8] sm:$0xff] %vm375_vm0, %v989_v50  ;;  %4880 = vst.msk [vmem:[#allocation3 + $0x178] sm:$0xff] %vm375_vm0, %v2412_v36  ;;  %6763 = vmatmul.mubr.msk.f32.gmra.mrb[46].mxu0 %vm375_vm0, %v2516_v60  ;;  %v1748_v36 = vmul.f32 %v7367_v9, %v7667_v51  ;;  %v1970_v51 = vmul.f32 %v7716_v17, %v7723_v24  ;;  %v1747_v50 = vmul.f32 %v7657_v48, %v7685_v56 }
 0x13c   : > { %2438 = vst.msk [vmem:[#allocation3 + $0x1a8] sm:$0xff] %vm375_vm0, %v2430_v13  ;;  %998 = vst.msk [vmem:[#allocation3 + $0x1e0] sm:$0xff] %vm375_vm0, %v990_v45  ;;  %v654_v60 = vadd.f32 %v6720_v47, %v7427_v40  ;;  %v648_v13 = vpop.f32.mrb[23].mxu0  ;;  %v1234_v45 = vmul.f32 %v7367_v9, %v7685_v56 }
 0x13d   : > { %v7951_v0 = vld [vmem:[#allocation2 + $0xe9] sm:$0xff]  ;;  %v8013_v56 = vld [vmem:[#allocation2 + $0xf1] sm:$0xff] }
 0x13e   : > { %1476 = vrot.lane.b32.xlu1 %v1456_v29, %s7083_s18  ;;  %1253 = vrot.lane.b32.xlu0 %v1232_v31, %s7085_s21  ;;  %v2431_v27 = vmul.f32 %v7598_v16, %v7951_v0  ;;  %v7966_v29 = vld [vmem:[#allocation2 + $0xef] sm:$0xff]  ;;  %v1972_v31 = vmul.f32 %v7721_v23, %v1964_v63 }
 0x13f   : > { %v991_v32 = vmul.f32 %v7716_v17, %v7966_v29 }
 0x140   : > { %2439 = vst.msk [vmem:[#allocation3 + $0x1c0] sm:$0xff] %vm375_vm0, %v2431_v27  ;;  %v649_v27 = vadd.f32 %v7427_v40, %v648_v13 }
 0x141   : > { %v2519_v2 = vld [vmem:[#allocation3 + $0x190] sm:$0xff]  ;;  %999 = vst.msk [vmem:[#allocation3 + $0x1f8] sm:$0xff] %vm375_vm0, %v991_v32  ;;  %v1458_v32 = vmul.f32 %v7728_v25, %v7723_v24 }
 0x142   : > { %1056 = vrot.lane.b32.xlu1 %v1033_v1, %s7082_s14  ;;  %1478 = vrot.lane.b32.xlu0 %v1457_v22, %s7083_s18  ;;  %v1963_v22 = vld [vmem:[#allocation2 + $0x47] sm:$0xff]  ;;  %v8024_v24 = vld [vmem:[#allocation2 + $0xf0] sm:$0xff] }
 0x143   : > { %6765 = vmatprep.mubr.msk.f32.mxu0 %vm375_vm0, %v2519_v2  ;;  %v2522_v59 = vld [vmem:[#allocation3 + $0x1a8] sm:$0xff]  ;;  %v1971_v63 = vmul.f32 %v7728_v25, %v1963_v22  ;;  %1713 = vst.msk [vmem:[#allocation3 + $0x1e8] sm:$0xff] %vm375_vm0, %v8024_v24 }
 0x144   : > { %6766 = vmatmul.mubr.msk.f32.gmra.mrb[48].mxu0 %vm375_vm0, %v2522_v59 }
 0x146   : > { %2207 = vrot.lane.b32.xlu1 %v1033_v1, %s7083_s18  ;;  %2209 = vrot.lane.b32.xlu0 %v7671_v30, %s7083_s18  ;;  %v1704_v30 = vld [vmem:[#allocation2 + $0xe8] sm:$0xff]  ;;  %v1746_v1 = vmul.f32 %v7695_v49, %v7683_v55 }
 0x147   : > { %1712 = vst.msk [vmem:[#allocation3 + $0x1d0] sm:$0xff] %vm375_vm0, %v1704_v30  ;;  %v2525_v2 = vld [vmem:[#allocation3 + $0x1c0] sm:$0xff]  ;;  %v720_v30 = vmax.f32 %v654_v60, 0.0  ;;  %v8028_v60 = vld [vmem:[#allocation2 + $0xf7] sm:$0xff] }
 0x148   : > { %6768 = vmatprep.mubr.msk.f32.mxu0 %vm375_vm0, %v2525_v2 }
 0x149   : > { %762 = vst.msk [vmem:[#allocation2 + $0x108] sm:$0xff] %vm375_vm0, %v720_v30 }
 0x14a   : > { %1995 = vrot.lane.b32.xlu1 %v1972_v31, %s7085_s21  ;;  %1771 = vrot.lane.b32.xlu0 %v1748_v36, %s7082_s14  ;;  %v719_v31 = vmax.f32 %v649_v27, 0.0  ;;  %v1233_v36 = vmul.f32 %v7657_v48, %v7683_v55  ;;  %v1077_v55 = vld [vmem:[#allocation2 + $0x78] sm:$0xff] }
 0x14b   : > { %v1706_v27 = vld [vmem:[#allocation2 + $0xf8] sm:$0xff] }
 0x14c   : > { %761 = vst.msk [vmem:[#allocation2 + $0x100] sm:$0xff] %vm375_vm0, %v719_v31  ;;  %1714 = vst.msk [vmem:[#allocation3 + $0x200] sm:$0xff] %vm375_vm0, %v1706_v27  ;;  %v1276_v31 = vld [vmem:[#allocation2 + $0x69] sm:$0xff] }
 0x14e   : > { %1991 = vrot.lane.b32.xlu1 %v1970_v51, %s7085_s21  ;;  %1767 = vrot.lane.b32.xlu0 %v1746_v1, %s7082_s14  ;;  %v1459_v51 = vmul.f32 %v7721_v23, %v1963_v22  ;;  %v1076_v1 = vld [vmem:[#allocation2 + $0x70] sm:$0xff]  ;;  %v2432_v22 = vmul.f32 %v7625_v3, %v8013_v56 }
 0x150   : > { %v8015_v59 = vld [vmem:[#allocation2 + $0x109] sm:$0xff]  ;;  %2440 = vst.msk [vmem:[#allocation3 + $0x1d8] sm:$0xff] %vm375_vm0, %v2432_v22 }
 0x151   : > { %v2435_v47 = vmul.f32 %v7657_v48, %v8015_v59 }
 0x152   : > { %1769 = vrot.lane.b32.xlu1 %v1747_v50, %s7082_s14  ;;  %1993 = vrot.lane.b32.xlu0 %v1971_v63, %s7085_s21  ;;  %v1789_v63 = vld [vmem:[#allocation2 + $0x71] sm:$0xff] }
 0x153   : > { %v8019_v50 = vld [vmem:[#allocation2 + $0xf9] sm:$0xff]  ;;  %2443 = vst.msk [vmem:[#allocation3 + $0x220] sm:$0xff] %vm375_vm0, %v2435_v47  ;;  %v1797_v30 = vmul.f32 %v7483_v18, %v1789_v63 }
 0x154   : > { %v8030_v2 = vld [vmem:[#allocation2 + $0xff] sm:$0xff]  ;;  %v2433_v13 = vmul.f32 %v7690_v26, %v8019_v50 }
 0x156   : > { %1255 = vrot.lane.b32.xlu1 %v1233_v36, %s7085_s21  ;;  %1257 = vrot.lane.b32.xlu0 %v1234_v45, %s7085_s21  ;;  %2441 = vst.msk [vmem:[#allocation3 + $0x1f0] sm:$0xff] %vm375_vm0, %v2433_v13  ;;  %v992_v36 = vmul.f32 %v7728_v25, %v8028_v60  ;;  %v993_v45 = vmul.f32 %v7721_v23, %v8030_v2 }
 0x157   : > { %v2528_v13 = vld [vmem:[#allocation3 + $0x1d8] sm:$0xff] }
 0x158   : > { %1000 = vst.msk [vmem:[#allocation3 + $0x210] sm:$0xff] %vm375_vm0, %v992_v36  ;;  %1001 = vst.msk [vmem:[#allocation3 + $0x228] sm:$0xff] %vm375_vm0, %v993_v45  ;;  %v8058_v36 = vpop.permute.xlu1 %2211  ;;  %6769 = vmatmul.mubr.msk.f32.gmra.mrb[50].mxu0 %vm375_vm0, %v2528_v13  ;;  %v1078_v13 = vld [vmem:[#allocation2 + $0x80] sm:$0xff] }
 0x15a   : > { %1480 = vrot.lane.b32.xlu1 %v1458_v32, %s7083_s18  ;;  %1482 = vrot.lane.b32.xlu0 %v1459_v51, %s7083_s18  ;;  %v1284_v32 = vmul.f32 %v7483_v18, %v1276_v31  ;;  %v2021_v51 = vmul.f32 %v7389_v19, %v7761_v4  ;;  %v1285_v31 = vmul.f32 %v7529_v44, %v1789_v63 }
 0x15e   : > { %1093 = vrot.lane.b32.xlu1 %v1076_v1, %s7082_s14  ;;  %1095 = vrot.lane.b32.xlu0 %v1077_v55, %s7082_s14  ;;  %v6723_v1 = vpop.f32.mrb[24].mxu0 }
 0x15f   : > { %v664_v47 = vadd.f32 %v6723_v1, %v7427_v40  ;;  %v658_v22 = vpop.f32.mrb[25].mxu0 }
 0x160   : > { %v6726_v27 = vpop.f32.mrb[26].mxu0 }
 0x161   : > { %v722_v45 = vmax.f32 %v664_v47, 0.0  ;;  %v668_v57 = vpop.f32.mrb[27].mxu0 }
 0x162   : > { %1813 = vrot.lane.b32.xlu1 %v1797_v30, %s7082_s14  ;;  %2245 = vrot.lane.b32.xlu0 %v1077_v55, %s7083_s18  ;;  %v659_v55 = vadd.f32 %v7427_v40, %v658_v22  ;;  %v1509_v30 = vmul.f32 %v7389_v19, %v7763_v54  ;;  %v669_v22 = vadd.f32 %v7427_v40, %v668_v57  ;;  %v6729_v52 = vpop.f32.mrb[28].mxu0 }
 0x163   : > { %768 = vst.msk [vmem:[#allocation2 + $0x138] sm:$0xff] %vm375_vm0, %v722_v45  ;;  %v684_v63 = vadd.f32 %v6729_v52, %v7427_v40  ;;  %v678_v47 = vpop.f32.mrb[29].mxu0  ;;  %v1510_v57 = vmul.f32 %v7486_v21, %v7761_v4 }
 0x164   : > { %v721_v1 = vmax.f32 %v659_v55, 0.0  ;;  %v679_v55 = vadd.f32 %v7427_v40, %v678_v47 }
 0x166   : > { %1300 = vrot.lane.b32.xlu1 %v1284_v32, %s7085_s21  ;;  %2037 = vrot.lane.b32.xlu0 %v2021_v51, %s7085_s21  ;;  %v2531_v32 = vld [vmem:[#allocation3 + $0x1f0] sm:$0xff]  ;;  %v674_v51 = vadd.f32 %v6726_v27, %v7427_v40  ;;  %767 = vst.msk [vmem:[#allocation2 + $0x130] sm:$0xff] %vm375_vm0, %v721_v1  ;;  %v723_v27 = vmax.f32 %v669_v22, 0.0  ;;  %v725_v52 = vmax.f32 %v679_v55, 0.0  ;;  %v8078_v1 = vpop.permute.xlu1 %2259  ;;  %v2022_v55 = vmul.f32 %v7486_v21, %v7787_v28 }
 0x167   : > { %6771 = vmatprep.mubr.msk.f32.mxu0 %vm375_vm0, %v2531_v32  ;;  %v6732_v32 = vpop.f32.mrb[30].mxu0 }
 0x168   : > { %v724_v54 = vmax.f32 %v674_v51, 0.0  ;;  %v688_v45 = vpop.f32.mrb[31].mxu0  ;;  %769 = vst.msk [vmem:[#allocation2 + $0x140] sm:$0xff] %vm375_vm0, %v723_v27  ;;  %771 = vst.msk [vmem:[#allocation2 + $0x150] sm:$0xff] %vm375_vm0, %v725_v52  ;;  %v1798_v52 = vmul.f32 %v7529_v44, %v7775_v15 }
 0x169   : > { %v689_v51 = vadd.f32 %v7427_v40, %v688_v45  ;;  %v1799_v45 = vmul.f32 %v7598_v16, %v7777_v38 }
 0x16a   : > { %1525 = vrot.lane.b32.xlu1 %v1509_v30, %s7083_s18  ;;  %1302 = vrot.lane.b32.xlu0 %v1285_v31, %s7085_s21  ;;  %770 = vst.msk [vmem:[#allocation2 + $0x148] sm:$0xff] %vm375_vm0, %v724_v54  ;;  %v726_v30 = vmax.f32 %v684_v63, 0.0  ;;  %v694_v31 = vadd.f32 %v6732_v32, %v7427_v40  ;;  %v1079_v54 = vld [vmem:[#allocation2 + $0x88] sm:$0xff] }
 0x16b   : > { %v727_v22 = vmax.f32 %v689_v51, 0.0  ;;  %v8086_v40 = vld [vmem:[#allocation2 + $0x108] sm:$0xff] }
 0x16c   : > { %772 = vst.msk [vmem:[#allocation2 + $0x158] sm:$0xff] %vm375_vm0, %v726_v30  ;;  %v728_v4 = vmax.f32 %v694_v31, 0.0  ;;  %v8088_v63 = vld [vmem:[#allocation2 + $0x101] sm:$0xff]  ;;  %1716 = vst.msk [vmem:[#allocation3 + $0x230] sm:$0xff] %vm375_vm0, %v8086_v40 }
 0x16d   : > { %773 = vst.msk [vmem:[#allocation2 + $0x160] sm:$0xff] %vm375_vm0, %v727_v22  ;;  %v2434_v32 = vmul.f32 %v7695_v49, %v8088_v63 }
 0x16e   : > { %1097 = vrot.lane.b32.xlu1 %v1078_v13, %s7082_s14  ;;  %1527 = vrot.lane.b32.xlu0 %v1510_v57, %s7083_s18  ;;  %774 = vst.msk [vmem:[#allocation2 + $0x168] sm:$0xff] %vm375_vm0, %v728_v4 }
 0x16f   : > { %2442 = vst.msk [vmem:[#allocation3 + $0x208] sm:$0xff] %vm375_vm0, %v2434_v32 }
 0x172   : > { %2247 = vrot.lane.b32.xlu1 %v1078_v13, %s7083_s18  ;;  %1099 = vrot.lane.b32.xlu0 %v1079_v54, %s7082_s14  ;;  %v8097_v13 = vld [vmem:[#allocation2 + $0x100] sm:$0xff] }
 0x173   : > { %1715 = vst.msk [vmem:[#allocation3 + $0x218] sm:$0xff] %vm375_vm0, %v8097_v13 }
 0x174   : > { %v2198_v47 = vpop.permute.xlu0 %2197  ;;  %v1047_v27 = vpop.permute.xlu1 %1046 }
 0x175   : > { %1069 = vst.msk [vmem:[#allocation3 + $0x30] sm:$0xff] %vm1066_vm3, %v1047_v27  ;;  %v2451_v57 = vld [vmem:[#allocation2 + $0x169] sm:$0xff]  ;;  %v2023_v27 = vmul.f32 %v7508_v34, %v7789_v33 }
 0x176   : > { %2039 = vrot.lane.b32.xlu1 %v2022_v55, %s7085_s21  ;;  %2249 = vrot.lane.b32.xlu0 %v1079_v54, %s7083_s18  ;;  %v2459_v51 = vmul.f32 %v7657_v48, %v2451_v57  ;;  %v1286_v54 = vmul.f32 %v7598_v16, %v7775_v15  ;;  %v2537_v55 = vld [vmem:[#allocation3 + $0x220] sm:$0xff]  ;;  %v2534_v32 = vld [vmem:[#allocation3 + $0x208] sm:$0xff]  ;;  %v1511_v15 = vmul.f32 %v7508_v34, %v7787_v28 }
 0x177   : > { %6772 = vmatmul.mubr.msk.f32.gmra.mrb[52].mxu0 %vm375_vm0, %v2534_v32  ;;  %v1512_v28 = vmul.f32 %v7566_v62, %v7789_v33 }
 0x178   : > { %v1758_v30 = vpop.permute.xlu1 %1757  ;;  %v1045_v31 = vpop.permute.xlu0 %1044  ;;  %2467 = vst.msk [vmem:[#allocation3 + $0x2e0] sm:$0xff] %vm375_vm0, %v2459_v51  ;;  %6774 = vmatprep.mubr.msk.f32.mxu0 %vm375_vm0, %v2537_v55  ;;  %v2024_v55 = vmul.f32 %v7566_v62, %v7835_v20 }
 0x179   : > { %1781 = vst.msk [vmem:[#allocation3 + $0x8] sm:$0xff] %vm1066_vm3, %v1758_v30  ;;  %1068 = vst.msk [vmem:[#allocation3 + $0x18] sm:$0xff] %vm1066_vm3, %v1045_v31  ;;  %v1287_v31 = vmul.f32 %v7625_v3, %v7777_v38 }
 0x17a   : > { %1817 = vrot.lane.b32.xlu1 %v1799_v45, %s7082_s14  ;;  %1815 = vrot.lane.b32.xlu0 %v1798_v52, %s7082_s14 }
 0x17c   : > { %v1244_v4 = vpop.permute.xlu1 %1243  ;;  %v1982_v22 = vpop.permute.xlu0 %1981 }
 0x17d   : > { %1268 = vst.msk [vmem:[#allocation3] sm:$0xff] %vm1267_vm4, %v1244_v4  ;;  %2005 = vst.msk [vmem:[#allocation3 + $0x8] sm:$0xff] %vm1267_vm4, %v1982_v22 }
 0x17e   : > { %2221 = vst.msk [vmem:[#allocation3 + $0x8] sm:$0xff] %vm1492_vm5, %v2198_v47  ;;  %1304 = vrot.lane.b32.xlu1 %v1286_v54, %s7085_s21  ;;  %2041 = vrot.lane.b32.xlu0 %v2023_v27, %s7085_s21  ;;  %v1080_v47 = vld [vmem:[#allocation2 + $0x90] sm:$0xff]  ;;  %v1081_v54 = vld [vmem:[#allocation2 + $0x98] sm:$0xff] }
 0x180   : > { %v1469_v57 = vpop.permute.xlu1 %1468  ;;  %v1246_v30 = vpop.permute.xlu0 %1245 }
 0x181   : > { %1493 = vst.msk [vmem:[#allocation3] sm:$0xff] %vm1492_vm5, %v1469_v57 }
 0x182   : > { %1269 = vst.msk [vmem:[#allocation3 + $0x18] sm:$0xff] %vm1267_vm4, %v1246_v30  ;;  %1529 = vrot.lane.b32.xlu1 %v1511_v15, %s7083_s18  ;;  %1306 = vrot.lane.b32.xlu0 %v1287_v31, %s7085_s21  ;;  %v1801_v30 = vmul.f32 %v7690_v26, %v7800_v42  ;;  %v1800_v15 = vmul.f32 %v7625_v3, %v7798_v41 }
 0x184   : > { %v1049_v45 = vpop.permute.xlu1 %1048  ;;  %v1471_v52 = vpop.permute.xlu0 %1470 }
 0x185   : > { %1070 = vst.msk [vmem:[#allocation3 + $0x48] sm:$0xff] %vm1066_vm3, %v1049_v45  ;;  %v2470_v38 = vld [vmem:[#allocation3 + $0x8] sm:$0xff]  ;;  %v1288_v45 = vmul.f32 %v7690_v26, %v7798_v41  ;;  %v1513_v41 = vmul.f32 %v7586_v12, %v7835_v20  ;;  %v1004_v20 = vld [vmem:[#allocation2 + $0x137] sm:$0xff] }
 0x186   : > { %1494 = vst.msk [vmem:[#allocation3 + $0x18] sm:$0xff] %vm1492_vm5, %v1471_v52  ;;  %1101 = vrot.lane.b32.xlu1 %v1080_v47, %s7082_s14  ;;  %1531 = vrot.lane.b32.xlu0 %v1512_v28, %s7083_s18  ;;  %v2025_v52 = vmul.f32 %v7586_v12, %v7840_v7  ;;  %v8165_v28 = vld [vmem:[#allocation2 + $0x139] sm:$0xff] }
 0x187   : > { %2768 = vmatprep.mubr.f32.mxu1 %v2470_v38  ;;  %v2428_v38 = vld [vmem:[#allocation2 + $0x111] sm:$0xff] }
 0x188   : > { %v2200_v51 = vpop.permute.xlu1 %2199  ;;  %v1051_v4 = vpop.permute.xlu0 %1050  ;;  %v2469_v22 = vld [vmem:[#allocation3] sm:$0xff] }
 0x189   : > { %1071 = vst.msk [vmem:[#allocation3 + $0x60] sm:$0xff] %vm1066_vm3, %v1051_v4  ;;  %2769 = vmatmul.mubr.f32.vlgmr.msra.gmra.mrb[0].mxu1 %v2469_v22  ;;  %v1289_v22 = vmul.f32 %v7695_v49, %v7800_v42 }
 0x18a   : > { %2251 = vrot.lane.b32.xlu1 %v1080_v47, %s7083_s18  ;;  %1103 = vrot.lane.b32.xlu0 %v1081_v54, %s7082_s14 }
 0x18c   : > { %v1984_v33 = vpop.permute.xlu1 %1983  ;;  %v2202_v27 = vpop.permute.xlu0 %2201 }
 0x18e   : > { %2043 = vrot.lane.b32.xlu1 %v2024_v55, %s7085_s21  ;;  %2253 = vrot.lane.b32.xlu0 %v1081_v54, %s7083_s18  ;;  %v8171_v54 = vld [vmem:[#allocation2 + $0x138] sm:$0xff]  ;;  %v8178_v55 = vld [vmem:[#allocation2 + $0x12f] sm:$0xff] }
 0x18f   : > { %1726 = vst.msk [vmem:[#allocation3 + $0x260] sm:$0xff] %vm375_vm0, %v8171_v54 }
 0x190   : > { %v1762_v32 = vpop.permute.xlu1 %1761  ;;  %v1760_v57 = vpop.permute.xlu0 %1759 }
 0x191   : > { %1783 = vst.msk [vmem:[#allocation3 + $0x38] sm:$0xff] %vm1066_vm3, %v1762_v32  ;;  %1782 = vst.msk [vmem:[#allocation3 + $0x20] sm:$0xff] %vm1066_vm3, %v1760_v57  ;;  %v8180_v32 = vld [vmem:[#allocation2 + $0x130] sm:$0xff]  ;;  %v1005_v57 = vld [vmem:[#allocation2 + $0x13f] sm:$0xff] }
 0x192   : > { %2006 = vst.msk [vmem:[#allocation3 + $0x20] sm:$0xff] %vm1267_vm4, %v1984_v33  ;;  %1821 = vrot.lane.b32.xlu1 %v1801_v30, %s7082_s14  ;;  %1819 = vrot.lane.b32.xlu0 %v1800_v15, %s7082_s14  ;;  %v2436_v33 = vmul.f32 %v7367_v9, %v2428_v38  ;;  %v2472_v30 = vld [vmem:[#allocation3 + $0x18] sm:$0xff]  ;;  %v1082_v15 = vld [vmem:[#allocation2 + $0xa0] sm:$0xff]  ;;  %v1012_v38 = vmul.f32 %v7508_v34, %v1004_v20 }
 0x193   : > { %2222 = vst.msk [vmem:[#allocation3 + $0x20] sm:$0xff] %vm1492_vm5, %v2200_v51 }
 0x194   : > { %v1248_v31 = vpop.permute.xlu1 %1247  ;;  %v1986_v47 = vpop.permute.xlu0 %1985  ;;  %2444 = vst.msk [vmem:[#allocation3 + $0x238] sm:$0xff] %vm375_vm0, %v2436_v33  ;;  %1725 = vst.msk [vmem:[#allocation3 + $0x248] sm:$0xff] %vm375_vm0, %v8180_v32 }
 0x195   : > { %1270 = vst.msk [vmem:[#allocation3 + $0x30] sm:$0xff] %vm1267_vm4, %v1248_v31  ;;  %2007 = vst.msk [vmem:[#allocation3 + $0x38] sm:$0xff] %vm1267_vm4, %v1986_v47  ;;  %v1011_v31 = vmul.f32 %v7486_v21, %v8178_v55 }
 0x196   : > { %2223 = vst.msk [vmem:[#allocation3 + $0x38] sm:$0xff] %vm1492_vm5, %v2202_v27  ;;  %1308 = vrot.lane.b32.xlu1 %v1288_v45, %s7085_s21  ;;  %2045 = vrot.lane.b32.xlu0 %v2025_v52, %s7085_s21  ;;  %v2453_v27 = vmul.f32 %v7483_v18, %v8165_v28  ;;  %v1514_v52 = vmul.f32 %v7716_v17, %v7840_v7 }
 0x197   : > { %1019 = vst.msk [vmem:[#allocation3 + $0x258] sm:$0xff] %vm375_vm0, %v1011_v31  ;;  %1020 = vst.msk [vmem:[#allocation3 + $0x270] sm:$0xff] %vm375_vm0, %v1012_v38  ;;  %v8223_v38 = vld [vmem:[#allocation2 + $0x148] sm:$0xff] }
 0x198   : > { %v1473_v51 = vpop.permute.xlu1 %1472  ;;  %v1250_v4 = vpop.permute.xlu0 %1249  ;;  %2461 = vst.msk [vmem:[#allocation3 + $0x250] sm:$0xff] %vm375_vm0, %v2453_v27  ;;  %v2020_v27 = vld [vmem:[#allocation2 + $0xaf] sm:$0xff]  ;;  %1728 = vst.msk [vmem:[#allocation3 + $0x290] sm:$0xff] %vm375_vm0, %v8223_v38 }
 0x199   : > { %1495 = vst.msk [vmem:[#allocation3 + $0x30] sm:$0xff] %vm1492_vm5, %v1473_v51  ;;  %v1013_v51 = vmul.f32 %v7566_v62, %v1005_v57  ;;  %v8209_v57 = vld [vmem:[#allocation2 + $0x149] sm:$0xff] }
 0x19a   : > { %1271 = vst.msk [vmem:[#allocation3 + $0x48] sm:$0xff] %vm1267_vm4, %v1250_v4  ;;  %1533 = vrot.lane.b32.xlu1 %v1513_v41, %s7083_s18  ;;  %1310 = vrot.lane.b32.xlu0 %v1289_v22, %s7085_s21  ;;  %v2473_v42 = vld [vmem:[#allocation3 + $0x20] sm:$0xff] }
 0x19b   : > { %2773 = vmatprep.mubr.f32.mxu1 %v2473_v42  ;;  %1021 = vst.msk [vmem:[#allocation3 + $0x288] sm:$0xff] %vm375_vm0, %v1013_v51  ;;  %v8204_v42 = vld [vmem:[#allocation2 + $0x141] sm:$0xff]  ;;  %v2540_v20 = vld [vmem:[#allocation3 + $0x238] sm:$0xff] }
 0x19c   : > { %v1053_v47 = vpop.permute.xlu1 %1052  ;;  %v1475_v45 = vpop.permute.xlu0 %1474  ;;  %2774 = vmatmul.mubr.f32.gmra.mrb[2].mxu1 %v2472_v30  ;;  %4904 = vst.msk [vmem:[#allocation3 + $0x238] sm:$0xff] %vm375_vm0, %v2436_v33  ;;  %6775 = vmatmul.mubr.msk.f32.gmra.mrb[54].mxu0 %vm375_vm0, %v2540_v20  ;;  %v2455_v33 = vmul.f32 %v7598_v16, %v8209_v57  ;;  %v1006_v51 = vld [vmem:[#allocation2 + $0x147] sm:$0xff]  ;;  %v2026_v20 = vmul.f32 %v7716_v17, %v7844_v11 }
 0x19d   : > { %1072 = vst.msk [vmem:[#allocation3 + $0x78] sm:$0xff] %vm1066_vm3, %v1053_v47  ;;  %v2476_v4 = vld [vmem:[#allocation3 + $0x38] sm:$0xff] }
 0x19e   : > { %1496 = vst.msk [vmem:[#allocation3 + $0x48] sm:$0xff] %vm1492_vm5, %v1475_v45  ;;  %1105 = vrot.lane.b32.xlu1 %v1082_v15, %s7082_s14  ;;  %1535 = vrot.lane.b32.xlu0 %v1514_v52, %s7083_s18  ;;  %v2028_v45 = vmul.f32 %v7721_v23, %v2020_v27  ;;  %v1804_v52 = vmul.f32 %v7367_v9, %v7804_v43  ;;  %v1007_v43 = vld [vmem:[#allocation2 + $0x14f] sm:$0xff] }
 0x19f   : > { %2778 = vmatprep.mubr.f32.mxu1 %v2476_v4  ;;  %v2543_v30 = vld [vmem:[#allocation3 + $0x250] sm:$0xff]  ;;  %2463 = vst.msk [vmem:[#allocation3 + $0x280] sm:$0xff] %vm375_vm0, %v2455_v33  ;;  %v1014_v4 = vmul.f32 %v7586_v12, %v1006_v51  ;;  %v1803_v33 = vmul.f32 %v7657_v48, %v7818_v53 }
 0x1a0   : > { %v2204_v7 = vpop.permute.xlu1 %2203  ;;  %v1055_v41 = vpop.permute.xlu0 %1054  ;;  %v2475_v22 = vld [vmem:[#allocation3 + $0x30] sm:$0xff]  ;;  %6777 = vmatprep.mubr.msk.f32.mxu0 %vm375_vm0, %v2543_v30  ;;  %v1802_v30 = vmul.f32 %v7695_v49, %v7816_v39 }
 0x1a1   : > { %1073 = vst.msk [vmem:[#allocation3 + $0x90] sm:$0xff] %vm1066_vm3, %v1055_v41  ;;  %2779 = vmatmul.mubr.f32.gmra.mrb[4].mxu1 %v2475_v22  ;;  %v1015_v41 = vmul.f32 %v7716_v17, %v1007_v43 }
 0x1a2   : > { %2255 = vrot.lane.b32.xlu1 %v1082_v15, %s7083_s18  ;;  %2257 = vrot.lane.b32.xlu0 %v7837_v6, %s7083_s18  ;;  %v8217_v15 = vld [vmem:[#allocation2 + $0x140] sm:$0xff]  ;;  %v2454_v6 = vmul.f32 %v7529_v44, %v8204_v42  ;;  %1022 = vst.msk [vmem:[#allocation3 + $0x2a0] sm:$0xff] %vm375_vm0, %v1014_v4 }
 0x1a3   : > { %1727 = vst.msk [vmem:[#allocation3 + $0x278] sm:$0xff] %vm375_vm0, %v8217_v15  ;;  %1023 = vst.msk [vmem:[#allocation3 + $0x2b8] sm:$0xff] %vm375_vm0, %v1015_v41  ;;  %v1290_v41 = vmul.f32 %v7657_v48, %v7816_v39  ;;  %v1515_v39 = vmul.f32 %v7728_v25, %v7844_v11  ;;  %v8276_v11 = vld [vmem:[#allocation2 + $0x159] sm:$0xff] }
 0x1a4   : > { %v1988_v31 = vpop.permute.xlu1 %1987  ;;  %v2206_v47 = vpop.permute.xlu0 %2205  ;;  %2462 = vst.msk [vmem:[#allocation3 + $0x268] sm:$0xff] %vm375_vm0, %v2454_v6 }
 0x1a6   : > { %2051 = vrot.lane.b32.xlu1 %v2028_v45, %s7085_s21  ;;  %1827 = vrot.lane.b32.xlu0 %v1804_v52, %s7082_s14  ;;  %v2019_v45 = vld [vmem:[#allocation2 + $0xa7] sm:$0xff] }
 0x1a7   : > { %v2027_v51 = vmul.f32 %v7728_v25, %v2019_v45 }
 0x1a8   : > { %v1766_v22 = vpop.permute.xlu1 %1765  ;;  %v1764_v27 = vpop.permute.xlu0 %1763 }
 0x1a9   : > { %1785 = vst.msk [vmem:[#allocation3 + $0x68] sm:$0xff] %vm1066_vm3, %v1766_v22  ;;  %1784 = vst.msk [vmem:[#allocation3 + $0x50] sm:$0xff] %vm1066_vm3, %v1764_v27  ;;  %v1291_v22 = vmul.f32 %v7367_v9, %v7818_v53  ;;  %v2478_v27 = vld [vmem:[#allocation3 + $0x48] sm:$0xff]  ;;  %v1516_v53 = vmul.f32 %v7721_v23, %v2019_v45 }
 0x1aa   : > { %2008 = vst.msk [vmem:[#allocation3 + $0x50] sm:$0xff] %vm1267_vm4, %v1988_v31  ;;  %2047 = vrot.lane.b32.xlu1 %v2026_v20, %s7085_s21  ;;  %1823 = vrot.lane.b32.xlu0 %v1802_v30, %s7082_s14  ;;  %v2549_v31 = vld [vmem:[#allocation3 + $0x280] sm:$0xff] }
 0x1ab   : > { %2224 = vst.msk [vmem:[#allocation3 + $0x50] sm:$0xff] %vm1492_vm5, %v2204_v7  ;;  %v2546_v43 = vld [vmem:[#allocation3 + $0x268] sm:$0xff] }
 0x1ac   : > { %v1252_v52 = vpop.permute.xlu1 %1251  ;;  %v1990_v6 = vpop.permute.xlu0 %1989  ;;  %6778 = vmatmul.mubr.msk.f32.gmra.mrb[56].mxu0 %vm375_vm0, %v2546_v43 }
 0x1ad   : > { %1272 = vst.msk [vmem:[#allocation3 + $0x60] sm:$0xff] %vm1267_vm4, %v1252_v52  ;;  %2009 = vst.msk [vmem:[#allocation3 + $0x68] sm:$0xff] %vm1267_vm4, %v1990_v6  ;;  %6780 = vmatprep.mubr.msk.f32.mxu0 %vm375_vm0, %v2549_v31  ;;  %v1125_v6 = vld [vmem:[#allocation2 + $0xd8] sm:$0xff] }
 0x1ae   : > { %2225 = vst.msk [vmem:[#allocation3 + $0x68] sm:$0xff] %vm1492_vm5, %v2206_v47  ;;  %1825 = vrot.lane.b32.xlu1 %v1803_v33, %s7082_s14  ;;  %2049 = vrot.lane.b32.xlu0 %v2027_v51, %s7085_s21  ;;  %v8272_v31 = vld [vmem:[#allocation2 + $0x151] sm:$0xff] }
 0x1b0   : > { %v1477_v7 = vpop.permute.xlu1 %1476  ;;  %v1254_v4 = vpop.permute.xlu0 %1253 }
 0x1b1   : > { %1497 = vst.msk [vmem:[#allocation3 + $0x60] sm:$0xff] %vm1492_vm5, %v1477_v7 }
 0x1b2   : > { %1273 = vst.msk [vmem:[#allocation3 + $0x78] sm:$0xff] %vm1267_vm4, %v1254_v4  ;;  %1312 = vrot.lane.b32.xlu1 %v1290_v41, %s7085_s21  ;;  %1314 = vrot.lane.b32.xlu0 %v1291_v22, %s7085_s21  ;;  %v2479_v47 = vld [vmem:[#allocation3 + $0x50] sm:$0xff]  ;;  %v2077_v4 = vmul.f32 %v7389_v19, %v7921_v37  ;;  %v2456_v22 = vmul.f32 %v7625_v3, %v8272_v31 }
 0x1b3   : > { %2783 = vmatprep.mubr.f32.mxu1 %v2479_v47  ;;  %v8280_v41 = vld [vmem:[#allocation2 + $0x150] sm:$0xff] }
 0x1b4   : > { %v1057_v20 = vpop.permute.xlu1 %1056  ;;  %v1479_v30 = vpop.permute.xlu0 %1478  ;;  %2784 = vmatmul.mubr.f32.gmra.mrb[6].mxu1 %v2478_v27  ;;  %v1845_v47 = vld [vmem:[#allocation2 + $0xd1] sm:$0xff]  ;;  %v2457_v27 = vmul.f32 %v7690_v26, %v8276_v11  ;;  %1729 = vst.msk [vmem:[#allocation3 + $0x2a8] sm:$0xff] %vm375_vm0, %v8280_v41  ;;  %2464 = vst.msk [vmem:[#allocation3 + $0x298] sm:$0xff] %vm375_vm0, %v2456_v22 }
 0x1b5   : > { %1074 = vst.msk [vmem:[#allocation3 + $0xa8] sm:$0xff] %vm1066_vm3, %v1057_v20  ;;  %v2482_v52 = vld [vmem:[#allocation3 + $0x68] sm:$0xff]  ;;  %v8287_v20 = vld [vmem:[#allocation2 + $0x158] sm:$0xff] }
 0x1b6   : > { %1498 = vst.msk [vmem:[#allocation3 + $0x78] sm:$0xff] %vm1492_vm5, %v1479_v30  ;;  %1537 = vrot.lane.b32.xlu1 %v1515_v39, %s7083_s18  ;;  %1539 = vrot.lane.b32.xlu0 %v1516_v53, %s7083_s18  ;;  %v1008_v30 = vld [vmem:[#allocation2 + $0x157] sm:$0xff]  ;;  %v1009_v39 = vld [vmem:[#allocation2 + $0x15f] sm:$0xff]  ;;  %v8300_v53 = vld [vmem:[#allocation2 + $0xe8] sm:$0xff] }
 0x1b7   : > { %2788 = vmatprep.mubr.f32.mxu1 %v2482_v52  ;;  %1730 = vst.msk [vmem:[#allocation3 + $0x2c0] sm:$0xff] %vm375_vm0, %v8287_v20  ;;  %2465 = vst.msk [vmem:[#allocation3 + $0x2b0] sm:$0xff] %vm375_vm0, %v2457_v27  ;;  %v1016_v52 = vmul.f32 %v7728_v25, %v1008_v30 }
 0x1b8   : > { %v2208_v33 = vpop.permute.xlu1 %2207  ;;  %v2210_v51 = vpop.permute.xlu0 %2209  ;;  %v2481_v43 = vld [vmem:[#allocation3 + $0x60] sm:$0xff] }
 0x1b9   : > { %2789 = vmatmul.mubr.f32.gmra.mrb[8].mxu1 %v2481_v43  ;;  %1024 = vst.msk [vmem:[#allocation3 + $0x2d0] sm:$0xff] %vm375_vm0, %v1016_v52  ;;  %v1565_v52 = vmul.f32 %v7389_v19, %v7925_v46  ;;  %v1341_v46 = vmul.f32 %v7529_v44, %v1845_v47 }
 0x1ba   : > { %1143 = vrot.lane.b32.xlu1 %v1125_v6, %s7082_s14  ;;  %2293 = vrot.lane.b32.xlu0 %v1125_v6, %s7083_s18  ;;  %v1017_v6 = vmul.f32 %v7721_v23, %v1009_v39 }
 0x1bb   : > { %v2552_v27 = vld [vmem:[#allocation3 + $0x298] sm:$0xff] }
 0x1bc   : > { %v1996_v45 = vpop.permute.xlu1 %1995  ;;  %v1772_v7 = vpop.permute.xlu0 %1771  ;;  %1025 = vst.msk [vmem:[#allocation3 + $0x2e8] sm:$0xff] %vm375_vm0, %v1017_v6  ;;  %6781 = vmatmul.mubr.msk.f32.gmra.mrb[58].mxu0 %vm375_vm0, %v2552_v27  ;;  %v1854_v6 = vmul.f32 %v7529_v44, %v7910_v10  ;;  %v1566_v27 = vmul.f32 %v7486_v21, %v7921_v37  ;;  %v8350_v37 = vld [vmem:[#allocation2 + $0x160] sm:$0xff] }
 0x1bd   : > { %1788 = vst.msk [vmem:[#allocation3 + $0xb0] sm:$0xff] %vm1066_vm3, %v1772_v7  ;;  %v1332_v7 = vld [vmem:[#allocation2 + $0xc9] sm:$0xff] }
 0x1be   : > { %2012 = vst.msk [vmem:[#allocation3 + $0xb0] sm:$0xff] %vm1267_vm4, %v1996_v45  ;;  %1141 = vrot.lane.b32.xlu1 %v7918_v35, %s7082_s14  ;;  %2093 = vrot.lane.b32.xlu0 %v2077_v4, %s7085_s21  ;;  %v1853_v45 = vmul.f32 %v7483_v18, %v1845_v47  ;;  %v1340_v22 = vmul.f32 %v7483_v18, %v1332_v7  ;;  %v2555_v30 = vld [vmem:[#allocation3 + $0x2b0] sm:$0xff] }
 0x1bf   : > { %2228 = vst.msk [vmem:[#allocation3 + $0xb0] sm:$0xff] %vm1492_vm5, %v8058_v36  ;;  %6783 = vmatprep.mubr.msk.f32.mxu0 %vm375_vm0, %v2555_v30  ;;  %v2078_v7 = vmul.f32 %v7486_v21, %v7927_v8  ;;  %v1855_v47 = vmul.f32 %v7598_v16, %v7949_v5  ;;  %v8344_v30 = vld [vmem:[#allocation2 + $0x161] sm:$0xff] }
 0x1c0   : > { %v1992_v35 = vpop.permute.xlu1 %1991  ;;  %v1768_v43 = vpop.permute.xlu0 %1767  ;;  %1731 = vst.msk [vmem:[#allocation3 + $0x2d8] sm:$0xff] %vm375_vm0, %v8350_v37 }
 0x1c1   : > { %1786 = vst.msk [vmem:[#allocation3 + $0x80] sm:$0xff] %vm1066_vm3, %v1768_v43 }
 0x1c2   : > { %2010 = vst.msk [vmem:[#allocation3 + $0x80] sm:$0xff] %vm1267_vm4, %v1992_v35  ;;  %1869 = vrot.lane.b32.xlu1 %v1853_v45, %s7082_s14  ;;  %2297 = vrot.lane.b32.xlu0 %v8300_v53, %s7083_s18  ;;  %v2484_v35 = vld [vmem:[#allocation3 + $0x78] sm:$0xff] }
 0x1c3   : > { %2226 = vst.msk [vmem:[#allocation3 + $0x80] sm:$0xff] %vm1492_vm5, %v2208_v33 }
 0x1c4   : > { %v1770_v36 = vpop.permute.xlu1 %1769  ;;  %v1994_v4 = vpop.permute.xlu0 %1993 }
 0x1c5   : > { %1787 = vst.msk [vmem:[#allocation3 + $0x98] sm:$0xff] %vm1066_vm3, %v1770_v36 }
 0x1c6   : > { %2011 = vst.msk [vmem:[#allocation3 + $0x98] sm:$0xff] %vm1267_vm4, %v1994_v4  ;;  %1356 = vrot.lane.b32.xlu1 %v1340_v22, %s7085_s21  ;;  %2295 = vrot.lane.b32.xlu0 %v7957_v58, %s7083_s18 }
 0x1c7   : > { %2227 = vst.msk [vmem:[#allocation3 + $0x98] sm:$0xff] %vm1492_vm5, %v2210_v51 }
 0x1c8   : > { %v1256_v33 = vpop.permute.xlu1 %1255  ;;  %v1258_v39 = vpop.permute.xlu0 %1257 }
 0x1c9   : > { %1274 = vst.msk [vmem:[#allocation3 + $0x90] sm:$0xff] %vm1267_vm4, %v1256_v33  ;;  %1275 = vst.msk [vmem:[#allocation3 + $0xa8] sm:$0xff] %vm1267_vm4, %v1258_v39 }
 0x1ca   : > { %1581 = vrot.lane.b32.xlu1 %v1565_v52, %s7083_s18  ;;  %1871 = vrot.lane.b32.xlu0 %v1854_v6, %s7082_s14  ;;  %v2485_v51 = vld [vmem:[#allocation3 + $0x80] sm:$0xff]  ;;  %v2079_v6 = vmul.f32 %v7508_v34, %v7961_v14 }
 0x1cb   : > { %2793 = vmatprep.mubr.f32.mxu1 %v2485_v51  ;;  %v2458_v51 = vmul.f32 %v7695_v49, %v8344_v30 }
 0x1cc   : > { %v1481_v43 = vpop.permute.xlu1 %1480  ;;  %v1483_v45 = vpop.permute.xlu0 %1482  ;;  %2794 = vmatmul.mubr.f32.gmra.mrb[10].mxu1 %v2484_v35  ;;  %v8355_v35 = vld [vmem:[#allocation2 + $0x168] sm:$0xff] }
 0x1cd   : > { %1499 = vst.msk [vmem:[#allocation3 + $0x90] sm:$0xff] %vm1492_vm5, %v1481_v43  ;;  %1500 = vst.msk [vmem:[#allocation3 + $0xa8] sm:$0xff] %vm1492_vm5, %v1483_v45  ;;  %v2491_v43 = vld [vmem:[#allocation3 + $0xb0] sm:$0xff]  ;;  %v2281_v45 = vld [vmem:[#allocation2 + $0xf8] sm:$0xff] }
 0x1ce   : > { %1358 = vrot.lane.b32.xlu1 %v1341_v46, %s7085_s21  ;;  %2095 = vrot.lane.b32.xlu0 %v2078_v7, %s7085_s21  ;;  %v2488_v36 = vld [vmem:[#allocation3 + $0x98] sm:$0xff]  ;;  %2466 = vst.msk [vmem:[#allocation3 + $0x2c8] sm:$0xff] %vm375_vm0, %v2458_v51  ;;  %1732 = vst.msk [vmem:[#allocation3 + $0x2f0] sm:$0xff] %vm375_vm0, %v8355_v35 }
 0x1cf   : > { %2798 = vmatprep.mubr.f32.mxu1 %v2488_v36 }
 0x1d0   : > { %v1094_v4 = vpop.permute.xlu1 %1093  ;;  %v1096_v22 = vpop.permute.xlu0 %1095 }
 0x1d1   : > { %1116 = vst.msk [vmem:[#allocation3 + $0xd8] sm:$0xff] %vm1066_vm3, %v1094_v4  ;;  %1117 = vst.msk [vmem:[#allocation3 + $0xf0] sm:$0xff] %vm1066_vm3, %v1096_v22  ;;  %v1342_v22 = vmul.f32 %v7598_v16, %v7910_v10  ;;  %v1856_v10 = vmul.f32 %v7625_v3, %v7951_v0  ;;  %v2080_v0 = vmul.f32 %v7566_v62, %v7966_v29 }
 0x1d2   : > { %1583 = vrot.lane.b32.xlu1 %v1566_v27, %s7083_s18  ;;  %1873 = vrot.lane.b32.xlu0 %v1855_v47, %s7082_s14  ;;  %v2561_v47 = vld [vmem:[#allocation3 + $0x2e0] sm:$0xff] }
 0x1d4   : > { %v1814_v33 = vpop.permute.xlu1 %1813  ;;  %v2246_v39 = vpop.permute.xlu0 %2245  ;;  %v2487_v52 = vld [vmem:[#allocation3 + $0x90] sm:$0xff]  ;;  %v2490_v36 = vld [vmem:[#allocation3 + $0xa8] sm:$0xff] }
 0x1d5   : > { %1837 = vst.msk [vmem:[#allocation3 + $0xc8] sm:$0xff] %vm1066_vm3, %v1814_v33  ;;  %2799 = vmatmul.mubr.f32.gmra.mrb[12].mxu1 %v2487_v52  ;;  %v2558_v27 = vld [vmem:[#allocation3 + $0x2c8] sm:$0xff] }
 0x1d6   : > { %1147 = vrot.lane.b32.xlu1 %v8300_v53, %s7082_s14  ;;  %2097 = vrot.lane.b32.xlu0 %v2079_v6, %s7085_s21 }
 0x1d7   : > { %2803 = vmatprep.mubr.f32.mxu1 %v2491_v43  ;;  %6784 = vmatmul.mubr.msk.f32.gmra.mrb[60].mxu0 %vm375_vm0, %v2558_v27 }
 0x1d8   : > { %v1301_v46 = vpop.permute.xlu1 %1300  ;;  %v2038_v7 = vpop.permute.xlu0 %2037  ;;  %6786 = vmatprep.mubr.msk.f32.mxu0 %vm375_vm0, %v2561_v47 }
 0x1d9   : > { %1324 = vst.msk [vmem:[#allocation3 + $0xc0] sm:$0xff] %vm1267_vm4, %v1301_v46  ;;  %2061 = vst.msk [vmem:[#allocation3 + $0xc8] sm:$0xff] %vm1267_vm4, %v2038_v7  ;;  %2804 = vmatmul.mubr.f32.gmra.mrb[14].mxu1 %v2490_v36 }
 0x1da   : > { %2269 = vst.msk [vmem:[#allocation3 + $0xc8] sm:$0xff] %vm1492_vm5, %v2246_v39  ;;  %1145 = vrot.lane.b32.xlu1 %v7957_v58, %s7082_s14  ;;  %2301 = vrot.lane.b32.xlu0 %v2281_v45, %s7083_s18  ;;  %v1567_v39 = vmul.f32 %v7508_v34, %v7927_v8  ;;  %v1343_v8 = vmul.f32 %v7625_v3, %v7949_v5 }
 0x1db   : > { %v1857_v5 = vmul.f32 %v7690_v26, %v8013_v56 }
 0x1dc   : > { %v1526_v53 = vpop.permute.xlu1 %1525  ;;  %v1303_v4 = vpop.permute.xlu0 %1302 }
 0x1dd   : > { %1549 = vst.msk [vmem:[#allocation3 + $0xc0] sm:$0xff] %vm1492_vm5, %v1526_v53 }
 0x1de   : > { %1325 = vst.msk [vmem:[#allocation3 + $0xd8] sm:$0xff] %vm1267_vm4, %v1303_v4  ;;  %1360 = vrot.lane.b32.xlu1 %v1342_v22, %s7085_s21  ;;  %2299 = vrot.lane.b32.xlu0 %v8024_v24, %s7083_s18  ;;  %v1568_v4 = vmul.f32 %v7566_v62, %v7961_v14 }
 0x1e0   : > { %v1098_v58 = vpop.permute.xlu1 %1097  ;;  %v1528_v33 = vpop.permute.xlu0 %1527 }
 0x1e1   : > { %1118 = vst.msk [vmem:[#allocation3 + $0x108] sm:$0xff] %vm1066_vm3, %v1098_v58  ;;  %v2494_v52 = vld [vmem:[#allocation3 + $0xc8] sm:$0xff]  ;;  %v2081_v58 = vmul.f32 %v7586_v12, %v8028_v60 }
 0x1e2   : > { %1550 = vst.msk [vmem:[#allocation3 + $0xd8] sm:$0xff] %vm1492_vm5, %v1528_v33  ;;  %1585 = vrot.lane.b32.xlu1 %v1567_v39, %s7083_s18  ;;  %1875 = vrot.lane.b32.xlu0 %v1856_v10, %s7082_s14 }
 0x1e3   : > { %2808 = vmatprep.mubr.f32.mxu1 %v2494_v52 }
 0x1e4   : > { %v2248_v6 = vpop.permute.xlu1 %2247  ;;  %v1100_v51 = vpop.permute.xlu0 %1099  ;;  %v2493_v43 = vld [vmem:[#allocation3 + $0xc0] sm:$0xff] }
 0x1e5   : > { %1119 = vst.msk [vmem:[#allocation3 + $0x120] sm:$0xff] %vm1066_vm3, %v1100_v51  ;;  %2809 = vmatmul.mubr.f32.gmra.mrb[16].mxu1 %v2493_v43  ;;  %v7009_v43 = vld [vmem:[#allocation2 + $0xe9] sm:$0xff] }
 0x1e6   : > { %1362 = vrot.lane.b32.xlu1 %v1343_v8, %s7085_s21  ;;  %2099 = vrot.lane.b32.xlu0 %v2080_v0, %s7085_s21  ;;  %v8395_v46 = vpop.f32.mrb[32].mxu0  ;;  %v1344_v8 = vmul.f32 %v7009_v43, %v7690_v26 }
 0x1e7   : > { %v8397_v7 = vpop.f32.mrb[33].mxu0 }
 0x1e8   : > { %v2040_v36 = vpop.permute.xlu1 %2039  ;;  %v2250_v53 = vpop.permute.xlu0 %2249 }
 0x1ea   : > { %1587 = vrot.lane.b32.xlu1 %v1568_v4, %s7083_s18  ;;  %1877 = vrot.lane.b32.xlu0 %v1857_v5, %s7082_s14  ;;  %v8405_v29 = vpop.f32.mrb[34].mxu0  ;;  %v1860_v5 = vmul.f32 %v7367_v9, %v8015_v59  ;;  %v1345_v59 = vmul.f32 %v7695_v49, %v8013_v56  ;;  %v1858_v56 = vmul.f32 %v7695_v49, %v8019_v50 }
 0x1eb   : > { %v8407_v22 = vpop.f32.mrb[35].mxu0 }
 0x1ec   : > { %v1818_v27 = vpop.permute.xlu1 %1817  ;;  %v1816_v47 = vpop.permute.xlu0 %1815 }
 0x1ed   : > { %1839 = vst.msk [vmem:[#allocation3 + $0xf8] sm:$0xff] %vm1066_vm3, %v1818_v27  ;;  %1838 = vst.msk [vmem:[#allocation3 + $0xe0] sm:$0xff] %vm1066_vm3, %v1816_v47  ;;  %v2076_v47 = vld [vmem:[#allocation2 + $0x10f] sm:$0xff] }
 0x1ee   : > { %2062 = vst.msk [vmem:[#allocation3 + $0xe0] sm:$0xff] %vm1267_vm4, %v2040_v36  ;;  %1151 = vrot.lane.b32.xlu1 %v2281_v45, %s7082_s14  ;;  %2101 = vrot.lane.b32.xlu0 %v2081_v58, %s7085_s21  ;;  %v8416_v14 = vpop.f32.mrb[36].mxu0  ;;  %v2084_v43 = vmul.f32 %v7721_v23, %v2076_v47  ;;  %v2082_v47 = vmul.f32 %v7716_v17, %v8030_v2 }
 0x1ef   : > { %2270 = vst.msk [vmem:[#allocation3 + $0xe0] sm:$0xff] %vm1492_vm5, %v2248_v6  ;;  %v8419_v33 = vpop.f32.mrb[37].mxu0  ;;  %v1859_v2 = vmul.f32 %v7657_v48, %v8088_v63 }
 0x1f0   : > { %v1305_v39 = vpop.permute.xlu1 %1304  ;;  %v2042_v10 = vpop.permute.xlu0 %2041 }
 0x1f1   : > { %1326 = vst.msk [vmem:[#allocation3 + $0xf0] sm:$0xff] %vm1267_vm4, %v1305_v39  ;;  %2063 = vst.msk [vmem:[#allocation3 + $0xf8] sm:$0xff] %vm1267_vm4, %v2042_v10 }
 0x1f2   : > { %2271 = vst.msk [vmem:[#allocation3 + $0xf8] sm:$0xff] %vm1492_vm5, %v2250_v53  ;;  %1149 = vrot.lane.b32.xlu1 %v8024_v24, %s7082_s14  ;;  %2305 = vrot.lane.b32.xlu0 %v8086_v40, %s7083_s18  ;;  %v8428_v45 = vpop.f32.mrb[38].mxu0  ;;  %v2496_v40 = vld [vmem:[#allocation3 + $0xd8] sm:$0xff]  ;;  %v7010_v53 = vld [vmem:[#allocation2 + $0xef] sm:$0xff] }
 0x1f3   : > { %v8430_v52 = vpop.f32.mrb[39].mxu0  ;;  %v1569_v4 = vmul.f32 %v7010_v53, %v7586_v12 }
 0x1f4   : > { %v1530_v6 = vpop.permute.xlu1 %1529  ;;  %v1307_v51 = vpop.permute.xlu0 %1306 }
 0x1f5   : > { %1551 = vst.msk [vmem:[#allocation3 + $0xf0] sm:$0xff] %vm1492_vm5, %v1530_v6 }
 0x1f6   : > { %1327 = vst.msk [vmem:[#allocation3 + $0x108] sm:$0xff] %vm1267_vm4, %v1307_v51  ;;  %1364 = vrot.lane.b32.xlu1 %v1344_v8, %s7085_s21  ;;  %2303 = vrot.lane.b32.xlu0 %v8097_v13, %s7083_s18  ;;  %v2497_v24 = vld [vmem:[#allocation3 + $0xe0] sm:$0xff] }
 0x1f7   : > { %2813 = vmatprep.mubr.f32.mxu1 %v2497_v24  ;;  %v8445_v58 = vpop.f32.mrb[40].mxu0 }
 0x1f8   : > { %v1102_v0 = vpop.permute.xlu1 %1101  ;;  %v1532_v36 = vpop.permute.xlu0 %1531  ;;  %2814 = vmatmul.mubr.f32.gmra.mrb[18].mxu1 %v2496_v40 }
 0x1f9   : > { %1120 = vst.msk [vmem:[#allocation3 + $0x138] sm:$0xff] %vm1066_vm3, %v1102_v0  ;;  %v2500_v27 = vld [vmem:[#allocation3 + $0xf8] sm:$0xff]  ;;  %v8447_v39 = vpop.f32.mrb[41].mxu0 }
 0x1fa   : > { %1552 = vst.msk [vmem:[#allocation3 + $0x108] sm:$0xff] %vm1492_vm5, %v1532_v36  ;;  %1589 = vrot.lane.b32.xlu1 %v1569_v4, %s7083_s18  ;;  %1883 = vrot.lane.b32.xlu0 %v1860_v5, %s7082_s14  ;;  %v1570_v36 = vmul.f32 %v7716_v17, %v8028_v60 }
 0x1fb   : > { %2818 = vmatprep.mubr.f32.mxu1 %v2500_v27  ;;  %v8455_v8 = vpop.f32.mrb[42].mxu0 }
 0x1fc   : > { %v2252_v10 = vpop.permute.xlu1 %2251  ;;  %v1104_v6 = vpop.permute.xlu0 %1103  ;;  %v2499_v51 = vld [vmem:[#allocation3 + $0xf0] sm:$0xff] }
 0x1fd   : > { %1121 = vst.msk [vmem:[#allocation3 + $0x150] sm:$0xff] %vm1066_vm3, %v1104_v6  ;;  %2819 = vmatmul.mubr.f32.gmra.mrb[20].mxu1 %v2499_v51  ;;  %v8457_v24 = vpop.f32.mrb[43].mxu0  ;;  %v7011_v6 = vld [vmem:[#allocation2 + $0xf9] sm:$0xff] }
 0x1fe   : > { %1366 = vrot.lane.b32.xlu1 %v1345_v59, %s7085_s21  ;;  %2107 = vrot.lane.b32.xlu0 %v2084_v43, %s7085_s21  ;;  %v1346_v51 = vmul.f32 %v7011_v6, %v7657_v48  ;;  %v2075_v59 = vld [vmem:[#allocation2 + $0x107] sm:$0xff]  ;;  %v7012_v43 = vld [vmem:[#allocation2 + $0xff] sm:$0xff] }
 0x1ff   : > { %v8465_v53 = vpop.f32.mrb[44].mxu0 }
 0x200   : > { %v2044_v40 = vpop.permute.xlu1 %2043  ;;  %v2254_v0 = vpop.permute.xlu0 %2253 }
 0x201   : > { %v8467_v4 = vpop.f32.mrb[45].mxu0 }
 0x202   : > { %1591 = vrot.lane.b32.xlu1 %v1570_v36, %s7083_s18  ;;  %1879 = vrot.lane.b32.xlu0 %v1858_v56, %s7082_s14  ;;  %v2083_v36 = vmul.f32 %v7728_v25, %v2075_v59  ;;  %v1002_v56 = vld [vmem:[#allocation2 + $0x127] sm:$0xff] }
 0x204   : > { %v1822_v5 = vpop.permute.xlu1 %1821  ;;  %v1820_v27 = vpop.permute.xlu0 %1819 }
 0x205   : > { %1841 = vst.msk [vmem:[#allocation3 + $0x128] sm:$0xff] %vm1066_vm3, %v1822_v5  ;;  %1840 = vst.msk [vmem:[#allocation3 + $0x110] sm:$0xff] %vm1066_vm3, %v1820_v27  ;;  %v1010_v5 = vmul.f32 %v7389_v19, %v1002_v56  ;;  %v2502_v27 = vld [vmem:[#allocation3 + $0x108] sm:$0xff] }
 0x206   : > { %2064 = vst.msk [vmem:[#allocation3 + $0x110] sm:$0xff] %vm1267_vm4, %v2044_v40  ;;  %1153 = vrot.lane.b32.xlu1 %v8097_v13, %s7082_s14  ;;  %2103 = vrot.lane.b32.xlu0 %v2082_v47, %s7085_s21  ;;  %v1571_v40 = vmul.f32 %v7012_v43, %v7728_v25  ;;  %v8493_v47 = vld [vmem:[#allocation2 + $0x110] sm:$0xff]  ;;  %v8510_v56 = vld [vmem:[#allocation2 + $0x128] sm:$0xff] }
 0x207   : > { %2272 = vst.msk [vmem:[#allocation3 + $0x110] sm:$0xff] %vm1492_vm5, %v2252_v10 }
 0x208   : > { %v1309_v50 = vpop.permute.xlu1 %1308  ;;  %v2046_v60 = vpop.permute.xlu0 %2045  ;;  %1018 = vst.msk [vmem:[#allocation3 + $0x240] sm:$0xff] %vm375_vm0, %v1010_v5 }
 0x209   : > { %1328 = vst.msk [vmem:[#allocation3 + $0x120] sm:$0xff] %vm1267_vm4, %v1309_v50  ;;  %2065 = vst.msk [vmem:[#allocation3 + $0x128] sm:$0xff] %vm1267_vm4, %v2046_v60  ;;  %v8495_v50 = vld [vmem:[#allocation2 + $0x131] sm:$0xff] }
 0x20a   : > { %2273 = vst.msk [vmem:[#allocation3 + $0x128] sm:$0xff] %vm1492_vm5, %v2254_v0  ;;  %1368 = vrot.lane.b32.xlu1 %v1346_v51, %s7085_s21  ;;  %1881 = vrot.lane.b32.xlu0 %v1859_v2, %s7082_s14  ;;  %v1347_v51 = vmul.f32 %v7367_v9, %v8088_v63  ;;  %v2125_v63 = vld [vmem:[#allocation2 + $0x137] sm:$0xff] }
 0x20c   : > { %v1534_v13 = vpop.permute.xlu1 %1533  ;;  %v1311_v10 = vpop.permute.xlu0 %1310 }
 0x20d   : > { %1553 = vst.msk [vmem:[#allocation3 + $0x120] sm:$0xff] %vm1492_vm5, %v1534_v13  ;;  %v1909_v13 = vmul.f32 %v7483_v18, %v8495_v50 }
 0x20e   : > { %1329 = vst.msk [vmem:[#allocation3 + $0x138] sm:$0xff] %vm1267_vm4, %v1311_v10  ;;  %1593 = vrot.lane.b32.xlu1 %v1571_v40, %s7083_s18  ;;  %2105 = vrot.lane.b32.xlu0 %v2083_v36, %s7085_s21  ;;  %v2503_v0 = vld [vmem:[#allocation3 + $0x110] sm:$0xff]  ;;  %v1572_v36 = vmul.f32 %v7721_v23, %v2075_v59 }
 0x20f   : > { %2823 = vmatprep.mubr.f32.mxu1 %v2503_v0 }
 0x210   : > { %v1106_v60 = vpop.permute.xlu1 %1105  ;;  %v1536_v6 = vpop.permute.xlu0 %1535  ;;  %2824 = vmatmul.mubr.f32.gmra.mrb[22].mxu1 %v2502_v27  ;;  %v2133_v27 = vmul.f32 %v7389_v19, %v2125_v63 }
 0x211   : > { %1122 = vst.msk [vmem:[#allocation3 + $0x168] sm:$0xff] %vm1066_vm3, %v1106_v60  ;;  %v2506_v2 = vld [vmem:[#allocation3 + $0x128] sm:$0xff] }
 0x212   : > { %1554 = vst.msk [vmem:[#allocation3 + $0x138] sm:$0xff] %vm1492_vm5, %v1536_v6  ;;  %1370 = vrot.lane.b32.xlu1 %v1347_v51, %s7085_s21  ;;  %2307 = vrot.lane.b32.xlu0 %v8493_v47, %s7083_s18  ;;  %v1388_v60 = vld [vmem:[#allocation2 + $0x129] sm:$0xff] }
 0x213   : > { %2828 = vmatprep.mubr.f32.mxu1 %v2506_v2  ;;  %v1396_v51 = vmul.f32 %v7483_v18, %v1388_v60  ;;  %v8526_v2 = vpop.f32.mrb[46].mxu0 }
 0x214   : > { %v2256_v10 = vpop.permute.xlu1 %2255  ;;  %v2258_v43 = vpop.permute.xlu0 %2257  ;;  %v2505_v40 = vld [vmem:[#allocation3 + $0x120] sm:$0xff] }
 0x215   : > { %2829 = vmatmul.mubr.f32.gmra.mrb[24].mxu1 %v2505_v40 }
 0x216   : > { %1595 = vrot.lane.b32.xlu1 %v1572_v36, %s7083_s18  ;;  %1925 = vrot.lane.b32.xlu0 %v1909_v13, %s7082_s14  ;;  %v1910_v36 = vmul.f32 %v7529_v44, %v8165_v28 }
 0x218   : > { %v2052_v5 = vpop.permute.xlu1 %2051  ;;  %v1828_v0 = vpop.permute.xlu0 %1827 }
 0x219   : > { %1844 = vst.msk [vmem:[#allocation3 + $0x170] sm:$0xff] %vm1066_vm3, %v1828_v0  ;;  %v8537_v0 = vpop.f32.mrb[47].mxu0 }
 0x21a   : > { %2068 = vst.msk [vmem:[#allocation3 + $0x170] sm:$0xff] %vm1267_vm4, %v2052_v5  ;;  %1187 = vrot.lane.b32.xlu1 %v8510_v56, %s7082_s14  ;;  %2149 = vrot.lane.b32.xlu0 %v2133_v27, %s7085_s21  ;;  %v2126_v5 = vld [vmem:[#allocation2 + $0x13f] sm:$0xff] }
 0x21b   : > { %2276 = vst.msk [vmem:[#allocation3 + $0x170] sm:$0xff] %vm1492_vm5, %v8078_v1  ;;  %v1621_v1 = vmul.f32 %v7389_v19, %v8178_v55  ;;  %v2134_v60 = vmul.f32 %v7486_v21, %v2126_v5 }
 0x21c   : > { %v2048_v59 = vpop.permute.xlu1 %2047  ;;  %v1824_v6 = vpop.permute.xlu0 %1823 }
 0x21d   : > { %1842 = vst.msk [vmem:[#allocation3 + $0x140] sm:$0xff] %vm1066_vm3, %v1824_v6 }
 0x21e   : > { %2066 = vst.msk [vmem:[#allocation3 + $0x140] sm:$0xff] %vm1267_vm4, %v2048_v59  ;;  %1412 = vrot.lane.b32.xlu1 %v1396_v51, %s7085_s21  ;;  %2341 = vrot.lane.b32.xlu0 %v8171_v54, %s7083_s18 }
 0x21f   : > { %2274 = vst.msk [vmem:[#allocation3 + $0x140] sm:$0xff] %vm1492_vm5, %v2256_v10  ;;  %v8540_v10 = vpop.f32.mrb[48].mxu0 }
 0x220   : > { %v1826_v13 = vpop.permute.xlu1 %1825  ;;  %v2050_v40 = vpop.permute.xlu0 %2049 }
 0x221   : > { %1843 = vst.msk [vmem:[#allocation3 + $0x158] sm:$0xff] %vm1066_vm3, %v1826_v13  ;;  %v8545_v59 = vpop.f32.mrb[49].mxu0 }
 0x222   : > { %2067 = vst.msk [vmem:[#allocation3 + $0x158] sm:$0xff] %vm1267_vm4, %v2050_v40  ;;  %1637 = vrot.lane.b32.xlu1 %v1621_v1, %s7083_s18  ;;  %1927 = vrot.lane.b32.xlu0 %v1910_v36, %s7082_s14  ;;  %v1397_v40 = vmul.f32 %v7529_v44, %v8495_v50  ;;  %v2127_v50 = vld [vmem:[#allocation2 + $0x147] sm:$0xff] }
 0x223   : > { %2275 = vst.msk [vmem:[#allocation3 + $0x158] sm:$0xff] %vm1492_vm5, %v2258_v43  ;;  %v2508_v43 = vld [vmem:[#allocation3 + $0x138] sm:$0xff] }
 0x224   : > { %v1313_v27 = vpop.permute.xlu1 %1312  ;;  %v1315_v55 = vpop.permute.xlu0 %1314 }
 0x225   : > { %1330 = vst.msk [vmem:[#allocation3 + $0x150] sm:$0xff] %vm1267_vm4, %v1313_v27  ;;  %1331 = vst.msk [vmem:[#allocation3 + $0x168] sm:$0xff] %vm1267_vm4, %v1315_v55  ;;  %v1622_v27 = vmul.f32 %v7486_v21, %v2125_v63  ;;  %v1911_v55 = vmul.f32 %v7598_v16, %v8204_v42  ;;  %v2515_v63 = vld [vmem:[#allocation3 + $0x170] sm:$0xff] }
 0x226   : > { %1189 = vrot.lane.b32.xlu1 %v8180_v32, %s7082_s14  ;;  %2151 = vrot.lane.b32.xlu0 %v2134_v60, %s7085_s21  ;;  %v2509_v6 = vld [vmem:[#allocation3 + $0x140] sm:$0xff] }
 0x227   : > { %2833 = vmatprep.mubr.f32.mxu1 %v2509_v6 }
 0x228   : > { %v1538_v51 = vpop.permute.xlu1 %1537  ;;  %v1540_v13 = vpop.permute.xlu0 %1539  ;;  %2834 = vmatmul.mubr.f32.gmra.mrb[26].mxu1 %v2508_v43 }
 0x229   : > { %1555 = vst.msk [vmem:[#allocation3 + $0x150] sm:$0xff] %vm1492_vm5, %v1538_v51  ;;  %1556 = vst.msk [vmem:[#allocation3 + $0x168] sm:$0xff] %vm1492_vm5, %v1540_v13  ;;  %v2135_v51 = vmul.f32 %v7508_v34, %v2127_v50 }
 0x22a   : > { %1414 = vrot.lane.b32.xlu1 %v1397_v40, %s7085_s21  ;;  %2343 = vrot.lane.b32.xlu0 %v8217_v15, %s7083_s18  ;;  %v2512_v32 = vld [vmem:[#allocation3 + $0x158] sm:$0xff] }
 0x22b   : > { %2838 = vmatprep.mubr.f32.mxu1 %v2512_v32 }
 0x22c   : > { %v1144_v1 = vpop.permute.xlu1 %1143  ;;  %v2294_v36 = vpop.permute.xlu0 %2293 }
 0x22d   : > { %1165 = vst.msk [vmem:[#allocation3 + $0x1b0] sm:$0xff] %vm1066_vm3, %v1144_v1  ;;  %v1398_v1 = vmul.f32 %v7598_v16, %v8165_v28  ;;  %v2128_v28 = vld [vmem:[#allocation2 + $0x14f] sm:$0xff] }
 0x22e   : > { %1639 = vrot.lane.b32.xlu1 %v1622_v27, %s7083_s18  ;;  %1929 = vrot.lane.b32.xlu0 %v1911_v55, %s7082_s14  ;;  %v1623_v55 = vmul.f32 %v7508_v34, %v2126_v5 }
 0x230   : > { %v1142_v60 = vpop.permute.xlu1 %1141  ;;  %v2094_v6 = vpop.permute.xlu0 %2093  ;;  %v2511_v43 = vld [vmem:[#allocation3 + $0x150] sm:$0xff]  ;;  %v2514_v32 = vld [vmem:[#allocation3 + $0x168] sm:$0xff] }
 0x231   : > { %1164 = vst.msk [vmem:[#allocation3 + $0x198] sm:$0xff] %vm1066_vm3, %v1142_v60  ;;  %2839 = vmatmul.mubr.f32.gmra.mrb[28].mxu1 %v2511_v43  ;;  %v1912_v60 = vmul.f32 %v7625_v3, %v8209_v57 }
 0x232   : > { %1191 = vrot.lane.b32.xlu1 %v8171_v54, %s7082_s14  ;;  %2153 = vrot.lane.b32.xlu0 %v2135_v51, %s7085_s21 }
 0x233   : > { %2843 = vmatprep.mubr.f32.mxu1 %v2515_v63 }
 0x234   : > { %v1870_v13 = vpop.permute.xlu1 %1869  ;;  %v2298_v40 = vpop.permute.xlu0 %2297 }
 0x235   : > { %1893 = vst.msk [vmem:[#allocation3 + $0x188] sm:$0xff] %vm1066_vm3, %v1870_v13  ;;  %2844 = vmatmul.mubr.f32.gmra.mrb[30].mxu1 %v2514_v32 }
 0x236   : > { %2117 = vst.msk [vmem:[#allocation3 + $0x188] sm:$0xff] %vm1267_vm4, %v2094_v6  ;;  %1416 = vrot.lane.b32.xlu1 %v1398_v1, %s7085_s21  ;;  %2345 = vrot.lane.b32.xlu0 %v8223_v38, %s7083_s18  ;;  %v8582_v6 = vpop.f32.mrb[50].mxu0  ;;  %v1399_v1 = vmul.f32 %v7625_v3, %v8204_v42  ;;  %v8606_v42 = vld [vmem:[#allocation2 + $0x157] sm:$0xff] }
 0x237   : > { %2317 = vst.msk [vmem:[#allocation3 + $0x188] sm:$0xff] %vm1492_vm5, %v2294_v36  ;;  %v2136_v36 = vmul.f32 %v7566_v62, %v2128_v28  ;;  %v8587_v5 = vpop.f32.mrb[51].mxu0 }
 0x238   : > { %v1357_v54 = vpop.permute.xlu1 %1356  ;;  %v2296_v27 = vpop.permute.xlu0 %2295 }
 0x239   : > { %1380 = vst.msk [vmem:[#allocation3 + $0x180] sm:$0xff] %vm1267_vm4, %v1357_v54 }
 0x23a   : > { %1641 = vrot.lane.b32.xlu1 %v1623_v55, %s7083_s18  ;;  %1931 = vrot.lane.b32.xlu0 %v1912_v60, %s7082_s14  ;;  %v1624_v60 = vmul.f32 %v7566_v62, %v2127_v50  ;;  %v2137_v50 = vmul.f32 %v7586_v12, %v8606_v42 }
 0x23c   : > { %v1582_v43 = vpop.permute.xlu1 %1581  ;;  %v1872_v51 = vpop.permute.xlu0 %1871 }
 0x23d   : > { %1605 = vst.msk [vmem:[#allocation3 + $0x180] sm:$0xff] %vm1492_vm5, %v1582_v43  ;;  %v1913_v43 = vmul.f32 %v7690_v26, %v8272_v31 }
 0x23e   : > { %1894 = vst.msk [vmem:[#allocation3 + $0x1a0] sm:$0xff] %vm1066_vm3, %v1872_v51  ;;  %1193 = vrot.lane.b32.xlu1 %v8217_v15, %s7082_s14  ;;  %2155 = vrot.lane.b32.xlu0 %v2136_v36, %s7085_s21  ;;  %v2518_v63 = vld [vmem:[#allocation3 + $0x188] sm:$0xff] }
 0x23f   : > { %2848 = vmatprep.mubr.f32.mxu1 %v2518_v63 }
 0x240   : > { %v1359_v13 = vpop.permute.xlu1 %1358  ;;  %v2096_v32 = vpop.permute.xlu0 %2095 }
 0x241   : > { %1381 = vst.msk [vmem:[#allocation3 + $0x198] sm:$0xff] %vm1267_vm4, %v1359_v13  ;;  %2118 = vst.msk [vmem:[#allocation3 + $0x1a0] sm:$0xff] %vm1267_vm4, %v2096_v32 }
 0x242   : > { %2318 = vst.msk [vmem:[#allocation3 + $0x1a0] sm:$0xff] %vm1492_vm5, %v2296_v27  ;;  %1418 = vrot.lane.b32.xlu1 %v1399_v1, %s7085_s21  ;;  %2347 = vrot.lane.b32.xlu0 %v8280_v41, %s7083_s18  ;;  %v1400_v1 = vmul.f32 %v7690_v26, %v8209_v57 }
 0x244   : > { %v1584_v15 = vpop.permute.xlu1 %1583  ;;  %v1874_v54 = vpop.permute.xlu0 %1873  ;;  %v2517_v55 = vld [vmem:[#allocation3 + $0x180] sm:$0xff] }
 0x245   : > { %1606 = vst.msk [vmem:[#allocation3 + $0x198] sm:$0xff] %vm1492_vm5, %v1584_v15  ;;  %2849 = vmatmul.mubr.f32.gmra.mrb[32].mxu1 %v2517_v55  ;;  %v1625_v55 = vmul.f32 %v7586_v12, %v2128_v28  ;;  %v6480_v28 = vld [vmem:[%s10742_s4 + $0x130] sm:$0xff] }
 0x246   : > { %1895 = vst.msk [vmem:[#allocation3 + $0x1b8] sm:$0xff] %vm1066_vm3, %v1874_v54  ;;  %1643 = vrot.lane.b32.xlu1 %v1624_v60, %s7083_s18  ;;  %1933 = vrot.lane.b32.xlu0 %v1913_v43, %s7082_s14  ;;  %v1914_v60 = vmul.f32 %v7695_v49, %v8276_v11 }
 0x248   : > { %v1148_v27 = vpop.permute.xlu1 %1147  ;;  %v2098_v51 = vpop.permute.xlu0 %2097 }
 0x249   : > { %1167 = vst.msk [vmem:[#allocation3 + $0x1e0] sm:$0xff] %vm1066_vm3, %v1148_v27  ;;  %v2521_v36 = vld [vmem:[#allocation3 + $0x1a0] sm:$0xff] }
 0x24a   : > { %2119 = vst.msk [vmem:[#allocation3 + $0x1b8] sm:$0xff] %vm1267_vm4, %v2098_v51  ;;  %1195 = vrot.lane.b32.xlu1 %v8223_v38, %s7082_s14  ;;  %2157 = vrot.lane.b32.xlu0 %v2137_v50, %s7085_s21  ;;  %v6478_v38 = vld [vmem:[%s10742_s4 + $0x120] sm:$0xff]  ;;  %v6481_v51 = vld [vmem:[%s10742_s4 + $0x138] sm:$0xff]  ;;  %v8651_v50 = vpop.f32.mrb[52].mxu0 }
 0x24b   : > { %2319 = vst.msk [vmem:[#allocation3 + $0x1b8] sm:$0xff] %vm1492_vm5, %v2298_v40  ;;  %2853 = vmatprep.mubr.f32.mxu1 %v2521_v36  ;;  %v6479_v40 = vld [vmem:[%s10742_s4 + $0x128] sm:$0xff]  ;;  %v8636_v27 = vld [vmem:[#allocation2 + $0x15f] sm:$0xff]  ;;  %10779 = vst [vmem:[#allocation9_spill] sm:$0xff] %v8651_v50  ;;  %v10780_v36 = vmov 0.0|0.0  }
 0x24c   : > { %v1146_v63 = vpop.permute.xlu1 %1145  ;;  %v8618_v13 = vpop.permute.xlu0 %2301  ;;  %v2520_v32 = vld [vmem:[#allocation3 + $0x198] sm:$0xff]  ;;  %v6910_v15 = vpack.c.bf16 %v6479_v40, %v6478_v38  ;;  %v2138_v38 = vmul.f32 %v7716_v17, %v8636_v27  ;;  %v3154_v40 = vld [vmem:[%s8643_s13] sm:$0x1] }
 0x24d   : > { %1166 = vst.msk [vmem:[#allocation3 + $0x1c8] sm:$0xff] %vm1066_vm3, %v1146_v63  ;;  %2854 = vmatmul.mubr.f32.gmra.mrb[34].mxu1 %v2520_v32  ;;  %v6913_v63 = vpack.c.bf16 %v6481_v51, %v6480_v28  ;;  %v1401_v51 = vmul.f32 %v7695_v49, %v8272_v31  ;;  %v6484_v31 = vld [vmem:[%s10742_s4 + $0x150] sm:$0xff] }
 0x24e   : > { %1420 = vrot.lane.b32.xlu1 %v1400_v1, %s7085_s21  ;;  %2349 = vrot.lane.b32.xlu0 %v8287_v20, %s7083_s18 }
 0x24f   : > { %6911 = vmatpush1.bf16.msra.mxu0 %v6910_v15  ;;  %v8659_v15 = vpop.f32.mrb[53].mxu0 }
 0x250   : > { %v1361_v54 = vpop.permute.xlu1 %1360  ;;  %v2300_v57 = vpop.permute.xlu0 %2299  ;;  %6912 = vmatprep.subr.bf16.mxu0 %v10780_v36 }
 0x251   : > { %1382 = vst.msk [vmem:[#allocation3 + $0x1b0] sm:$0xff] %vm1267_vm4, %v1361_v54  ;;  %v6482_v54 = vld [vmem:[%s10742_s4 + $0x140] sm:$0xff] }
 0x252   : > { %v2524_v43 = vld [vmem:[#allocation3 + $0x1b8] sm:$0xff]  ;;  %1645 = vrot.lane.b32.xlu1 %v1625_v55, %s7083_s18  ;;  %1935 = vrot.lane.b32.xlu0 %v1914_v60, %s7082_s14  ;;  %v6483_v55 = vld [vmem:[%s10742_s4 + $0x148] sm:$0xff] }
 0x253   : > { %2858 = vmatprep.mubr.f32.mxu1 %v2524_v43  ;;  %6914 = vmatpush1.bf16.msra.mxu0 %v6913_v63  ;;  %v6916_v60 = vpack.c.bf16 %v6483_v55, %v6482_v54  ;;  %v3156_v63 = vadd.f32 1.0, %v3154_v40 }
 0x254   : > { %v1586_v32 = vpop.permute.xlu1 %1585  ;;  %v1876_v1 = vpop.permute.xlu0 %1875  ;;  %6915 = vmatprep.subr.bf16.mxu0 %v10780_v36 }
 0x255   : > { %1607 = vst.msk [vmem:[#allocation3 + $0x1b0] sm:$0xff] %vm1492_vm5, %v1586_v32  ;;  %v8681_v32 = vsub.s32 0, %v7337_v61 }
 0x256   : > { %1896 = vst.msk [vmem:[#allocation3 + $0x1d0] sm:$0xff] %vm1066_vm3, %v1876_v1  ;;  %1197 = vrot.lane.b32.xlu1 %v8280_v41, %s7082_s14  ;;  %2159 = vrot.lane.b32.xlu0 %v2138_v38, %s7085_s21  ;;  %v8678_v41 = vld [vmem:[%s10743_s5] ss:$0 sm:$0xff]  ;;  %v6485_v1 = vld [vmem:[%s10742_s4 + $0x158] sm:$0xff] }
 0x257   : > { %6917 = vmatpush1.bf16.msra.mxu0 %v6916_v60  ;;  %v6919_v38 = vpack.c.bf16 %v6485_v1, %v6484_v31  ;;  %v1915_v60 = vmul.f32 %v7657_v48, %v8344_v30  ;;  %v8703_v31 = vld [vmem:[#allocation2 + $0x167] sm:$0xff]  ;;  %v2452_v1 = vld [vmem:[#allocation2 + $0x171] sm:$0xff] }
 0x258   : > { %v1363_v43 = vpop.permute.xlu1 %1362  ;;  %v2100_v28 = vpop.permute.xlu0 %2099  ;;  %6918 = vmatprep.subr.bf16.mxu0 %v10780_v36 }
 0x259   : > { %1383 = vst.msk [vmem:[#allocation3 + $0x1c8] sm:$0xff] %vm1267_vm4, %v1363_v43  ;;  %2120 = vst.msk [vmem:[#allocation3 + $0x1d0] sm:$0xff] %vm1267_vm4, %v2100_v28  ;;  %v8701_v28 = vrot.slane %v3156_v63, %v8681_v32  ;;  %v6487_v63 = vld [vmem:[%s10742_s4 + $0x168] sm:$0xff] }
 0x25a   : > { %2320 = vst.msk [vmem:[#allocation3 + $0x1d0] sm:$0xff] %vm1492_vm5, %v2300_v57  ;;  %1422 = vrot.lane.b32.xlu1 %v1401_v51, %s7085_s21  ;;  %2351 = vrot.lane.b32.xlu0 %v8350_v37, %s7083_s18  ;;  %v1626_v57 = vmul.f32 %v7716_v17, %v8606_v42  ;;  %v6486_v42 = vld [vmem:[%s10742_s4 + $0x160] sm:$0xff] }
 0x25b   : > { %6920 = vmatpush1.bf16.msra.mxu0 %v6919_v38  ;;  %v6922_v38 = vpack.c.bf16 %v6487_v63, %v6486_v42 }
 0x25c   : > { %v1588_v40 = vpop.permute.xlu1 %1587  ;;  %v2770_v54 = vpop.f32.mrb[0].mxu1  ;;  %v2523_v55 = vld [vmem:[#allocation3 + $0x1b0] sm:$0xff]  ;;  %6921 = vmatprep.subr.bf16.mxu0 %v10780_v36 }
 0x25d   : > { %1608 = vst.msk [vmem:[#allocation3 + $0x1c8] sm:$0xff] %vm1492_vm5, %v1588_v40  ;;  %v2771_v43 = vadd.f32 %v8678_v41, %v2770_v54  ;;  %v1878_v51 = vpop.permute.xlu0 %1877  ;;  %v2772_v61 = vpop.f32.mrb[1].mxu1  ;;  %2859 = vmatmul.mubr.f32.gmra.mrb[36].mxu1 %v2523_v55  ;;  %v2460_v40 = vmul.f32 %v7367_v9, %v2452_v1  ;;  %v8718_v54 = vld [vmem:[%s8643_s13 + $0x1] ss:$0 sm:$0xff] }
 0x25e   : > { %1897 = vst.msk [vmem:[#allocation3 + $0x1e8] sm:$0xff] %vm1066_vm3, %v1878_v51  ;;  %1647 = vrot.lane.b32.xlu1 %v1626_v57, %s7083_s18  ;;  %1937 = vrot.lane.b32.xlu0 %v1915_v60, %s7082_s14  ;;  %v2139_v57 = vmul.f32 %v7728_v25, %v8703_v31 }
 0x25f   : > { %v2996_v61 = vadd.f32 %v8397_v7, %v2771_v43  ;;  %6923 = vmatpush1.bf16.msra.mxu0 %v6922_v38  ;;  %2468 = vst.msk [vmem:[#allocation3 + $0x2f8] sm:$0xff] %vm375_vm0, %v2460_v40  ;;  %v6488_v7 = vld [vmem:[%s10742_s4 + $0x170] sm:$0xff]  ;;  %v6489_v43 = vld [vmem:[%s10742_s4 + $0x178] sm:$0xff] }
 0x260   : > { %v1152_v55 = vpop.permute.xlu1 %1151  ;;  %6924 = vmatprep.subr.bf16.mxu0 %v10780_v36  ;;  %v6925_v63 = vpack.c.bf16 %v6489_v43, %v6488_v7  ;;  %v1627_v7 = vmul.f32 %v7728_v25, %v8636_v27  ;;  %v7013_v43 = vld [vmem:[#allocation2 + $0x169] sm:$0xff] }
 0x261   : > { %v3161_v60 = vmul.f32 %v8701_v28, %v2996_v61  ;;  %1169 = vst.msk [vmem:[#allocation3 + $0x210] sm:$0xff] %vm1066_vm3, %v1152_v55  ;;  %v2102_v51 = vpop.permute.xlu0 %2101  ;;  %v2527_v50 = vld [vmem:[#allocation3 + $0x1d0] sm:$0xff]  ;;  %v1402_v61 = vmul.f32 %v7657_v48, %v8276_v11  ;;  %v6491_v11 = vld [vmem:[%s10742_s4 + $0x188] sm:$0xff] }
 0x262   : > { %2121 = vst.msk [vmem:[#allocation3 + $0x1e8] sm:$0xff] %vm1267_vm4, %v2102_v51  ;;  %1199 = vrot.lane.b32.xlu1 %v8287_v20, %s7082_s14  ;;  %2161 = vrot.lane.b32.xlu0 %v2139_v57, %s7085_s21  ;;  %v3189_v57 = vld [vmem:[#allocation2 + $0x10] sm:$0xff] }
 0x263   : > { %v3173_v42 = vadd.f32 %v8718_v54, %v3161_v60  ;;  %2321 = vst.msk [vmem:[#allocation3 + $0x1e8] sm:$0xff] %vm1492_vm5, %v8618_v13  ;;  %2863 = vmatprep.mubr.f32.mxu1 %v2527_v50  ;;  %6926 = vmatpush1.bf16.msra.mxu0 %v6925_v63  ;;  %v6490_v13 = vld [vmem:[%s10742_s4 + $0x180] sm:$0xff] }
 0x264   : > { %v1150_v20 = vpop.permute.xlu1 %1149  ;;  %v2526_v1 = vld [vmem:[#allocation3 + $0x1c8] sm:$0xff]  ;;  %6927 = vmatprep.subr.bf16.mxu0 %v10780_v36  ;;  %v6928_v60 = vpack.c.bf16 %v6491_v11, %v6490_v13 }
 0x265   : > { %v3181_v38 = vmax.f32 %v3173_v42, 0.0  ;;  %1168 = vst.msk [vmem:[#allocation3 + $0x1f8] sm:$0xff] %vm1066_vm3, %v1150_v20  ;;  %v8742_v55 = vpop.permute.xlu0 %2305  ;;  %2864 = vmatmul.mubr.f32.gmra.mrb[38].mxu1 %v2526_v1  ;;  %v1916_v42 = vmul.f32 %v7013_v43, %v7367_v9  ;;  %v2132_v20 = vld [vmem:[#allocation2 + $0x16f] sm:$0xff]  ;;  %v6494_v43 = vld [vmem:[%s10742_s4 + $0x1a0] sm:$0xff] }
 0x266   : > { %1424 = vrot.lane.b32.xlu1 %v1402_v61, %s7085_s21  ;;  %2353 = vrot.lane.b32.xlu0 %v8355_v35, %s7083_s18  ;;  %v2564_v35 = vld [vmem:[#allocation3 + $0x2f8] sm:$0xff]  ;;  %v6492_v1 = vld [vmem:[%s10742_s4 + $0x190] sm:$0xff]  ;;  %v2140_v13 = vmul.f32 %v7721_v23, %v2132_v20 }
 0x267   : > { %v3197_v50 = vadd.f32 %v3189_v57, %v3181_v38  ;;  %6787 = vmatmul.mubr.msk.f32.gmra.mrb[62].mxu0 %vm375_vm0, %v2564_v35  ;;  %4928 = vst.msk [vmem:[#allocation3 + $0x2f8] sm:$0xff] %vm375_vm0, %v2460_v40  ;;  %v6493_v61 = vld [vmem:[%s10742_s4 + $0x198] sm:$0xff]  ;;  %v3393_v40 = vld [vmem:[#allocation2 + $0x7] sm:$0xff]  ;;  %v2332_v20 = vld [vmem:[#allocation2 + $0x170] sm:$0xff] }
 0x268   : > { %v1365_v51 = vpop.permute.xlu1 %1364  ;;  %6929 = vmatpush1.bf16.msra.mxu0 %v6928_v60  ;;  %v6931_v38 = vpack.c.bf16 %v6493_v61, %v6492_v1  ;;  %v6511_v60 = vld [vmem:[%s10742_s4 + $0x228] sm:$0xff] }
 0x269   : > { %3205 = vst.msk [vmem:[#allocation2 + $0x10] sm:$0xff] %vm375_vm0, %v3197_v50  ;;  %v8759_v63 = vpop.permute.xlu0 %2303  ;;  %6930 = vmatprep.subr.bf16.mxu0 %v10780_v36  ;;  %v3401_v50 = vmul.f32 %v7389_v19, %v3393_v40  ;;  %v3417_v40 = vld [vmem:[#allocation2 + $0x67] sm:$0xff] }
 0x26a   : > { %1384 = vst.msk [vmem:[#allocation3 + $0x1e0] sm:$0xff] %vm1267_vm4, %v1365_v51  ;;  %1649 = vrot.lane.b32.xlu1 %v1627_v7, %s7083_s18  ;;  %1939 = vrot.lane.b32.xlu0 %v1916_v42, %s7082_s14  ;;  %v2530_v27 = vld [vmem:[#allocation3 + $0x1e8] sm:$0xff]  ;;  %v6510_v51 = vld [vmem:[%s10742_s4 + $0x220] sm:$0xff] }
 0x26b   : > { %2868 = vmatprep.mubr.f32.mxu1 %v2530_v27  ;;  %v6957_v7 = vpack.c.bf16 %v6511_v60, %v6510_v51  ;;  %v6495_v42 = vld [vmem:[%s10742_s4 + $0x1a8] sm:$0xff]  ;;  %3409 = vst.msk [vmem:[#allocation3] sm:$0xff] %vm375_vm0, %v3401_v50  ;;  %v6496_v60 = vld [vmem:[%s10742_s4 + $0x1b0] sm:$0xff] }
 0x26c   : > { %v1590_v57 = vpop.permute.xlu1 %1589  ;;  %6932 = vmatpush1.bf16.msra.mxu0 %v6931_v38  ;;  %v6934_v27 = vpack.c.bf16 %v6495_v42, %v6494_v43  ;;  %v6512_v38 = vld [vmem:[%s10742_s4 + $0x230] sm:$0xff] }
 0x26d   : > { %1609 = vst.msk [vmem:[#allocation3 + $0x1e0] sm:$0xff] %vm1492_vm5, %v1590_v57  ;;  %v1884_v11 = vpop.permute.xlu0 %1883  ;;  %v1403_v57 = vmul.f32 %v7367_v9, %v8344_v30  ;;  %6933 = vmatprep.subr.bf16.mxu0 %v10780_v36  ;;  %6958 = vmatprep.subr.bf16.mxu1 %v6957_v7  ;;  %v3425_v30 = vmul.f32 %v7389_v19, %v3417_v40  ;;  %v4648_v42 = vld [vmem:[#allocation2 + $0x50] sm:$0xff] }
 0x26e   : > { %1900 = vst.msk [vmem:[#allocation3 + $0x230] sm:$0xff] %vm1066_vm3, %v1884_v11  ;;  %1201 = vrot.lane.b32.xlu1 %v8350_v37, %s7082_s14  ;;  %2163 = vrot.lane.b32.xlu0 %v2140_v13, %s7085_s21  ;;  %v6513_v11 = vld [vmem:[%s10742_s4 + $0x238] sm:$0xff] }
 0x26f   : > { %v2775_v35 = vpop.f32.mrb[2].mxu1  ;;  %6960 = vmatpush3.bf16.msra.mxu1 %v6957_v7  ;;  %v6961_v51 = vpack.c.bf16 %v6513_v11, %v6512_v38  ;;  %v6497_v7 = vld [vmem:[%s10742_s4 + $0x1b8] sm:$0xff]  ;;  %3433 = vst.msk [vmem:[#allocation3 + $0xc0] sm:$0xff] %vm375_vm0, %v3425_v30  ;;  %v6499_v30 = vld [vmem:[%s10742_s4 + $0x1c8] sm:$0xff] }
 0x270   : > { %v2776_v1 = vadd.f32 %v8678_v41, %v2775_v35  ;;  %v1367_v37 = vpop.permute.xlu1 %1366  ;;  %v2777_v61 = vpop.f32.mrb[3].mxu1  ;;  %v4129_v43 = vld [vmem:[#allocation2 + $0x10] sm:$0xff]  ;;  %6935 = vmatpush1.bf16.msra.mxu0 %v6934_v27 }
 0x271   : > { %1385 = vst.msk [vmem:[#allocation3 + $0x1f8] sm:$0xff] %vm1267_vm4, %v1367_v37  ;;  %v2108_v13 = vpop.permute.xlu0 %2107  ;;  %v3394_v35 = vld [vmem:[#allocation2 + $0xf] sm:$0xff]  ;;  %6936 = vmatprep.subr.bf16.mxu0 %v10780_v36  ;;  %6962 = vmatprep.subr.bf16.mxu1 %v6961_v51 }
 0x272   : > { %v3001_v50 = vadd.f32 %v8395_v46, %v2776_v1  ;;  %2124 = vst.msk [vmem:[#allocation3 + $0x230] sm:$0xff] %vm1267_vm4, %v2108_v13  ;;  %1426 = vrot.lane.b32.xlu1 %v1403_v57, %s7085_s21  ;;  %2355 = vrot.lane.b32.xlu0 %v2332_v20, %s7083_s18  ;;  %v6937_v46 = vpack.c.bf16 %v6497_v7, %v6496_v60  ;;  %v3441_v13 = vld [vmem:[#allocation2 + $0xc7] sm:$0xff] }
 0x273   : > { %4137 = vst.msk [vmem:[#allocation3 + $0x8] sm:$0xff] %vm375_vm0, %v4129_v43  ;;  %v1628_v57 = vmul.f32 %v7721_v23, %v8703_v31  ;;  %v3402_v27 = vmul.f32 %v7486_v21, %v3394_v35  ;;  %v6498_v31 = vld [vmem:[%s10742_s4 + $0x1c0] sm:$0xff]  ;;  %v3489_v43 = vld [vmem:[#allocation2 + $0x8] sm:$0xff]  ;;  %v4696_v35 = vld [vmem:[#allocation2 + $0xb0] sm:$0xff]  ;;  %6964 = vmatpush3.bf16.msra.mxu1 %v6961_v51 }
 0x274   : > { %v3162_v20 = vmul.f32 %v8701_v28, %v3001_v50  ;;  %v1592_v1 = vpop.permute.xlu1 %1591  ;;  %v2780_v37 = vpop.f32.mrb[4].mxu1  ;;  %v2529_v61 = vld [vmem:[#allocation3 + $0x1e0] sm:$0xff]  ;;  %v3449_v50 = vmul.f32 %v7389_v19, %v3441_v13  ;;  %6938 = vmatpush1.bf16.msra.mxu0 %v6937_v46  ;;  %v6501_v51 = vld [vmem:[%s10742_s4 + $0x1d8] sm:$0xff] }
 0x275   : > { %1610 = vst.msk [vmem:[#allocation3 + $0x1f8] sm:$0xff] %vm1492_vm5, %v1592_v1  ;;  %v1880_v40 = vpop.permute.xlu0 %1879  ;;  %v2781_v38 = vadd.f32 %v8678_v41, %v2780_v37  ;;  %v2782_v11 = vpop.f32.mrb[5].mxu1  ;;  %2869 = vmatmul.mubr.f32.gmra.mrb[40].mxu1 %v2529_v61  ;;  %v6940_v1 = vpack.c.bf16 %v6499_v30, %v6498_v31  ;;  %6939 = vmatprep.subr.bf16.mxu0 %v10780_v36  ;;  %v3191_v31 = vld [vmem:[#allocation2 + $0x20] sm:$0xff]  ;;  %v6503_v30 = vld [vmem:[%s10742_s4 + $0x1e8] sm:$0xff] }
 0x276   : > { %v3174_v60 = vadd.f32 %v8718_v54, %v3162_v20  ;;  %1898 = vst.msk [vmem:[#allocation3 + $0x200] sm:$0xff] %vm1066_vm3, %v1880_v40  ;;  %1651 = vrot.lane.b32.xlu1 %v1628_v57, %s7083_s18  ;;  %4671 = vrot.lane.b32.xlu0 %v4648_v42, %s7083_s18  ;;  %v3190_v20 = vld [vmem:[#allocation2 + $0x18] sm:$0xff] }
 0x277   : > { %3410 = vst.msk [vmem:[#allocation3 + $0x18] sm:$0xff] %vm375_vm0, %v3402_v27  ;;  %v3006_v7 = vadd.f32 %v8407_v22, %v2781_v38  ;;  %3457 = vst.msk [vmem:[#allocation3 + $0x180] sm:$0xff] %vm375_vm0, %v3449_v50  ;;  %v6500_v22 = vld [vmem:[%s10742_s4 + $0x1d0] sm:$0xff]  ;;  %v3537_v27 = vld [vmem:[#allocation2 + $0x68] sm:$0xff] }
 0x278   : > { %v3182_v37 = vmax.f32 %v3174_v60, 0.0  ;;  %v1154_v61 = vpop.permute.xlu1 %1153  ;;  %6941 = vmatpush1.bf16.msra.mxu0 %v6940_v1  ;;  %v6943_v40 = vpack.c.bf16 %v6501_v51, %v6500_v22 }
 0x279   : > { %v3163_v57 = vmul.f32 %v8701_v28, %v3006_v7  ;;  %1170 = vst.msk [vmem:[#allocation3 + $0x228] sm:$0xff] %vm1066_vm3, %v1154_v61  ;;  %v2104_v42 = vpop.permute.xlu0 %2103  ;;  %6942 = vmatprep.subr.bf16.mxu0 %v10780_v36  ;;  %v3585_v7 = vld [vmem:[#allocation2 + $0xc8] sm:$0xff] }
 0x27a   : > { %v3198_v46 = vadd.f32 %v3190_v20, %v3182_v37  ;;  %2122 = vst.msk [vmem:[#allocation3 + $0x200] sm:$0xff] %vm1267_vm4, %v2104_v42  ;;  %3505 = vrot.lane.b32.xlu1 %v3489_v43, %s7082_s14  ;;  %4719 = vrot.lane.b32.xlu0 %v4696_v35, %s7083_s18  ;;  %v8865_v43 = vpop.f32.mrb[54].mxu0  ;;  %v6505_v42 = vld [vmem:[%s10742_s4 + $0x1f8] sm:$0xff] }
 0x27b   : > { %v3175_v13 = vadd.f32 %v8718_v54, %v3163_v57  ;;  %2322 = vst.msk [vmem:[#allocation3 + $0x200] sm:$0xff] %vm1492_vm5, %v8759_v63  ;;  %v6502_v63 = vld [vmem:[%s10742_s4 + $0x1e0] sm:$0xff]  ;;  %v8867_v37 = vpop.f32.mrb[55].mxu0  ;;  %v6504_v57 = vld [vmem:[%s10742_s4 + $0x1f0] sm:$0xff] }
 0x27c   : > { %3206 = vst.msk [vmem:[#allocation2 + $0x18] sm:$0xff] %vm375_vm0, %v3198_v46  ;;  %v1369_v38 = vpop.permute.xlu1 %1368  ;;  %6944 = vmatpush1.bf16.msra.mxu0 %v6943_v40  ;;  %v6946_v35 = vpack.c.bf16 %v6503_v30, %v6502_v63  ;;  %v2532_v22 = vld [vmem:[#allocation3 + $0x1f8] sm:$0xff]  ;;  %v6506_v63 = vld [vmem:[%s10742_s4 + $0x200] sm:$0xff]  ;;  %v6507_v30 = vld [vmem:[%s10742_s4 + $0x208] sm:$0xff] }
 0x27d   : > { %v3183_v11 = vmax.f32 %v3175_v13, 0.0  ;;  %1386 = vst.msk [vmem:[#allocation3 + $0x210] sm:$0xff] %vm1267_vm4, %v1369_v38  ;;  %v1882_v50 = vpop.permute.xlu0 %1881  ;;  %6945 = vmatprep.subr.bf16.mxu0 %v10780_v36 }
 0x27e   : > { %1899 = vst.msk [vmem:[#allocation3 + $0x218] sm:$0xff] %vm1066_vm3, %v1882_v50  ;;  %3553 = vrot.lane.b32.xlu1 %v3537_v27, %s7082_s14  ;;  %4767 = vrot.lane.b32.xlu0 %v8493_v47, %s7083_s18  ;;  %v6949_v27 = vpack.c.bf16 %v6505_v42, %v6504_v57 }
 0x27f   : > { %v3199_v60 = vadd.f32 %v3191_v31, %v3183_v11  ;;  %v8874_v20 = vpop.f32.mrb[56].mxu0 }
 0x280   : > { %v1594_v1 = vpop.permute.xlu1 %1593  ;;  %6947 = vmatpush1.bf16.msra.mxu0 %v6946_v35  ;;  %v8888_v13 = vpop.f32.mrb[57].mxu0  ;;  %v6952_v35 = vpack.c.bf16 %v6507_v30, %v6506_v63  ;;  %v6509_v63 = vld [vmem:[%s10742_s4 + $0x218] sm:$0xff] }
 0x281   : > { %3207 = vst.msk [vmem:[#allocation2 + $0x20] sm:$0xff] %vm375_vm0, %v3199_v60  ;;  %v2106_v47 = vpop.permute.xlu0 %2105  ;;  %6948 = vmatprep.subr.bf16.mxu0 %v10780_v36 }
 0x282   : > { %1611 = vst.msk [vmem:[#allocation3 + $0x210] sm:$0xff] %vm1492_vm5, %v1594_v1  ;;  %3601 = vrot.lane.b32.xlu1 %v3585_v7, %s7082_s14  ;;  %v2533_v61 = vld [vmem:[#allocation3 + $0x200] sm:$0xff] }
 0x283   : > { %2123 = vst.msk [vmem:[#allocation3 + $0x218] sm:$0xff] %vm1267_vm4, %v2106_v47  ;;  %2873 = vmatprep.mubr.f32.mxu1 %v2533_v61  ;;  %v8884_v51 = vld [vmem:[#allocation2 + $0x18] sm:$0xff]  ;;  %v3490_v61 = vld [vmem:[#allocation2 + $0x10] sm:$0xff] }
 0x284   : > { %2323 = vst.msk [vmem:[#allocation3 + $0x218] sm:$0xff] %vm1492_vm5, %v8742_v55  ;;  %v8886_v46 = vld [vmem:[#allocation2 + $0x11] sm:$0xff]  ;;  %2874 = vmatmul.mubr.f32.gmra.mrb[42].mxu1 %v2532_v22  ;;  %v1371_v40 = vpop.permute.xlu1 %1370  ;;  %4657 = vrot.lane.b32.xlu0 %v8884_v51, %s7083_s18  ;;  %v3681_v22 = vld [vmem:[#allocation2 + $0x9] sm:$0xff] }
 0x285   : > { %v4130_v38 = vld [vmem:[#allocation2 + $0x18] sm:$0xff]  ;;  %1387 = vst.msk [vmem:[#allocation3 + $0x228] sm:$0xff] %vm1267_vm4, %v1371_v40  ;;  %v2308_v55 = vpop.permute.xlu0 %2307  ;;  %v4201_v31 = vmul.f32 %v7483_v18, %v8886_v46  ;;  %6950 = vmatpush1.bf16.msra.mxu0 %v6949_v27 }
 0x286   : > { %v3395_v11 = vld [vmem:[#allocation2 + $0x17] sm:$0xff]  ;;  %4138 = vst.msk [vmem:[#allocation3 + $0x20] sm:$0xff] %vm375_vm0, %v4130_v38  ;;  %3649 = vrot.lane.b32.xlu1 %v8510_v56, %s7082_s14  ;;  %6951 = vmatprep.subr.bf16.mxu0 %v10780_v36 }
 0x287   : > { %v3403_v50 = vmul.f32 %v7508_v34, %v3395_v11  ;;  %2324 = vst.msk [vmem:[#allocation3 + $0x230] sm:$0xff] %vm1492_vm5, %v2308_v55  ;;  %v2785_v60 = vpop.f32.mrb[6].mxu1  ;;  %v8907_v7 = vld [vmem:[#allocation2 + $0x17] sm:$0xff] }
 0x288   : > { %v2786_v56 = vadd.f32 %v8678_v41, %v2785_v60  ;;  %v1596_v1 = vpop.permute.xlu1 %1595  ;;  %v2787_v47 = vpop.f32.mrb[7].mxu1  ;;  %4217 = vrot.lane.b32.xlu0 %v4201_v31, %s7082_s14  ;;  %v8912_v57 = vld [vmem:[#allocation2 + $0x19] sm:$0xff]  ;;  %v6508_v31 = vld [vmem:[%s10742_s4 + $0x210] sm:$0xff] }
 0x289   : > { %3411 = vst.msk [vmem:[#allocation3 + $0x30] sm:$0xff] %vm375_vm0, %v3403_v50  ;;  %v1926_v42 = vpop.permute.xlu0 %1925  ;;  %v4841_v27 = vmul.f32 %v7483_v18, %v8912_v57  ;;  %v4131_v40 = vld [vmem:[#allocation2 + $0x20] sm:$0xff]  ;;  %v4425_v50 = vmul.f32 %v7389_v19, %v8907_v7  ;;  %v2535_v30 = vld [vmem:[#allocation3 + $0x210] sm:$0xff]  ;;  %6953 = vmatpush1.bf16.msra.mxu0 %v6952_v35  ;;  %v6955_v60 = vpack.c.bf16 %v6509_v63, %v6508_v31 }
 0x28a   : > { %1612 = vst.msk [vmem:[#allocation3 + $0x228] sm:$0xff] %vm1492_vm5, %v1596_v1  ;;  %v3396_v38 = vld [vmem:[#allocation2 + $0x1f] sm:$0xff]  ;;  %v3011_v11 = vadd.f32 %v8405_v29, %v2786_v56  ;;  %3507 = vrot.lane.b32.xlu1 %v3490_v61, %s7082_s14  ;;  %v3689_v61 = vmul.f32 %v7483_v18, %v3681_v22  ;;  %v3905_v35 = vld [vmem:[#allocation2 + $0xf] sm:$0xff]  ;;  %6954 = vmatprep.subr.bf16.mxu0 %v10780_v36 }
 0x28b   : > { %1949 = vst.msk [vmem:[#allocation3 + $0x248] sm:$0xff] %vm1066_vm3, %v1926_v42  ;;  %v2536_v55 = vld [vmem:[#allocation3 + $0x218] sm:$0xff]  ;;  %v3404_v29 = vmul.f32 %v7566_v62, %v3396_v38  ;;  %v3913_v36 = vmul.f32 %v7389_v19, %v3905_v35  ;;  %v3465_v35 = vld [vmem:[#allocation2 + $0x127] sm:$0xff] }
 0x28c   : > { %4139 = vst.msk [vmem:[#allocation3 + $0x38] sm:$0xff] %vm375_vm0, %v4131_v40  ;;  %2878 = vmatprep.mubr.f32.mxu1 %v2536_v55  ;;  %4849 = vst.msk [vmem:[#allocation3 + $0x10] sm:$0xff] %vm375_vm0, %v4841_v27  ;;  %v3164_v56 = vmul.f32 %v8701_v28, %v3011_v11  ;;  %v1188_v1 = vpop.permute.xlu1 %1187  ;;  %v2790_v47 = vpop.f32.mrb[8].mxu1  ;;  %4441 = vrot.lane.b32.xlu0 %v4425_v50, %s7085_s21  ;;  %v8943_v55 = vld [vmem:[#allocation2 + $0x20] sm:$0xff] }
 0x28d   : > { %2879 = vmatmul.mubr.f32.gmra.mrb[44].mxu1 %v2535_v30  ;;  %3412 = vst.msk [vmem:[#allocation3 + $0x48] sm:$0xff] %vm375_vm0, %v3404_v29  ;;  %v2150_v42 = vpop.permute.xlu0 %2149  ;;  %v2791_v40 = vadd.f32 %v8678_v41, %v2790_v47  ;;  %v2792_v38 = vpop.f32.mrb[9].mxu1  ;;  %6956 = vmatpush1.bf16.msra.mxu0 %v6955_v60  ;;  %v3192_v29 = vld [vmem:[#allocation2 + $0x28] sm:$0xff]  ;;  %v8955_v47 = vld [vmem:[#allocation2 + $0x1f] sm:$0xff] }
 0x28e   : > { %1211 = vst.msk [vmem:[#allocation3 + $0x240] sm:$0xff] %vm1066_vm3, %v1188_v1  ;;  %v2539_v27 = vld [vmem:[#allocation3 + $0x230] sm:$0xff]  ;;  %v3176_v11 = vadd.f32 %v8718_v54, %v3164_v56  ;;  %3705 = vrot.lane.b32.xlu1 %v3689_v61, %s7085_s21 }
 0x28f   : > { %2173 = vst.msk [vmem:[#allocation3 + $0x248] sm:$0xff] %vm1267_vm4, %v2150_v42  ;;  %2883 = vmatprep.mubr.f32.mxu1 %v2539_v27  ;;  %v3016_v22 = vadd.f32 %v8419_v33, %v2791_v40  ;;  %v4202_v33 = vmul.f32 %v7529_v44, %v8912_v57  ;;  %v3193_v38 = vld [vmem:[#allocation2 + $0x30] sm:$0xff]  ;;  %v4426_v27 = vmul.f32 %v7486_v21, %v8955_v47 }
 0x290   : > { %v3184_v50 = vmax.f32 %v3176_v11, 0.0  ;;  %v1413_v31 = vpop.permute.xlu1 %1412  ;;  %4659 = vrot.lane.b32.xlu0 %v8943_v55, %s7083_s18 }
 0x291   : > { %v2538_v63 = vld [vmem:[#allocation3 + $0x228] sm:$0xff]  ;;  %v3165_v30 = vmul.f32 %v8701_v28, %v3016_v22  ;;  %1436 = vst.msk [vmem:[#allocation3 + $0x240] sm:$0xff] %vm1267_vm4, %v1413_v31  ;;  %v2342_v56 = vpop.permute.xlu0 %2341 }
 0x292   : > { %2884 = vmatmul.mubr.f32.gmra.mrb[46].mxu1 %v2538_v63  ;;  %v3200_v1 = vadd.f32 %v3192_v29, %v3184_v50  ;;  %2365 = vst.msk [vmem:[#allocation3 + $0x248] sm:$0xff] %vm1492_vm5, %v2342_v56  ;;  %3929 = vrot.lane.b32.xlu1 %v3913_v36, %s7083_s18  ;;  %v3690_v50 = vmul.f32 %v7529_v44, %v8886_v46 }
 0x293   : > { %v3177_v60 = vadd.f32 %v8718_v54, %v3165_v30  ;;  %v3473_v36 = vmul.f32 %v7389_v19, %v3465_v35 }
 0x294   : > { %3208 = vst.msk [vmem:[#allocation2 + $0x28] sm:$0xff] %vm375_vm0, %v3200_v1  ;;  %v1638_v61 = vpop.permute.xlu1 %1637  ;;  %4219 = vrot.lane.b32.xlu0 %v4202_v33, %s7082_s14  ;;  %v3914_v33 = vmul.f32 %v7486_v21, %v8907_v7 }
 0x295   : > { %v3185_v42 = vmax.f32 %v3177_v60, 0.0  ;;  %1661 = vst.msk [vmem:[#allocation3 + $0x240] sm:$0xff] %vm1492_vm5, %v1638_v61  ;;  %v1928_v40 = vpop.permute.xlu0 %1927 }
 0x296   : > { %1950 = vst.msk [vmem:[#allocation3 + $0x260] sm:$0xff] %vm1066_vm3, %v1928_v40  ;;  %3509 = vrot.lane.b32.xlu1 %v8884_v51, %s7082_s14  ;;  %v8973_v51 = vpop.f32.mrb[58].mxu0 }
 0x297   : > { %v3201_v11 = vadd.f32 %v3193_v38, %v3185_v42  ;;  %v8979_v46 = vpop.f32.mrb[59].mxu0 }
 0x298   : > { %v1190_v22 = vpop.permute.xlu1 %1189  ;;  %4443 = vrot.lane.b32.xlu0 %v4426_v27, %s7085_s21 }
 0x299   : > { %3209 = vst.msk [vmem:[#allocation2 + $0x30] sm:$0xff] %vm375_vm0, %v3201_v11  ;;  %v2152_v31 = vpop.permute.xlu0 %2151  ;;  %v2542_v63 = vld [vmem:[#allocation3 + $0x248] sm:$0xff] }
 0x29a   : > { %1212 = vst.msk [vmem:[#allocation3 + $0x258] sm:$0xff] %vm1066_vm3, %v1190_v22  ;;  %2888 = vmatprep.mubr.f32.mxu1 %v2542_v63  ;;  %3707 = vrot.lane.b32.xlu1 %v3690_v50, %s7085_s21 }
 0x29b   : > { %2174 = vst.msk [vmem:[#allocation3 + $0x260] sm:$0xff] %vm1267_vm4, %v2152_v31  ;;  %v8975_v29 = vld [vmem:[#allocation2 + $0x28] sm:$0xff] }
 0x29c   : > { %v8977_v30 = vld [vmem:[#allocation2 + $0x21] sm:$0xff]  ;;  %v1415_v56 = vpop.permute.xlu1 %1414  ;;  %4661 = vrot.lane.b32.xlu0 %v8975_v29, %s7083_s18 }
 0x29d   : > { %v2541_v1 = vld [vmem:[#allocation3 + $0x240] sm:$0xff]  ;;  %1437 = vst.msk [vmem:[#allocation3 + $0x258] sm:$0xff] %vm1267_vm4, %v1415_v56  ;;  %v2344_v60 = vpop.permute.xlu0 %2343  ;;  %v4842_v61 = vmul.f32 %v7529_v44, %v8977_v30  ;;  %v4132_v42 = vld [vmem:[#allocation2 + $0x28] sm:$0xff]  ;;  %v4203_v38 = vmul.f32 %v7598_v16, %v8977_v30 }
 0x29e   : > { %2889 = vmatmul.mubr.f32.gmra.mrb[48].mxu1 %v2541_v1  ;;  %3481 = vst.msk [vmem:[#allocation3 + $0x240] sm:$0xff] %vm375_vm0, %v3473_v36  ;;  %v3397_v40 = vld [vmem:[#allocation2 + $0x27] sm:$0xff]  ;;  %3931 = vrot.lane.b32.xlu1 %v3914_v33, %s7083_s18  ;;  %4140 = vst.msk [vmem:[#allocation3 + $0x50] sm:$0xff] %vm375_vm0, %v4132_v42 }
 0x29f   : > { %2366 = vst.msk [vmem:[#allocation3 + $0x260] sm:$0xff] %vm1492_vm5, %v2344_v60  ;;  %v3405_v7 = vmul.f32 %v7586_v12, %v3397_v40  ;;  %v2795_v27 = vpop.f32.mrb[10].mxu1  ;;  %v8995_v35 = vld [vmem:[#allocation2 + $0x27] sm:$0xff] }
 0x2a0   : > { %4850 = vst.msk [vmem:[#allocation3 + $0x28] sm:$0xff] %vm375_vm0, %v4842_v61  ;;  %v2796_v11 = vadd.f32 %v8678_v41, %v2795_v27  ;;  %v1640_v22 = vpop.permute.xlu1 %1639  ;;  %v2797_v50 = vpop.f32.mrb[11].mxu1  ;;  %4221 = vrot.lane.b32.xlu0 %v4203_v38, %s7082_s14  ;;  %v9000_v31 = vld [vmem:[#allocation2 + $0x29] sm:$0xff]  ;;  %v4427_v33 = vmul.f32 %v7508_v34, %v8995_v35 }
 0x2a1   : > { %3413 = vst.msk [vmem:[#allocation3 + $0x60] sm:$0xff] %vm375_vm0, %v3405_v7  ;;  %v1930_v63 = vpop.permute.xlu0 %1929  ;;  %v4133_v36 = vld [vmem:[#allocation2 + $0x30] sm:$0xff]  ;;  %v4843_v60 = vmul.f32 %v7598_v16, %v9000_v31 }
 0x2a2   : > { %1662 = vst.msk [vmem:[#allocation3 + $0x258] sm:$0xff] %vm1492_vm5, %v1640_v22  ;;  %v3398_v56 = vld [vmem:[#allocation2 + $0x2f] sm:$0xff]  ;;  %v3021_v1 = vadd.f32 %v8416_v14, %v2796_v11  ;;  %3511 = vrot.lane.b32.xlu1 %v8943_v55, %s7082_s14  ;;  %v3691_v14 = vmul.f32 %v7598_v16, %v8912_v57 }
 0x2a3   : > { %1951 = vst.msk [vmem:[#allocation3 + $0x278] sm:$0xff] %vm1066_vm3, %v1930_v63  ;;  %v3406_v61 = vmul.f32 %v7716_v17, %v3398_v56  ;;  %v9024_v27 = vld [vmem:[#allocation2 + $0x30] sm:$0xff]  ;;  %v3915_v63 = vmul.f32 %v7508_v34, %v8955_v47 }
 0x2a4   : > { %4141 = vst.msk [vmem:[#allocation3 + $0x68] sm:$0xff] %vm375_vm0, %v4133_v36  ;;  %v3166_v42 = vmul.f32 %v8701_v28, %v3021_v1  ;;  %v1192_v40 = vpop.permute.xlu1 %1191  ;;  %4445 = vrot.lane.b32.xlu0 %v4427_v33, %s7085_s21  ;;  %4851 = vst.msk [vmem:[#allocation3 + $0x40] sm:$0xff] %vm375_vm0, %v4843_v60  ;;  %v3194_v36 = vld [vmem:[#allocation2 + $0x38] sm:$0xff] }
 0x2a5   : > { %3414 = vst.msk [vmem:[#allocation3 + $0x78] sm:$0xff] %vm375_vm0, %v3406_v61  ;;  %v2154_v55 = vpop.permute.xlu0 %2153  ;;  %v4204_v61 = vmul.f32 %v7625_v3, %v9000_v31 }
 0x2a6   : > { %1213 = vst.msk [vmem:[#allocation3 + $0x270] sm:$0xff] %vm1066_vm3, %v1192_v40  ;;  %v2545_v38 = vld [vmem:[#allocation3 + $0x260] sm:$0xff]  ;;  %v3178_v7 = vadd.f32 %v8718_v54, %v3166_v42  ;;  %3709 = vrot.lane.b32.xlu1 %v3691_v14, %s7085_s21  ;;  %v9037_v40 = vld [vmem:[#allocation2 + $0x2f] sm:$0xff] }
 0x2a7   : > { %2175 = vst.msk [vmem:[#allocation3 + $0x278] sm:$0xff] %vm1267_vm4, %v2154_v55  ;;  %2893 = vmatprep.mubr.f32.mxu1 %v2545_v38 }
 0x2a8   : > { %v3186_v11 = vmax.f32 %v3178_v7, 0.0  ;;  %v1417_v22 = vpop.permute.xlu1 %1416  ;;  %v2800_v57 = vpop.f32.mrb[12].mxu1  ;;  %4663 = vrot.lane.b32.xlu0 %v9024_v27, %s7083_s18 }
 0x2a9   : > { %v2544_v50 = vld [vmem:[#allocation3 + $0x258] sm:$0xff]  ;;  %1438 = vst.msk [vmem:[#allocation3 + $0x270] sm:$0xff] %vm1267_vm4, %v1417_v22  ;;  %v2346_v56 = vpop.permute.xlu0 %2345  ;;  %v2801_v1 = vadd.f32 %v8678_v41, %v2800_v57  ;;  %v2802_v33 = vpop.f32.mrb[13].mxu1 }
 0x2aa   : > { %2894 = vmatmul.mubr.f32.gmra.mrb[50].mxu1 %v2544_v50  ;;  %v3202_v60 = vadd.f32 %v3194_v36, %v3186_v11  ;;  %2367 = vst.msk [vmem:[#allocation3 + $0x278] sm:$0xff] %vm1492_vm5, %v2346_v56  ;;  %3933 = vrot.lane.b32.xlu1 %v3915_v63, %s7083_s18  ;;  %v3692_v63 = vmul.f32 %v7625_v3, %v8977_v30  ;;  %v3195_v33 = vld [vmem:[#allocation2 + $0x40] sm:$0xff] }
 0x2ab   : > { %v3026_v42 = vadd.f32 %v8430_v52, %v2801_v1  ;;  %v4428_v52 = vmul.f32 %v7566_v62, %v9037_v40 }
 0x2ac   : > { %3210 = vst.msk [vmem:[#allocation2 + $0x38] sm:$0xff] %vm375_vm0, %v3202_v60  ;;  %v1642_v47 = vpop.permute.xlu1 %1641  ;;  %v2805_v14 = vpop.f32.mrb[14].mxu1  ;;  %4223 = vrot.lane.b32.xlu0 %v4204_v61, %s7082_s14 }
 0x2ad   : > { %v3167_v55 = vmul.f32 %v8701_v28, %v3026_v42  ;;  %1663 = vst.msk [vmem:[#allocation3 + $0x270] sm:$0xff] %vm1492_vm5, %v1642_v47  ;;  %v1932_v38 = vpop.permute.xlu0 %1931  ;;  %v2806_v7 = vadd.f32 %v8678_v41, %v2805_v14  ;;  %v2807_v11 = vpop.f32.mrb[15].mxu1 }
 0x2ae   : > { %1952 = vst.msk [vmem:[#allocation3 + $0x290] sm:$0xff] %vm1066_vm3, %v1932_v38  ;;  %3513 = vrot.lane.b32.xlu1 %v8975_v29, %s7082_s14  ;;  %v9059_v60 = vpop.f32.mrb[60].mxu0  ;;  %v3916_v38 = vmul.f32 %v7566_v62, %v8995_v35 }
 0x2af   : > { %v3179_v22 = vadd.f32 %v8718_v54, %v3167_v55  ;;  %v3031_v57 = vadd.f32 %v8428_v45, %v2806_v7  ;;  %v6469_v45 = vld [vmem:[%s8643_s13 + $0x4] sm:$0x1] }
 0x2b0   : > { %v1194_v50 = vpop.permute.xlu1 %1193  ;;  %4447 = vrot.lane.b32.xlu0 %v4428_v52, %s7085_s21 }
 0x2b1   : > { %v3187_v36 = vmax.f32 %v3179_v22, 0.0  ;;  %v3168_v56 = vmul.f32 %v8701_v28, %v3031_v57  ;;  %1214 = vst.msk [vmem:[#allocation3 + $0x288] sm:$0xff] %vm1066_vm3, %v1194_v50  ;;  %v2156_v29 = vpop.permute.xlu0 %2155  ;;  %v2548_v1 = vld [vmem:[#allocation3 + $0x278] sm:$0xff]  ;;  %v9066_v28 = vpop.f32.mrb[61].mxu0  ;;  %v3216_v22 = vadd.f32 1.0, %v6469_v45 }
 0x2b2   : > { %2176 = vst.msk [vmem:[#allocation3 + $0x290] sm:$0xff] %vm1267_vm4, %v2156_v29  ;;  %2898 = vmatprep.mubr.f32.mxu1 %v2548_v1  ;;  %3711 = vrot.lane.b32.xlu1 %v3692_v63, %s7085_s21  ;;  %v3196_v63 = vld [vmem:[#allocation2 + $0x48] sm:$0xff] }
 0x2b3   : > { %v3203_v61 = vadd.f32 %v3195_v33, %v3187_v36  ;;  %v3180_v42 = vadd.f32 %v8718_v54, %v3168_v56  ;;  %v9062_v30 = vld [vmem:[#allocation2 + $0x38] sm:$0xff] }
 0x2b4   : > { %v9064_v47 = vld [vmem:[#allocation2 + $0x31] sm:$0xff]  ;;  %v1419_v14 = vpop.permute.xlu1 %1418  ;;  %4665 = vrot.lane.b32.xlu0 %v9062_v30, %s7083_s18 }
 0x2b5   : > { %v2547_v55 = vld [vmem:[#allocation3 + $0x270] sm:$0xff]  ;;  %v4134_v7 = vld [vmem:[#allocation2 + $0x38] sm:$0xff]  ;;  %3211 = vst.msk [vmem:[#allocation2 + $0x40] sm:$0xff] %vm375_vm0, %v3203_v61  ;;  %v3188_v52 = vmax.f32 %v3180_v42, 0.0  ;;  %v2348_v54 = vpop.permute.xlu0 %2347  ;;  %v4844_v57 = vmul.f32 %v7625_v3, %v9064_v47  ;;  %v4205_v35 = vmul.f32 %v7690_v26, %v9064_v47  ;;  %v9091_v61 = vrot.slane %v3216_v22, %v8681_v32 }
 0x2b6   : > { %v3399_v11 = vld [vmem:[#allocation2 + $0x37] sm:$0xff]  ;;  %1439 = vst.msk [vmem:[#allocation3 + $0x288] sm:$0xff] %vm1267_vm4, %v1419_v14  ;;  %2899 = vmatmul.mubr.f32.gmra.mrb[52].mxu1 %v2547_v55  ;;  %3935 = vrot.lane.b32.xlu1 %v3916_v38, %s7083_s18  ;;  %v9100_v38 = vld [vmem:[%s8643_s13 + $0x5] ss:$0 sm:$0xff] }
 0x2b7   : > { %4142 = vst.msk [vmem:[#allocation3 + $0x80] sm:$0xff] %vm375_vm0, %v4134_v7  ;;  %v3407_v50 = vmul.f32 %v7728_v25, %v3399_v11  ;;  %v3204_v36 = vadd.f32 %v3196_v63, %v3188_v52  ;;  %v9082_v56 = vld [vmem:[#allocation2 + $0x37] sm:$0xff]  ;;  %4852 = vst.msk [vmem:[#allocation3 + $0x58] sm:$0xff] %vm375_vm0, %v4844_v57 }
 0x2b8   : > { %2368 = vst.msk [vmem:[#allocation3 + $0x290] sm:$0xff] %vm1492_vm5, %v2348_v54  ;;  %v1644_v29 = vpop.permute.xlu1 %1643  ;;  %v2810_v1 = vpop.f32.mrb[16].mxu1  ;;  %4225 = vrot.lane.b32.xlu0 %v4205_v35, %s7082_s14  ;;  %v4429_v14 = vmul.f32 %v7586_v12, %v9082_v56 }
 0x2b9   : > { %3415 = vst.msk [vmem:[#allocation3 + $0x90] sm:$0xff] %vm375_vm0, %v3407_v50  ;;  %3212 = vst.msk [vmem:[#allocation2 + $0x48] sm:$0xff] %vm375_vm0, %v3204_v36  ;;  %v1934_v33 = vpop.permute.xlu0 %1933  ;;  %v2811_v45 = vadd.f32 %v8678_v41, %v2810_v1  ;;  %v2812_v42 = vpop.f32.mrb[17].mxu1  ;;  %v3693_v41 = vmul.f32 %v7690_v26, %v9000_v31 }
 0x2ba   : > { %1664 = vst.msk [vmem:[#allocation3 + $0x288] sm:$0xff] %vm1492_vm5, %v1644_v29  ;;  %3515 = vrot.lane.b32.xlu1 %v9024_v27, %s7082_s14  ;;  %v3917_v29 = vmul.f32 %v7586_v12, %v9037_v40 }
 0x2bb   : > { %1953 = vst.msk [vmem:[#allocation3 + $0x2a8] sm:$0xff] %vm1066_vm3, %v1934_v33  ;;  %v3036_v55 = vadd.f32 %v8447_v39, %v2811_v45 }
 0x2bc   : > { %v1196_v7 = vpop.permute.xlu1 %1195  ;;  %4449 = vrot.lane.b32.xlu0 %v4429_v14, %s7085_s21  ;;  %v9105_v11 = vld [vmem:[#allocation2 + $0x39] sm:$0xff] }
 0x2bd   : > { %v3221_v52 = vmul.f32 %v9091_v61, %v3036_v55  ;;  %1215 = vst.msk [vmem:[#allocation3 + $0x2a0] sm:$0xff] %vm1066_vm3, %v1196_v7  ;;  %v2158_v27 = vpop.permute.xlu0 %2157  ;;  %v4135_v22 = vld [vmem:[#allocation2 + $0x40] sm:$0xff]  ;;  %v4845_v39 = vmul.f32 %v7690_v26, %v9105_v11  ;;  %v3249_v55 = vld [vmem:[#allocation2 + $0x70] sm:$0xff]  ;;  %v4206_v40 = vmul.f32 %v7695_v49, %v9105_v11 }
 0x2be   : > { %v3400_v57 = vld [vmem:[#allocation2 + $0x3f] sm:$0xff]  ;;  %2177 = vst.msk [vmem:[#allocation3 + $0x2a8] sm:$0xff] %vm1267_vm4, %v2158_v27  ;;  %3713 = vrot.lane.b32.xlu1 %v3693_v41, %s7085_s21 }
 0x2bf   : > { %v2551_v54 = vld [vmem:[#allocation3 + $0x290] sm:$0xff]  ;;  %4143 = vst.msk [vmem:[#allocation3 + $0x98] sm:$0xff] %vm375_vm0, %v4135_v22  ;;  %v3408_v31 = vmul.f32 %v7721_v23, %v3400_v57  ;;  %v3233_v50 = vadd.f32 %v9100_v38, %v3221_v52  ;;  %v9116_v63 = vld [vmem:[#allocation2 + $0x40] sm:$0xff]  ;;  %4853 = vst.msk [vmem:[#allocation3 + $0x70] sm:$0xff] %vm375_vm0, %v4845_v39 }
 0x2c0   : > { %2903 = vmatprep.mubr.f32.mxu1 %v2551_v54  ;;  %v1421_v35 = vpop.permute.xlu1 %1420  ;;  %4667 = vrot.lane.b32.xlu0 %v9116_v63, %s7083_s18  ;;  %v9122_v1 = vld [vmem:[#allocation2 + $0x41] sm:$0xff]  ;;  %v9127_v42 = vld [vmem:[#allocation2 + $0x49] sm:$0xff] }
 0x2c1   : > { %v2550_v36 = vld [vmem:[#allocation3 + $0x288] sm:$0xff]  ;;  %3416 = vst.msk [vmem:[#allocation3 + $0xa8] sm:$0xff] %vm375_vm0, %v3408_v31  ;;  %v3241_v33 = vmax.f32 %v3233_v50, 0.0  ;;  %v2350_v45 = vpop.permute.xlu0 %2349  ;;  %v4846_v14 = vmul.f32 %v7695_v49, %v9122_v1  ;;  %v9135_v52 = vld [vmem:[#allocation2 + $0x3f] sm:$0xff]  ;;  %v4847_v27 = vmul.f32 %v7657_v48, %v9127_v42  ;;  %v3694_v31 = vmul.f32 %v7695_v49, %v9064_v47 }
 0x2c2   : > { %1440 = vst.msk [vmem:[#allocation3 + $0x2a0] sm:$0xff] %vm1267_vm4, %v1421_v35  ;;  %2904 = vmatmul.mubr.f32.gmra.mrb[54].mxu1 %v2550_v36  ;;  %3937 = vrot.lane.b32.xlu1 %v3917_v29, %s7083_s18  ;;  %v4136_v7 = vld [vmem:[#allocation2 + $0x48] sm:$0xff]  ;;  %v4430_v57 = vmul.f32 %v7716_v17, %v9135_v52  ;;  %v9159_v29 = vld [vmem:[%s10743_s5] ss:$0 sm:$0xff] }
 0x2c3   : > { %2369 = vst.msk [vmem:[#allocation3 + $0x2a8] sm:$0xff] %vm1492_vm5, %v2350_v45  ;;  %v3257_v41 = vadd.f32 %v3249_v55, %v3241_v33  ;;  %v3918_v55 = vmul.f32 %v7716_v17, %v9082_v56 }
 0x2c4   : > { %4854 = vst.msk [vmem:[#allocation3 + $0x88] sm:$0xff] %vm375_vm0, %v4846_v14  ;;  %4144 = vst.msk [vmem:[#allocation3 + $0xb0] sm:$0xff] %vm375_vm0, %v4136_v7  ;;  %v1646_v54 = vpop.permute.xlu1 %1645  ;;  %4227 = vrot.lane.b32.xlu0 %v4206_v40, %s7082_s14 }
 0x2c5   : > { %3265 = vst.msk [vmem:[#allocation2 + $0x70] sm:$0xff] %vm375_vm0, %v3257_v41  ;;  %v1936_v22 = vpop.permute.xlu0 %1935  ;;  %4855 = vst.msk [vmem:[#allocation3 + $0xa0] sm:$0xff] %vm375_vm0, %v4847_v27  ;;  %v4207_v27 = vmul.f32 %v7657_v48, %v9122_v1 }
 0x2c6   : > { %1665 = vst.msk [vmem:[#allocation3 + $0x2a0] sm:$0xff] %vm1492_vm5, %v1646_v54  ;;  %3517 = vrot.lane.b32.xlu1 %v9062_v30, %s7082_s14  ;;  %v4647_v30 = vld [vmem:[#allocation2 + $0x48] sm:$0xff] }
 0x2c7   : > { %1954 = vst.msk [vmem:[#allocation3 + $0x2c0] sm:$0xff] %vm1066_vm3, %v1936_v22  ;;  %v4423_v22 = vld [vmem:[#allocation2 + $0x47] sm:$0xff] }
 0x2c8   : > { %v1198_v39 = vpop.permute.xlu1 %1197  ;;  %4451 = vrot.lane.b32.xlu0 %v4430_v57, %s7085_s21 }
 0x2c9   : > { %1216 = vst.msk [vmem:[#allocation3 + $0x2b8] sm:$0xff] %vm1066_vm3, %v1198_v39  ;;  %v2160_v50 = vpop.permute.xlu0 %2159 }
 0x2ca   : > { %v2554_v35 = vld [vmem:[#allocation3 + $0x2a8] sm:$0xff]  ;;  %2178 = vst.msk [vmem:[#allocation3 + $0x2c0] sm:$0xff] %vm1267_vm4, %v2160_v50  ;;  %3715 = vrot.lane.b32.xlu1 %v3694_v31, %s7085_s21 }
 0x2cb   : > { %2908 = vmatprep.mubr.f32.mxu1 %v2554_v35  ;;  %v2815_v36 = vpop.f32.mrb[18].mxu1 }
 0x2cc   : > { %v2816_v33 = vadd.f32 %v9159_v29, %v2815_v36  ;;  %v1423_v45 = vpop.permute.xlu1 %1422  ;;  %v2817_v47 = vpop.f32.mrb[19].mxu1  ;;  %4669 = vrot.lane.b32.xlu0 %v4647_v30, %s7083_s18  ;;  %v4145_v7 = vld [vmem:[#allocation2 + $0x70] sm:$0xff]  ;;  %v4431_v30 = vmul.f32 %v7728_v25, %v4423_v22 }
 0x2cd   : > { %v2553_v14 = vld [vmem:[#allocation3 + $0x2a0] sm:$0xff]  ;;  %1441 = vst.msk [vmem:[#allocation3 + $0x2b8] sm:$0xff] %vm1267_vm4, %v1423_v45  ;;  %v2352_v40 = vpop.permute.xlu0 %2351  ;;  %v3418_v54 = vld [vmem:[#allocation2 + $0x6f] sm:$0xff] }
 0x2ce   : > { %2909 = vmatmul.mubr.f32.gmra.mrb[56].mxu1 %v2553_v14  ;;  %v3041_v41 = vadd.f32 %v8445_v58, %v2816_v33  ;;  %2370 = vst.msk [vmem:[#allocation3 + $0x2c0] sm:$0xff] %vm1492_vm5, %v2352_v40  ;;  %3939 = vrot.lane.b32.xlu1 %v3918_v55, %s7083_s18  ;;  %v3426_v56 = vmul.f32 %v7486_v21, %v3418_v54  ;;  %v3250_v55 = vld [vmem:[#allocation2 + $0x78] sm:$0xff]  ;;  %v4424_v54 = vld [vmem:[#allocation2 + $0x4f] sm:$0xff] }
 0x2cf   : > { %4153 = vst.msk [vmem:[#allocation3 + $0xc8] sm:$0xff] %vm375_vm0, %v4145_v7  ;;  %v3695_v14 = vmul.f32 %v7657_v48, %v9105_v11 }
 0x2d0   : > { %v3222_v57 = vmul.f32 %v9091_v61, %v3041_v41  ;;  %v1648_v39 = vpop.permute.xlu1 %1647  ;;  %v2820_v31 = vpop.f32.mrb[20].mxu1  ;;  %4229 = vrot.lane.b32.xlu0 %v4207_v27, %s7082_s14  ;;  %3434 = vst.msk [vmem:[#allocation3 + $0xd8] sm:$0xff] %vm375_vm0, %v3426_v56 }
 0x2d1   : > { %1666 = vst.msk [vmem:[#allocation3 + $0x2b8] sm:$0xff] %vm1492_vm5, %v1648_v39  ;;  %v1938_v58 = vpop.permute.xlu0 %1937  ;;  %v2821_v50 = vadd.f32 %v9159_v29, %v2820_v31  ;;  %v2822_v35 = vpop.f32.mrb[21].mxu1 }
 0x2d2   : > { %v3234_v36 = vadd.f32 %v9100_v38, %v3222_v57  ;;  %1955 = vst.msk [vmem:[#allocation3 + $0x2d8] sm:$0xff] %vm1066_vm3, %v1938_v58  ;;  %3519 = vrot.lane.b32.xlu1 %v9116_v63, %s7082_s14  ;;  %v3919_v57 = vmul.f32 %v7728_v25, %v9135_v52  ;;  %v3251_v58 = vld [vmem:[#allocation2 + $0x80] sm:$0xff] }
 0x2d3   : > { %v3046_v33 = vadd.f32 %v8457_v24, %v2821_v50  ;;  %v4208_v24 = vmul.f32 %v7367_v9, %v9127_v42  ;;  %v4432_v42 = vmul.f32 %v7721_v23, %v4424_v54 }
 0x2d4   : > { %v3242_v45 = vmax.f32 %v3234_v36, 0.0  ;;  %v1200_v47 = vpop.permute.xlu1 %1199  ;;  %4453 = vrot.lane.b32.xlu0 %v4431_v30, %s7085_s21  ;;  %v3696_v36 = vmul.f32 %v7367_v9, %v9122_v1 }
 0x2d5   : > { %v3223_v40 = vmul.f32 %v9091_v61, %v3046_v33  ;;  %1217 = vst.msk [vmem:[#allocation3 + $0x2d0] sm:$0xff] %vm1066_vm3, %v1200_v47  ;;  %v2162_v7 = vpop.permute.xlu0 %2161  ;;  %v2557_v41 = vld [vmem:[#allocation3 + $0x2c0] sm:$0xff]  ;;  %v3920_v47 = vmul.f32 %v7721_v23, %v4423_v22 }
 0x2d6   : > { %v3258_v27 = vadd.f32 %v3250_v55, %v3242_v45  ;;  %2179 = vst.msk [vmem:[#allocation3 + $0x2d8] sm:$0xff] %vm1267_vm4, %v2162_v7  ;;  %2913 = vmatprep.mubr.f32.mxu1 %v2557_v41  ;;  %3717 = vrot.lane.b32.xlu1 %v3695_v14, %s7085_s21 }
 0x2d7   : > { %v3235_v63 = vadd.f32 %v9100_v38, %v3223_v40 }
 0x2d8   : > { %3266 = vst.msk [vmem:[#allocation2 + $0x78] sm:$0xff] %vm375_vm0, %v3258_v27  ;;  %v1425_v11 = vpop.permute.xlu1 %1424  ;;  %4231 = vrot.lane.b32.xlu0 %v4208_v24, %s7082_s14  ;;  %v2556_v56 = vld [vmem:[#allocation3 + $0x2b8] sm:$0xff] }
 0x2d9   : > { %v3243_v39 = vmax.f32 %v3235_v63, 0.0  ;;  %1442 = vst.msk [vmem:[#allocation3 + $0x2d0] sm:$0xff] %vm1267_vm4, %v1425_v11  ;;  %v2354_v31 = vpop.permute.xlu0 %2353  ;;  %2914 = vmatmul.mubr.f32.gmra.mrb[58].mxu1 %v2556_v56  ;;  %v3538_v56 = vld [vmem:[#allocation2 + $0x70] sm:$0xff] }
 0x2da   : > { %2371 = vst.msk [vmem:[#allocation3 + $0x2d8] sm:$0xff] %vm1492_vm5, %v2354_v31  ;;  %3941 = vrot.lane.b32.xlu1 %v3919_v57, %s7083_s18  ;;  %v3737_v31 = vld [vmem:[#allocation2 + $0x69] sm:$0xff] }
 0x2db   : > { %v3259_v50 = vadd.f32 %v3251_v58, %v3243_v39 }
 0x2dc   : > { %v1650_v35 = vpop.permute.xlu1 %1649  ;;  %4455 = vrot.lane.b32.xlu0 %v4432_v42, %s7085_s21 }
 0x2dd   : > { %3267 = vst.msk [vmem:[#allocation2 + $0x80] sm:$0xff] %vm375_vm0, %v3259_v50  ;;  %v1940_v52 = vpop.permute.xlu0 %1939 }
 0x2de   : > { %1667 = vst.msk [vmem:[#allocation3 + $0x2d0] sm:$0xff] %vm1492_vm5, %v1650_v35  ;;  %3719 = vrot.lane.b32.xlu1 %v3696_v36, %s7085_s21 }
 0x2df   : > { %1956 = vst.msk [vmem:[#allocation3 + $0x2f0] sm:$0xff] %vm1066_vm3, %v1940_v52  ;;  %v9209_v30 = vld [vmem:[#allocation2 + $0x78] sm:$0xff] }
 0x2e0   : > { %v9211_v33 = vld [vmem:[#allocation2 + $0x71] sm:$0xff]  ;;  %v1202_v45 = vpop.permute.xlu1 %1201  ;;  %4705 = vrot.lane.b32.xlu0 %v9209_v30, %s7083_s18 }
 0x2e1   : > { %v4146_v1 = vld [vmem:[#allocation2 + $0x78] sm:$0xff]  ;;  %1218 = vst.msk [vmem:[#allocation3 + $0x2e8] sm:$0xff] %vm1066_vm3, %v1202_v45  ;;  %v2164_v55 = vpop.permute.xlu0 %2163  ;;  %v4257_v41 = vmul.f32 %v7483_v18, %v9211_v33 }
 0x2e2   : > { %v3419_v14 = vld [vmem:[#allocation2 + $0x77] sm:$0xff]  ;;  %4154 = vst.msk [vmem:[#allocation3 + $0xe0] sm:$0xff] %vm375_vm0, %v4146_v1  ;;  %3943 = vrot.lane.b32.xlu1 %v3920_v47, %s7083_s18 }
 0x2e3   : > { %v2560_v40 = vld [vmem:[#allocation3 + $0x2d8] sm:$0xff]  ;;  %v3427_v7 = vmul.f32 %v7508_v34, %v3419_v14  ;;  %2180 = vst.msk [vmem:[#allocation3 + $0x2f0] sm:$0xff] %vm1267_vm4, %v2164_v55  ;;  %v2825_v27 = vpop.f32.mrb[22].mxu1 }
 0x2e4   : > { %2918 = vmatprep.mubr.f32.mxu1 %v2560_v40  ;;  %v9223_v22 = vld [vmem:[#allocation2 + $0x77] sm:$0xff]  ;;  %v2826_v24 = vadd.f32 %v9159_v29, %v2825_v27  ;;  %v1427_v63 = vpop.permute.xlu1 %1426  ;;  %v2827_v54 = vpop.f32.mrb[23].mxu1  ;;  %4273 = vrot.lane.b32.xlu0 %v4257_v41, %s7082_s14  ;;  %v4147_v42 = vld [vmem:[#allocation2 + $0x80] sm:$0xff] }
 0x2e5   : > { %3435 = vst.msk [vmem:[#allocation3 + $0xf0] sm:$0xff] %vm375_vm0, %v3427_v7  ;;  %v2559_v11 = vld [vmem:[#allocation3 + $0x2d0] sm:$0xff]  ;;  %v9228_v57 = vld [vmem:[#allocation2 + $0x79] sm:$0xff]  ;;  %v2356_v39 = vpop.permute.xlu0 %2355  ;;  %v4481_v36 = vmul.f32 %v7389_v19, %v9223_v22  ;;  %4155 = vst.msk [vmem:[#allocation3 + $0xf8] sm:$0xff] %vm375_vm0, %v4147_v42 }
 0x2e6   : > { %1443 = vst.msk [vmem:[#allocation3 + $0x2e8] sm:$0xff] %vm1267_vm4, %v1427_v63  ;;  %2919 = vmatmul.mubr.f32.gmra.mrb[60].mxu1 %v2559_v11  ;;  %v4865_v58 = vmul.f32 %v7483_v18, %v9228_v57  ;;  %v3420_v50 = vld [vmem:[#allocation2 + $0x7f] sm:$0xff]  ;;  %v3051_v35 = vadd.f32 %v8455_v8, %v2826_v24  ;;  %3555 = vrot.lane.b32.xlu1 %v3538_v56, %s7082_s14  ;;  %v3961_v7 = vld [vmem:[#allocation2 + $0x6f] sm:$0xff] }
 0x2e7   : > { %2372 = vst.msk [vmem:[#allocation3 + $0x2f0] sm:$0xff] %vm1492_vm5, %v2356_v39  ;;  %v3428_v52 = vmul.f32 %v7566_v62, %v3420_v50  ;;  %v3745_v8 = vmul.f32 %v7483_v18, %v3737_v31  ;;  %v9252_v24 = vld [vmem:[#allocation2 + $0x80] sm:$0xff]  ;;  %v3969_v11 = vmul.f32 %v7389_v19, %v3961_v7  ;;  %v3252_v56 = vld [vmem:[#allocation2 + $0x88] sm:$0xff] }
 0x2e8   : > { %4873 = vst.msk [vmem:[#allocation3 + $0xd0] sm:$0xff] %vm375_vm0, %v4865_v58  ;;  %v3224_v45 = vmul.f32 %v9091_v61, %v3051_v35  ;;  %v1652_v47 = vpop.permute.xlu1 %1651  ;;  %v2830_v1 = vpop.f32.mrb[24].mxu1  ;;  %4497 = vrot.lane.b32.xlu0 %v4481_v36, %s7085_s21  ;;  %v9265_v35 = vld [vmem:[#allocation2 + $0x7f] sm:$0xff] }
 0x2e9   : > { %3436 = vst.msk [vmem:[#allocation3 + $0x108] sm:$0xff] %vm375_vm0, %v3428_v52  ;;  %v2831_v14 = vadd.f32 %v9159_v29, %v2830_v1  ;;  %v2832_v55 = vpop.f32.mrb[25].mxu1  ;;  %v9247_v40 = vpop.permute.xlu0 %4671  ;;  %v4931_v1 = vld [vmem:[#allocation3 + $0x10] sm:$0xff] }
 0x2ea   : > { %1668 = vst.msk [vmem:[#allocation3 + $0x2e8] sm:$0xff] %vm1492_vm5, %v1652_v47  ;;  %v3236_v41 = vadd.f32 %v9100_v38, %v3224_v45  ;;  %3761 = vrot.lane.b32.xlu1 %v3745_v8, %s7085_s21  ;;  %v3253_v8 = vld [vmem:[#allocation2 + $0x90] sm:$0xff] }
 0x2eb   : > { %v3056_v27 = vadd.f32 %v8467_v4, %v2831_v14  ;;  %v4258_v4 = vmul.f32 %v7529_v44, %v9228_v57  ;;  %v4482_v14 = vmul.f32 %v7486_v21, %v9265_v35 }
 0x2ec   : > { %v3244_v63 = vmax.f32 %v3236_v41, 0.0  ;;  %v3506_v54 = vpop.permute.xlu1 %3505  ;;  %4707 = vrot.lane.b32.xlu0 %v9252_v24, %s7083_s18  ;;  %v4934_v41 = vld [vmem:[#allocation3 + $0x28] sm:$0xff] }
 0x2ed   : > { %v3225_v39 = vmul.f32 %v9091_v61, %v3056_v27  ;;  %3529 = vst.msk [vmem:[#allocation3] sm:$0xff] %vm1066_vm3, %v3506_v54  ;;  %v9259_v31 = vpop.permute.xlu0 %4719  ;;  %v3746_v27 = vmul.f32 %v7529_v44, %v9211_v33  ;;  %v4940_v33 = vld [vmem:[#allocation3 + $0x58] sm:$0xff] }
 0x2ee   : > { %v2563_v58 = vld [vmem:[#allocation3 + $0x2f0] sm:$0xff]  ;;  %v3260_v42 = vadd.f32 %v3252_v56, %v3244_v63  ;;  %3985 = vrot.lane.b32.xlu1 %v3969_v11, %s7083_s18  ;;  %v4937_v63 = vld [vmem:[#allocation3 + $0x40] sm:$0xff] }
 0x2ef   : > { %2923 = vmatprep.mubr.f32.mxu1 %v2563_v58  ;;  %v3237_v50 = vadd.f32 %v9100_v38, %v3225_v39  ;;  %v3970_v39 = vmul.f32 %v7486_v21, %v9223_v22 }
 0x2f0   : > { %3268 = vst.msk [vmem:[#allocation2 + $0x88] sm:$0xff] %vm375_vm0, %v3260_v42  ;;  %v3554_v36 = vpop.permute.xlu1 %3553  ;;  %4275 = vrot.lane.b32.xlu0 %v4258_v4, %s7082_s14 }
 0x2f1   : > { %v2562_v52 = vld [vmem:[#allocation3 + $0x2e8] sm:$0xff]  ;;  %v3245_v45 = vmax.f32 %v3237_v50, 0.0  ;;  %3577 = vst.msk [vmem:[#allocation3 + $0xc0] sm:$0xff] %vm1066_vm3, %v3554_v36  ;;  %v9270_v47 = vpop.permute.xlu0 %4767  ;;  %v4943_v50 = vld [vmem:[#allocation3 + $0x70] sm:$0xff] }
 0x2f2   : > { %2924 = vmatmul.mubr.f32.gmra.mrb[62].mxu1 %v2562_v52  ;;  %3557 = vrot.lane.b32.xlu1 %v9209_v30, %s7082_s14 }
 0x2f3   : > { %6797 = vmatprep.mubr.msk.f32.mxu1 %vm375_vm0, %v4931_v1  ;;  %v3261_v55 = vadd.f32 %v3253_v8, %v3245_v45 }
 0x2f4   : > { %v3602_v7 = vpop.permute.xlu1 %3601  ;;  %4499 = vrot.lane.b32.xlu0 %v4482_v14, %s7085_s21 }
 0x2f5   : > { %3269 = vst.msk [vmem:[#allocation2 + $0x90] sm:$0xff] %vm375_vm0, %v3261_v55 }
 0x2f6   : > { %3625 = vst.msk [vmem:[#allocation3 + $0x180] sm:$0xff] %vm1066_vm3, %v3602_v7  ;;  %6798 = vmatmul.mubr.msk.f32.vlgmr.msra.gmra.mrb[64].mxu1 %vm375_vm0, %v4934_v41  ;;  %v4658_v30 = vpop.permute.xlu0 %4657  ;;  %3763 = vrot.lane.b32.xlu1 %v3746_v27, %s7085_s21  ;;  %v4946_v7 = vld [vmem:[#allocation3 + $0x88] sm:$0xff]  ;;  %v4949_v27 = vld [vmem:[#allocation3 + $0xa0] sm:$0xff] }
 0x2f7   : > { %6800 = vmatprep.mubr.msk.f32.mxu1 %vm375_vm0, %v4937_v63  ;;  %v9285_v54 = vld [vmem:[#allocation2 + $0x88] sm:$0xff] }
 0x2f8   : > { %v9287_v11 = vld [vmem:[#allocation2 + $0x81] sm:$0xff]  ;;  %v3650_v56 = vpop.permute.xlu1 %3649  ;;  %4709 = vrot.lane.b32.xlu0 %v9285_v54, %s7083_s18 }
 0x2f9   : > { %v4866_v58 = vmul.f32 %v7529_v44, %v9287_v11  ;;  %v4148_v42 = vld [vmem:[#allocation2 + $0x88] sm:$0xff]  ;;  %3673 = vst.msk [vmem:[#allocation3 + $0x240] sm:$0xff] %vm1066_vm3, %v3650_v56  ;;  %v4259_v22 = vmul.f32 %v7598_v16, %v9287_v11 }
 0x2fa   : > { %v3421_v4 = vld [vmem:[#allocation2 + $0x87] sm:$0xff]  ;;  %6801 = vmatmul.mubr.msk.f32.gmra.mrb[66].mxu1 %vm375_vm0, %v4940_v33  ;;  %4156 = vst.msk [vmem:[#allocation3 + $0x110] sm:$0xff] %vm375_vm0, %v4148_v42  ;;  %v4218_v52 = vpop.permute.xlu0 %4217  ;;  %3987 = vrot.lane.b32.xlu1 %v3970_v39, %s7083_s18 }
 0x2fb   : > { %v3429_v36 = vmul.f32 %v7586_v12, %v3421_v4  ;;  %6803 = vmatprep.mubr.msk.f32.mxu1 %vm375_vm0, %v4943_v50  ;;  %4874 = vst.msk [vmem:[#allocation3 + $0xe8] sm:$0xff] %vm375_vm0, %v4866_v58  ;;  %v2835_v45 = vpop.f32.mrb[26].mxu1  ;;  %v9305_v1 = vld [vmem:[#allocation2 + $0x87] sm:$0xff]  ;;  %v4952_v4 = vld [vmem:[#allocation3 + $0xb8] sm:$0xff] }
 0x2fc   : > { %4241 = vst.msk [vmem:[#allocation3 + $0x8] sm:$0xff] %vm1066_vm3, %v4218_v52  ;;  %v2836_v8 = vadd.f32 %v9159_v29, %v2835_v45  ;;  %v3508_v14 = vpop.permute.xlu1 %3507  ;;  %v2837_v55 = vpop.f32.mrb[27].mxu1  ;;  %4277 = vrot.lane.b32.xlu0 %v4259_v22, %s7082_s14  ;;  %v9310_v41 = vld [vmem:[#allocation2 + $0x89] sm:$0xff]  ;;  %v4483_v42 = vmul.f32 %v7508_v34, %v9305_v1 }
 0x2fd   : > { %3437 = vst.msk [vmem:[#allocation3 + $0x120] sm:$0xff] %vm375_vm0, %v3429_v36  ;;  %v4867_v63 = vmul.f32 %v7598_v16, %v9310_v41  ;;  %v4149_v56 = vld [vmem:[#allocation2 + $0x90] sm:$0xff] }
 0x2fe   : > { %3530 = vst.msk [vmem:[#allocation3 + $0x18] sm:$0xff] %vm1066_vm3, %v3508_v14  ;;  %6804 = vmatmul.mubr.msk.f32.gmra.mrb[68].mxu1 %vm375_vm0, %v4946_v7  ;;  %v3422_v33 = vld [vmem:[#allocation2 + $0x8f] sm:$0xff]  ;;  %v3061_v39 = vadd.f32 %v8465_v53, %v2836_v8  ;;  %v4442_v58 = vpop.permute.xlu0 %4441  ;;  %3559 = vrot.lane.b32.xlu1 %v9252_v24, %s7082_s14  ;;  %v3747_v24 = vmul.f32 %v7598_v16, %v9228_v57 }
 0x2ff   : > { %6806 = vmatprep.mubr.msk.f32.mxu1 %vm375_vm0, %v4949_v27  ;;  %4157 = vst.msk [vmem:[#allocation3 + $0x128] sm:$0xff] %vm375_vm0, %v4149_v56  ;;  %v3430_v50 = vmul.f32 %v7716_v17, %v3422_v33  ;;  %4875 = vst.msk [vmem:[#allocation3 + $0x100] sm:$0xff] %vm375_vm0, %v4867_v63  ;;  %v4955_v52 = vld [vmem:[#allocation3 + $0xd0] sm:$0xff]  ;;  %v3971_v7 = vmul.f32 %v7508_v34, %v9265_v35  ;;  %v3254_v27 = vld [vmem:[#allocation2 + $0x98] sm:$0xff] }
 0x300   : > { %4465 = vst.msk [vmem:[#allocation3 + $0x8] sm:$0xff] %vm1267_vm4, %v4442_v58  ;;  %v3226_v53 = vmul.f32 %v9091_v61, %v3061_v39  ;;  %v3706_v36 = vpop.permute.xlu1 %3705  ;;  %4501 = vrot.lane.b32.xlu0 %v4483_v42, %s7085_s21  ;;  %v4260_v42 = vmul.f32 %v7625_v3, %v9310_v41 }
 0x301   : > { %4681 = vst.msk [vmem:[#allocation3 + $0x8] sm:$0xff] %vm1492_vm5, %v4658_v30  ;;  %v9337_v30 = vld [vmem:[#allocation2 + $0x90] sm:$0xff] }
 0x302   : > { %3438 = vst.msk [vmem:[#allocation3 + $0x138] sm:$0xff] %vm375_vm0, %v3430_v50  ;;  %6807 = vmatmul.mubr.msk.f32.gmra.mrb[70].mxu1 %vm375_vm0, %v4952_v4  ;;  %v3238_v22 = vadd.f32 %v9100_v38, %v3226_v53  ;;  %v4660_v45 = vpop.permute.xlu0 %4659  ;;  %3765 = vrot.lane.b32.xlu1 %v3747_v24, %s7085_s21  ;;  %v4958_v57 = vld [vmem:[#allocation3 + $0xe8] sm:$0xff] }
 0x303   : > { %3729 = vst.msk [vmem:[#allocation3] sm:$0xff] %vm1267_vm4, %v3706_v36  ;;  %6809 = vmatprep.mubr.msk.f32.mxu1 %vm375_vm0, %v4955_v52  ;;  %v9352_v50 = vld [vmem:[#allocation2 + $0x8f] sm:$0xff] }
 0x304   : > { %v3246_v8 = vmax.f32 %v3238_v22, 0.0  ;;  %v3930_v14 = vpop.permute.xlu1 %3929  ;;  %v2840_v55 = vpop.f32.mrb[28].mxu1  ;;  %4711 = vrot.lane.b32.xlu0 %v9337_v30, %s7083_s18 }
 0x305   : > { %3953 = vst.msk [vmem:[#allocation3] sm:$0xff] %vm1492_vm5, %v3930_v14  ;;  %v2841_v63 = vadd.f32 %v9159_v29, %v2840_v55  ;;  %v2842_v56 = vpop.f32.mrb[29].mxu1 }
 0x306   : > { %6810 = vmatmul.mubr.msk.f32.gmra.mrb[72].mxu1 %vm375_vm0, %v4958_v57  ;;  %v3262_v33 = vadd.f32 %v3254_v27, %v3246_v8  ;;  %v4220_v39 = vpop.permute.xlu0 %4219  ;;  %3989 = vrot.lane.b32.xlu1 %v3971_v7, %s7083_s18  ;;  %v4961_v58 = vld [vmem:[#allocation3 + $0x100] sm:$0xff]  ;;  %v4484_v8 = vmul.f32 %v7566_v62, %v9352_v50  ;;  %v3748_v27 = vmul.f32 %v7625_v3, %v9287_v11 }
 0x307   : > { %v3066_v4 = vadd.f32 %v8537_v0, %v2841_v63  ;;  %4242 = vst.msk [vmem:[#allocation3 + $0x20] sm:$0xff] %vm1066_vm3, %v4220_v39  ;;  %6812 = vmatprep.mubr.msk.f32.mxu1 %vm375_vm0, %v4961_v58  ;;  %v3255_v56 = vld [vmem:[#allocation2 + $0xa0] sm:$0xff] }
 0x308   : > { %v4930_v35 = vld [vmem:[#allocation3 + $0x8] sm:$0xff]  ;;  %3270 = vst.msk [vmem:[#allocation2 + $0x98] sm:$0xff] %vm375_vm0, %v3262_v33  ;;  %v2845_v53 = vpop.f32.mrb[30].mxu1  ;;  %4279 = vrot.lane.b32.xlu0 %v4260_v42, %s7082_s14  ;;  %v3510_v36 = vpop.permute.xlu1 %3509 }
 0x309   : > { %5230 = vmatprep.mubr.f32.mxu0 %v4930_v35  ;;  %v3227_v24 = vmul.f32 %v9091_v61, %v3066_v4  ;;  %v2846_v52 = vadd.f32 %v9159_v29, %v2845_v53  ;;  %3531 = vst.msk [vmem:[#allocation3 + $0x30] sm:$0xff] %vm1066_vm3, %v3510_v36  ;;  %v2847_v0 = vpop.f32.mrb[31].mxu1  ;;  %v3256_v36 = vld [vmem:[#allocation2 + $0xa8] sm:$0xff] }
 0x30a   : > { %v4444_v22 = vpop.permute.xlu0 %4443  ;;  %3561 = vrot.lane.b32.xlu1 %v9285_v54, %s7082_s14 }
 0x30b   : > { %v3239_v14 = vadd.f32 %v9100_v38, %v3227_v24  ;;  %v3071_v55 = vadd.f32 %v8526_v2, %v2846_v52  ;;  %4466 = vst.msk [vmem:[#allocation3 + $0x20] sm:$0xff] %vm1267_vm4, %v4444_v22  ;;  %v6472_v52 = vld [vmem:[%s8643_s13 + $0x8] sm:$0x1] }
 0x30c   : > { %4682 = vst.msk [vmem:[#allocation3 + $0x20] sm:$0xff] %vm1492_vm5, %v4660_v45  ;;  %4503 = vrot.lane.b32.xlu0 %v4484_v8, %s7085_s21  ;;  %v3708_v57 = vpop.permute.xlu1 %3707  ;;  %v4929_v7 = vld [vmem:[#allocation3] sm:$0xff] }
 0x30d   : > { %v3247_v63 = vmax.f32 %v3239_v14, 0.0  ;;  %v3228_v54 = vmul.f32 %v9091_v61, %v3071_v55  ;;  %3730 = vst.msk [vmem:[#allocation3 + $0x18] sm:$0xff] %vm1267_vm4, %v3708_v57  ;;  %5231 = vmatmul.mubr.f32.vlgmr.msra.gmra.mrb[64].mxu0 %v4929_v7  ;;  %v3972_v61 = vmul.f32 %v7566_v62, %v9305_v1  ;;  %v3276_v55 = vadd.f32 1.0, %v6472_v52 }
 0x30e   : > { %v4662_v33 = vpop.permute.xlu0 %4661  ;;  %3767 = vrot.lane.b32.xlu1 %v3748_v27, %s7085_s21 }
 0x30f   : > { %v3263_v2 = vadd.f32 %v3255_v56, %v3247_v63  ;;  %v3240_v45 = vadd.f32 %v9100_v38, %v3228_v54  ;;  %v9374_v39 = vld [vmem:[#allocation2 + $0x98] sm:$0xff]  ;;  %v3749_v56 = vmul.f32 %v7690_v26, %v9310_v41 }
 0x310   : > { %v9376_v58 = vld [vmem:[#allocation2 + $0x91] sm:$0xff]  ;;  %4713 = vrot.lane.b32.xlu0 %v9374_v39, %s7083_s18  ;;  %v3932_v11 = vpop.permute.xlu1 %3931 }
 0x311   : > { %v4868_v42 = vmul.f32 %v7625_v3, %v9376_v58  ;;  %v4150_v4 = vld [vmem:[#allocation2 + $0x98] sm:$0xff]  ;;  %3271 = vst.msk [vmem:[#allocation2 + $0xa0] sm:$0xff] %vm375_vm0, %v3263_v2  ;;  %v3248_v38 = vmax.f32 %v3240_v45, 0.0  ;;  %v4261_v1 = vmul.f32 %v7690_v26, %v9376_v58 }
 0x312   : > { %v3423_v35 = vld [vmem:[#allocation2 + $0x97] sm:$0xff]  ;;  %3954 = vst.msk [vmem:[#allocation3 + $0x18] sm:$0xff] %vm1492_vm5, %v3932_v11  ;;  %v4222_v24 = vpop.permute.xlu0 %4221  ;;  %3991 = vrot.lane.b32.xlu1 %v3972_v61, %s7083_s18 }
 0x313   : > { %4158 = vst.msk [vmem:[#allocation3 + $0x140] sm:$0xff] %vm375_vm0, %v4150_v4  ;;  %v3431_v53 = vmul.f32 %v7728_v25, %v3423_v35  ;;  %4876 = vst.msk [vmem:[#allocation3 + $0x118] sm:$0xff] %vm375_vm0, %v4868_v42  ;;  %v3264_v0 = vadd.f32 %v3256_v36, %v3248_v38  ;;  %v4933_v22 = vld [vmem:[#allocation3 + $0x20] sm:$0xff]  ;;  %v9394_v8 = vld [vmem:[#allocation2 + $0x97] sm:$0xff] }
 0x314   : > { %4243 = vst.msk [vmem:[#allocation3 + $0x38] sm:$0xff] %vm1066_vm3, %v4222_v24  ;;  %4281 = vrot.lane.b32.xlu0 %v4261_v1, %s7082_s14  ;;  %5235 = vmatprep.mubr.f32.mxu0 %v4933_v22  ;;  %v3512_v14 = vpop.permute.xlu1 %3511  ;;  %v4485_v7 = vmul.f32 %v7586_v12, %v9394_v8  ;;  %v9427_v36 = vld [vmem:[%s8643_s13 + $0x9] ss:$0 sm:$0xff]  ;;  %v3973_v1 = vmul.f32 %v7586_v12, %v9352_v50 }
 0x315   : > { %3439 = vst.msk [vmem:[#allocation3 + $0x150] sm:$0xff] %vm375_vm0, %v3431_v53  ;;  %3272 = vst.msk [vmem:[#allocation2 + $0xa8] sm:$0xff] %vm375_vm0, %v3264_v0 }
 0x316   : > { %3532 = vst.msk [vmem:[#allocation3 + $0x48] sm:$0xff] %vm1066_vm3, %v3512_v14  ;;  %v4446_v57 = vpop.permute.xlu0 %4445  ;;  %3563 = vrot.lane.b32.xlu1 %v9337_v30, %s7082_s14  ;;  %v9413_v30 = vrot.slane %v3276_v55, %v8681_v32 }
 0x317   : > { %4467 = vst.msk [vmem:[#allocation3 + $0x38] sm:$0xff] %vm1267_vm4, %v4446_v57 }
 0x318   : > { %4683 = vst.msk [vmem:[#allocation3 + $0x38] sm:$0xff] %vm1492_vm5, %v4662_v33  ;;  %v2850_v27 = vpop.f32.mrb[32].mxu1  ;;  %4505 = vrot.lane.b32.xlu0 %v4485_v7, %s7085_s21  ;;  %v3710_v63 = vpop.permute.xlu1 %3709  ;;  %v9409_v2 = vld [vmem:[#allocation2 + $0x99] sm:$0xff] }
 0x319   : > { %v4932_v54 = vld [vmem:[#allocation3 + $0x18] sm:$0xff]  ;;  %v2851_v45 = vadd.f32 %v9159_v29, %v2850_v27  ;;  %3731 = vst.msk [vmem:[#allocation3 + $0x30] sm:$0xff] %vm1267_vm4, %v3710_v63  ;;  %v2852_v11 = vpop.f32.mrb[33].mxu1  ;;  %v4869_v61 = vmul.f32 %v7690_v26, %v9409_v2  ;;  %v4151_v42 = vld [vmem:[#allocation2 + $0xa0] sm:$0xff]  ;;  %v4262_v50 = vmul.f32 %v7695_v49, %v9409_v2 }
 0x31a   : > { %5236 = vmatmul.mubr.f32.gmra.mrb[66].mxu0 %v4932_v54  ;;  %v4964_v33 = vld [vmem:[#allocation3 + $0x118] sm:$0xff]  ;;  %v4664_v41 = vpop.permute.xlu0 %4663  ;;  %3769 = vrot.lane.b32.xlu1 %v3749_v56, %s7085_s21  ;;  %4159 = vst.msk [vmem:[#allocation3 + $0x158] sm:$0xff] %vm375_vm0, %v4151_v42  ;;  %v9422_v38 = vld [vmem:[#allocation2 + $0xa0] sm:$0xff] }
 0x31b   : > { %6813 = vmatmul.mubr.msk.f32.gmra.mrb[74].mxu1 %vm375_vm0, %v4964_v33  ;;  %v3424_v4 = vld [vmem:[#allocation2 + $0x9f] sm:$0xff]  ;;  %v3076_v35 = vadd.f32 %v8545_v59, %v2851_v45  ;;  %4877 = vst.msk [vmem:[#allocation3 + $0x130] sm:$0xff] %vm375_vm0, %v4869_v61  ;;  %v3309_v61 = vld [vmem:[#allocation2 + $0xd0] sm:$0xff] }
 0x31c   : > { %v3432_v53 = vmul.f32 %v7721_v23, %v3424_v4  ;;  %4715 = vrot.lane.b32.xlu0 %v9422_v38, %s7083_s18  ;;  %v3934_v24 = vpop.permute.xlu1 %3933  ;;  %v9433_v52 = vld [vmem:[#allocation2 + $0xa1] sm:$0xff]  ;;  %v9435_v0 = vld [vmem:[#allocation2 + $0xa9] sm:$0xff] }
 0x31d   : > { %v3281_v59 = vmul.f32 %v9413_v30, %v3076_v35  ;;  %3955 = vst.msk [vmem:[#allocation3 + $0x30] sm:$0xff] %vm1492_vm5, %v3934_v24  ;;  %v4870_v22 = vmul.f32 %v7695_v49, %v9433_v52  ;;  %v4871_v14 = vmul.f32 %v7657_v48, %v9435_v0  ;;  %v4152_v55 = vld [vmem:[#allocation2 + $0xa8] sm:$0xff]  ;;  %v9450_v63 = vld [vmem:[#allocation2 + $0x9f] sm:$0xff] }
 0x31e   : > { %3440 = vst.msk [vmem:[#allocation3 + $0x168] sm:$0xff] %vm375_vm0, %v3432_v53  ;;  %v4224_v57 = vpop.permute.xlu0 %4223  ;;  %3993 = vrot.lane.b32.xlu1 %v3973_v1, %s7083_s18  ;;  %4160 = vst.msk [vmem:[#allocation3 + $0x170] sm:$0xff] %vm375_vm0, %v4152_v55  ;;  %v4486_v35 = vmul.f32 %v7716_v17, %v9450_v63 }
 0x31f   : > { %v3293_v7 = vadd.f32 %v9427_v36, %v3281_v59  ;;  %4244 = vst.msk [vmem:[#allocation3 + $0x50] sm:$0xff] %vm1066_vm3, %v4224_v57  ;;  %v4936_v27 = vld [vmem:[#allocation3 + $0x38] sm:$0xff]  ;;  %v4695_v57 = vld [vmem:[#allocation2 + $0xa8] sm:$0xff] }
 0x320   : > { %4878 = vst.msk [vmem:[#allocation3 + $0x148] sm:$0xff] %vm375_vm0, %v4870_v22  ;;  %4879 = vst.msk [vmem:[#allocation3 + $0x160] sm:$0xff] %vm375_vm0, %v4871_v14  ;;  %v2855_v54 = vpop.f32.mrb[34].mxu1  ;;  %4283 = vrot.lane.b32.xlu0 %v4262_v50, %s7082_s14  ;;  %5240 = vmatprep.mubr.f32.mxu0 %v4936_v27  ;;  %v3514_v56 = vpop.permute.xlu1 %3513  ;;  %v3974_v50 = vmul.f32 %v7716_v17, %v9394_v8 }
 0x321   : > { %v3301_v45 = vmax.f32 %v3293_v7, 0.0  ;;  %v2856_v11 = vadd.f32 %v9159_v29, %v2855_v54  ;;  %3533 = vst.msk [vmem:[#allocation3 + $0x60] sm:$0xff] %vm1066_vm3, %v3514_v56  ;;  %v2857_v33 = vpop.f32.mrb[35].mxu1  ;;  %v4976_v7 = vld [vmem:[#allocation3 + $0x178] sm:$0xff] }
 0x322   : > { %v4448_v42 = vpop.permute.xlu0 %4447  ;;  %3565 = vrot.lane.b32.xlu1 %v9374_v39, %s7082_s14  ;;  %v4967_v4 = vld [vmem:[#allocation3 + $0x130] sm:$0xff]  ;;  %v3750_v39 = vmul.f32 %v7695_v49, %v9376_v58  ;;  %v3310_v54 = vld [vmem:[#allocation2 + $0xd8] sm:$0xff] }
 0x323   : > { %v3317_v53 = vadd.f32 %v3309_v61, %v3301_v45  ;;  %v3081_v24 = vadd.f32 %v8540_v10, %v2856_v11  ;;  %4468 = vst.msk [vmem:[#allocation3 + $0x50] sm:$0xff] %vm1267_vm4, %v4448_v42  ;;  %6815 = vmatprep.mubr.msk.f32.mxu1 %vm375_vm0, %v4967_v4  ;;  %v4263_v45 = vmul.f32 %v7657_v48, %v9433_v52  ;;  %v9483_v61 = vld [vmem:[#allocation2 + $0xa7] sm:$0xff] }
 0x324   : > { %4684 = vst.msk [vmem:[#allocation3 + $0x50] sm:$0xff] %vm1492_vm5, %v4664_v41  ;;  %4507 = vrot.lane.b32.xlu0 %v4486_v35, %s7085_s21  ;;  %v3712_v1 = vpop.permute.xlu1 %3711  ;;  %v4935_v59 = vld [vmem:[#allocation3 + $0x30] sm:$0xff] }
 0x325   : > { %3325 = vst.msk [vmem:[#allocation2 + $0xd0] sm:$0xff] %vm375_vm0, %v3317_v53  ;;  %v3282_v22 = vmul.f32 %v9413_v30, %v3081_v24  ;;  %5241 = vmatmul.mubr.f32.gmra.mrb[68].mxu0 %v4935_v59  ;;  %v4487_v24 = vmul.f32 %v7728_v25, %v9483_v61 }
 0x326   : > { %3732 = vst.msk [vmem:[#allocation3 + $0x48] sm:$0xff] %vm1267_vm4, %v3712_v1  ;;  %v4666_v10 = vpop.permute.xlu0 %4665  ;;  %3771 = vrot.lane.b32.xlu1 %v3750_v39, %s7085_s21 }
 0x327   : > { %v4970_v14 = vld [vmem:[#allocation3 + $0x148] sm:$0xff]  ;;  %v4973_v55 = vld [vmem:[#allocation3 + $0x160] sm:$0xff]  ;;  %v3294_v41 = vadd.f32 %v9427_v36, %v3282_v22  ;;  %v3751_v22 = vmul.f32 %v7657_v48, %v9409_v2  ;;  %v3975_v2 = vmul.f32 %v7728_v25, %v9450_v63 }
 0x328   : > { %6816 = vmatmul.mubr.msk.f32.gmra.mrb[76].mxu1 %vm375_vm0, %v4970_v14  ;;  %4717 = vrot.lane.b32.xlu0 %v4695_v57, %s7083_s18  ;;  %v3936_v58 = vpop.permute.xlu1 %3935  ;;  %v4480_v57 = vld [vmem:[#allocation2 + $0xaf] sm:$0xff] }
 0x329   : > { %6818 = vmatprep.mubr.msk.f32.mxu1 %vm375_vm0, %v4973_v55  ;;  %v3302_v27 = vmax.f32 %v3294_v41, 0.0  ;;  %3956 = vst.msk [vmem:[#allocation3 + $0x48] sm:$0xff] %vm1492_vm5, %v3936_v58 }
 0x32a   : > { %v4226_v56 = vpop.permute.xlu0 %4225  ;;  %3995 = vrot.lane.b32.xlu1 %v3974_v50, %s7083_s18 }
 0x32b   : > { %v3318_v11 = vadd.f32 %v3310_v54, %v3302_v27  ;;  %4245 = vst.msk [vmem:[#allocation3 + $0x68] sm:$0xff] %vm1066_vm3, %v4226_v56  ;;  %v4939_v33 = vld [vmem:[#allocation3 + $0x50] sm:$0xff] }
 0x32c   : > { %6819 = vmatmul.mubr.msk.f32.gmra.mrb[78].mxu1 %vm375_vm0, %v4976_v7  ;;  %4285 = vrot.lane.b32.xlu0 %v4263_v45, %s7082_s14  ;;  %v3516_v8 = vpop.permute.xlu1 %3515  ;;  %v9487_v42 = vld [vmem:[#allocation2 + $0xd0] sm:$0xff] }
 0x32d   : > { %5245 = vmatprep.mubr.f32.mxu0 %v4939_v33  ;;  %v9489_v4 = vld [vmem:[#allocation2 + $0xcf] sm:$0xff]  ;;  %3326 = vst.msk [vmem:[#allocation2 + $0xd8] sm:$0xff] %vm375_vm0, %v3318_v11  ;;  %4169 = vst.msk [vmem:[#allocation3 + $0x188] sm:$0xff] %vm375_vm0, %v9487_v42  ;;  %v3752_v33 = vmul.f32 %v7367_v9, %v9433_v52 }
 0x32e   : > { %3534 = vst.msk [vmem:[#allocation3 + $0x78] sm:$0xff] %vm1066_vm3, %v3516_v8  ;;  %v3450_v35 = vmul.f32 %v7486_v21, %v9489_v4  ;;  %v4450_v53 = vpop.permute.xlu0 %4449  ;;  %3567 = vrot.lane.b32.xlu1 %v9422_v38, %s7082_s14 }
 0x32f   : > { %4469 = vst.msk [vmem:[#allocation3 + $0x68] sm:$0xff] %vm1267_vm4, %v4450_v53 }
 0x330   : > { %3458 = vst.msk [vmem:[#allocation3 + $0x198] sm:$0xff] %vm375_vm0, %v3450_v35  ;;  %v2860_v1 = vpop.f32.mrb[36].mxu1  ;;  %4509 = vrot.lane.b32.xlu0 %v4487_v24, %s7085_s21  ;;  %v3714_v59 = vpop.permute.xlu1 %3713  ;;  %v4938_v39 = vld [vmem:[#allocation3 + $0x48] sm:$0xff]  ;;  %v3311_v24 = vld [vmem:[#allocation2 + $0xe0] sm:$0xff] }
 0x331   : > { %4685 = vst.msk [vmem:[#allocation3 + $0x68] sm:$0xff] %vm1492_vm5, %v4666_v10  ;;  %v2861_v14 = vadd.f32 %v9159_v29, %v2860_v1  ;;  %v2862_v38 = vpop.f32.mrb[37].mxu1  ;;  %5246 = vmatmul.mubr.f32.gmra.mrb[70].mxu0 %v4938_v39  ;;  %v4264_v10 = vmul.f32 %v7367_v9, %v9435_v0  ;;  %v4488_v0 = vmul.f32 %v7721_v23, %v4480_v57 }
 0x332   : > { %3733 = vst.msk [vmem:[#allocation3 + $0x60] sm:$0xff] %vm1267_vm4, %v3714_v59  ;;  %v4668_v55 = vpop.permute.xlu0 %4667  ;;  %3773 = vrot.lane.b32.xlu1 %v3751_v22, %s7085_s21  ;;  %v3976_v38 = vmul.f32 %v7721_v23, %v9483_v61 }
 0x333   : > { %v3086_v41 = vadd.f32 %v8587_v5, %v2861_v14 }
 0x334   : > { %4287 = vrot.lane.b32.xlu0 %v4264_v10, %s7082_s14  ;;  %v3938_v58 = vpop.permute.xlu1 %3937  ;;  %v4162_v7 = vld [vmem:[#allocation2 + $0xd8] sm:$0xff] }
 0x335   : > { %v3283_v50 = vmul.f32 %v9413_v30, %v3086_v41  ;;  %3957 = vst.msk [vmem:[#allocation3 + $0x60] sm:$0xff] %vm1492_vm5, %v3938_v58  ;;  %v3443_v27 = vld [vmem:[#allocation2 + $0xd7] sm:$0xff] }
 0x336   : > { %v4228_v54 = vpop.permute.xlu0 %4227  ;;  %3997 = vrot.lane.b32.xlu1 %v3975_v2, %s7083_s18  ;;  %4170 = vst.msk [vmem:[#allocation3 + $0x1a0] sm:$0xff] %vm375_vm0, %v4162_v7  ;;  %v3451_v5 = vmul.f32 %v7508_v34, %v3443_v27  ;;  %v9533_v22 = vld [vmem:[#allocation2 + $0xd8] sm:$0xff]  ;;  %v3793_v7 = vld [vmem:[#allocation2 + $0xc9] sm:$0xff] }
 0x337   : > { %v3295_v56 = vadd.f32 %v9427_v36, %v3283_v50  ;;  %4246 = vst.msk [vmem:[#allocation3 + $0x80] sm:$0xff] %vm1066_vm3, %v4228_v54  ;;  %v9535_v52 = vld [vmem:[#allocation2 + $0xd1] sm:$0xff]  ;;  %v3312_v27 = vld [vmem:[#allocation2 + $0xe8] sm:$0xff] }
 0x338   : > { %v4942_v63 = vld [vmem:[#allocation3 + $0x68] sm:$0xff]  ;;  %v2865_v45 = vpop.f32.mrb[38].mxu1  ;;  %4511 = vrot.lane.b32.xlu0 %v4488_v0, %s7085_s21  ;;  %v3518_v11 = vpop.permute.xlu1 %3517  ;;  %3459 = vst.msk [vmem:[#allocation3 + $0x1b0] sm:$0xff] %vm375_vm0, %v3451_v5  ;;  %v4313_v57 = vmul.f32 %v7483_v18, %v9535_v52  ;;  %v9553_v61 = vld [vmem:[#allocation2 + $0xd7] sm:$0xff] }
 0x339   : > { %5250 = vmatprep.mubr.f32.mxu0 %v4942_v63  ;;  %v3303_v8 = vmax.f32 %v3295_v56, 0.0  ;;  %v2866_v35 = vadd.f32 %v9159_v29, %v2865_v45  ;;  %3535 = vst.msk [vmem:[#allocation3 + $0x90] sm:$0xff] %vm1066_vm3, %v3518_v11  ;;  %v2867_v53 = vpop.f32.mrb[39].mxu1  ;;  %v4537_v0 = vmul.f32 %v7389_v19, %v9553_v61  ;;  %v3801_v45 = vmul.f32 %v7483_v18, %v3793_v7 }
 0x33a   : > { %v4452_v1 = vpop.permute.xlu0 %4451  ;;  %3775 = vrot.lane.b32.xlu1 %v3752_v33, %s7085_s21  ;;  %v9542_v10 = vpop.f32.mrb[62].mxu0 }
 0x33b   : > { %v3319_v59 = vadd.f32 %v3311_v24, %v3303_v8  ;;  %v3091_v39 = vadd.f32 %v8582_v6, %v2866_v35  ;;  %4470 = vst.msk [vmem:[#allocation3 + $0x80] sm:$0xff] %vm1267_vm4, %v4452_v1  ;;  %v9547_v41 = vpop.f32.mrb[63].mxu0 }
 0x33c   : > { %4686 = vst.msk [vmem:[#allocation3 + $0x80] sm:$0xff] %vm1492_vm5, %v4668_v55  ;;  %4753 = vrot.lane.b32.xlu0 %v9533_v22, %s7083_s18  ;;  %v3716_v29 = vpop.permute.xlu1 %3715  ;;  %v4941_v14 = vld [vmem:[#allocation3 + $0x60] sm:$0xff] }
 0x33d   : > { %3327 = vst.msk [vmem:[#allocation2 + $0xe0] sm:$0xff] %vm375_vm0, %v3319_v59  ;;  %v3284_v6 = vmul.f32 %v9413_v30, %v3091_v39  ;;  %5251 = vmatmul.mubr.f32.gmra.mrb[72].mxu0 %v4941_v14  ;;  %v9586_v14 = vld [vmem:[%s10743_s5] ss:$0 sm:$0xff] }
 0x33e   : > { %3734 = vst.msk [vmem:[#allocation3 + $0x78] sm:$0xff] %vm1267_vm4, %v3716_v29  ;;  %v4670_v55 = vpop.permute.xlu0 %4669  ;;  %3999 = vrot.lane.b32.xlu1 %v3976_v38, %s7083_s18  ;;  %v4025_v29 = vmul.f32 %v7389_v19, %v9489_v4 }
 0x33f   : > { %v3296_v58 = vadd.f32 %v9427_v36, %v3284_v6 }
 0x340   : > { %4329 = vrot.lane.b32.xlu0 %v4313_v57, %s7082_s14  ;;  %v3940_v2 = vpop.permute.xlu1 %3939 }
 0x341   : > { %v3304_v50 = vmax.f32 %v3296_v58, 0.0  ;;  %3958 = vst.msk [vmem:[#allocation3 + $0x78] sm:$0xff] %vm1492_vm5, %v3940_v2 }
 0x342   : > { %v4230_v54 = vpop.permute.xlu0 %4229  ;;  %3603 = vrot.lane.b32.xlu1 %v9487_v42, %s7082_s14 }
 0x343   : > { %v3320_v5 = vadd.f32 %v3312_v27, %v3304_v50  ;;  %4247 = vst.msk [vmem:[#allocation3 + $0x98] sm:$0xff] %vm1066_vm3, %v4230_v54  ;;  %v4945_v56 = vld [vmem:[#allocation3 + $0x80] sm:$0xff] }
 0x344   : > { %4553 = vrot.lane.b32.xlu0 %v4537_v0, %s7085_s21  ;;  %v3520_v63 = vpop.permute.xlu1 %3519  ;;  %5255 = vmatprep.mubr.f32.mxu0 %v4945_v56  ;;  %v9564_v11 = vld [vmem:[#allocation2 + $0xd9] sm:$0xff] }
 0x345   : > { %3328 = vst.msk [vmem:[#allocation2 + $0xe8] sm:$0xff] %vm375_vm0, %v3320_v5  ;;  %v4889_v42 = vmul.f32 %v7483_v18, %v9564_v11  ;;  %v4163_v33 = vld [vmem:[#allocation2 + $0xe0] sm:$0xff]  ;;  %v4314_v57 = vmul.f32 %v7529_v44, %v9564_v11 }
 0x346   : > { %3536 = vst.msk [vmem:[#allocation3 + $0xa8] sm:$0xff] %vm1066_vm3, %v3520_v63  ;;  %v3444_v8 = vld [vmem:[#allocation2 + $0xdf] sm:$0xff]  ;;  %v4454_v35 = vpop.permute.xlu0 %4453  ;;  %3817 = vrot.lane.b32.xlu1 %v3801_v45, %s7085_s21 }
 0x347   : > { %4171 = vst.msk [vmem:[#allocation3 + $0x1b8] sm:$0xff] %vm375_vm0, %v4163_v33  ;;  %v3452_v53 = vmul.f32 %v7566_v62, %v3444_v8  ;;  %v9574_v24 = vld [vmem:[#allocation2 + $0xe0] sm:$0xff]  ;;  %4897 = vst.msk [vmem:[#allocation3 + $0x190] sm:$0xff] %vm375_vm0, %v4889_v42  ;;  %v3802_v33 = vmul.f32 %v7529_v44, %v9535_v52  ;;  %v4026_v52 = vmul.f32 %v7486_v21, %v9553_v61 }
 0x348   : > { %4471 = vst.msk [vmem:[#allocation3 + $0x98] sm:$0xff] %vm1267_vm4, %v4454_v35  ;;  %v2870_v1 = vpop.f32.mrb[40].mxu1  ;;  %4755 = vrot.lane.b32.xlu0 %v9574_v24, %s7083_s18  ;;  %v3718_v59 = vpop.permute.xlu1 %3717  ;;  %v4944_v39 = vld [vmem:[#allocation3 + $0x78] sm:$0xff]  ;;  %v3313_v35 = vld [vmem:[#allocation2 + $0xf0] sm:$0xff] }
 0x349   : > { %4687 = vst.msk [vmem:[#allocation3 + $0x98] sm:$0xff] %vm1492_vm5, %v4670_v55  ;;  %v2871_v38 = vadd.f32 %v9586_v14, %v2870_v1  ;;  %v2872_v6 = vpop.f32.mrb[41].mxu1  ;;  %5256 = vmatmul.mubr.f32.gmra.mrb[74].mxu0 %v4944_v39  ;;  %v9595_v58 = vld [vmem:[#allocation2 + $0xdf] sm:$0xff] }
 0x34a   : > { %3460 = vst.msk [vmem:[#allocation3 + $0x1c8] sm:$0xff] %vm375_vm0, %v3452_v53  ;;  %v4232_v55 = vpop.permute.xlu0 %4231  ;;  %4041 = vrot.lane.b32.xlu1 %v4025_v29, %s7083_s18  ;;  %v4538_v56 = vmul.f32 %v7486_v21, %v9595_v58 }
 0x34b   : > { %3735 = vst.msk [vmem:[#allocation3 + $0x90] sm:$0xff] %vm1267_vm4, %v3718_v59  ;;  %v3096_v4 = vadd.f32 %v8659_v15, %v2871_v38 }
 0x34c   : > { %4248 = vst.msk [vmem:[#allocation3 + $0xb0] sm:$0xff] %vm1066_vm3, %v4232_v55  ;;  %4331 = vrot.lane.b32.xlu0 %v4314_v57, %s7082_s14  ;;  %v3942_v2 = vpop.permute.xlu1 %3941  ;;  %v9598_v50 = vld [vmem:[#allocation2 + $0xe1] sm:$0xff] }
 0x34d   : > { %v3285_v7 = vmul.f32 %v9413_v30, %v3096_v4  ;;  %3959 = vst.msk [vmem:[#allocation3 + $0x90] sm:$0xff] %vm1492_vm5, %v3942_v2  ;;  %v4890_v27 = vmul.f32 %v7529_v44, %v9598_v50  ;;  %v4164_v54 = vld [vmem:[#allocation2 + $0xe8] sm:$0xff]  ;;  %v4315_v6 = vmul.f32 %v7598_v16, %v9598_v50 }
 0x34e   : > { %v3445_v0 = vld [vmem:[#allocation2 + $0xe7] sm:$0xff]  ;;  %v4456_v5 = vpop.permute.xlu0 %4455  ;;  %3605 = vrot.lane.b32.xlu1 %v9533_v22, %s7082_s14  ;;  %v4979_v15 = vld [vmem:[#allocation3 + $0x190] sm:$0xff]  ;;  %4172 = vst.msk [vmem:[#allocation3 + $0x1d0] sm:$0xff] %vm375_vm0, %v4164_v54 }
 0x34f   : > { %v3453_v63 = vmul.f32 %v7586_v12, %v3445_v0  ;;  %v3297_v45 = vadd.f32 %v9427_v36, %v3285_v7  ;;  %4472 = vst.msk [vmem:[#allocation3 + $0xb0] sm:$0xff] %vm1267_vm4, %v4456_v5  ;;  %6821 = vmatprep.mubr.msk.f32.mxu1 %vm375_vm0, %v4979_v15  ;;  %v9622_v59 = vld [vmem:[#allocation2 + $0xe8] sm:$0xff] }
 0x350   : > { %v4948_v42 = vld [vmem:[#allocation3 + $0x98] sm:$0xff]  ;;  %4898 = vst.msk [vmem:[#allocation3 + $0x1a8] sm:$0xff] %vm375_vm0, %v4890_v27  ;;  %4555 = vrot.lane.b32.xlu0 %v4538_v56, %s7085_s21  ;;  %v3720_v22 = vpop.permute.xlu1 %3719  ;;  %v9635_v4 = vld [vmem:[#allocation2 + $0xe7] sm:$0xff]  ;;  %v10781_v27 = vld [vmem:[#allocation9_spill] sm:$0xff] }
 0x351   : > { %4688 = vst.msk [vmem:[#allocation3 + $0xb0] sm:$0xff] %vm1492_vm5, %v9247_v40  ;;  %5260 = vmatprep.mubr.f32.mxu0 %v4948_v42  ;;  %v3305_v8 = vmax.f32 %v3297_v45, 0.0  ;;  %v4539_v5 = vmul.f32 %v7508_v34, %v9635_v4  ;;  %v3803_v45 = vmul.f32 %v7598_v16, %v9564_v11 }
 0x352   : > { %3461 = vst.msk [vmem:[#allocation3 + $0x1e0] sm:$0xff] %vm375_vm0, %v3453_v63  ;;  %v4706_v53 = vpop.permute.xlu0 %4705  ;;  %3819 = vrot.lane.b32.xlu1 %v3802_v33, %s7085_s21 }
 0x353   : > { %3736 = vst.msk [vmem:[#allocation3 + $0xa8] sm:$0xff] %vm1267_vm4, %v3720_v22  ;;  %v3321_v1 = vadd.f32 %v3313_v35, %v3305_v8 }
 0x354   : > { %4757 = vrot.lane.b32.xlu0 %v9622_v59, %s7083_s18  ;;  %v3944_v40 = vpop.permute.xlu1 %3943  ;;  %v4947_v39 = vld [vmem:[#allocation3 + $0x90] sm:$0xff] }
 0x355   : > { %3329 = vst.msk [vmem:[#allocation2 + $0xf0] sm:$0xff] %vm375_vm0, %v3321_v1  ;;  %5261 = vmatmul.mubr.f32.gmra.mrb[76].mxu0 %v4947_v39 }
 0x356   : > { %3960 = vst.msk [vmem:[#allocation3 + $0xa8] sm:$0xff] %vm1492_vm5, %v3944_v40  ;;  %v4274_v29 = vpop.permute.xlu0 %4273  ;;  %4043 = vrot.lane.b32.xlu1 %v4026_v52, %s7083_s18 }
 0x357   : > { %v4982_v38 = vld [vmem:[#allocation3 + $0x1a8] sm:$0xff]  ;;  %v2875_v55 = vpop.f32.mrb[42].mxu1  ;;  %4297 = vst.msk [vmem:[#allocation3 + $0xc8] sm:$0xff] %vm1066_vm3, %v4274_v29 }
 0x358   : > { %6822 = vmatmul.mubr.msk.f32.gmra.mrb[80].mxu1 %vm375_vm0, %v4982_v38  ;;  %v4951_v57 = vld [vmem:[#allocation3 + $0xb0] sm:$0xff]  ;;  %v2876_v61 = vadd.f32 %v9586_v14, %v2875_v55  ;;  %v2877_v2 = vpop.f32.mrb[43].mxu1  ;;  %4333 = vrot.lane.b32.xlu0 %v4315_v6, %s7082_s14  ;;  %v3556_v7 = vpop.permute.xlu1 %3555  ;;  %v4027_v38 = vmul.f32 %v7508_v34, %v9595_v58  ;;  %v3314_v6 = vld [vmem:[#allocation2 + $0xf8] sm:$0xff] }
 0x359   : > { %5265 = vmatprep.mubr.f32.mxu0 %v4951_v57  ;;  %3578 = vst.msk [vmem:[#allocation3 + $0xd8] sm:$0xff] %vm1066_vm3, %v3556_v7 }
 0x35a   : > { %v3101_v54 = vadd.f32 %v10781_v27, %v2876_v61  ;;  %v4498_v0 = vpop.permute.xlu0 %4497  ;;  %3607 = vrot.lane.b32.xlu1 %v9574_v24, %s7082_s14 }
 0x35b   : > { %4521 = vst.msk [vmem:[#allocation3 + $0xc8] sm:$0xff] %vm1267_vm4, %v4498_v0 }
 0x35c   : > { %v3286_v15 = vmul.f32 %v9413_v30, %v3101_v54  ;;  %4729 = vst.msk [vmem:[#allocation3 + $0xc8] sm:$0xff] %vm1492_vm5, %v4706_v53  ;;  %4557 = vrot.lane.b32.xlu0 %v4539_v5, %s7085_s21  ;;  %v3762_v56 = vpop.permute.xlu1 %3761  ;;  %v9651_v42 = vld [vmem:[#allocation2 + $0xe9] sm:$0xff] }
 0x35d   : > { %v4950_v63 = vld [vmem:[#allocation3 + $0xa8] sm:$0xff]  ;;  %3785 = vst.msk [vmem:[#allocation3 + $0xc0] sm:$0xff] %vm1267_vm4, %v3762_v56  ;;  %v4891_v24 = vmul.f32 %v7598_v16, %v9651_v42  ;;  %v4165_v22 = vld [vmem:[#allocation2 + $0xf0] sm:$0xff]  ;;  %v4316_v2 = vmul.f32 %v7625_v3, %v9651_v42 }
 0x35e   : > { %5266 = vmatmul.mubr.f32.gmra.mrb[78].mxu0 %v4950_v63  ;;  %v3446_v33 = vld [vmem:[#allocation2 + $0xef] sm:$0xff]  ;;  %v3298_v8 = vadd.f32 %v9427_v36, %v3286_v15  ;;  %v4708_v35 = vpop.permute.xlu0 %4707  ;;  %3821 = vrot.lane.b32.xlu1 %v3803_v45, %s7085_s21  ;;  %4173 = vst.msk [vmem:[#allocation3 + $0x1e8] sm:$0xff] %vm375_vm0, %v4165_v22 }
 0x35f   : > { %v3454_v53 = vmul.f32 %v7716_v17, %v3446_v33  ;;  %v9660_v1 = vld [vmem:[#allocation2 + $0xf0] sm:$0xff]  ;;  %4899 = vst.msk [vmem:[#allocation3 + $0x1c0] sm:$0xff] %vm375_vm0, %v4891_v24 }
 0x360   : > { %v2880_v11 = vpop.f32.mrb[44].mxu1  ;;  %v3306_v40 = vmax.f32 %v3298_v8, 0.0  ;;  %4759 = vrot.lane.b32.xlu0 %v9660_v1, %s7083_s18  ;;  %v3986_v29 = vpop.permute.xlu1 %3985  ;;  %v9675_v27 = vld [vmem:[#allocation2 + $0xef] sm:$0xff] }
 0x361   : > { %v2881_v39 = vadd.f32 %v9586_v14, %v2880_v11  ;;  %v2882_v52 = vpop.f32.mrb[45].mxu1  ;;  %3462 = vst.msk [vmem:[#allocation3 + $0x1f8] sm:$0xff] %vm375_vm0, %v3454_v53  ;;  %v4540_v45 = vmul.f32 %v7566_v62, %v9675_v27  ;;  %v3315_v53 = vld [vmem:[#allocation2 + $0x100] sm:$0xff] }
 0x362   : > { %4009 = vst.msk [vmem:[#allocation3 + $0xc0] sm:$0xff] %vm1492_vm5, %v3986_v29  ;;  %v3322_v55 = vadd.f32 %v3314_v6, %v3306_v40  ;;  %v4276_v61 = vpop.permute.xlu0 %4275  ;;  %4045 = vrot.lane.b32.xlu1 %v4027_v38, %s7083_s18 }
 0x363   : > { %v3106_v57 = vadd.f32 %v8867_v37, %v2881_v39  ;;  %4298 = vst.msk [vmem:[#allocation3 + $0xe0] sm:$0xff] %vm1066_vm3, %v4276_v61  ;;  %v4954_v7 = vld [vmem:[#allocation3 + $0xc8] sm:$0xff] }
 0x364   : > { %3330 = vst.msk [vmem:[#allocation2 + $0xf8] sm:$0xff] %vm375_vm0, %v3322_v55  ;;  %4335 = vrot.lane.b32.xlu0 %v4316_v2, %s7082_s14  ;;  %v3558_v0 = vpop.permute.xlu1 %3557  ;;  %5270 = vmatprep.mubr.f32.mxu0 %v4954_v7  ;;  %v6475_v39 = vld [vmem:[%s8643_s13 + $0xc] sm:$0x1] }
 0x365   : > { %v3287_v58 = vmul.f32 %v9413_v30, %v3106_v57  ;;  %v2885_v54 = vpop.f32.mrb[46].mxu1  ;;  %3579 = vst.msk [vmem:[#allocation3 + $0xf0] sm:$0xff] %vm1066_vm3, %v3558_v0  ;;  %v3316_v2 = vld [vmem:[#allocation2 + $0x108] sm:$0xff] }
 0x366   : > { %v2886_v37 = vadd.f32 %v9586_v14, %v2885_v54  ;;  %v2887_v5 = vpop.f32.mrb[47].mxu1  ;;  %v4500_v56 = vpop.permute.xlu0 %4499  ;;  %3609 = vrot.lane.b32.xlu1 %v9622_v59, %s7082_s14  ;;  %v4985_v63 = vld [vmem:[#allocation3 + $0x1c0] sm:$0xff]  ;;  %v3804_v59 = vmul.f32 %v7625_v3, %v9598_v50  ;;  %v4028_v50 = vmul.f32 %v7566_v62, %v9635_v4 }
 0x367   : > { %v3299_v15 = vadd.f32 %v9427_v36, %v3287_v58  ;;  %4522 = vst.msk [vmem:[#allocation3 + $0xe0] sm:$0xff] %vm1267_vm4, %v4500_v56  ;;  %6824 = vmatprep.mubr.msk.f32.mxu1 %vm375_vm0, %v4985_v63 }
 0x368   : > { %v3111_v24 = vadd.f32 %v8865_v43, %v2886_v37  ;;  %4730 = vst.msk [vmem:[#allocation3 + $0xe0] sm:$0xff] %vm1492_vm5, %v4708_v35  ;;  %4559 = vrot.lane.b32.xlu0 %v4540_v45, %s7085_s21  ;;  %v3764_v33 = vpop.permute.xlu1 %3763 }
 0x369   : > { %v3307_v22 = vmax.f32 %v3299_v15, 0.0  ;;  %v4953_v8 = vld [vmem:[#allocation3 + $0xc0] sm:$0xff]  ;;  %3786 = vst.msk [vmem:[#allocation3 + $0xd8] sm:$0xff] %vm1267_vm4, %v3764_v33  ;;  %v9734_v33 = vld [vmem:[%s8643_s13 + $0xd] ss:$0 sm:$0xff] }
 0x36a   : > { %v3288_v11 = vmul.f32 %v9413_v30, %v3111_v24  ;;  %5271 = vmatmul.mubr.f32.gmra.mrb[80].mxu0 %v4953_v8  ;;  %v4710_v40 = vpop.permute.xlu0 %4709  ;;  %3823 = vrot.lane.b32.xlu1 %v3804_v59, %s7085_s21 }
 0x36b   : > { %v3323_v43 = vadd.f32 %v3315_v53, %v3307_v22  ;;  %v9699_v52 = vld [vmem:[#allocation2 + $0xf8] sm:$0xff] }
 0x36c   : > { %v3300_v35 = vadd.f32 %v9427_v36, %v3288_v11  ;;  %v9701_v29 = vld [vmem:[#allocation2 + $0xf1] sm:$0xff]  ;;  %4761 = vrot.lane.b32.xlu0 %v9699_v52, %s7083_s18  ;;  %v3988_v30 = vpop.permute.xlu1 %3987  ;;  %v3336_v36 = vadd.f32 1.0, %v6475_v39 }
 0x36d   : > { %3331 = vst.msk [vmem:[#allocation2 + $0x100] sm:$0xff] %vm375_vm0, %v3323_v43  ;;  %v4892_v38 = vmul.f32 %v7625_v3, %v9701_v29  ;;  %v4166_v6 = vld [vmem:[#allocation2 + $0xf8] sm:$0xff]  ;;  %v4317_v4 = vmul.f32 %v7690_v26, %v9701_v29 }
 0x36e   : > { %v3447_v55 = vld [vmem:[#allocation2 + $0xf7] sm:$0xff]  ;;  %v3308_v57 = vmax.f32 %v3300_v35, 0.0  ;;  %4010 = vst.msk [vmem:[#allocation3 + $0xd8] sm:$0xff] %vm1492_vm5, %v3988_v30  ;;  %v4278_v7 = vpop.permute.xlu0 %4277  ;;  %4047 = vrot.lane.b32.xlu1 %v4028_v50, %s7083_s18  ;;  %v9725_v56 = vrot.slane %v3336_v36, %v8681_v32 }
 0x36f   : > { %4174 = vst.msk [vmem:[#allocation3 + $0x200] sm:$0xff] %vm375_vm0, %v4166_v6  ;;  %v3455_v61 = vmul.f32 %v7728_v25, %v3447_v55  ;;  %4900 = vst.msk [vmem:[#allocation3 + $0x1d8] sm:$0xff] %vm375_vm0, %v4892_v38  ;;  %v4957_v54 = vld [vmem:[#allocation3 + $0xe0] sm:$0xff]  ;;  %v9718_v0 = vld [vmem:[#allocation2 + $0xf7] sm:$0xff]  ;;  %v4029_v6 = vmul.f32 %v7586_v12, %v9675_v27 }
 0x370   : > { %v3324_v58 = vadd.f32 %v3316_v2, %v3308_v57  ;;  %4299 = vst.msk [vmem:[#allocation3 + $0xf8] sm:$0xff] %vm1066_vm3, %v4278_v7  ;;  %4337 = vrot.lane.b32.xlu0 %v4317_v4, %s7082_s14  ;;  %v3560_v5 = vpop.permute.xlu1 %3559  ;;  %5275 = vmatprep.mubr.f32.mxu0 %v4957_v54  ;;  %v4541_v24 = vmul.f32 %v7586_v12, %v9718_v0  ;;  %v3369_v4 = vld [vmem:[#allocation2 + $0x130] sm:$0xff] }
 0x371   : > { %3463 = vst.msk [vmem:[#allocation3 + $0x210] sm:$0xff] %vm375_vm0, %v3455_v61  ;;  %v2890_v37 = vpop.f32.mrb[48].mxu1 }
 0x372   : > { %3332 = vst.msk [vmem:[#allocation2 + $0x108] sm:$0xff] %vm375_vm0, %v3324_v58  ;;  %v2891_v15 = vadd.f32 %v9586_v14, %v2890_v37  ;;  %v2892_v63 = vpop.f32.mrb[49].mxu1  ;;  %v4502_v45 = vpop.permute.xlu0 %4501  ;;  %3611 = vrot.lane.b32.xlu1 %v9660_v1, %s7082_s14  ;;  %v3805_v1 = vmul.f32 %v7690_v26, %v9651_v42 }
 0x373   : > { %3580 = vst.msk [vmem:[#allocation3 + $0x108] sm:$0xff] %vm1066_vm3, %v3560_v5 }
 0x374   : > { %v3116_v22 = vadd.f32 %v8888_v13, %v2891_v15  ;;  %4523 = vst.msk [vmem:[#allocation3 + $0xf8] sm:$0xff] %vm1267_vm4, %v4502_v45  ;;  %v9737_v8 = vld [vmem:[#allocation2 + $0xf9] sm:$0xff]  ;;  %4561 = vrot.lane.b32.xlu0 %v4541_v24, %s7085_s21  ;;  %v3766_v59 = vpop.permute.xlu1 %3765 }
 0x375   : > { %4731 = vst.msk [vmem:[#allocation3 + $0xf8] sm:$0xff] %vm1492_vm5, %v4710_v40  ;;  %v4956_v53 = vld [vmem:[#allocation3 + $0xd8] sm:$0xff]  ;;  %v4893_v11 = vmul.f32 %v7690_v26, %v9737_v8  ;;  %v4167_v43 = vld [vmem:[#allocation2 + $0x100] sm:$0xff]  ;;  %v4318_v27 = vmul.f32 %v7695_v49, %v9737_v8 }
 0x376   : > { %v3448_v13 = vld [vmem:[#allocation2 + $0xff] sm:$0xff]  ;;  %v3341_v39 = vmul.f32 %v9725_v56, %v3116_v22  ;;  %3787 = vst.msk [vmem:[#allocation3 + $0xf0] sm:$0xff] %vm1267_vm4, %v3766_v59  ;;  %5276 = vmatmul.mubr.f32.gmra.mrb[82].mxu0 %v4956_v53  ;;  %v4712_v30 = vpop.permute.xlu0 %4711  ;;  %3825 = vrot.lane.b32.xlu1 %v3805_v1, %s7085_s21 }
 0x377   : > { %v4988_v35 = vld [vmem:[#allocation3 + $0x1d8] sm:$0xff]  ;;  %4175 = vst.msk [vmem:[#allocation3 + $0x218] sm:$0xff] %vm375_vm0, %v4167_v43  ;;  %v3456_v40 = vmul.f32 %v7721_v23, %v3448_v13  ;;  %4901 = vst.msk [vmem:[#allocation3 + $0x1f0] sm:$0xff] %vm375_vm0, %v4893_v11  ;;  %v9753_v50 = vld [vmem:[#allocation2 + $0x100] sm:$0xff]  ;;  %v3806_v13 = vmul.f32 %v7695_v49, %v9701_v29 }
 0x378   : > { %6825 = vmatmul.mubr.msk.f32.gmra.mrb[82].mxu1 %vm375_vm0, %v4988_v35  ;;  %v3353_v42 = vadd.f32 %v9734_v33, %v3341_v39  ;;  %4763 = vrot.lane.b32.xlu0 %v9753_v50, %s7083_s18  ;;  %v3990_v38 = vpop.permute.xlu1 %3989  ;;  %v9774_v5 = vld [vmem:[#allocation2 + $0xff] sm:$0xff] }
 0x379   : > { %3464 = vst.msk [vmem:[#allocation3 + $0x228] sm:$0xff] %vm375_vm0, %v3456_v40  ;;  %v9760_v55 = vld [vmem:[#allocation2 + $0x101] sm:$0xff]  ;;  %v9762_v57 = vld [vmem:[#allocation2 + $0x109] sm:$0xff]  ;;  %v4542_v53 = vmul.f32 %v7716_v17, %v9774_v5 }
 0x37a   : > { %v3361_v36 = vmax.f32 %v3353_v42, 0.0  ;;  %4011 = vst.msk [vmem:[#allocation3 + $0xf0] sm:$0xff] %vm1492_vm5, %v3990_v38  ;;  %v4894_v61 = vmul.f32 %v7695_v49, %v9760_v55  ;;  %v4895_v2 = vmul.f32 %v7657_v48, %v9762_v57  ;;  %v4168_v7 = vld [vmem:[#allocation2 + $0x108] sm:$0xff]  ;;  %v4280_v58 = vpop.permute.xlu0 %4279  ;;  %4049 = vrot.lane.b32.xlu1 %v4029_v6, %s7083_s18  ;;  %v4030_v42 = vmul.f32 %v7716_v17, %v9718_v0  ;;  %v5000_v6 = vld [vmem:[#allocation3 + $0x238] sm:$0xff] }
 0x37b   : > { %4176 = vst.msk [vmem:[#allocation3 + $0x230] sm:$0xff] %vm375_vm0, %v4168_v7  ;;  %v3370_v7 = vld [vmem:[#allocation2 + $0x138] sm:$0xff]  ;;  %v4319_v0 = vmul.f32 %v7657_v48, %v9760_v55 }
 0x37c   : > { %v3377_v54 = vadd.f32 %v3369_v4, %v3361_v36  ;;  %4300 = vst.msk [vmem:[#allocation3 + $0x110] sm:$0xff] %vm1066_vm3, %v4280_v58  ;;  %v4960_v37 = vld [vmem:[#allocation3 + $0xf8] sm:$0xff]  ;;  %4339 = vrot.lane.b32.xlu0 %v4318_v27, %s7082_s14  ;;  %v3562_v63 = vpop.permute.xlu1 %3561 }
 0x37d   : > { %4902 = vst.msk [vmem:[#allocation3 + $0x208] sm:$0xff] %vm375_vm0, %v4894_v61  ;;  %4903 = vst.msk [vmem:[#allocation3 + $0x220] sm:$0xff] %vm375_vm0, %v4895_v2  ;;  %v2895_v15 = vpop.f32.mrb[50].mxu1  ;;  %5280 = vmatprep.mubr.f32.mxu0 %v4960_v37 }
 0x37e   : > { %3385 = vst.msk [vmem:[#allocation2 + $0x130] sm:$0xff] %vm375_vm0, %v3377_v54  ;;  %v2896_v45 = vadd.f32 %v9586_v14, %v2895_v15  ;;  %v2897_v24 = vpop.f32.mrb[51].mxu1  ;;  %v4991_v22 = vld [vmem:[#allocation3 + $0x1f0] sm:$0xff]  ;;  %v4504_v59 = vpop.permute.xlu0 %4503  ;;  %3613 = vrot.lane.b32.xlu1 %v9699_v52, %s7082_s14  ;;  %v9815_v54 = vld [vmem:[#allocation2 + $0x107] sm:$0xff] }
 0x37f   : > { %3581 = vst.msk [vmem:[#allocation3 + $0x120] sm:$0xff] %vm1066_vm3, %v3562_v63  ;;  %6827 = vmatprep.mubr.msk.f32.mxu1 %vm375_vm0, %v4991_v22  ;;  %v4543_v22 = vmul.f32 %v7728_v25, %v9815_v54 }
 0x380   : > { %v3121_v1 = vadd.f32 %v8874_v20, %v2896_v45  ;;  %4524 = vst.msk [vmem:[#allocation3 + $0x110] sm:$0xff] %vm1267_vm4, %v4504_v59  ;;  %4563 = vrot.lane.b32.xlu0 %v4542_v53, %s7085_s21  ;;  %v3768_v11 = vpop.permute.xlu1 %3767 }
 0x381   : > { %4732 = vst.msk [vmem:[#allocation3 + $0x110] sm:$0xff] %vm1492_vm5, %v4712_v30  ;;  %v4959_v43 = vld [vmem:[#allocation3 + $0xf0] sm:$0xff]  ;;  %v4743_v30 = vld [vmem:[#allocation2 + $0x108] sm:$0xff] }
 0x382   : > { %v3342_v39 = vmul.f32 %v9725_v56, %v3121_v1  ;;  %3788 = vst.msk [vmem:[#allocation3 + $0x108] sm:$0xff] %vm1267_vm4, %v3768_v11  ;;  %5281 = vmatmul.mubr.f32.gmra.mrb[84].mxu0 %v4959_v43  ;;  %v4714_v52 = vpop.permute.xlu0 %4713  ;;  %3827 = vrot.lane.b32.xlu1 %v3806_v13, %s7085_s21  ;;  %v3807_v11 = vmul.f32 %v7657_v48, %v9737_v8 }
 0x383   : > { %v4031_v8 = vmul.f32 %v7728_v25, %v9774_v5 }
 0x384   : > { %v4994_v20 = vld [vmem:[#allocation3 + $0x208] sm:$0xff]  ;;  %v4997_v35 = vld [vmem:[#allocation3 + $0x220] sm:$0xff]  ;;  %v3354_v40 = vadd.f32 %v9734_v33, %v3342_v39  ;;  %4765 = vrot.lane.b32.xlu0 %v4743_v30, %s7083_s18  ;;  %v3992_v29 = vpop.permute.xlu1 %3991 }
 0x385   : > { %6828 = vmatmul.mubr.msk.f32.gmra.mrb[84].mxu1 %vm375_vm0, %v4994_v20  ;;  %v9802_v38 = vld [vmem:[#allocation2 + $0x130] sm:$0xff]  ;;  %4012 = vst.msk [vmem:[#allocation3 + $0x108] sm:$0xff] %vm1492_vm5, %v3992_v29 }
 0x386   : > { %6830 = vmatprep.mubr.msk.f32.mxu1 %vm375_vm0, %v4997_v35  ;;  %v9804_v36 = vld [vmem:[#allocation2 + $0x12f] sm:$0xff]  ;;  %v3362_v61 = vmax.f32 %v3354_v40, 0.0  ;;  %4185 = vst.msk [vmem:[#allocation3 + $0x248] sm:$0xff] %vm375_vm0, %v9802_v38  ;;  %v4282_v4 = vpop.permute.xlu0 %4281  ;;  %4051 = vrot.lane.b32.xlu1 %v4030_v42, %s7083_s18 }
 0x387   : > { %v3474_v2 = vmul.f32 %v7486_v21, %v9804_v36  ;;  %4301 = vst.msk [vmem:[#allocation3 + $0x128] sm:$0xff] %vm1066_vm3, %v4282_v4  ;;  %v4536_v39 = vld [vmem:[#allocation2 + $0x10f] sm:$0xff] }
 0x388   : > { %v3378_v58 = vadd.f32 %v3370_v7, %v3362_v61  ;;  %v4963_v27 = vld [vmem:[#allocation3 + $0x110] sm:$0xff]  ;;  %4341 = vrot.lane.b32.xlu0 %v4319_v0, %s7082_s14  ;;  %v3564_v15 = vpop.permute.xlu1 %3563  ;;  %v4544_v29 = vmul.f32 %v7721_v23, %v4536_v39  ;;  %v3808_v7 = vmul.f32 %v7367_v9, %v9760_v55 }
 0x389   : > { %6831 = vmatmul.mubr.msk.f32.gmra.mrb[86].mxu1 %vm375_vm0, %v5000_v6  ;;  %3482 = vst.msk [vmem:[#allocation3 + $0x258] sm:$0xff] %vm375_vm0, %v3474_v2  ;;  %v2900_v37 = vpop.f32.mrb[52].mxu1  ;;  %5285 = vmatprep.mubr.f32.mxu0 %v4963_v27 }
 0x38a   : > { %3386 = vst.msk [vmem:[#allocation2 + $0x138] sm:$0xff] %vm375_vm0, %v3378_v58  ;;  %v2901_v63 = vadd.f32 %v9586_v14, %v2900_v37  ;;  %v2902_v45 = vpop.f32.mrb[53].mxu1  ;;  %v4506_v24 = vpop.permute.xlu0 %4505  ;;  %3615 = vrot.lane.b32.xlu1 %v9753_v50, %s7082_s14 }
 0x38b   : > { %3582 = vst.msk [vmem:[#allocation3 + $0x138] sm:$0xff] %vm1066_vm3, %v3564_v15 }
 0x38c   : > { %v3126_v59 = vadd.f32 %v8979_v46, %v2901_v63  ;;  %4525 = vst.msk [vmem:[#allocation3 + $0x128] sm:$0xff] %vm1267_vm4, %v4506_v24  ;;  %4565 = vrot.lane.b32.xlu0 %v4543_v22, %s7085_s21  ;;  %v3770_v53 = vpop.permute.xlu1 %3769  ;;  %v4962_v1 = vld [vmem:[#allocation3 + $0x108] sm:$0xff]  ;;  %v4320_v46 = vmul.f32 %v7367_v9, %v9762_v57  ;;  %v3371_v57 = vld [vmem:[#allocation2 + $0x140] sm:$0xff]  ;;  %v4032_v63 = vmul.f32 %v7721_v23, %v9815_v54 }
 0x38d   : > { %4733 = vst.msk [vmem:[#allocation3 + $0x128] sm:$0xff] %vm1492_vm5, %v4714_v52  ;;  %5286 = vmatmul.mubr.f32.gmra.mrb[86].mxu0 %v4962_v1 }
 0x38e   : > { %v3343_v43 = vmul.f32 %v9725_v56, %v3126_v59  ;;  %3789 = vst.msk [vmem:[#allocation3 + $0x120] sm:$0xff] %vm1267_vm4, %v3770_v53  ;;  %v4716_v50 = vpop.permute.xlu0 %4715  ;;  %3829 = vrot.lane.b32.xlu1 %v3807_v11, %s7085_s21 }
 0x390   : > { %v3355_v13 = vadd.f32 %v9734_v33, %v3343_v43  ;;  %4343 = vrot.lane.b32.xlu0 %v4320_v46, %s7082_s14  ;;  %v3994_v52 = vpop.permute.xlu1 %3993  ;;  %v3849_v43 = vld [vmem:[#allocation2 + $0x129] sm:$0xff] }
 0x391   : > { %v9842_v20 = vld [vmem:[#allocation2 + $0x138] sm:$0xff]  ;;  %4013 = vst.msk [vmem:[#allocation3 + $0x120] sm:$0xff] %vm1492_vm5, %v3994_v52  ;;  %v3372_v46 = vld [vmem:[#allocation2 + $0x148] sm:$0xff] }
 0x392   : > { %v9844_v35 = vld [vmem:[#allocation2 + $0x137] sm:$0xff]  ;;  %v3363_v40 = vmax.f32 %v3355_v13, 0.0  ;;  %4186 = vst.msk [vmem:[#allocation3 + $0x260] sm:$0xff] %vm375_vm0, %v9842_v20  ;;  %v4284_v30 = vpop.permute.xlu0 %4283  ;;  %4053 = vrot.lane.b32.xlu1 %v4031_v8, %s7083_s18 }
 0x393   : > { %v3475_v42 = vmul.f32 %v7508_v34, %v9844_v35  ;;  %4302 = vst.msk [vmem:[#allocation3 + $0x140] sm:$0xff] %vm1066_vm3, %v4284_v30  ;;  %v9864_v37 = vld [vmem:[#allocation2 + $0x131] sm:$0xff]  ;;  %v4593_v39 = vmul.f32 %v7389_v19, %v9844_v35 }
 0x394   : > { %v3379_v5 = vadd.f32 %v3371_v57, %v3363_v40  ;;  %v4966_v6 = vld [vmem:[#allocation3 + $0x128] sm:$0xff]  ;;  %4567 = vrot.lane.b32.xlu0 %v4544_v29, %s7085_s21  ;;  %v3566_v2 = vpop.permute.xlu1 %3565  ;;  %v4369_v24 = vmul.f32 %v7483_v18, %v9864_v37  ;;  %v3857_v29 = vmul.f32 %v7483_v18, %v3849_v43 }
 0x395   : > { %v2905_v61 = vpop.f32.mrb[54].mxu1  ;;  %5290 = vmatprep.mubr.f32.mxu0 %v4966_v6  ;;  %3483 = vst.msk [vmem:[#allocation3 + $0x270] sm:$0xff] %vm375_vm0, %v3475_v42 }
 0x396   : > { %3387 = vst.msk [vmem:[#allocation2 + $0x140] sm:$0xff] %vm375_vm0, %v3379_v5  ;;  %v2906_v4 = vadd.f32 %v9586_v14, %v2905_v61  ;;  %v2907_v0 = vpop.f32.mrb[55].mxu1  ;;  %v4508_v58 = vpop.permute.xlu0 %4507  ;;  %3831 = vrot.lane.b32.xlu1 %v3808_v7, %s7085_s21 }
 0x397   : > { %3583 = vst.msk [vmem:[#allocation3 + $0x150] sm:$0xff] %vm1066_vm3, %v3566_v2  ;;  %v4081_v2 = vmul.f32 %v7389_v19, %v9804_v36 }
 0x398   : > { %v3131_v27 = vadd.f32 %v8973_v51, %v2906_v4  ;;  %4526 = vst.msk [vmem:[#allocation3 + $0x140] sm:$0xff] %vm1267_vm4, %v4508_v58  ;;  %4801 = vrot.lane.b32.xlu0 %v9842_v20, %s7083_s18  ;;  %v3772_v55 = vpop.permute.xlu1 %3771  ;;  %v4965_v15 = vld [vmem:[#allocation3 + $0x120] sm:$0xff] }
 0x399   : > { %4734 = vst.msk [vmem:[#allocation3 + $0x140] sm:$0xff] %vm1492_vm5, %v4716_v50  ;;  %5291 = vmatmul.mubr.f32.gmra.mrb[88].mxu0 %v4965_v15 }
 0x39a   : > { %v3344_v45 = vmul.f32 %v9725_v56, %v3131_v27  ;;  %3790 = vst.msk [vmem:[#allocation3 + $0x138] sm:$0xff] %vm1267_vm4, %v3772_v55  ;;  %v4718_v51 = vpop.permute.xlu0 %4717  ;;  %4055 = vrot.lane.b32.xlu1 %v4032_v63, %s7083_s18 }
 0x39c   : > { %v3356_v22 = vadd.f32 %v9734_v33, %v3344_v45  ;;  %4385 = vrot.lane.b32.xlu0 %v4369_v24, %s7082_s14  ;;  %v3996_v59 = vpop.permute.xlu1 %3995  ;;  %v3373_v45 = vld [vmem:[#allocation2 + $0x150] sm:$0xff] }
 0x39d   : > { %v9878_v53 = vld [vmem:[#allocation2 + $0x140] sm:$0xff]  ;;  %4014 = vst.msk [vmem:[#allocation3 + $0x138] sm:$0xff] %vm1492_vm5, %v3996_v59 }
 0x39e   : > { %v9880_v1 = vld [vmem:[#allocation2 + $0x139] sm:$0xff]  ;;  %v3364_v11 = vmax.f32 %v3356_v22, 0.0  ;;  %4187 = vst.msk [vmem:[#allocation3 + $0x278] sm:$0xff] %vm375_vm0, %v9878_v53  ;;  %v4286_v13 = vpop.permute.xlu0 %4285  ;;  %3651 = vrot.lane.b32.xlu1 %v9802_v38, %s7082_s14 }
 0x39f   : > { %v9882_v54 = vld [vmem:[#allocation2 + $0x13f] sm:$0xff]  ;;  %v4913_v50 = vmul.f32 %v7483_v18, %v9880_v1  ;;  %4303 = vst.msk [vmem:[#allocation3 + $0x158] sm:$0xff] %vm1066_vm3, %v4286_v13  ;;  %v4370_v0 = vmul.f32 %v7529_v44, %v9880_v1 }
 0x3a0   : > { %v3476_v52 = vmul.f32 %v7566_v62, %v9882_v54  ;;  %v3380_v8 = vadd.f32 %v3372_v46, %v3364_v11  ;;  %v4969_v40 = vld [vmem:[#allocation3 + $0x140] sm:$0xff]  ;;  %4609 = vrot.lane.b32.xlu0 %v4593_v39, %s7085_s21  ;;  %v3568_v30 = vpop.permute.xlu1 %3567  ;;  %v4594_v24 = vmul.f32 %v7486_v21, %v9882_v54 }
 0x3a1   : > { %4921 = vst.msk [vmem:[#allocation3 + $0x250] sm:$0xff] %vm375_vm0, %v4913_v50  ;;  %v2910_v57 = vpop.f32.mrb[56].mxu1  ;;  %5295 = vmatprep.mubr.f32.mxu0 %v4969_v40 }
 0x3a2   : > { %3484 = vst.msk [vmem:[#allocation3 + $0x288] sm:$0xff] %vm375_vm0, %v3476_v52  ;;  %3388 = vst.msk [vmem:[#allocation2 + $0x148] sm:$0xff] %vm375_vm0, %v3380_v8  ;;  %v2911_v38 = vadd.f32 %v9586_v14, %v2910_v57  ;;  %v2912_v42 = vpop.f32.mrb[57].mxu1  ;;  %v4510_v5 = vpop.permute.xlu0 %4509  ;;  %3873 = vrot.lane.b32.xlu1 %v3857_v29, %s7085_s21 }
 0x3a3   : > { %3584 = vst.msk [vmem:[#allocation3 + $0x168] sm:$0xff] %vm1066_vm3, %v3568_v30 }
 0x3a4   : > { %v3136_v6 = vadd.f32 %v9066_v28, %v2911_v38  ;;  %4527 = vst.msk [vmem:[#allocation3 + $0x158] sm:$0xff] %vm1267_vm4, %v4510_v5  ;;  %4803 = vrot.lane.b32.xlu0 %v9878_v53, %s7083_s18  ;;  %v3774_v18 = vpop.permute.xlu1 %3773  ;;  %v4968_v61 = vld [vmem:[#allocation3 + $0x138] sm:$0xff] }
 0x3a5   : > { %4735 = vst.msk [vmem:[#allocation3 + $0x158] sm:$0xff] %vm1492_vm5, %v4718_v51  ;;  %5296 = vmatmul.mubr.f32.gmra.mrb[90].mxu0 %v4968_v61  ;;  %v3374_v61 = vld [vmem:[#allocation2 + $0x158] sm:$0xff] }
 0x3a6   : > { %v3345_v7 = vmul.f32 %v9725_v56, %v3136_v6  ;;  %3791 = vst.msk [vmem:[#allocation3 + $0x150] sm:$0xff] %vm1267_vm4, %v3774_v18  ;;  %v4288_v4 = vpop.permute.xlu0 %4287  ;;  %4097 = vrot.lane.b32.xlu1 %v4081_v2, %s7083_s18 }
 0x3a7   : > { %4304 = vst.msk [vmem:[#allocation3 + $0x170] sm:$0xff] %vm1066_vm3, %v4288_v4 }
 0x3a8   : > { %v5003_v28 = vld [vmem:[#allocation3 + $0x250] sm:$0xff]  ;;  %v3357_v58 = vadd.f32 %v9734_v33, %v3345_v7  ;;  %4387 = vrot.lane.b32.xlu0 %v4370_v0, %s7082_s14  ;;  %v3998_v19 = vpop.permute.xlu1 %3997 }
 0x3a9   : > { %6833 = vmatprep.mubr.msk.f32.mxu1 %vm375_vm0, %v5003_v28  ;;  %v9920_v36 = vld [vmem:[#allocation2 + $0x148] sm:$0xff]  ;;  %4015 = vst.msk [vmem:[#allocation3 + $0x150] sm:$0xff] %vm1492_vm5, %v3998_v19 }
 0x3aa   : > { %v9922_v27 = vld [vmem:[#allocation2 + $0x141] sm:$0xff]  ;;  %v3365_v15 = vmax.f32 %v3357_v58, 0.0  ;;  %4188 = vst.msk [vmem:[#allocation3 + $0x290] sm:$0xff] %vm375_vm0, %v9920_v36  ;;  %v4512_v51 = vpop.permute.xlu0 %4511  ;;  %3653 = vrot.lane.b32.xlu1 %v9842_v20, %s7082_s14  ;;  %v3858_v20 = vmul.f32 %v7529_v44, %v9864_v37  ;;  %v4083_v58 = vmul.f32 %v7508_v34, %v9882_v54 }
 0x3ab   : > { %v9924_v55 = vld [vmem:[#allocation2 + $0x147] sm:$0xff]  ;;  %v4914_v63 = vmul.f32 %v7529_v44, %v9922_v27  ;;  %4528 = vst.msk [vmem:[#allocation3 + $0x170] sm:$0xff] %vm1267_vm4, %v4512_v51  ;;  %v4082_v44 = vmul.f32 %v7486_v21, %v9844_v35  ;;  %v3859_v35 = vmul.f32 %v7598_v16, %v9880_v1 }
 0x3ac   : > { %v3477_v22 = vmul.f32 %v7586_v12, %v9924_v55  ;;  %v3381_v59 = vadd.f32 %v3373_v45, %v3365_v15  ;;  %v4972_v11 = vld [vmem:[#allocation3 + $0x158] sm:$0xff]  ;;  %4736 = vst.msk [vmem:[#allocation3 + $0x170] sm:$0xff] %vm1492_vm5, %v9259_v31  ;;  %v2915_v43 = vpop.f32.mrb[58].mxu1  ;;  %4611 = vrot.lane.b32.xlu0 %v4594_v24, %s7085_s21  ;;  %v3776_v50 = vpop.permute.xlu1 %3775  ;;  %v4595_v1 = vmul.f32 %v7508_v34, %v9924_v55 }
 0x3ad   : > { %4922 = vst.msk [vmem:[#allocation3 + $0x268] sm:$0xff] %vm375_vm0, %v4914_v63  ;;  %5300 = vmatprep.mubr.f32.mxu0 %v4972_v11  ;;  %v2916_v46 = vadd.f32 %v9586_v14, %v2915_v43  ;;  %v2917_v13 = vpop.f32.mrb[59].mxu1 }
 0x3ae   : > { %3485 = vst.msk [vmem:[#allocation3 + $0x2a0] sm:$0xff] %vm375_vm0, %v3477_v22  ;;  %3389 = vst.msk [vmem:[#allocation2 + $0x150] sm:$0xff] %vm375_vm0, %v3381_v59  ;;  %v4754_v39 = vpop.permute.xlu0 %4753  ;;  %3875 = vrot.lane.b32.xlu1 %v3858_v20, %s7085_s21 }
 0x3af   : > { %3792 = vst.msk [vmem:[#allocation3 + $0x168] sm:$0xff] %vm1267_vm4, %v3776_v50  ;;  %v3141_v31 = vadd.f32 %v9059_v60, %v2916_v46  ;;  %v4371_v60 = vmul.f32 %v7598_v16, %v9922_v27  ;;  %v3860_v50 = vmul.f32 %v7625_v3, %v9922_v27 }
 0x3b0   : > { %4805 = vrot.lane.b32.xlu0 %v9920_v36, %s7083_s18  ;;  %v4000_v52 = vpop.permute.xlu1 %3999  ;;  %v4971_v8 = vld [vmem:[#allocation3 + $0x150] sm:$0xff] }
 0x3b1   : > { %v3346_v37 = vmul.f32 %v9725_v56, %v3141_v31  ;;  %4016 = vst.msk [vmem:[#allocation3 + $0x168] sm:$0xff] %vm1492_vm5, %v4000_v52  ;;  %5301 = vmatmul.mubr.f32.gmra.mrb[92].mxu0 %v4971_v8  ;;  %v3375_v31 = vld [vmem:[#allocation2 + $0x160] sm:$0xff] }
 0x3b2   : > { %v4330_v40 = vpop.permute.xlu0 %4329  ;;  %4099 = vrot.lane.b32.xlu1 %v4082_v44, %s7083_s18 }
 0x3b3   : > { %v3358_v30 = vadd.f32 %v9734_v33, %v3346_v37  ;;  %4353 = vst.msk [vmem:[#allocation3 + $0x188] sm:$0xff] %vm1066_vm3, %v4330_v40  ;;  %v4975_v29 = vld [vmem:[#allocation3 + $0x170] sm:$0xff]  ;;  %v4084_v40 = vmul.f32 %v7566_v62, %v9924_v55 }
 0x3b4   : > { %v5006_v57 = vld [vmem:[#allocation3 + $0x268] sm:$0xff]  ;;  %4389 = vrot.lane.b32.xlu0 %v4371_v60, %s7082_s14  ;;  %v3604_v21 = vpop.permute.xlu1 %3603  ;;  %5305 = vmatprep.mubr.f32.mxu0 %v4975_v29 }
 0x3b5   : > { %6834 = vmatmul.mubr.msk.f32.gmra.mrb[88].mxu1 %vm375_vm0, %v5006_v57  ;;  %v9965_v38 = vld [vmem:[#allocation2 + $0x149] sm:$0xff]  ;;  %v3366_v6 = vmax.f32 %v3358_v30, 0.0  ;;  %3626 = vst.msk [vmem:[#allocation3 + $0x198] sm:$0xff] %vm1066_vm3, %v3604_v21 }
 0x3b6   : > { %v9967_v42 = vld [vmem:[#allocation2 + $0x14f] sm:$0xff]  ;;  %v4915_v18 = vmul.f32 %v7598_v16, %v9965_v38  ;;  %v4554_v2 = vpop.permute.xlu0 %4553  ;;  %3877 = vrot.lane.b32.xlu1 %v3859_v35, %s7085_s21  ;;  %v4372_v45 = vmul.f32 %v7625_v3, %v9965_v38 }
 0x3b7   : > { %v9969_v5 = vld [vmem:[#allocation2 + $0x150] sm:$0xff]  ;;  %v3478_v7 = vmul.f32 %v7716_v17, %v9967_v42  ;;  %v3382_v4 = vadd.f32 %v3374_v61, %v3366_v6  ;;  %4577 = vst.msk [vmem:[#allocation3 + $0x188] sm:$0xff] %vm1267_vm4, %v4554_v2  ;;  %v4596_v59 = vmul.f32 %v7566_v62, %v9967_v42 }
 0x3b8   : > { %4189 = vst.msk [vmem:[#allocation3 + $0x2a8] sm:$0xff] %vm375_vm0, %v9969_v5  ;;  %4923 = vst.msk [vmem:[#allocation3 + $0x280] sm:$0xff] %vm375_vm0, %v4915_v18  ;;  %4613 = vrot.lane.b32.xlu0 %v4595_v1, %s7085_s21  ;;  %v3818_v28 = vpop.permute.xlu1 %3817  ;;  %v4974_v0 = vld [vmem:[#allocation3 + $0x168] sm:$0xff] }
 0x3b9   : > { %4777 = vst.msk [vmem:[#allocation3 + $0x188] sm:$0xff] %vm1492_vm5, %v4754_v39  ;;  %v2920_v16 = vpop.f32.mrb[60].mxu1  ;;  %5306 = vmatmul.mubr.f32.gmra.mrb[94].mxu0 %v4974_v0 }
 0x3ba   : > { %3486 = vst.msk [vmem:[#allocation3 + $0x2b8] sm:$0xff] %vm375_vm0, %v3478_v7  ;;  %3390 = vst.msk [vmem:[#allocation2 + $0x158] sm:$0xff] %vm375_vm0, %v3382_v4  ;;  %v2921_v19 = vadd.f32 %v9586_v14, %v2920_v16  ;;  %v2922_v15 = vpop.f32.mrb[61].mxu1  ;;  %v4756_v63 = vpop.permute.xlu0 %4755  ;;  %4101 = vrot.lane.b32.xlu1 %v4083_v58, %s7083_s18  ;;  %v3376_v58 = vld [vmem:[#allocation2 + $0x168] sm:$0xff] }
 0x3bb   : > { %3841 = vst.msk [vmem:[#allocation3 + $0x180] sm:$0xff] %vm1267_vm4, %v3818_v28 }
 0x3bc   : > { %v3146_v51 = vadd.f32 %v9547_v41, %v2921_v19  ;;  %4391 = vrot.lane.b32.xlu0 %v4372_v45, %s7082_s14  ;;  %v4042_v34 = vpop.permute.xlu1 %4041 }
 0x3bd   : > { %4065 = vst.msk [vmem:[#allocation3 + $0x180] sm:$0xff] %vm1492_vm5, %v4042_v34 }
 0x3be   : > { %v3347_v54 = vmul.f32 %v9725_v56, %v3146_v51  ;;  %v4332_v24 = vpop.permute.xlu0 %4331  ;;  %3655 = vrot.lane.b32.xlu1 %v9878_v53, %s7082_s14  ;;  %v4085_v51 = vmul.f32 %v7586_v12, %v9967_v42 }
 0x3bf   : > { %v5009_v22 = vld [vmem:[#allocation3 + $0x280] sm:$0xff]  ;;  %4354 = vst.msk [vmem:[#allocation3 + $0x1a0] sm:$0xff] %vm1066_vm3, %v4332_v24 }
 0x3c0   : > { %v3359_v11 = vadd.f32 %v9734_v33, %v3347_v54  ;;  %6836 = vmatprep.mubr.msk.f32.mxu1 %vm375_vm0, %v5009_v22  ;;  %v4978_v41 = vld [vmem:[#allocation3 + $0x188] sm:$0xff]  ;;  %4615 = vrot.lane.b32.xlu0 %v4596_v59, %s7085_s21  ;;  %v3606_v43 = vpop.permute.xlu1 %3605 }
 0x3c1   : > { %5310 = vmatprep.mubr.f32.mxu0 %v4978_v41  ;;  %v10008_v20 = vld [vmem:[#allocation2 + $0x151] sm:$0xff]  ;;  %3627 = vst.msk [vmem:[#allocation3 + $0x1b0] sm:$0xff] %vm1066_vm3, %v3606_v43 }
 0x3c2   : > { %v10010_v53 = vld [vmem:[#allocation2 + $0x157] sm:$0xff]  ;;  %v3367_v13 = vmax.f32 %v3359_v11, 0.0  ;;  %v4916_v39 = vmul.f32 %v7625_v3, %v10008_v20  ;;  %v4556_v52 = vpop.permute.xlu0 %4555  ;;  %3879 = vrot.lane.b32.xlu1 %v3860_v50, %s7085_s21  ;;  %v4373_v29 = vmul.f32 %v7690_v26, %v10008_v20 }
 0x3c3   : > { %v10012_v46 = vld [vmem:[#allocation2 + $0x158] sm:$0xff]  ;;  %v3479_v27 = vmul.f32 %v7728_v25, %v10010_v53  ;;  %4578 = vst.msk [vmem:[#allocation3 + $0x1a0] sm:$0xff] %vm1267_vm4, %v4556_v52  ;;  %v4597_v61 = vmul.f32 %v7586_v12, %v10010_v53 }
 0x3c4   : > { %4190 = vst.msk [vmem:[#allocation3 + $0x2c0] sm:$0xff] %vm375_vm0, %v10012_v46  ;;  %v3383_v8 = vadd.f32 %v3375_v31, %v3367_v13  ;;  %4924 = vst.msk [vmem:[#allocation3 + $0x298] sm:$0xff] %vm375_vm0, %v4916_v39  ;;  %4807 = vrot.lane.b32.xlu0 %v9969_v5, %s7083_s18  ;;  %v3820_v3 = vpop.permute.xlu1 %3819  ;;  %v4977_v37 = vld [vmem:[#allocation3 + $0x180] sm:$0xff]  ;;  %v3862_v39 = vmul.f32 %v7695_v49, %v10008_v20 }
 0x3c5   : > { %4778 = vst.msk [vmem:[#allocation3 + $0x1a0] sm:$0xff] %vm1492_vm5, %v4756_v63  ;;  %v2925_v44 = vpop.f32.mrb[62].mxu1  ;;  %5311 = vmatmul.mubr.f32.gmra.mrb[96].mxu0 %v4977_v37  ;;  %v6548_v37 = vld [vmem:[%s8643_s13 + $0x2] sm:$0x1] }
 0x3c6   : > { %3487 = vst.msk [vmem:[#allocation3 + $0x2d0] sm:$0xff] %vm375_vm0, %v3479_v27  ;;  %3391 = vst.msk [vmem:[#allocation2 + $0x160] sm:$0xff] %vm375_vm0, %v3383_v8  ;;  %v2926_v57 = vadd.f32 %v9586_v14, %v2925_v44  ;;  %v2927_v60 = vpop.f32.mrb[63].mxu1  ;;  %v4758_v30 = vpop.permute.xlu0 %4757  ;;  %4103 = vrot.lane.b32.xlu1 %v4084_v40, %s7083_s18  ;;  %v4086_v40 = vmul.f32 %v7716_v17, %v10010_v53 }
 0x3c7   : > { %3842 = vst.msk [vmem:[#allocation3 + $0x198] sm:$0xff] %vm1267_vm4, %v3820_v3 }
 0x3c8   : > { %v3151_v21 = vadd.f32 %v9542_v10, %v2926_v57  ;;  %4393 = vrot.lane.b32.xlu0 %v4373_v29, %s7082_s14  ;;  %v4044_v62 = vpop.permute.xlu1 %4043  ;;  %v5619_v57 = vadd.f32 1.0, %v6548_v37  ;;  %v4792_v37 = vld [vmem:[#allocation2 + $0x170] sm:$0xff] }
 0x3c9   : > { %v10037_v35 = vpop.f32.mrb[64].mxu1  ;;  %4066 = vst.msk [vmem:[#allocation3 + $0x198] sm:$0xff] %vm1492_vm5, %v4044_v62 }
 0x3ca   : > { %v3348_v55 = vmul.f32 %v9725_v56, %v3151_v21  ;;  %v10042_v14 = vpop.f32.mrb[65].mxu1  ;;  %v4334_v6 = vpop.permute.xlu0 %4333  ;;  %3657 = vrot.lane.b32.xlu1 %v9920_v36, %s7082_s14  ;;  %v3861_v36 = vmul.f32 %v7690_v26, %v9965_v38 }
 0x3cb   : > { %v5012_v18 = vld [vmem:[#allocation3 + $0x298] sm:$0xff]  ;;  %4355 = vst.msk [vmem:[#allocation3 + $0x1b8] sm:$0xff] %vm1066_vm3, %v4334_v6 }
 0x3cc   : > { %v3360_v10 = vadd.f32 %v9734_v33, %v3348_v55  ;;  %6837 = vmatmul.mubr.msk.f32.gmra.mrb[90].mxu1 %vm375_vm0, %v5012_v18  ;;  %v4981_v2 = vld [vmem:[#allocation3 + $0x1a0] sm:$0xff]  ;;  %4617 = vrot.lane.b32.xlu0 %v4597_v61, %s7085_s21  ;;  %v3608_v1 = vpop.permute.xlu1 %3607  ;;  %v10142_v55 = vrot.slane %v5619_v57, %v8681_v32 }
 0x3cd   : > { %v10051_v56 = vpop.f32.mrb[66].mxu1  ;;  %5315 = vmatprep.mubr.f32.mxu0 %v4981_v2  ;;  %v10056_v7 = vld [vmem:[#allocation2 + $0x159] sm:$0xff]  ;;  %3628 = vst.msk [vmem:[#allocation3 + $0x1c8] sm:$0xff] %vm1066_vm3, %v3608_v1 }
 0x3ce   : > { %v10058_v4 = vld [vmem:[#allocation2 + $0x15f] sm:$0xff]  ;;  %v3368_v33 = vmax.f32 %v3360_v10, 0.0  ;;  %v10063_v28 = vpop.f32.mrb[67].mxu1  ;;  %v4917_v0 = vmul.f32 %v7690_v26, %v10056_v7  ;;  %v4558_v19 = vpop.permute.xlu0 %4557  ;;  %3881 = vrot.lane.b32.xlu1 %v3861_v36, %s7085_s21  ;;  %v4374_v24 = vmul.f32 %v7695_v49, %v10056_v7 }
 0x3cf   : > { %v10060_v16 = vld [vmem:[#allocation2 + $0x160] sm:$0xff]  ;;  %v3480_v38 = vmul.f32 %v7721_v23, %v10058_v4  ;;  %4579 = vst.msk [vmem:[#allocation3 + $0x1b8] sm:$0xff] %vm1267_vm4, %v4558_v19  ;;  %v4598_v41 = vmul.f32 %v7716_v17, %v10058_v4 }
 0x3d0   : > { %4191 = vst.msk [vmem:[#allocation3 + $0x2d8] sm:$0xff] %vm375_vm0, %v10060_v16  ;;  %v3384_v15 = vadd.f32 %v3376_v58, %v3368_v33  ;;  %4925 = vst.msk [vmem:[#allocation3 + $0x2b0] sm:$0xff] %vm375_vm0, %v4917_v0  ;;  %4809 = vrot.lane.b32.xlu0 %v10012_v46, %s7083_s18  ;;  %v3822_v26 = vpop.permute.xlu1 %3821  ;;  %v4980_v45 = vld [vmem:[#allocation3 + $0x198] sm:$0xff]  ;;  %v10153_v33 = vld [vmem:[%s8643_s13 + $0x3] ss:$0 sm:$0xff] }
 0x3d1   : > { %4779 = vst.msk [vmem:[#allocation3 + $0x1b8] sm:$0xff] %vm1492_vm5, %v4758_v30  ;;  %v10075_v63 = vpop.f32.mrb[68].mxu1  ;;  %5316 = vmatmul.mubr.f32.gmra.mrb[98].mxu0 %v4980_v45  ;;  %v10133_v30 = vld [vmem:[%s10743_s5 + $0x1] ss:$0 sm:$0xff]  ;;  %v5652_v45 = vld [vmem:[#allocation2 + $0x10] sm:$0xff] }
 0x3d2   : > { %3488 = vst.msk [vmem:[#allocation3 + $0x2e8] sm:$0xff] %vm375_vm0, %v3480_v38  ;;  %3392 = vst.msk [vmem:[#allocation2 + $0x168] sm:$0xff] %vm375_vm0, %v3384_v15  ;;  %v10084_v34 = vpop.f32.mrb[69].mxu1  ;;  %v4760_v54 = vpop.permute.xlu0 %4759  ;;  %4105 = vrot.lane.b32.xlu1 %v4085_v51, %s7083_s18 }
 0x3d3   : > { %3843 = vst.msk [vmem:[#allocation3 + $0x1b0] sm:$0xff] %vm1267_vm4, %v3822_v26 }
 0x3d4   : > { %4395 = vrot.lane.b32.xlu0 %v4374_v24, %s7082_s14  ;;  %v4046_v22 = vpop.permute.xlu1 %4045 }
 0x3d5   : > { %v10090_v59 = vpop.f32.mrb[70].mxu1  ;;  %4067 = vst.msk [vmem:[#allocation3 + $0x1b0] sm:$0xff] %vm1492_vm5, %v4046_v22 }
 0x3d6   : > { %v10093_v12 = vpop.f32.mrb[71].mxu1  ;;  %v4336_v42 = vpop.permute.xlu0 %4335  ;;  %3659 = vrot.lane.b32.xlu1 %v9969_v5, %s7082_s14 }
 0x3d7   : > { %v5015_v11 = vld [vmem:[#allocation3 + $0x2b0] sm:$0xff]  ;;  %4356 = vst.msk [vmem:[#allocation3 + $0x1d0] sm:$0xff] %vm1066_vm3, %v4336_v42 }
 0x3d8   : > { %6839 = vmatprep.mubr.msk.f32.mxu1 %vm375_vm0, %v5015_v11  ;;  %v4984_v43 = vld [vmem:[#allocation3 + $0x1b8] sm:$0xff]  ;;  %4619 = vrot.lane.b32.xlu0 %v4598_v41, %s7085_s21  ;;  %v3610_v13 = vpop.permute.xlu1 %3609 }
 0x3d9   : > { %v10101_v50 = vpop.f32.mrb[72].mxu1  ;;  %5320 = vmatprep.mubr.f32.mxu0 %v4984_v43  ;;  %v10106_v5 = vld [vmem:[#allocation2 + $0x161] sm:$0xff]  ;;  %v10108_v31 = vld [vmem:[#allocation2 + $0x169] sm:$0xff]  ;;  %3629 = vst.msk [vmem:[#allocation3 + $0x1e0] sm:$0xff] %vm1066_vm3, %v3610_v13 }
 0x3da   : > { %v10111_v52 = vpop.f32.mrb[73].mxu1  ;;  %v4918_v27 = vmul.f32 %v7695_v49, %v10106_v5  ;;  %v4919_v8 = vmul.f32 %v7657_v48, %v10108_v31  ;;  %v4791_v44 = vld [vmem:[#allocation2 + $0x168] sm:$0xff]  ;;  %v4560_v3 = vpop.permute.xlu0 %4559  ;;  %3883 = vrot.lane.b32.xlu1 %v3862_v39, %s7085_s21  ;;  %v4375_v29 = vmul.f32 %v7657_v48, %v10106_v5 }
 0x3db   : > { %4192 = vst.msk [vmem:[#allocation3 + $0x2f0] sm:$0xff] %vm375_vm0, %v4791_v44  ;;  %v10137_v21 = vld [vmem:[#allocation2 + $0x167] sm:$0xff]  ;;  %v4592_v22 = vld [vmem:[#allocation2 + $0x16f] sm:$0xff] }
 0x3dc   : > { %4580 = vst.msk [vmem:[#allocation3 + $0x1d0] sm:$0xff] %vm1267_vm4, %v4560_v3  ;;  %4811 = vrot.lane.b32.xlu0 %v10060_v16, %s7083_s18  ;;  %v3824_v49 = vpop.permute.xlu1 %3823  ;;  %v4983_v20 = vld [vmem:[#allocation3 + $0x1b0] sm:$0xff]  ;;  %v4599_v2 = vmul.f32 %v7728_v25, %v10137_v21  ;;  %v4600_v39 = vmul.f32 %v7721_v23, %v4592_v22 }
 0x3dd   : > { %4926 = vst.msk [vmem:[#allocation3 + $0x2c8] sm:$0xff] %vm375_vm0, %v4918_v27  ;;  %4927 = vst.msk [vmem:[#allocation3 + $0x2e0] sm:$0xff] %vm375_vm0, %v4919_v8  ;;  %5321 = vmatmul.mubr.f32.gmra.mrb[100].mxu0 %v4983_v20 }
 0x3de   : > { %4780 = vst.msk [vmem:[#allocation3 + $0x1d0] sm:$0xff] %vm1492_vm5, %v4760_v54  ;;  %v4762_v60 = vpop.permute.xlu0 %4761  ;;  %4107 = vrot.lane.b32.xlu1 %v4086_v40, %s7083_s18  ;;  %v4376_v54 = vmul.f32 %v7367_v9, %v10108_v31  ;;  %v5653_v40 = vld [vmem:[#allocation2 + $0x18] sm:$0xff] }
 0x3df   : > { %3844 = vst.msk [vmem:[#allocation3 + $0x1c8] sm:$0xff] %vm1267_vm4, %v3824_v49 }
 0x3e0   : > { %v5232_v62 = vpop.f32.mrb[64].mxu0  ;;  %4397 = vrot.lane.b32.xlu0 %v4375_v29, %s7082_s14  ;;  %v4048_v17 = vpop.permute.xlu1 %4047 }
 0x3e1   : > { %v5233_v53 = vadd.f32 %v10133_v30, %v5232_v62  ;;  %4068 = vst.msk [vmem:[#allocation3 + $0x1c8] sm:$0xff] %vm1492_vm5, %v4048_v17  ;;  %v5234_v6 = vpop.f32.mrb[65].mxu0 }
 0x3e2   : > { %v4338_v18 = vpop.permute.xlu0 %4337  ;;  %3661 = vrot.lane.b32.xlu1 %v10012_v46, %s7082_s14  ;;  %v3863_v46 = vmul.f32 %v7657_v48, %v10056_v7  ;;  %v4087_v48 = vmul.f32 %v7728_v25, %v10058_v4  ;;  %v5024_v7 = vld [vmem:[#allocation3 + $0x2f8] sm:$0xff] }
 0x3e3   : > { %v5458_v1 = vadd.f32 %v10042_v14, %v5233_v53  ;;  %4357 = vst.msk [vmem:[#allocation3 + $0x1e8] sm:$0xff] %vm1066_vm3, %v4338_v18 }
 0x3e4   : > { %v5018_v61 = vld [vmem:[#allocation3 + $0x2c8] sm:$0xff]  ;;  %v5021_v10 = vld [vmem:[#allocation3 + $0x2e0] sm:$0xff]  ;;  %4621 = vrot.lane.b32.xlu0 %v4599_v2, %s7085_s21  ;;  %v3612_v0 = vpop.permute.xlu1 %3611 }
 0x3e5   : > { %6840 = vmatmul.mubr.msk.f32.gmra.mrb[92].mxu1 %vm375_vm0, %v5018_v61  ;;  %v4987_v36 = vld [vmem:[#allocation3 + $0x1d0] sm:$0xff]  ;;  %v5624_v58 = vmul.f32 %v10142_v55, %v5458_v1  ;;  %3630 = vst.msk [vmem:[#allocation3 + $0x1f8] sm:$0xff] %vm1066_vm3, %v3612_v0 }
 0x3e6   : > { %6842 = vmatprep.mubr.msk.f32.mxu1 %vm375_vm0, %v5021_v10  ;;  %5325 = vmatprep.mubr.f32.mxu0 %v4987_v36  ;;  %v4562_v14 = vpop.permute.xlu0 %4561 }
 0x3e7   : > { %3885 = vrot.lane.b32.xlu1 %v3863_v46, %s7085_s21  ;;  %v5636_v19 = vadd.f32 %v10153_v33, %v5624_v58  ;;  %4581 = vst.msk [vmem:[#allocation3 + $0x1e8] sm:$0xff] %vm1267_vm4, %v4562_v14 }
 0x3e8   : > { %4781 = vst.msk [vmem:[#allocation3 + $0x1e8] sm:$0xff] %vm1492_vm5, %v4762_v60  ;;  %4813 = vrot.lane.b32.xlu0 %v4791_v44, %s7083_s18  ;;  %v3826_v38 = vpop.permute.xlu1 %3825  ;;  %v4986_v15 = vld [vmem:[#allocation3 + $0x1c8] sm:$0xff]  ;;  %v3864_v44 = vmul.f32 %v7367_v9, %v10106_v5  ;;  %v4088_v9 = vmul.f32 %v7721_v23, %v10137_v21 }
 0x3e9   : > { %v5644_v26 = vmax.f32 %v5636_v19, 0.0  ;;  %3845 = vst.msk [vmem:[#allocation3 + $0x1e0] sm:$0xff] %vm1267_vm4, %v3826_v38  ;;  %5326 = vmatmul.mubr.f32.gmra.mrb[102].mxu0 %v4986_v15  ;;  %6843 = vmatmul.mubr.msk.f32.gmra.mrb[94].mxu1 %vm375_vm0, %v5024_v7  ;;  %v5654_v19 = vld [vmem:[#allocation2 + $0x20] sm:$0xff] }
 0x3ea   : > { %v4764_v51 = vpop.permute.xlu0 %4763 }
 0x3eb   : > { %4109 = vrot.lane.b32.xlu1 %v4087_v48, %s7083_s18  ;;  %v5660_v24 = vadd.f32 %v5652_v45, %v5644_v26 }
 0x3ec   : > { %4399 = vrot.lane.b32.xlu0 %v4376_v54, %s7082_s14  ;;  %v4050_v25 = vpop.permute.xlu1 %4049 }
 0x3ed   : > { %v5237_v42 = vpop.f32.mrb[66].mxu0  ;;  %5668 = vst.msk [vmem:[#allocation2 + $0x10] sm:$0xff] %vm375_vm0, %v5660_v24 }
 0x3ee   : > { %v5238_v4 = vadd.f32 %v10133_v30, %v5237_v42  ;;  %4069 = vst.msk [vmem:[#allocation3 + $0x1e0] sm:$0xff] %vm1492_vm5, %v4050_v25  ;;  %v5239_v11 = vpop.f32.mrb[67].mxu0  ;;  %v10177_v41 = vpop.f32.mrb[74].mxu1 }
 0x3ef   : > { %v10179_v43 = vpop.f32.mrb[75].mxu1  ;;  %v4340_v13 = vpop.permute.xlu0 %4339  ;;  %3663 = vrot.lane.b32.xlu1 %v10060_v16, %s7082_s14  ;;  %v4990_v27 = vld [vmem:[#allocation3 + $0x1e8] sm:$0xff]  ;;  %s10691_s14 = scalar_lea.hbm %s10746_s8, %s6565_s22 }
 0x3f0   : > { %v5463_v31 = vadd.f32 %v10037_v35, %v5238_v4  ;;  %4358 = vst.msk [vmem:[#allocation3 + $0x200] sm:$0xff] %vm1066_vm3, %v4340_v13  ;;  %4623 = vrot.lane.b32.xlu0 %v4600_v39, %s7085_s21  ;;  %v3614_v8 = vpop.permute.xlu1 %3613  ;;  %5330 = vmatprep.mubr.f32.mxu0 %v4990_v27 }
 0x3f1   : > { %3631 = vst.msk [vmem:[#allocation3 + $0x210] sm:$0xff] %vm1066_vm3, %v3614_v8 }
 0x3f2   : > { %v5625_v3 = vmul.f32 %v10142_v55, %v5463_v31 }
 0x3f3   : > { %v4564_v16 = vpop.permute.xlu0 %4563  ;;  %3887 = vrot.lane.b32.xlu1 %v3864_v44, %s7085_s21  ;;  %s7086_s21 = smov [#allocation5]  }
 0x3f4   : > { %v5637_v35 = vadd.f32 %v10153_v33, %v5625_v3  ;;  %4582 = vst.msk [vmem:[#allocation3 + $0x200] sm:$0xff] %vm1267_vm4, %v4564_v16  ;;  %4815 = vrot.lane.b32.xlu0 %v4792_v37, %s7083_s18  ;;  %v3828_v49 = vpop.permute.xlu1 %3827  ;;  %v5857_v11 = vld [vmem:[#allocation2 + $0x10] sm:$0xff]  ;;  %s7021_s26 = sshll.u32 %s7086_s21, 4  ;;  %s7022_s26 = int_to_ptr.vmem [resolvable:$false] %s7021_s26 }
 0x3f5   : > { %4782 = vst.msk [vmem:[#allocation3 + $0x200] sm:$0xff] %vm1492_vm5, %v4764_v51  ;;  %v4989_v20 = vld [vmem:[#allocation3 + $0x1e0] sm:$0xff]  ;;  %p7024_p1 = scmp.lt.s32.totalorder %s10693_s23, %s7022_s26 }
 0x3f6   : > { %v5645_v5 = vmax.f32 %v5637_v35, 0.0  ;;  %3846 = vst.msk [vmem:[#allocation3 + $0x1f8] sm:$0xff] %vm1267_vm4, %v3828_v49  ;;  %5331 = vmatmul.mubr.f32.gmra.mrb[104].mxu0 %v4989_v20 }
 0x3f7   : > { %v4766_v57 = vpop.permute.xlu0 %4765  ;;  %4111 = vrot.lane.b32.xlu1 %v4088_v9, %s7083_s18  ;;  %s7017_s18 = scalar_lea.vmem %s10693_s23, 64 }
 0x3f8   : > { %v5661_v60 = vadd.f32 %v5653_v40, %v5645_v5  ;;  %v4052_v29 = vpop.permute.xlu1 %4051  ;;  %v5242_v62 = vpop.f32.mrb[68].mxu0  ;;  %p7018_p12 = scmp.ne.s32.totalorder %s10693_s23, %s7017_s18 }
 0x3f9   : > { %4070 = vst.msk [vmem:[#allocation3 + $0x1f8] sm:$0xff] %vm1492_vm5, %v4052_v29  ;;  %v5243_v17 = vadd.f32 %v10133_v30, %v5242_v62  ;;  %v5244_v53 = vpop.f32.mrb[69].mxu0 }
 0x3fa   : > { %5669 = vst.msk [vmem:[#allocation2 + $0x18] sm:$0xff] %vm375_vm0, %v5661_v60  ;;  %p7019_p13 = pnand %p7018_p12, %p7173_p5 }
 0x3fb   : > { %v10203_v6 = vpop.f32.mrb[76].mxu1  ;;  %v4342_v23 = vpop.permute.xlu0 %4341  ;;  %v5468_v21 = vadd.f32 %v10063_v28, %v5243_v17 }
 0x3fc   : > { %4359 = vst.msk [vmem:[#allocation3 + $0x218] sm:$0xff] %vm1066_vm3, %v4342_v23  ;;  %v10207_v18 = vpop.f32.mrb[77].mxu1  ;;  %v4993_v61 = vld [vmem:[#allocation3 + $0x200] sm:$0xff]  ;;  %v3616_v10 = vpop.permute.xlu1 %3615  ;;  %p7020_p0 = pneg %p7019_p13 }
 0x3fd   : > { %5335 = vmatprep.mubr.f32.mxu0 %v4993_v61  ;;  %v5626_v2 = vmul.f32 %v10142_v55, %v5468_v21  ;;  %3632 = vst.msk [vmem:[#allocation3 + $0x228] sm:$0xff] %vm1066_vm3, %v3616_v10 }
 0x3ff   : > { %v4566_v1 = vpop.permute.xlu0 %4565  ;;  %v10211_v36 = vpop.f32.mrb[78].mxu1  ;;  %v5638_v0 = vadd.f32 %v10153_v33, %v5626_v2  ;;  %v5656_v2 = vld [vmem:[#allocation2 + $0x30] sm:$0xff] }
 0x400   : > { %4583 = vst.msk [vmem:[#allocation3 + $0x218] sm:$0xff] %vm1267_vm4, %v4566_v1  ;;  %v10215_v46 = vpop.f32.mrb[79].mxu1  ;;  %v3830_v28 = vpop.permute.xlu1 %3829  ;;  %v4992_v58 = vld [vmem:[#allocation3 + $0x1f8] sm:$0xff] }
 0x401   : > { %4783 = vst.msk [vmem:[#allocation3 + $0x218] sm:$0xff] %vm1492_vm5, %v4766_v57  ;;  %v5646_v14 = vmax.f32 %v5638_v0, 0.0  ;;  %5336 = vmatmul.mubr.f32.gmra.mrb[106].mxu0 %v4992_v58  ;;  %v5858_v5 = vld [vmem:[#allocation2 + $0x18] sm:$0xff] }
 0x402   : > { %3847 = vst.msk [vmem:[#allocation3 + $0x210] sm:$0xff] %vm1267_vm4, %v3830_v28 }
 0x403   : > { %v4344_v38 = vpop.permute.xlu0 %4343  ;;  %v5662_v15 = vadd.f32 %v5654_v19, %v5646_v14 }
 0x404   : > { %4360 = vst.msk [vmem:[#allocation3 + $0x230] sm:$0xff] %vm1066_vm3, %v4344_v38  ;;  %v4054_v48 = vpop.permute.xlu1 %4053  ;;  %v5247_v7 = vpop.f32.mrb[70].mxu0 }
 0x405   : > { %5670 = vst.msk [vmem:[#allocation2 + $0x20] sm:$0xff] %vm375_vm0, %v5662_v15  ;;  %v5248_v26 = vadd.f32 %v10133_v30, %v5247_v7  ;;  %v5249_v45 = vpop.f32.mrb[71].mxu0 }
 0x406   : > { %4071 = vst.msk [vmem:[#allocation3 + $0x210] sm:$0xff] %vm1492_vm5, %v4054_v48 }
 0x407   : > { %v4568_v51 = vpop.permute.xlu0 %4567  ;;  %v5473_v54 = vadd.f32 %v10051_v56, %v5248_v26  ;;  %v10233_v56 = vld [vmem:[%s10744_s6] ss:$0 sm:$0xff] }
 0x408   : > { %4584 = vst.msk [vmem:[#allocation3 + $0x230] sm:$0xff] %vm1267_vm4, %v4568_v51  ;;  %v4996_v24 = vld [vmem:[#allocation3 + $0x218] sm:$0xff]  ;;  %v3832_v22 = vpop.permute.xlu1 %3831  ;;  %v5872_v8 = vmul.f32 %v10233_v56, %v5857_v11  ;;  %v5873_v62 = vmul.f32 %v10233_v56, %v5858_v5 }
 0x409   : > { %4784 = vst.msk [vmem:[#allocation3 + $0x230] sm:$0xff] %vm1492_vm5, %v9270_v47  ;;  %5340 = vmatprep.mubr.f32.mxu0 %v4996_v24  ;;  %v5627_v42 = vmul.f32 %v10142_v55, %v5473_v54  ;;  %v5655_v47 = vld [vmem:[#allocation2 + $0x28] sm:$0xff] }
 0x40a   : > { %3848 = vst.msk [vmem:[#allocation3 + $0x228] sm:$0xff] %vm1267_vm4, %v3832_v22  ;;  %v5880_v9 = vsel %vm375_vm0, %v5872_v8, 0.0  ;;  %v5883_v61 = vsel %vm375_vm0, %v5873_v62, 0.0 }
 0x40b   : > { %v4802_v25 = vpop.permute.xlu0 %4801  ;;  %v5639_v4 = vadd.f32 %v10153_v33, %v5627_v42 }
 0x40c   : > { %v4056_v13 = vpop.permute.xlu1 %4055  ;;  %v5859_v53 = vld [vmem:[#allocation2 + $0x20] sm:$0xff] }
 0x40d   : > { %v4995_v39 = vld [vmem:[#allocation3 + $0x210] sm:$0xff]  ;;  %v5647_v31 = vmax.f32 %v5639_v4, 0.0  ;;  %4072 = vst.msk [vmem:[#allocation3 + $0x228] sm:$0xff] %vm1492_vm5, %v4056_v13  ;;  %v5874_v10 = vmul.f32 %v10233_v56, %v5859_v53 }
 0x40e   : > { %5341 = vmatmul.mubr.f32.gmra.mrb[108].mxu0 %v4995_v39  ;;  %v5657_v39 = vld [vmem:[#allocation2 + $0x38] sm:$0xff] }
 0x40f   : > { %v4386_v27 = vpop.permute.xlu0 %4385  ;;  %v5663_v44 = vadd.f32 %v5655_v47, %v5647_v31  ;;  %v5886_v48 = vsel %vm375_vm0, %v5874_v10, 0.0 }
 0x410   : > { %4409 = vst.msk [vmem:[#allocation3 + $0x248] sm:$0xff] %vm1066_vm3, %v4386_v27  ;;  %v4999_v3 = vld [vmem:[#allocation3 + $0x230] sm:$0xff]  ;;  %v3652_v37 = vpop.permute.xlu1 %3651  ;;  %v5252_v16 = vpop.f32.mrb[72].mxu0 }
 0x411   : > { %5345 = vmatprep.mubr.f32.mxu0 %v4999_v3  ;;  %5671 = vst.msk [vmem:[#allocation2 + $0x28] sm:$0xff] %vm375_vm0, %v5663_v44  ;;  %v5253_v35 = vadd.f32 %v10133_v30, %v5252_v16  ;;  %v5254_v49 = vpop.f32.mrb[73].mxu0 }
 0x412   : > { %3674 = vst.msk [vmem:[#allocation3 + $0x258] sm:$0xff] %vm1066_vm3, %v3652_v37 }
 0x413   : > { %v4610_v20 = vpop.permute.xlu0 %4609  ;;  %v5478_v40 = vadd.f32 %v10084_v34, %v5253_v35  ;;  %5881 = vadd.xlane.f32.xlu0 %v5880_v9 }
 0x414   : > { %4633 = vst.msk [vmem:[#allocation3 + $0x248] sm:$0xff] %vm1267_vm4, %v4610_v20  ;;  %v3874_v57 = vpop.permute.xlu1 %3873  ;;  %v4998_v60 = vld [vmem:[#allocation3 + $0x228] sm:$0xff] }
 0x415   : > { %4825 = vst.msk [vmem:[#allocation3 + $0x248] sm:$0xff] %vm1492_vm5, %v4802_v25  ;;  %v5628_v29 = vmul.f32 %v10142_v55, %v5478_v40  ;;  %5346 = vmatmul.mubr.f32.gmra.mrb[110].mxu0 %v4998_v60 }
 0x416   : > { %3897 = vst.msk [vmem:[#allocation3 + $0x240] sm:$0xff] %vm1267_vm4, %v3874_v57 }
 0x417   : > { %v4804_v17 = vpop.permute.xlu0 %4803  ;;  %v5640_v23 = vadd.f32 %v10153_v33, %v5628_v29 }
 0x418   : > { %v4098_v21 = vpop.permute.xlu1 %4097  ;;  %v5860_v0 = vld [vmem:[#allocation2 + $0x28] sm:$0xff] }
 0x419   : > { %v5648_v34 = vmax.f32 %v5640_v23, 0.0  ;;  %4121 = vst.msk [vmem:[#allocation3 + $0x240] sm:$0xff] %vm1492_vm5, %v4098_v21  ;;  %v5875_v7 = vmul.f32 %v10233_v56, %v5860_v0 }
 0x41b   : > { %v4388_v1 = vpop.permute.xlu0 %4387  ;;  %5884 = vadd.xlane.f32.xlu1 %v5883_v61  ;;  %v5664_v28 = vadd.f32 %v5656_v2, %v5648_v34  ;;  %v5889_v22 = vsel %vm375_vm0, %v5875_v7, 0.0  ;;  %v5658_v61 = vld [vmem:[#allocation2 + $0x40] sm:$0xff] }
 0x41c   : > { %4410 = vst.msk [vmem:[#allocation3 + $0x260] sm:$0xff] %vm1066_vm3, %v4388_v1  ;;  %v5002_v58 = vld [vmem:[#allocation3 + $0x248] sm:$0xff]  ;;  %v3654_v14 = vpop.permute.xlu1 %3653  ;;  %v5257_v19 = vpop.f32.mrb[74].mxu0 }
 0x41d   : > { %5350 = vmatprep.mubr.f32.mxu0 %v5002_v58  ;;  %5672 = vst.msk [vmem:[#allocation2 + $0x30] sm:$0xff] %vm375_vm0, %v5664_v28  ;;  %v5258_v38 = vadd.f32 %v10133_v30, %v5257_v19  ;;  %v5259_v15 = vpop.f32.mrb[75].mxu0 }
 0x41e   : > { %3675 = vst.msk [vmem:[#allocation3 + $0x270] sm:$0xff] %vm1066_vm3, %v3654_v14  ;;  %v6551_v15 = vld [vmem:[%s8643_s13 + $0x6] sm:$0x1] }
 0x41f   : > { %v4612_v26 = vpop.permute.xlu0 %4611  ;;  %5887 = vadd.xlane.f32.xlu1 %v5886_v48  ;;  %v5483_v45 = vadd.f32 %v10075_v63, %v5258_v38 }
 0x420   : > { %4634 = vst.msk [vmem:[#allocation3 + $0x260] sm:$0xff] %vm1267_vm4, %v4612_v26  ;;  %v3876_v51 = vpop.permute.xlu1 %3875  ;;  %v5001_v54 = vld [vmem:[#allocation3 + $0x240] sm:$0xff]  ;;  %v5679_v26 = vadd.f32 1.0, %v6551_v15 }
 0x421   : > { %4826 = vst.msk [vmem:[#allocation3 + $0x260] sm:$0xff] %vm1492_vm5, %v4804_v17  ;;  %v5629_v24 = vmul.f32 %v10142_v55, %v5483_v45  ;;  %5351 = vmatmul.mubr.f32.gmra.mrb[112].mxu0 %v5001_v54  ;;  %v5659_v45 = vld [vmem:[#allocation2 + $0x48] sm:$0xff] }
 0x422   : > { %3898 = vst.msk [vmem:[#allocation3 + $0x258] sm:$0xff] %vm1267_vm4, %v3876_v51 }
 0x423   : > { %v4806_v42 = vpop.permute.xlu0 %4805  ;;  %5890 = vadd.xlane.f32.xlu1 %v5889_v22  ;;  %v5641_v25 = vadd.f32 %v10153_v33, %v5629_v24 }
 0x424   : > { %v4100_v4 = vpop.permute.xlu1 %4099  ;;  %v5861_v11 = vld [vmem:[#allocation2 + $0x30] sm:$0xff] }
 0x425   : > { %v5649_v63 = vmax.f32 %v5641_v25, 0.0  ;;  %4122 = vst.msk [vmem:[#allocation3 + $0x258] sm:$0xff] %vm1492_vm5, %v4100_v4  ;;  %v5876_v13 = vmul.f32 %v10233_v56, %v5861_v11 }
 0x427   : > { %v4390_v31 = vpop.permute.xlu0 %4389  ;;  %v5665_v47 = vadd.f32 %v5657_v39, %v5649_v63  ;;  %v5892_v8 = vsel %vm375_vm0, %v5876_v13, 0.0 }
 0x428   : > { %4411 = vst.msk [vmem:[#allocation3 + $0x278] sm:$0xff] %vm1066_vm3, %v4390_v31  ;;  %v5005_v27 = vld [vmem:[#allocation3 + $0x260] sm:$0xff]  ;;  %v3878_v44 = vpop.permute.xlu1 %3877  ;;  %v5262_v3 = vpop.f32.mrb[76].mxu0  ;;  %5893 = vadd.xlane.f32.xlu1 %v5892_v8 }
 0x429   : > { %5355 = vmatprep.mubr.f32.mxu0 %v5005_v27  ;;  %5673 = vst.msk [vmem:[#allocation2 + $0x38] sm:$0xff] %vm375_vm0, %v5665_v47  ;;  %v5263_v37 = vadd.f32 %v10133_v30, %v5262_v3  ;;  %v5264_v16 = vpop.f32.mrb[77].mxu0  ;;  %v10308_v31 = vld [vmem:[%s8643_s13 + $0x7] ss:$0 sm:$0xff] }
 0x42a   : > { %3899 = vst.msk [vmem:[#allocation3 + $0x270] sm:$0xff] %vm1267_vm4, %v3878_v44  ;;  %v5712_v16 = vld [vmem:[#allocation2 + $0x70] sm:$0xff] }
 0x42b   : > { %v10272_v35 = vpop.f32.mrb[80].mxu1  ;;  %v4614_v49 = vpop.permute.xlu0 %4613  ;;  %v5488_v20 = vadd.f32 %v10093_v12, %v5263_v37 }
 0x42c   : > { %4635 = vst.msk [vmem:[#allocation3 + $0x278] sm:$0xff] %vm1267_vm4, %v4614_v49  ;;  %v10276_v9 = vpop.f32.mrb[81].mxu1  ;;  %v4102_v5 = vpop.permute.xlu1 %4101  ;;  %v5004_v40 = vld [vmem:[#allocation3 + $0x258] sm:$0xff] }
 0x42d   : > { %4827 = vst.msk [vmem:[#allocation3 + $0x278] sm:$0xff] %vm1492_vm5, %v4806_v42  ;;  %v5630_v57 = vmul.f32 %v10142_v55, %v5488_v20  ;;  %4123 = vst.msk [vmem:[#allocation3 + $0x270] sm:$0xff] %vm1492_vm5, %v4102_v5  ;;  %5356 = vmatmul.mubr.f32.gmra.mrb[114].mxu0 %v5004_v40  ;;  %v10301_v42 = vrot.slane %v5679_v26, %v8681_v32 }
 0x42f   : > { %v4392_v60 = vpop.permute.xlu0 %4391  ;;  %v5642_v29 = vadd.f32 %v10153_v33, %v5630_v57 }
 0x430   : > { %4412 = vst.msk [vmem:[#allocation3 + $0x290] sm:$0xff] %vm1066_vm3, %v4392_v60  ;;  %v3656_v62 = vpop.permute.xlu1 %3655  ;;  %v5862_v17 = vld [vmem:[#allocation2 + $0x38] sm:$0xff] }
 0x431   : > { %v5267_v12 = vpop.f32.mrb[78].mxu0  ;;  %v5650_v53 = vmax.f32 %v5642_v29, 0.0  ;;  %3676 = vst.msk [vmem:[#allocation3 + $0x288] sm:$0xff] %vm1066_vm3, %v3656_v62  ;;  %v5877_v34 = vmul.f32 %v10233_v56, %v5862_v17 }
 0x432   : > { %v5268_v23 = vadd.f32 %v10133_v30, %v5267_v12  ;;  %v5269_v21 = vpop.f32.mrb[79].mxu0 }
 0x433   : > { %v4616_v10 = vpop.permute.xlu0 %4615  ;;  %v5666_v2 = vadd.f32 %v5658_v61, %v5650_v53  ;;  %v5895_v28 = vsel %vm375_vm0, %v5877_v34, 0.0 }
 0x434   : > { %v5493_v1 = vadd.f32 %v10090_v59, %v5268_v23  ;;  %4636 = vst.msk [vmem:[#allocation3 + $0x290] sm:$0xff] %vm1267_vm4, %v4616_v10  ;;  %v5008_v0 = vld [vmem:[#allocation3 + $0x278] sm:$0xff]  ;;  %v3880_v58 = vpop.permute.xlu1 %3879  ;;  %5896 = vadd.xlane.f32.xlu1 %v5895_v28  ;;  %v5007_v14 = vld [vmem:[#allocation3 + $0x270] sm:$0xff] }
 0x435   : > { %5360 = vmatprep.mubr.f32.mxu0 %v5008_v0  ;;  %5674 = vst.msk [vmem:[#allocation2 + $0x40] sm:$0xff] %vm375_vm0, %v5666_v2  ;;  %v5713_v28 = vld [vmem:[#allocation2 + $0x78] sm:$0xff] }
 0x436   : > { %v5631_v19 = vmul.f32 %v10142_v55, %v5493_v1  ;;  %3900 = vst.msk [vmem:[#allocation3 + $0x288] sm:$0xff] %vm1267_vm4, %v3880_v58  ;;  %5361 = vmatmul.mubr.f32.gmra.mrb[116].mxu0 %v5007_v14 }
 0x437   : > { %v4808_v38 = vpop.permute.xlu0 %4807 }
 0x438   : > { %v5643_v59 = vadd.f32 %v10153_v33, %v5631_v19  ;;  %4828 = vst.msk [vmem:[#allocation3 + $0x290] sm:$0xff] %vm1492_vm5, %v4808_v38  ;;  %v4104_v48 = vpop.permute.xlu1 %4103 }
 0x439   : > { %4124 = vst.msk [vmem:[#allocation3 + $0x288] sm:$0xff] %vm1492_vm5, %v4104_v48 }
 0x43a   : > { %v5651_v7 = vmax.f32 %v5643_v59, 0.0 }
 0x43b   : > { %v4394_v51 = vpop.permute.xlu0 %4393 }
 0x43c   : > { %v5667_v54 = vadd.f32 %v5659_v45, %v5651_v7  ;;  %4413 = vst.msk [vmem:[#allocation3 + $0x2a8] sm:$0xff] %vm1066_vm3, %v4394_v51  ;;  %v3658_v55 = vpop.permute.xlu1 %3657  ;;  %v5863_v22 = vld [vmem:[#allocation2 + $0x40] sm:$0xff] }
 0x43d   : > { %v5272_v24 = vpop.f32.mrb[80].mxu0  ;;  %3677 = vst.msk [vmem:[#allocation3 + $0x2a0] sm:$0xff] %vm1066_vm3, %v3658_v55  ;;  %v5878_v4 = vmul.f32 %v10233_v56, %v5863_v22 }
 0x43e   : > { %5675 = vst.msk [vmem:[#allocation2 + $0x48] sm:$0xff] %vm375_vm0, %v5667_v54  ;;  %v5273_v33 = vadd.f32 %v10133_v30, %v5272_v24  ;;  %v5274_v25 = vpop.f32.mrb[81].mxu0 }
 0x43f   : > { %v4618_v11 = vpop.permute.xlu0 %4617  ;;  %v5011_v63 = vld [vmem:[#allocation3 + $0x290] sm:$0xff]  ;;  %v5898_v39 = vsel %vm375_vm0, %v5878_v4, 0.0 }
 0x440   : > { %v5498_v13 = vadd.f32 %v10111_v52, %v5273_v33  ;;  %4637 = vst.msk [vmem:[#allocation3 + $0x2a8] sm:$0xff] %vm1267_vm4, %v4618_v11  ;;  %5365 = vmatprep.mubr.f32.mxu0 %v5011_v63  ;;  %v3882_v47 = vpop.permute.xlu1 %3881  ;;  %5899 = vadd.xlane.f32.xlu1 %v5898_v39  ;;  %v5010_v27 = vld [vmem:[#allocation3 + $0x288] sm:$0xff] }
 0x441   : > { %3901 = vst.msk [vmem:[#allocation3 + $0x2a0] sm:$0xff] %vm1267_vm4, %v3882_v47  ;;  %5366 = vmatmul.mubr.f32.gmra.mrb[118].mxu0 %v5010_v27  ;;  %v5714_v47 = vld [vmem:[#allocation2 + $0x80] sm:$0xff] }
 0x442   : > { %v5684_v8 = vmul.f32 %v10301_v42, %v5498_v13 }
 0x443   : > { %v4810_v44 = vpop.permute.xlu0 %4809 }
 0x444   : > { %v5696_v3 = vadd.f32 %v10308_v31, %v5684_v8  ;;  %4829 = vst.msk [vmem:[#allocation3 + $0x2a8] sm:$0xff] %vm1492_vm5, %v4810_v44  ;;  %v4106_v52 = vpop.permute.xlu1 %4105 }
 0x445   : > { %4125 = vst.msk [vmem:[#allocation3 + $0x2a0] sm:$0xff] %vm1492_vm5, %v4106_v52 }
 0x446   : > { %v5704_v37 = vmax.f32 %v5696_v3, 0.0 }
 0x447   : > { %v4396_v49 = vpop.permute.xlu0 %4395 }
 0x448   : > { %v5720_v20 = vadd.f32 %v5712_v16, %v5704_v37  ;;  %4414 = vst.msk [vmem:[#allocation3 + $0x2c0] sm:$0xff] %vm1066_vm3, %v4396_v49  ;;  %v3660_v5 = vpop.permute.xlu1 %3659 }
 0x449   : > { %v5277_v40 = vpop.f32.mrb[82].mxu0  ;;  %3678 = vst.msk [vmem:[#allocation3 + $0x2b8] sm:$0xff] %vm1066_vm3, %v3660_v5 }
 0x44a   : > { %5728 = vst.msk [vmem:[#allocation2 + $0x70] sm:$0xff] %vm375_vm0, %v5720_v20  ;;  %v5278_v60 = vadd.f32 %v10133_v30, %v5277_v40  ;;  %v5279_v29 = vpop.f32.mrb[83].mxu0 }
 0x44b   : > { %v10317_v57 = vpop.f32.mrb[82].mxu1  ;;  %v4620_v12 = vpop.permute.xlu0 %4619  ;;  %v5014_v17 = vld [vmem:[#allocation3 + $0x2a8] sm:$0xff] }
 0x44c   : > { %v10321_v62 = vpop.f32.mrb[83].mxu1  ;;  %v5503_v53 = vadd.f32 %v10101_v50, %v5278_v60  ;;  %4638 = vst.msk [vmem:[#allocation3 + $0x2c0] sm:$0xff] %vm1267_vm4, %v4620_v12  ;;  %5370 = vmatprep.mubr.f32.mxu0 %v5014_v17  ;;  %v3884_v23 = vpop.permute.xlu1 %3883  ;;  %v5013_v21 = vld [vmem:[#allocation3 + $0x2a0] sm:$0xff] }
 0x44d   : > { %3902 = vst.msk [vmem:[#allocation3 + $0x2b8] sm:$0xff] %vm1267_vm4, %v3884_v23  ;;  %5371 = vmatmul.mubr.f32.gmra.mrb[120].mxu0 %v5013_v21 }
 0x44e   : > { %v5685_v34 = vmul.f32 %v10301_v42, %v5503_v53 }
 0x44f   : > { %v4812_v61 = vpop.permute.xlu0 %4811 }
 0x450   : > { %v5697_v10 = vadd.f32 %v10308_v31, %v5685_v34  ;;  %4830 = vst.msk [vmem:[#allocation3 + $0x2c0] sm:$0xff] %vm1492_vm5, %v4812_v61  ;;  %v4108_v2 = vpop.permute.xlu1 %4107  ;;  %v5715_v34 = vld [vmem:[#allocation2 + $0x88] sm:$0xff] }
 0x451   : > { %v5979_v1 = vld [vmem:[#allocation2 + $0x70] sm:$0xff]  ;;  %4126 = vst.msk [vmem:[#allocation3 + $0x2b8] sm:$0xff] %vm1492_vm5, %v4108_v2 }
 0x452   : > { %v5705_v0 = vmax.f32 %v5697_v10, 0.0  ;;  %v5994_v50 = vmul.f32 %v10233_v56, %v5979_v1 }
 0x453   : > { %v4398_v58 = vpop.permute.xlu0 %4397 }
 0x454   : > { %v5721_v14 = vadd.f32 %v5713_v28, %v5705_v0  ;;  %4415 = vst.msk [vmem:[#allocation3 + $0x2d8] sm:$0xff] %vm1066_vm3, %v4398_v58  ;;  %v6002_v19 = vsel %vm375_vm0, %v5994_v50, 0.0  ;;  %v3662_v38 = vpop.permute.xlu1 %3661 }
 0x455   : > { %v5282_v15 = vpop.f32.mrb[84].mxu0  ;;  %6003 = vadd.xlane.f32.xlu0 %v6002_v19  ;;  %3679 = vst.msk [vmem:[#allocation3 + $0x2d0] sm:$0xff] %vm1066_vm3, %v3662_v38 }
 0x456   : > { %5729 = vst.msk [vmem:[#allocation2 + $0x78] sm:$0xff] %vm375_vm0, %v5721_v14  ;;  %v5283_v59 = vadd.f32 %v10133_v30, %v5282_v15  ;;  %v5284_v48 = vpop.f32.mrb[85].mxu0 }
 0x457   : > { %v4622_v26 = vpop.permute.xlu0 %4621  ;;  %v5017_v45 = vld [vmem:[#allocation3 + $0x2c0] sm:$0xff]  ;;  %v5716_v48 = vld [vmem:[#allocation2 + $0x90] sm:$0xff] }
 0x458   : > { %v10336_v7 = vpop.f32.mrb[84].mxu1  ;;  %v5508_v51 = vadd.f32 %v10179_v43, %v5283_v59  ;;  %4639 = vst.msk [vmem:[#allocation3 + $0x2d8] sm:$0xff] %vm1267_vm4, %v4622_v26  ;;  %5375 = vmatprep.mubr.f32.mxu0 %v5017_v45  ;;  %v5016_v24 = vld [vmem:[#allocation3 + $0x2b8] sm:$0xff] }
 0x459   : > { %v10340_v54 = vpop.f32.mrb[85].mxu1  ;;  %v3886_v55 = vpop.permute.xlu1 %3885  ;;  %5376 = vmatmul.mubr.f32.gmra.mrb[122].mxu0 %v5016_v24 }
 0x45a   : > { %v5686_v22 = vmul.f32 %v10301_v42, %v5508_v51  ;;  %3903 = vst.msk [vmem:[#allocation3 + $0x2d0] sm:$0xff] %vm1267_vm4, %v3886_v55 }
 0x45b   : > { %v4814_v33 = vpop.permute.xlu0 %4813 }
 0x45c   : > { %v10344_v25 = vpop.f32.mrb[86].mxu1  ;;  %v5698_v4 = vadd.f32 %v10308_v31, %v5686_v22  ;;  %4831 = vst.msk [vmem:[#allocation3 + $0x2d8] sm:$0xff] %vm1492_vm5, %v4814_v33 }
 0x45d   : > { %v10348_v43 = vpop.f32.mrb[87].mxu1  ;;  %v4110_v11 = vpop.permute.xlu1 %4109  ;;  %v5980_v63 = vld [vmem:[#allocation2 + $0x78] sm:$0xff] }
 0x45e   : > { %v5706_v13 = vmax.f32 %v5698_v4, 0.0  ;;  %4127 = vst.msk [vmem:[#allocation3 + $0x2d0] sm:$0xff] %vm1492_vm5, %v4110_v11  ;;  %v5995_v39 = vmul.f32 %v10233_v56, %v5980_v63 }
 0x45f   : > { %v4400_v27 = vpop.permute.xlu0 %4399 }
 0x460   : > { %v5722_v8 = vadd.f32 %v5714_v47, %v5706_v13  ;;  %4416 = vst.msk [vmem:[#allocation3 + $0x2f0] sm:$0xff] %vm1066_vm3, %v4400_v27  ;;  %v6005_v44 = vsel %vm375_vm0, %v5995_v39, 0.0  ;;  %v5287_v52 = vpop.f32.mrb[86].mxu0  ;;  %v5717_v13 = vld [vmem:[#allocation2 + $0x98] sm:$0xff] }
 0x461   : > { %v3664_v3 = vpop.permute.xlu1 %3663  ;;  %6006 = vadd.xlane.f32.xlu0 %v6005_v44  ;;  %v5288_v37 = vadd.f32 %v10133_v30, %v5287_v52  ;;  %v5289_v16 = vpop.f32.mrb[87].mxu0 }
 0x462   : > { %5730 = vst.msk [vmem:[#allocation2 + $0x80] sm:$0xff] %vm375_vm0, %v5722_v8 }
 0x463   : > { %3680 = vst.msk [vmem:[#allocation3 + $0x2e8] sm:$0xff] %vm1066_vm3, %v3664_v3  ;;  %v4624_v49 = vpop.permute.xlu0 %4623  ;;  %v5020_v20 = vld [vmem:[#allocation3 + $0x2d8] sm:$0xff]  ;;  %v5513_v5 = vadd.f32 %v10177_v41, %v5288_v37  ;;  %vm5932_vm3 = vcmask 130112  }
 0x464   : > { %4640 = vst.msk [vmem:[#allocation3 + $0x2f0] sm:$0xff] %vm1267_vm4, %v4624_v49  ;;  %5380 = vmatprep.mubr.f32.mxu0 %v5020_v20 }
 0x465   : > { %v3888_v40 = vpop.permute.xlu1 %3887  ;;  %v5019_v60 = vld [vmem:[#allocation3 + $0x2d0] sm:$0xff]  ;;  %v5687_v29 = vmul.f32 %v10301_v42, %v5513_v5 }
 0x466   : > { %3904 = vst.msk [vmem:[#allocation3 + $0x2e8] sm:$0xff] %vm1267_vm4, %v3888_v40  ;;  %5381 = vmatmul.mubr.f32.gmra.mrb[124].mxu0 %v5019_v60 }
 0x467   : > { %v4816_v12 = vpop.permute.xlu0 %4815  ;;  %v5699_v17 = vadd.f32 %v10308_v31, %v5687_v29 }
 0x468   : > { %4832 = vst.msk [vmem:[#allocation3 + $0x2f0] sm:$0xff] %vm1492_vm5, %v4816_v12  ;;  %v5718_v12 = vld [vmem:[#allocation2 + $0xa0] sm:$0xff] }
 0x469   : > { %v4112_v53 = vpop.permute.xlu1 %4111  ;;  %v5981_v23 = vld [vmem:[#allocation2 + $0x80] sm:$0xff]  ;;  %v5707_v21 = vmax.f32 %v5699_v17, 0.0 }
 0x46a   : > { %4128 = vst.msk [vmem:[#allocation3 + $0x2e8] sm:$0xff] %vm1492_vm5, %v4112_v53  ;;  %v5996_v41 = vmul.f32 %v10233_v56, %v5981_v23 }
 0x46b   : > { %v5723_v61 = vadd.f32 %v5715_v34, %v5707_v21  ;;  %v6554_v21 = vld [vmem:[%s8643_s13 + $0xa] sm:$0x1] }
 0x46c   : > { %v6008_v10 = vsel %vm375_vm0, %v5996_v41, 0.0  ;;  %v5292_v2 = vpop.f32.mrb[88].mxu0 }
 0x46d   : > { %6009 = vadd.xlane.f32.xlu0 %v6008_v10  ;;  %5731 = vst.msk [vmem:[#allocation2 + $0x88] sm:$0xff] %vm375_vm0, %v5723_v61  ;;  %v5293_v1 = vadd.f32 %v10133_v30, %v5292_v2  ;;  %v5294_v0 = vpop.f32.mrb[89].mxu0  ;;  %v5739_v61 = vadd.f32 1.0, %v6554_v21  ;;  %v5719_v10 = vld [vmem:[#allocation2 + $0xa8] sm:$0xff] }
 0x46f   : > { %v5023_v50 = vld [vmem:[#allocation3 + $0x2f0] sm:$0xff]  ;;  %v5518_v28 = vadd.f32 %v10207_v18, %v5293_v1 }
 0x470   : > { %5385 = vmatprep.mubr.f32.mxu0 %v5023_v50  ;;  %v10400_v50 = vrot.slane %v5739_v61, %v8681_v32 }
 0x471   : > { %v5022_v58 = vld [vmem:[#allocation3 + $0x2e8] sm:$0xff]  ;;  %v5688_v14 = vmul.f32 %v10301_v42, %v5518_v28 }
 0x472   : > { %5386 = vmatmul.mubr.f32.gmra.mrb[126].mxu0 %v5022_v58 }
 0x473   : > { %v5700_v19 = vadd.f32 %v10308_v31, %v5688_v14  ;;  %v10406_v14 = vld [vmem:[%s8643_s13 + $0xb] ss:$0 sm:$0xff] }
 0x474   : > { %v5982_v38 = vld [vmem:[#allocation2 + $0x88] sm:$0xff] }
 0x475   : > { %v5708_v15 = vmax.f32 %v5700_v19, 0.0  ;;  %v5997_v59 = vmul.f32 %v10233_v56, %v5982_v38 }
 0x477   : > { %v5724_v26 = vadd.f32 %v5716_v48, %v5708_v15  ;;  %v6011_v45 = vsel %vm375_vm0, %v5997_v59, 0.0 }
 0x478   : > { %v5297_v51 = vpop.f32.mrb[90].mxu0  ;;  %6012 = vadd.xlane.f32.xlu0 %v6011_v45 }
 0x479   : > { %5732 = vst.msk [vmem:[#allocation2 + $0x90] sm:$0xff] %vm375_vm0, %v5724_v26  ;;  %v5298_v18 = vadd.f32 %v10133_v30, %v5297_v51  ;;  %v5299_v55 = vpop.f32.mrb[91].mxu0  ;;  %v5772_v26 = vld [vmem:[#allocation2 + $0xd0] sm:$0xff] }
 0x47b   : > { %v5523_v24 = vadd.f32 %v10203_v6, %v5298_v18 }
 0x47d   : > { %v5689_v22 = vmul.f32 %v10301_v42, %v5523_v24 }
 0x47f   : > { %v5701_v33 = vadd.f32 %v10308_v31, %v5689_v22 }
 0x480   : > { %v5983_v4 = vld [vmem:[#allocation2 + $0x90] sm:$0xff] }
 0x481   : > { %v5709_v11 = vmax.f32 %v5701_v33, 0.0  ;;  %v5998_v63 = vmul.f32 %v10233_v56, %v5983_v4 }
 0x483   : > { %v5725_v39 = vadd.f32 %v5717_v13, %v5709_v11  ;;  %v6014_v47 = vsel %vm375_vm0, %v5998_v63, 0.0  ;;  %v5773_v63 = vld [vmem:[#allocation2 + $0xd8] sm:$0xff] }
 0x484   : > { %v5302_v27 = vpop.f32.mrb[92].mxu0  ;;  %6015 = vadd.xlane.f32.xlu0 %v6014_v47 }
 0x485   : > { %5733 = vst.msk [vmem:[#allocation2 + $0x98] sm:$0xff] %vm375_vm0, %v5725_v39  ;;  %v5303_v8 = vadd.f32 %v10133_v30, %v5302_v27  ;;  %v5304_v44 = vpop.f32.mrb[93].mxu0 }
 0x487   : > { %v5528_v3 = vadd.f32 %v10215_v46, %v5303_v8 }
 0x488   : > { %v10382_v6 = vpop.f32.mrb[88].mxu1 }
 0x489   : > { %v10385_v52 = vpop.f32.mrb[89].mxu1  ;;  %v5690_v37 = vmul.f32 %v10301_v42, %v5528_v3 }
 0x48b   : > { %v5702_v16 = vadd.f32 %v10308_v31, %v5690_v37 }
 0x48c   : > { %v5307_v49 = vpop.f32.mrb[94].mxu0  ;;  %v5984_v20 = vld [vmem:[#allocation2 + $0x98] sm:$0xff] }
 0x48d   : > { %v5710_v5 = vmax.f32 %v5702_v16, 0.0  ;;  %v5308_v40 = vadd.f32 %v10133_v30, %v5307_v49  ;;  %v5309_v60 = vpop.f32.mrb[95].mxu0  ;;  %v5999_v29 = vmul.f32 %v10233_v56, %v5984_v20 }
 0x48e   : > { %v5774_v60 = vld [vmem:[#allocation2 + $0xe0] sm:$0xff] }
 0x48f   : > { %v5726_v17 = vadd.f32 %v5718_v12, %v5710_v5  ;;  %v5533_v53 = vadd.f32 %v10211_v36, %v5308_v40  ;;  %v6017_v46 = vsel %vm375_vm0, %v5999_v29, 0.0 }
 0x490   : > { %6018 = vadd.xlane.f32.xlu0 %v6017_v46 }
 0x491   : > { %5734 = vst.msk [vmem:[#allocation2 + $0xa0] sm:$0xff] %vm375_vm0, %v5726_v17  ;;  %v5691_v23 = vmul.f32 %v10301_v42, %v5533_v53 }
 0x493   : > { %v5703_v41 = vadd.f32 %v10308_v31, %v5691_v23 }
 0x495   : > { %v5711_v34 = vmax.f32 %v5703_v41, 0.0 }
 0x497   : > { %v5727_v2 = vadd.f32 %v5719_v10, %v5711_v34 }
 0x498   : > { %v5312_v1 = vpop.f32.mrb[96].mxu0  ;;  %v5985_v0 = vld [vmem:[#allocation2 + $0xa0] sm:$0xff] }
 0x499   : > { %5735 = vst.msk [vmem:[#allocation2 + $0xa8] sm:$0xff] %vm375_vm0, %v5727_v2  ;;  %v5313_v36 = vadd.f32 %v10133_v30, %v5312_v1  ;;  %v5314_v28 = vpop.f32.mrb[97].mxu0  ;;  %v6000_v42 = vmul.f32 %v10233_v56, %v5985_v0 }
 0x49b   : > { %v5538_v58 = vadd.f32 %v10276_v9, %v5313_v36  ;;  %v6020_v31 = vsel %vm375_vm0, %v6000_v42, 0.0  ;;  %v5775_v36 = vld [vmem:[#allocation2 + $0xe8] sm:$0xff] }
 0x49c   : > { %6021 = vadd.xlane.f32.xlu0 %v6020_v31 }
 0x49d   : > { %v5744_v19 = vmul.f32 %v10400_v50, %v5538_v58 }
 0x49f   : > { %v10409_v38 = vpop.f32.mrb[90].mxu1  ;;  %v5756_v15 = vadd.f32 %v10406_v14, %v5744_v19 }
 0x4a0   : > { %v10412_v59 = vpop.f32.mrb[91].mxu1  ;;  %v5986_v20 = vld [vmem:[#allocation2 + $0xa8] sm:$0xff] }
 0x4a1   : > { %v5764_v48 = vmax.f32 %v5756_v15, 0.0  ;;  %v6001_v17 = vmul.f32 %v10233_v56, %v5986_v20 }
 0x4a3   : > { %v5780_v45 = vadd.f32 %v5772_v26, %v5764_v48  ;;  %v6023_v34 = vsel %vm375_vm0, %v6001_v17, 0.0 }
 0x4a4   : > { %v5317_v51 = vpop.f32.mrb[98].mxu0 }
 0x4a5   : > { %5788 = vst.msk [vmem:[#allocation2 + $0xd0] sm:$0xff] %vm375_vm0, %v5780_v45  ;;  %v5318_v9 = vadd.f32 %v10133_v30, %v5317_v51  ;;  %v5319_v18 = vpop.f32.mrb[99].mxu0 }
 0x4a7   : > { %v5543_v55 = vadd.f32 %v10272_v35, %v5318_v9  ;;  %v5776_v9 = vld [vmem:[#allocation2 + $0xf0] sm:$0xff] }
 0x4a9   : > { %v5745_v24 = vmul.f32 %v10400_v50, %v5543_v55 }
 0x4ab   : > { %v5757_v22 = vadd.f32 %v10406_v14, %v5745_v24 }
 0x4ac   : > { %v6083_v33 = vld [vmem:[#allocation2 + $0xd0] sm:$0xff] }
 0x4ad   : > { %v5765_v4 = vmax.f32 %v5757_v22, 0.0  ;;  %v6098_v11 = vmul.f32 %v10233_v56, %v6083_v33 }
 0x4af   : > { %v5781_v13 = vadd.f32 %v5773_v63, %v5765_v4  ;;  %v6106_v39 = vsel %vm375_vm0, %v6098_v11, 0.0 }
 0x4b0   : > { %v5322_v47 = vpop.f32.mrb[100].mxu0  ;;  %6107 = vadd.xlane.f32.xlu1 %v6106_v39 }
 0x4b1   : > { %5789 = vst.msk [vmem:[#allocation2 + $0xd8] sm:$0xff] %vm375_vm0, %v5781_v13  ;;  %v5323_v27 = vadd.f32 %v10133_v30, %v5322_v47  ;;  %v5324_v8 = vpop.f32.mrb[101].mxu0  ;;  %v5777_v47 = vld [vmem:[#allocation2 + $0xf8] sm:$0xff] }
 0x4b3   : > { %v5548_v35 = vadd.f32 %v10321_v62, %v5323_v27 }
 0x4b5   : > { %v5746_v44 = vmul.f32 %v10400_v50, %v5548_v35 }
 0x4b7   : > { %v5758_v37 = vadd.f32 %v10406_v14, %v5746_v44 }
 0x4b8   : > { %v10425_v3 = vpop.f32.mrb[92].mxu1  ;;  %v6084_v49 = vld [vmem:[#allocation2 + $0xd8] sm:$0xff] }
 0x4b9   : > { %v10428_v16 = vpop.f32.mrb[93].mxu1  ;;  %v5766_v5 = vmax.f32 %v5758_v37, 0.0  ;;  %v6099_v40 = vmul.f32 %v10233_v56, %v6084_v49 }
 0x4bb   : > { %v5782_v29 = vadd.f32 %v5774_v60, %v5766_v5  ;;  %v6109_v12 = vsel %vm375_vm0, %v6099_v40, 0.0 }
 0x4bc   : > { %v5327_v62 = vpop.f32.mrb[102].mxu0  ;;  %6110 = vadd.xlane.f32.xlu0 %v6109_v12  ;;  %v10433_v53 = vpop.f32.mrb[94].mxu1 }
 0x4bd   : > { %5790 = vst.msk [vmem:[#allocation2 + $0xe0] sm:$0xff] %vm375_vm0, %v5782_v29  ;;  %v5328_v46 = vadd.f32 %v10133_v30, %v5327_v62  ;;  %v5329_v23 = vpop.f32.mrb[103].mxu0  ;;  %v10437_v21 = vpop.f32.mrb[95].mxu1  ;;  %v5778_v62 = vld [vmem:[#allocation2 + $0x100] sm:$0xff] }
 0x4bf   : > { %v5553_v41 = vadd.f32 %v10317_v57, %v5328_v46  ;;  %v10449_v57 = vld [vmem:[%s10743_s5 + $0x1] ss:$0 sm:$0xff] }
 0x4c0   : > { %6024 = vadd.xlane.f32.xlu0 %v6023_v34  ;;  %v6557_v34 = vld [vmem:[%s8643_s13 + $0xe] sm:$0x1] }
 0x4c1   : > { %v5747_v61 = vmul.f32 %v10400_v50, %v5553_v41 }
 0x4c3   : > { %v5759_v10 = vadd.f32 %v10406_v14, %v5747_v61 }
 0x4c4   : > { %v6085_v2 = vld [vmem:[#allocation2 + $0xe0] sm:$0xff] }
 0x4c5   : > { %v5767_v1 = vmax.f32 %v5759_v10, 0.0  ;;  %v6100_v0 = vmul.f32 %v10233_v56, %v6085_v2  ;;  %v5799_v2 = vadd.f32 1.0, %v6557_v34 }
 0x4c7   : > { %v5783_v28 = vadd.f32 %v5775_v36, %v5767_v1  ;;  %v6112_v30 = vsel %vm375_vm0, %v6100_v0, 0.0  ;;  %v5779_v1 = vld [vmem:[#allocation2 + $0x108] sm:$0xff] }
 0x4c8   : > { %6113 = vadd.xlane.f32.xlu1 %v6112_v30  ;;  %v10480_v30 = vrot.slane %v5799_v2, %v8681_v32 }
 0x4c9   : > { %v5332_v42 = vpop.f32.mrb[104].mxu0  ;;  %5791 = vst.msk [vmem:[#allocation2 + $0xe8] sm:$0xff] %vm375_vm0, %v5783_v28 }
 0x4ca   : > { %v5333_v58 = vadd.f32 %v10449_v57, %v5332_v42  ;;  %v5334_v31 = vpop.f32.mrb[105].mxu0 }
 0x4cb   : > { %v10486_v31 = vld [vmem:[%s8643_s13 + $0xf] ss:$0 sm:$0xff]  ;;  %s7023_s13 = scalar_lea.vmem %s7022_s26, 128 }
 0x4cc   : > { %v5558_v19 = vadd.f32 %v10340_v54, %v5333_v58  ;;  %p7025_p2 = scmp.lt.s32.totalorder %s7023_s13, %s7017_s18 }
 0x4ce   : > { %v5748_v15 = vmul.f32 %v10400_v50, %v5558_v19  ;;  %p7026_p3 = por %p7025_p2, %p7024_p1 }
 0x4d0   : > { %v5760_v48 = vadd.f32 %v10406_v14, %v5748_v15  ;;  %v6086_v26 = vld [vmem:[#allocation2 + $0xe8] sm:$0xff]  ;;  %p7027_p4 = pnand %p7026_p3, %p7020_p0 }
 0x4d1   : > { %v6101_v51 = vmul.f32 %v10233_v56, %v6086_v26  ;;  %v5832_v26 = vld [vmem:[#allocation2 + $0x130] sm:$0xff] }
 0x4d2   : > { %v5768_v45 = vmax.f32 %v5760_v48, 0.0 }
 0x4d3   : > { %v6115_v55 = vsel %vm375_vm0, %v6101_v51, 0.0 }
 0x4d4   : > { %v5784_v18 = vadd.f32 %v5776_v9, %v5768_v45  ;;  %v5337_v24 = vpop.f32.mrb[106].mxu0  ;;  %6116 = vadd.xlane.f32.xlu1 %v6115_v55  ;;  %v10497_v55 = vld [vmem:[%s10744_s6] ss:$0 sm:$0xff] }
 0x4d5   : > { %v5338_v22 = vadd.f32 %v10449_v57, %v5337_v24  ;;  %v5339_v33 = vpop.f32.mrb[107].mxu0 }
 0x4d6   : > { %5792 = vst.msk [vmem:[#allocation2 + $0xf0] sm:$0xff] %vm375_vm0, %v5784_v18 }
 0x4d7   : > { %v5563_v54 = vadd.f32 %v10336_v7, %v5338_v22 }
 0x4d9   : > { %v5749_v4 = vmul.f32 %v10400_v50, %v5563_v54  ;;  %v5864_v54 = vld [vmem:[#allocation2 + $0x48] sm:$0xff] }
 0x4db   : > { %v5761_v11 = vadd.f32 %v10406_v14, %v5749_v4 }
 0x4dd   : > { %v6087_v63 = vld [vmem:[#allocation2 + $0xf0] sm:$0xff]  ;;  %v5769_v13 = vmax.f32 %v5761_v11, 0.0 }
 0x4de   : > { %v6102_v39 = vmul.f32 %v10233_v56, %v6087_v63 }
 0x4df   : > { %v5785_v27 = vadd.f32 %v5777_v47, %v5769_v13 }
 0x4e0   : > { %v6118_v8 = vsel %vm375_vm0, %v6102_v39, 0.0  ;;  %v5833_v39 = vld [vmem:[#allocation2 + $0x138] sm:$0xff] }
 0x4e1   : > { %v5342_v35 = vpop.f32.mrb[108].mxu0  ;;  %6119 = vadd.xlane.f32.xlu1 %v6118_v8  ;;  %5793 = vst.msk [vmem:[#allocation2 + $0xf8] sm:$0xff] %vm375_vm0, %v5785_v27  ;;  %v5879_v8 = vmul.f32 %v10233_v56, %v5864_v54 }
 0x4e2   : > { %v5343_v44 = vadd.f32 %v10449_v57, %v5342_v35  ;;  %v5344_v37 = vpop.f32.mrb[109].mxu0 }
 0x4e4   : > { %v5568_v7 = vadd.f32 %v10348_v43, %v5343_v44 }
 0x4e6   : > { %v5750_v49 = vmul.f32 %v10400_v50, %v5568_v7  ;;  %v5901_v7 = vsel %vm375_vm0, %v5879_v8, 0.0 }
 0x4e8   : > { %v5762_v20 = vadd.f32 %v10406_v14, %v5750_v49  ;;  %v5347_v5 = vpop.f32.mrb[110].mxu0  ;;  %v6088_v40 = vld [vmem:[#allocation2 + $0xf8] sm:$0xff] }
 0x4e9   : > { %v5348_v29 = vadd.f32 %v10449_v57, %v5347_v5  ;;  %v5349_v12 = vpop.f32.mrb[111].mxu0  ;;  %v6103_v17 = vmul.f32 %v10233_v56, %v6088_v40  ;;  %v5834_v5 = vld [vmem:[#allocation2 + $0x140] sm:$0xff] }
 0x4ea   : > { %v5770_v60 = vmax.f32 %v5762_v20, 0.0 }
 0x4eb   : > { %v5573_v23 = vadd.f32 %v10344_v25, %v5348_v29  ;;  %v6121_v41 = vsel %vm375_vm0, %v6103_v17, 0.0 }
 0x4ec   : > { %v5786_v46 = vadd.f32 %v5778_v62, %v5770_v60  ;;  %6122 = vadd.xlane.f32.xlu1 %v6121_v41 }
 0x4ed   : > { %v5751_v43 = vmul.f32 %v10400_v50, %v5573_v23 }
 0x4ee   : > { %5794 = vst.msk [vmem:[#allocation2 + $0x100] sm:$0xff] %vm375_vm0, %v5786_v46 }
 0x4ef   : > { %v5763_v61 = vadd.f32 %v10406_v14, %v5751_v43 }
 0x4f1   : > { %v5771_v10 = vmax.f32 %v5763_v61, 0.0 }
 0x4f3   : > { %v5787_v0 = vadd.f32 %v5779_v1, %v5771_v10  ;;  %v5835_v10 = vld [vmem:[#allocation2 + $0x148] sm:$0xff] }
 0x4f4   : > { %v5352_v36 = vpop.f32.mrb[112].mxu0 }
 0x4f5   : > { %v6089_v28 = vld [vmem:[#allocation2 + $0x100] sm:$0xff]  ;;  %5795 = vst.msk [vmem:[#allocation2 + $0x108] sm:$0xff] %vm375_vm0, %v5787_v0  ;;  %v5353_v25 = vadd.f32 %v10449_v57, %v5352_v36  ;;  %v5354_v42 = vpop.f32.mrb[113].mxu0 }
 0x4f6   : > { %v6104_v50 = vmul.f32 %v10233_v56, %v6089_v28 }
 0x4f7   : > { %v5578_v58 = vadd.f32 %v10385_v52, %v5353_v25 }
 0x4f8   : > { %v6124_v14 = vsel %vm375_vm0, %v6104_v50, 0.0 }
 0x4f9   : > { %6125 = vadd.xlane.f32.xlu1 %v6124_v14  ;;  %v5804_v19 = vmul.f32 %v10480_v30, %v5578_v58  ;;  %v10525_v58 = vpop.xlane.xlu0 %5881 }
 0x4fb   : > { %v5816_v15 = vadd.f32 %v10486_v31, %v5804_v19 }
 0x4fc   : > { %v6090_v35 = vld [vmem:[#allocation2 + $0x108] sm:$0xff] }
 0x4fd   : > { %v5824_v48 = vmax.f32 %v5816_v15, 0.0  ;;  %v6105_v49 = vmul.f32 %v10233_v56, %v6090_v35  ;;  %v5836_v15 = vld [vmem:[#allocation2 + $0x150] sm:$0xff] }
 0x4ff   : > { %v5840_v45 = vadd.f32 %v5832_v26, %v5824_v48  ;;  %v6127_v40 = vsel %vm375_vm0, %v6105_v49, 0.0 }
 0x500   : > { %v5357_v51 = vpop.f32.mrb[114].mxu0 }
 0x501   : > { %5848 = vst.msk [vmem:[#allocation2 + $0x130] sm:$0xff] %vm375_vm0, %v5840_v45  ;;  %v5358_v32 = vadd.f32 %v10449_v57, %v5357_v51  ;;  %v5359_v9 = vpop.f32.mrb[115].mxu0  ;;  %v6004_v51 = vpop.xlane.xlu0 %6003 }
 0x503   : > { %v5583_v52 = vadd.f32 %v10382_v6, %v5358_v32 }
 0x505   : > { %v5805_v18 = vmul.f32 %v10480_v30, %v5583_v52  ;;  %v6007_v52 = vpop.xlane.xlu0 %6006 }
 0x507   : > { %v5817_v24 = vadd.f32 %v10486_v31, %v5805_v18 }
 0x508   : > { %v6187_v33 = vld [vmem:[#allocation2 + $0x130] sm:$0xff] }
 0x509   : > { %v5362_v22 = vpop.f32.mrb[116].mxu0  ;;  %v5825_v4 = vmax.f32 %v5817_v24, 0.0  ;;  %v6202_v13 = vmul.f32 %v10497_v55, %v6187_v33  ;;  %v6010_v33 = vpop.xlane.xlu0 %6009 }
 0x50a   : > { %v5363_v11 = vadd.f32 %v10449_v57, %v5362_v22  ;;  %v5364_v63 = vpop.f32.mrb[117].mxu0 }
 0x50b   : > { %v5841_v6 = vadd.f32 %v5833_v39, %v5825_v4  ;;  %v6210_v27 = vsel %vm375_vm0, %v6202_v13, 0.0 }
 0x50c   : > { %v5588_v47 = vadd.f32 %v10412_v59, %v5363_v11  ;;  %6211 = vadd.xlane.f32.xlu1 %v6210_v27  ;;  %v5837_v11 = vld [vmem:[#allocation2 + $0x158] sm:$0xff] }
 0x50d   : > { %5849 = vst.msk [vmem:[#allocation2 + $0x138] sm:$0xff] %vm375_vm0, %v5841_v6  ;;  %v6013_v6 = vpop.xlane.xlu0 %6012 }
 0x50e   : > { %v5806_v44 = vmul.f32 %v10480_v30, %v5588_v47 }
 0x510   : > { %v5818_v37 = vadd.f32 %v10486_v31, %v5806_v44  ;;  %5902 = vadd.xlane.f32.xlu1 %v5901_v7 }
 0x511   : > { %v6016_v8 = vpop.xlane.xlu0 %6015 }
 0x512   : > { %v5826_v20 = vmax.f32 %v5818_v37, 0.0  ;;  %v10782_v37 = vlaneseq }
 0x514   : > { %v5842_v59 = vadd.f32 %v5834_v5, %v5826_v20  ;;  %v5367_v60 = vpop.f32.mrb[118].mxu0  ;;  %6128 = vadd.xlane.f32.xlu1 %v6127_v40  ;;  %v6188_v29 = vld [vmem:[#allocation2 + $0x138] sm:$0xff]  ;;  %v5922_v7 = vand.u32 127, %v10782_v37 }
 0x515   : > { %v5368_v12 = vadd.f32 %v10449_v57, %v5367_v60  ;;  %v5369_v17 = vpop.f32.mrb[119].mxu0  ;;  %v6203_v62 = vmul.f32 %v10497_v55, %v6188_v29  ;;  %v5838_v60 = vld [vmem:[#allocation2 + $0x160] sm:$0xff]  ;;  %v10543_v29 = vstv %s5856_s28 }
 0x516   : > { %5850 = vst.msk [vmem:[#allocation2 + $0x140] sm:$0xff] %vm375_vm0, %v5842_v59  ;;  %v5927_v40 = vadd.s32 4294967288, %v5922_v7 }
 0x517   : > { %v5593_v46 = vadd.f32 %v10409_v38, %v5368_v12  ;;  %v6213_v56 = vsel %vm375_vm0, %v6203_v62, 0.0  ;;  %v5934_v12 = vadd.s32 4294967280, %v5922_v7  ;;  %v5941_v62 = vadd.s32 4294967272, %v5922_v7 }
 0x518   : > { %6214 = vadd.xlane.f32.xlu0 %v6213_v56 }
 0x519   : > { %v5807_v23 = vmul.f32 %v10480_v30, %v5593_v46  ;;  %v6027_v46 = vadd.f32 %v6007_v52, %v10543_v29 }
 0x51b   : > { %v5819_v41 = vadd.f32 %v10486_v31, %v5807_v23  ;;  %v10783_v23 = vld [vmem:[#allocation8_spill] sm:$0xff] }
 0x51d   : > { %v6189_v43 = vld [vmem:[#allocation2 + $0x140] sm:$0xff]  ;;  %v5827_v34 = vmax.f32 %v5819_v41, 0.0  ;;  %v6019_v20 = vpop.xlane.xlu0 %6018  ;;  %v10548_v41 = vsub.s32 %v5922_v7, %v10783_v23 }
 0x51e   : > { %v6204_v61 = vmul.f32 %v10497_v55, %v6189_v43  ;;  %v5948_v43 = vadd.s32 4294967264, %v5922_v7 }
 0x51f   : > { %v5843_v2 = vadd.f32 %v5835_v10, %v5827_v34  ;;  %v6028_v34 = vadd.f32 %v6010_v33, %v10543_v29 }
 0x520   : > { %v6216_v1 = vsel %vm375_vm0, %v6204_v61, 0.0  ;;  %v5372_v0 = vpop.f32.mrb[120].mxu0 }
 0x521   : > { %6217 = vadd.xlane.f32.xlu0 %v6216_v1  ;;  %5851 = vst.msk [vmem:[#allocation2 + $0x148] sm:$0xff] %vm375_vm0, %v5843_v2  ;;  %v5373_v38 = vadd.f32 %v10449_v57, %v5372_v0  ;;  %v5374_v36 = vpop.f32.mrb[121].mxu0  ;;  %v10554_v1 = vsub.s32 %v5927_v40, %v10783_v23  ;;  %v5955_v0 = vadd.s32 4294967256, %v5922_v7 }
 0x522   : > { %v6029_v36 = vadd.f32 %v6013_v6, %v10543_v29  ;;  %v5839_v6 = vld [vmem:[#allocation2 + $0x168] sm:$0xff] }
 0x523   : > { %v5598_v28 = vadd.f32 %v10428_v16, %v5373_v38  ;;  %v6026_v38 = vadd.f32 %v6004_v51, %v10543_v29 }
 0x525   : > { %v5808_v25 = vmul.f32 %v10480_v30, %v5598_v28  ;;  %v10559_v28 = vsub.s32 %v5934_v12, %v10783_v23 }
 0x527   : > { %v5820_v42 = vadd.f32 %v10486_v31, %v5808_v25  ;;  %v5962_v25 = vadd.s32 4294967248, %v5922_v7 }
 0x528   : > { %v6190_v50 = vld [vmem:[#allocation2 + $0x148] sm:$0xff] }
 0x529   : > { %v5828_v14 = vmax.f32 %v5820_v42, 0.0  ;;  %v6205_v19 = vmul.f32 %v10497_v55, %v6190_v50  ;;  %v6022_v61 = vpop.xlane.xlu0 %6021  ;;  %v6030_v42 = vadd.f32 %v6016_v8, %v10543_v29  ;;  %v10583_v52 = vsub.s32 %v5962_v25, %v10783_v23 }
 0x52b   : > { %v5844_v48 = vadd.f32 %v5836_v15, %v5828_v14  ;;  %v6219_v26 = vsel %vm375_vm0, %v6205_v19, 0.0  ;;  %v6049_v14 = vrot.slane %v6027_v46, %v10554_v1  ;;  %v6031_v19 = vadd.f32 %v6019_v20, %v10543_v29 }
 0x52c   : > { %v5377_v45 = vpop.f32.mrb[122].mxu0  ;;  %6220 = vadd.xlane.f32.xlu0 %v6219_v26  ;;  %v5969_v15 = vadd.s32 4294967240, %v5922_v7  ;;  %v6054_v26 = vrot.slane %v6028_v34, %v10559_v28 }
 0x52d   : > { %5852 = vst.msk [vmem:[#allocation2 + $0x150] sm:$0xff] %vm375_vm0, %v5844_v48  ;;  %v5378_v16 = vadd.f32 %v10449_v57, %v5377_v45  ;;  %v5379_v32 = vpop.f32.mrb[123].mxu0  ;;  %v10569_v48 = vsub.s32 %v5948_v43, %v10783_v23  ;;  %v6032_v45 = vadd.f32 %v6022_v61, %v10543_v29 }
 0x52e   : > { %v6045_v32 = vrot.slane %v6026_v38, %v10548_v41  ;;  %v10590_v33 = vsub.s32 %v5969_v15, %v10783_v23 }
 0x52f   : > { %v5603_v9 = vadd.f32 %v10425_v3, %v5378_v16 }
 0x531   : > { %v5809_v18 = vmul.f32 %v10480_v30, %v5603_v9 }
 0x533   : > { %v5821_v24 = vadd.f32 %v10486_v31, %v5809_v18  ;;  %v6064_v18 = vrot.slane %v6030_v42, %v10569_v48 }
 0x534   : > { %v6191_v22 = vld [vmem:[#allocation2 + $0x150] sm:$0xff] }
 0x535   : > { %v5829_v54 = vmax.f32 %v5821_v24, 0.0  ;;  %v6206_v4 = vmul.f32 %v10497_v55, %v6191_v22  ;;  %v6050_v24 = vsel %vm5932_vm3, %v6049_v14, %v6045_v32 }
 0x537   : > { %v5845_v63 = vadd.f32 %v5837_v11, %v5829_v54  ;;  %v6222_v13 = vsel %vm375_vm0, %v6206_v4, 0.0  ;;  %v6055_v4 = vsel %vm5939_vm6, %v6054_v26, %v6050_v24  ;;  %v6074_v11 = vrot.slane %v6032_v45, %v10583_v52 }
 0x538   : > { %6223 = vadd.xlane.f32.xlu0 %v6222_v13 }
 0x539   : > { %v5382_v39 = vpop.f32.mrb[124].mxu0  ;;  %5853 = vst.msk [vmem:[#allocation2 + $0x158] sm:$0xff] %vm375_vm0, %v5845_v63 }
 0x53a   : > { %v5383_v3 = vadd.f32 %v10449_v57, %v5382_v39  ;;  %v5384_v47 = vpop.f32.mrb[125].mxu0 }
 0x53c   : > { %v5608_v27 = vadd.f32 %v10437_v21, %v5383_v3 }
 0x53e   : > { %v5810_v35 = vmul.f32 %v10480_v30, %v5608_v27 }
 0x540   : > { %v5822_v44 = vadd.f32 %v10486_v31, %v5810_v35  ;;  %v6192_v49 = vld [vmem:[#allocation2 + $0x158] sm:$0xff] }
 0x541   : > { %v6207_v59 = vmul.f32 %v10497_v55, %v6192_v49 }
 0x542   : > { %v5830_v5 = vmax.f32 %v5822_v44, 0.0 }
 0x543   : > { %v6225_v21 = vsel %vm375_vm0, %v6207_v59, 0.0  ;;  %v5885_v59 = vpop.xlane.xlu1 %5884 }
 0x544   : > { %v5846_v17 = vadd.f32 %v5838_v60, %v5830_v5  ;;  %6226 = vadd.xlane.f32.xlu0 %v6225_v21  ;;  %v5906_v34 = vadd.f32 %v10543_v29, %v5885_v59 }
 0x545   : > { %v5387_v56 = vpop.f32.mrb[126].mxu0 }
 0x546   : > { %5854 = vst.msk [vmem:[#allocation2 + $0x160] sm:$0xff] %vm375_vm0, %v5846_v17  ;;  %v5388_v10 = vadd.f32 %v10449_v57, %v5387_v56  ;;  %v5389_v2 = vpop.f32.mrb[127].mxu0  ;;  %v10564_v57 = vsub.s32 %v5941_v62, %v10783_v23  ;;  %v5931_v38 = vrot.slane %v5906_v34, %v10554_v1 }
 0x547   : > { %v5888_v40 = vpop.xlane.xlu1 %5887 }
 0x548   : > { %v5613_v50 = vadd.f32 %v10433_v53, %v5388_v10  ;;  %v10577_v53 = vsub.s32 %v5955_v0, %v10783_v23  ;;  %v6059_v9 = vrot.slane %v6029_v36, %v10564_v57  ;;  %v5907_v61 = vadd.f32 %v10543_v29, %v5888_v40 }
 0x549   : > { %v10574_v16 = vpop.xlane.xlu0 %6110 }
 0x54a   : > { %v5811_v51 = vmul.f32 %v10480_v30, %v5613_v50  ;;  %v6069_v22 = vrot.slane %v6031_v19, %v10577_v53  ;;  %v6131_v25 = vadd.f32 %v10574_v16, %v10543_v29  ;;  %v5938_v42 = vrot.slane %v5907_v61, %v10559_v28 }
 0x54b   : > { %v5891_v60 = vpop.xlane.xlu1 %5890 }
 0x54c   : > { %v5823_v30 = vadd.f32 %v10486_v31, %v5811_v51  ;;  %v6060_v31 = vsel %vm5946_vm7, %v6059_v9, %v6055_v4  ;;  %v5908_v2 = vadd.f32 %v10543_v29, %v5891_v60 }
 0x54d   : > { %v6193_v54 = vld [vmem:[#allocation2 + $0x160] sm:$0xff]  ;;  %v6025_v13 = vpop.xlane.xlu0 %6024  ;;  %v6065_v47 = vsel %vm5953_vm8, %v6064_v18, %v6060_v31  ;;  %v6153_v18 = vrot.slane %v6131_v25, %v10554_v1 }
 0x54e   : > { %v5831_v63 = vmax.f32 %v5823_v30, 0.0  ;;  %v6208_v39 = vmul.f32 %v10497_v55, %v6193_v54  ;;  %v6033_v3 = vadd.f32 %v6025_v13, %v10543_v29  ;;  %v6070_v35 = vsel %vm5960_vm9, %v6069_v22, %v6065_v47 }
 0x54f   : > { %v6075_v37 = vsel %vm5967_vm11, %v6074_v11, %v6070_v35  ;;  %v5894_v12 = vpop.xlane.xlu1 %5893  ;;  %v5945_v15 = vrot.slane %v5908_v2, %v10564_v57 }
 0x550   : > { %v5847_v27 = vadd.f32 %v5839_v6, %v5831_v63  ;;  %v6228_v8 = vsel %vm375_vm0, %v6208_v39, 0.0  ;;  %v6079_v44 = vrot.slane %v6033_v3, %v10590_v33  ;;  %v5909_v0 = vadd.f32 %v10543_v29, %v5894_v12 }
 0x551   : > { %6229 = vadd.xlane.f32.xlu0 %v6228_v8 }
 0x552   : > { %5855 = vst.msk [vmem:[#allocation2 + $0x168] sm:$0xff] %vm375_vm0, %v5847_v27  ;;  %v6080_v7 = vsel %vm5974_vm10, %v6079_v44, %v6075_v37  ;;  %v5952_v51 = vrot.slane %v5909_v0, %v10569_v48 }
 0x553   : > { %6082 = vst.msk [vmem:[%s10606_s20 + $0x1] sm:$0x1] %vm5977_vm12, %v6080_v7  ;;  %v5897_v17 = vpop.xlane.xlu1 %5896 }
 0x554   : > { %v5910_v36 = vadd.f32 %v10543_v29, %v5897_v17 }
 0x556   : > { %v5959_v9 = vrot.slane %v5910_v36, %v10577_v53 }
 0x557   : > { %v5900_v21 = vpop.xlane.xlu1 %5899 }
 0x558   : > { %v5911_v50 = vadd.f32 %v10543_v29, %v5900_v21 }
 0x559   : > { %v6194_v49 = vld [vmem:[#allocation2 + $0x168] sm:$0xff] }
 0x55a   : > { %v6209_v20 = vmul.f32 %v10497_v55, %v6194_v49  ;;  %v5905_v55 = vadd.f32 %v10543_v29, %v10525_v58  ;;  %v5966_v22 = vrot.slane %v5911_v50, %v10583_v52 }
 0x55b   : > { %v6108_v62 = vpop.xlane.xlu1 %6107 }
 0x55c   : > { %v6231_v5 = vsel %vm375_vm0, %v6209_v20, 0.0  ;;  %v5926_v58 = vrot.slane %v5905_v55, %v10548_v41  ;;  %v6130_v26 = vadd.f32 %v6108_v62, %v10543_v29 }
 0x55d   : > { %6232 = vadd.xlane.f32.xlu0 %v6231_v5 }
 0x55e   : > { %v5933_v16 = vsel %vm5932_vm3, %v5931_v38, %v5926_v58  ;;  %v6149_v13 = vrot.slane %v6130_v26, %v10548_v41 }
 0x55f   : > { %v6114_v46 = vpop.xlane.xlu1 %6113  ;;  %v5940_v24 = vsel %vm5939_vm6, %v5938_v42, %v5933_v16 }
 0x560   : > { %v6132_v14 = vadd.f32 %v6114_v46, %v10543_v29  ;;  %v5947_v63 = vsel %vm5946_vm7, %v5945_v15, %v5940_v24  ;;  %v6154_v27 = vsel %vm5932_vm3, %v6153_v18, %v6149_v13 }
 0x561   : > { %v5954_v6 = vsel %vm5953_vm8, %v5952_v51, %v5947_v63 }
 0x562   : > { %v6158_v54 = vrot.slane %v6132_v14, %v10559_v28  ;;  %v5961_v47 = vsel %vm5960_vm9, %v5959_v9, %v5954_v6 }
 0x563   : > { %v6117_v56 = vpop.xlane.xlu1 %6116  ;;  %v5968_v44 = vsel %vm5967_vm11, %v5966_v22, %v5961_v47 }
 0x564   : > { %v6133_v45 = vadd.f32 %v6117_v56, %v10543_v29  ;;  %v6159_v37 = vsel %vm5939_vm6, %v6158_v54, %v6154_v27 }
 0x566   : > { %v6163_v39 = vrot.slane %v6133_v45, %v10564_v57 }
 0x568   : > { %v6164_v20 = vsel %vm5946_vm7, %v6163_v39, %v6159_v37 }
 0x56e   : > { %v6120_v23 = vpop.xlane.xlu1 %6119 }
 0x56f   : > { %v6134_v32 = vadd.f32 %v6120_v23, %v10543_v29 }
 0x571   : > { %v6168_v3 = vrot.slane %v6134_v32, %v10569_v48 }
 0x573   : > { %v6169_v40 = vsel %vm5953_vm8, %v6168_v3, %v6164_v20 }
 0x579   : > { %v6123_v43 = vpop.xlane.xlu1 %6122 }
 0x57a   : > { %v6135_v30 = vadd.f32 %v6123_v43, %v10543_v29 }
 0x57c   : > { %v6173_v8 = vrot.slane %v6135_v30, %v10577_v53 }
 0x57e   : > { %v6174_v60 = vsel %vm5960_vm9, %v6173_v8, %v6169_v40 }
 0x586   : > { %v6126_v10 = vpop.xlane.xlu1 %6125 }
 0x587   : > { %v6136_v4 = vadd.f32 %v6126_v10, %v10543_v29 }
 0x589   : > { %v6178_v7 = vrot.slane %v6136_v4, %v10583_v52 }
 0x58b   : > { %v6179_v17 = vsel %vm5967_vm11, %v6178_v7, %v6174_v60 }
 0x599   : > { %v6212_v19 = vpop.xlane.xlu1 %6211 }
 0x59a   : > { %v6234_v10 = vadd.f32 %v6212_v19, %v10543_v29 }
 0x59c   : > { %v6253_v50 = vrot.slane %v6234_v10, %v10548_v41 }
 0x59d   : > { %v5903_v11 = vpop.xlane.xlu1 %5902 }
 0x59e   : > { %v5912_v31 = vadd.f32 %v10543_v29, %v5903_v11 }
 0x5a0   : > { %v5973_v35 = vrot.slane %v5912_v31, %v10590_v33 }
 0x5a1   : > { %v6129_v49 = vpop.xlane.xlu1 %6128 }
 0x5a2   : > { %v5975_v5 = vsel %vm5974_vm10, %v5973_v35, %v5968_v44  ;;  %v6137_v59 = vadd.f32 %v6129_v49, %v10543_v29 }
 0x5a3   : > { %5978 = vst.msk [vmem:[%s10606_s20] sm:$0x1] %vm5977_vm12, %v5975_v5 }
 0x5a4   : > { %v6183_v12 = vrot.slane %v6137_v59, %v10590_v33 }
 0x5a5   : > { %v6215_v62 = vpop.xlane.xlu0 %6214 }
 0x5a6   : > { %v6184_v21 = vsel %vm5974_vm10, %v6183_v12, %v6179_v17  ;;  %v6235_v34 = vadd.f32 %v6215_v62, %v10543_v29 }
 0x5a7   : > { %6186 = vst.msk [vmem:[%s10606_s20 + $0x2] sm:$0x1] %vm5977_vm12, %v6184_v21 }
 0x5a8   : > { %v6257_v38 = vrot.slane %v6235_v34, %v10554_v1 }
 0x5aa   : > { %v6258_v58 = vsel %vm5932_vm3, %v6257_v38, %v6253_v50 }
 0x5ae   : > { %v6218_v46 = vpop.xlane.xlu0 %6217 }
 0x5af   : > { %v6236_v61 = vadd.f32 %v6218_v46, %v10543_v29 }
 0x5b1   : > { %v6262_v25 = vrot.slane %v6236_v61, %v10559_v28 }
 0x5b3   : > { %v6263_v1 = vsel %vm5939_vm6, %v6262_v25, %v6258_v58 }
 0x5b9   : > { %v6221_v56 = vpop.xlane.xlu0 %6220 }
 0x5ba   : > { %v6237_v55 = vadd.f32 %v6221_v56, %v10543_v29 }
 0x5bc   : > { %v6267_v14 = vrot.slane %v6237_v55, %v10564_v57 }
 0x5be   : > { %v6268_v28 = vsel %vm5946_vm7, %v6267_v14, %v6263_v1 }
 0x5c5   : > { %v6224_v23 = vpop.xlane.xlu0 %6223 }
 0x5c6   : > { %v6238_v0 = vadd.f32 %v6224_v23, %v10543_v29 }
 0x5c8   : > { %v6272_v19 = vrot.slane %v6238_v0, %v10569_v48 }
 0x5ca   : > { %v6273_v57 = vsel %vm5953_vm8, %v6272_v19, %v6268_v28 }
 0x5d1   : > { %v6227_v43 = vpop.xlane.xlu0 %6226 }
 0x5d2   : > { %v6239_v36 = vadd.f32 %v6227_v43, %v10543_v29 }
 0x5d4   : > { %v6277_v15 = vrot.slane %v6239_v36, %v10577_v53 }
 0x5d6   : > { %v6278_v48 = vsel %vm5960_vm9, %v6277_v15, %v6273_v57 }
 0x5de   : > { %v6230_v2 = vpop.xlane.xlu0 %6229 }
 0x5df   : > { %v6240_v42 = vadd.f32 %v6230_v2, %v10543_v29 }
 0x5e1   : > { %v6282_v26 = vrot.slane %v6240_v42, %v10583_v52 }
 0x5e3   : > { %v6283_v53 = vsel %vm5967_vm11, %v6282_v26, %v6278_v48 }
 0x5ea   : > { %v6233_v45 = vpop.xlane.xlu0 %6232 }
 0x5eb   : > { %v6241_v41 = vadd.f32 %v6233_v45, %v10543_v29 }
 0x5ed   : > { %v6287_v51 = vrot.slane %v6241_v41, %v10590_v33 }
 0x5ef   : > { %v6288_v29 = vsel %vm5974_vm10, %v6287_v51, %v6283_v53 }
 0x5f0   : > { %6290 = vst.msk [vmem:[%s10606_s20 + $0x3] sm:$0x1] %vm5977_vm12, %v6288_v29 }
 0x5f1   : > { %7030 = shalt.err (!%p7027_p4)
}
 0x5f2   : > { %s7031_s27 = scalar_lea.hbm %s10691_s14, 64  ;;  %s7035_s19 = scalar_lea.hbm %s10746_s8, 128 }
 0x5f3   : > { %p7032_p7 = scmp.ne.s32.totalorder %s10691_s14, %s7031_s27  ;;  %p7036_p10 = scmp.lt.u32.totalorder %s10691_s14, %s10746_s8 }
 0x5f4   : > { %p7037_p11 = scmp.lt.u32.totalorder %s7035_s19, %s7031_s27  ;;  %p7039_p13 = scmp.lt.u32.totalorder %s7031_s27, %s10691_s14 }
 0x5f5   : > { %p7033_p8 = pnand %p7032_p7, %p7173_p5 }
 0x5f6   : > { %p7038_p12 = por %p7037_p11, %p7036_p10 }
 0x5f7   : > { %p7034_p9 = pneg %p7033_p8 }
 0x5f8   : > { %p7040_p0 = por %p7039_p13, %p7038_p12 }
 0x5fa   : > { %p7041_p1 = pnand %p7040_p0, %p7034_p9 }
 0x5fc   : > { %7044 = shalt.err (!%p7041_p1)
}
 0x5fd   : > { %6965 = dma.vmem_to_hbm [thread:$0]  (%p7173_p5), %s10693_s23, 64, %s10691_s14, %s6292_s7  }
 0x5fe PF: > { %p6971_p2 = scmp.ge.s32.totalorder %s7079_s10, 2  ;;  %s6317_s24 = sand.u32 1, %s7067_s29  }
 0x5ff   : > { %s6318_s25 = scalar_lea.sflag [#allocation6], %s6317_s24 }
 0x600   : > { %p6968_p3 = pnand %p6971_p2, %p7177_p6 }
 0x602   : > { %7062 = dma.done.wait (!%p6968_p3), %s6318_s25, 64  }
 0x603   : > { %7064 = vsyncadd (!%p6968_p3), %s6318_s25, 4294967232  ;;  %p19_p4 = scmp.ge.s32.totalorder %s7160_s12, 4   ;;  %s10784_s29 = smov %s7071_s30 }
 0x604   : > { %s10785_s30 = smov %s7075_s9  ;;  %s10786_s9 = smov %s7171_s15 }
 0x605   : > { %s10787_s10 = smov %s7160_s12  ;;  %21 = sbr.rel (!%p19_p4) target bundleno = 5 (0x5), region = 99 }
 0x60c   :  { %6323 = vsyncpa [#allocation6], 1 }
 0x60d   :  { %6325 = vsyncpa [#allocation6 + $0x1], 1 }

</bundles_post_ra>
